<compile_context>
chip_gen: v6e
topology: v6e:2x2x1
jax: 0.10.0
libtpu: 0.0.40
codegen_flags: <defaults>
</compile_context>

<pallas_src>
import functools

import jax
import jax.numpy as jnp
from jax import lax
from jax.experimental import pallas as pl
from jax.experimental.pallas import tpu as pltpu

BN_EPS = 1e-5
# bf16 matmul operands -> native MXU path on v5e/v6e/v7x; accumulation, BN
# statistics and all normalize math stay f32.
MATMUL_DTYPE = jnp.bfloat16


def _round_up(x, m):
    return (x + m - 1) // m * m


def _pick_vmem_limit():
    # ~75% of physical VMEM, capped at 96 MiB: 96 MiB on v5e/v6e (128 MiB),
    # 48 MiB on v7x (64 MiB).  Falls back to a safe 48 MiB.
    try:
        cap = int(pltpu.get_tpu_info().vmem_capacity_bytes)
    except Exception:
        cap = 64 * 1024 * 1024
    return int(min(96 * 1024 * 1024, cap * 3 // 4))


VMEM_LIMIT_BYTES = _pick_vmem_limit()


# ----------------------------------------------------------------------------
# One-time capability probes (run eagerly at import, before the jit trace).
# ----------------------------------------------------------------------------
def _probe_roll():
    """+1 if pltpu.roll matches jnp.roll, -1 if reversed, 0 if unusable."""
    def _k(o_ref):
        o_ref[...] = pltpu.roll(lax.broadcasted_iota(jnp.int32, (8, 128), 0), 1, 0)

    try:
        r = jax.device_get(pl.pallas_call(
            _k, out_shape=jax.ShapeDtypeStruct((8, 128), jnp.int32))())
        if int(r[1, 0]) == 0:
            return 1
        if int(r[1, 0]) == 2:
            return -1
        return 0
    except Exception:
        return 0


def _probe_single_buffer_weights():
    """True if pipeline_mode=pl.Buffered(1) works for a resident input block."""
    def _k(a_ref, b_ref, o_ref):
        o_ref[...] = a_ref[...] + b_ref[...]

    try:
        a = jnp.arange(16 * 128, dtype=jnp.float32).reshape(16, 128)
        b = jnp.ones((8, 128), jnp.float32)
        out = pl.pallas_call(
            _k,
            grid=(2,),
            in_specs=[pl.BlockSpec((8, 128), lambda i: (i, 0)),
                      pl.BlockSpec((8, 128), lambda i: (0, 0),
                                   pipeline_mode=pl.Buffered(1))],
            out_specs=pl.BlockSpec((8, 128), lambda i: (i, 0)),
            out_shape=jax.ShapeDtypeStruct((16, 128), jnp.float32),
        )(a, b)
        return bool(jnp.allclose(out, a + 1.0))
    except Exception:
        return False


_ROLL_MODE = _probe_roll()
_SINGLE_BUFFER_WEIGHTS = _probe_single_buffer_weights()


def _shift_rows(x, k):
    """result[f] = x[(f + k) % n] along axis 0 (XLU sublane rotate)."""
    if k == 0:
        return x
    n = x.shape[0]
    shift = (n - k) % n if _ROLL_MODE == 1 else k
    return pltpu.roll(x, shift, 0)


def _weight_spec(cp):
    # Constant index map -> never re-fetched; single-buffer it to halve its
    # VMEM footprint when the runtime supports pl.Buffered(1).
    if _SINGLE_BUFFER_WEIGHTS:
        return pl.BlockSpec((3, 3, cp, cp), lambda i: (0, 0, 0, 0),
                            pipeline_mode=pl.Buffered(1))
    return pl.BlockSpec((3, 3, cp, cp), lambda i: (0, 0, 0, 0))


# ----------------------------------------------------------------------------
# Pass A: fused [optional BN+ReLU on input] + 3x3 conv (+bias) + partial BN
#         sum / sum-of-squares statistics.
# ----------------------------------------------------------------------------
def conv_stats_kernel(*refs, h, w, with_prebn, with_bias, use_roll):
    it = iter(refs)
    x_ref = next(it)
    w_ref = next(it)
    scale_ref = next(it) if with_prebn else None
    shift_ref = next(it) if with_prebn else None
    bias_ref = next(it) if with_bias else None
    y_ref = next(it)
    stats_ref = next(it)
    pad_ref = next(it)

    cp = x_ref.shape[-1]
    wp2 = w + 2

    xin = x_ref[0]                                         # (h, w, cp) f32
    if with_prebn:
        # Previous stage's BatchNorm + ReLU, folded into scale/shift.
        scale = scale_ref[...].reshape(1, 1, cp)
        shift = shift_ref[...].reshape(1, 1, cp)
        xin = jnp.maximum(xin * scale + shift, 0.0)

    # Zero-halo padded tile in VMEM (re-zeroed every step: megacore-safe).
    pad_ref[...] = jnp.zeros_like(pad_ref)
    pad_ref[1:h + 1, 1:w + 1, :] = xin

    if use_roll:
        # 9 MXU matmuls on the full padded width; kw shift via XLU roll of the
        # f32 product (no per-tap sublane retile); border cols dropped once.
        acc = jnp.zeros((h * wp2, cp), jnp.float32)
        for kh in range(3):                                # static unroll
            x_kh = pad_ref[kh:kh + h, :, :].reshape(h * wp2, cp) \
                .astype(MATMUL_DTYPE)
            for kw in range(3):
                prod = jnp.dot(x_kh, w_ref[kh, kw],
                               preferred_element_type=jnp.float32)
                acc = acc + _shift_rows(prod, kw)
        y_out = acc.reshape(h, wp2, cp)[:, :w, :]
    else:
        # Fallback: per-tap shifted slices (safe path if roll is unavailable).
        acc = jnp.zeros((h * w, cp), jnp.float32)
        for kh in range(3):
            for kw in range(3):
                patch = pad_ref[kh:kh + h, kw:kw + w, :].reshape(h * w, cp) \
                    .astype(MATMUL_DTYPE)
                acc = acc + jnp.dot(patch, w_ref[kh, kw],
                                    preferred_element_type=jnp.float32)
        y_out = acc.reshape(h, w, cp)

    if with_bias:
        y_out = y_out + bias_ref[...].reshape(1, 1, cp)

    # Conv output stays f32 (keeps E[x^2]-E[x]^2 variance well conditioned).
    y_ref[0] = y_out.astype(y_ref.dtype)

    # Per-image partial BatchNorm statistics (reduced in the wrapper).
    s1 = jnp.sum(jnp.sum(y_out, axis=0), axis=0, keepdims=True)
    s2 = jnp.sum(jnp.sum(y_out * y_out, axis=0), axis=0, keepdims=True)
    stats_ref[0] = jnp.concatenate([s1, s2], axis=0)


def conv_stats(x_nhwc, w, bias=None, prebn=None):
    """x_nhwc: (N, H, W, Cp) f32 (un-padded spatially).  w: (3,3,Cp,Cp) bf16."""
    n, h, wd, cp = x_nhwc.shape
    wp2 = wd + 2

    in_specs = [
        pl.BlockSpec((1, h, wd, cp), lambda i: (i, 0, 0, 0)),
        _weight_spec(cp),
    ]
    args = [x_nhwc.astype(jnp.float32), w.astype(MATMUL_DTYPE)]
    if prebn is not None:
        scale1, shift1 = prebn
        in_specs += [pl.BlockSpec((1, cp), lambda i: (0, 0)),
                     pl.BlockSpec((1, cp), lambda i: (0, 0))]
        args += [scale1.astype(jnp.float32), shift1.astype(jnp.float32)]
    if bias is not None:
        in_specs.append(pl.BlockSpec((1, cp), lambda i: (0, 0)))
        args.append(bias.astype(jnp.float32))

    flops = 2 * n * h * wp2 * 9 * cp * cp
    bytes_accessed = (4 * n * h * wd * cp          # x (f32 in)
                      + 2 * 9 * cp * cp            # weights (bf16)
                      + 4 * n * h * wd * cp        # y (f32 out)
                      + 4 * n * 2 * cp)            # partial stats

    # TODO(synk): H-row halo tiling (grid (N, H//TH)) for large H*W*Cp so a
    # single image block never approaches the VMEM budget; whole-image blocks
    # are fine at these shapes.
    # TODO(synk): for tiny true Cin, an im2col tile with K=round_up(9*Cin,128)
    # would fill the 256x256 MXU far better than padding Cin to 128.
    y, stats = pl.pallas_call(
        functools.partial(conv_stats_kernel, h=h, w=wd,
                          with_prebn=prebn is not None,
                          with_bias=bias is not None,
                          use_roll=_ROLL_MODE != 0),
        grid=(n,),
        in_specs=in_specs,
        out_specs=(
            pl.BlockSpec((1, h, wd, cp), lambda i: (i, 0, 0, 0)),
            pl.BlockSpec((1, 2, cp), lambda i: (i, 0, 0)),
        ),
        out_shape=(
            jax.ShapeDtypeStruct((n, h, wd, cp), jnp.float32),
            jax.ShapeDtypeStruct((n, 2, cp), jnp.float32),
        ),
        scratch_shapes=[pltpu.VMEM((h + 2, wp2, cp), jnp.float32)],
        compiler_params=pltpu.CompilerParams(
            dimension_semantics=("parallel",),     # no resident accumulator
            vmem_limit_bytes=VMEM_LIMIT_BYTES),
        cost_estimate=pl.CostEstimate(flops=flops, transcendentals=0,
                                      bytes_accessed=bytes_accessed),
    )(*args)
    return y, stats


# ----------------------------------------------------------------------------
# Pass B: pre-folded BatchNorm scale/shift + residual + ReLU (elementwise).
# ----------------------------------------------------------------------------
def bn_act_kernel(*refs, with_residual):
    if with_residual:
        y_ref, scale_ref, shift_ref, r_ref, o_ref = refs
    else:
        y_ref, scale_ref, shift_ref, o_ref = refs
        r_ref = None
    out = y_ref[...] * scale_ref[...] + shift_ref[...]
    if with_residual:
        out = out + r_ref[...]
    o_ref[...] = jnp.maximum(out, 0.0).astype(o_ref.dtype)


def _pick_tile(p, cp, vmem_limit):
    # 4 (tp, cp) f32 streams, double-buffered, ~half the VMEM budget.
    cap = max(8, vmem_limit // (64 * cp))
    t = min(p, 2048, cap)
    t -= t % 8
    while t >= 8:
        if p % t == 0:
            return t
        t -= 8
    return p  # TODO(synk): pad P / masked tail for P not divisible by 8.


def bn_act(y2d, scale, shift, residual=None):
    p, cp = y2d.shape
    tp = _pick_tile(p, cp, VMEM_LIMIT_BYTES)

    in_specs = [
        pl.BlockSpec((tp, cp), lambda i: (i, 0)),
        pl.BlockSpec((1, cp), lambda i: (0, 0)),
        pl.BlockSpec((1, cp), lambda i: (0, 0)),
    ]
    args = [y2d, scale, shift]
    if residual is not None:
        in_specs.append(pl.BlockSpec((tp, cp), lambda i: (i, 0)))
        args.append(residual)

    n_big = 2 + (1 if residual is not None else 0)
    return pl.pallas_call(
        functools.partial(bn_act_kernel, with_residual=residual is not None),
        grid=(p // tp,),
        in_specs=in_specs,
        out_specs=pl.BlockSpec((tp, cp), lambda i: (i, 0)),
        out_shape=jax.ShapeDtypeStruct((p, cp), jnp.float32),
        compiler_params=pltpu.CompilerParams(
            dimension_semantics=("parallel",),
            vmem_limit_bytes=VMEM_LIMIT_BYTES),
        cost_estimate=pl.CostEstimate(flops=4 * p * cp, transcendentals=0,
                                      bytes_accessed=4 * (n_big * p * cp + 2 * cp)),
    )(*args)


# ----------------------------------------------------------------------------
# Glue (plain JAX): layout conversion, channel padding, BN folding.
# ----------------------------------------------------------------------------
def pack_conv_weight(w_oihw, cp):
    # PyTorch (Cout, Cin, kh, kw) -> (kh, kw, Cin_pad, Cout_pad), bf16.
    co, ci, kh, kw = w_oihw.shape
    w = jnp.transpose(w_oihw, (2, 3, 1, 0))
    w = jnp.pad(w, ((0, 0), (0, 0), (0, cp - ci), (0, cp - co)))
    return w.astype(MATMUL_DTYPE)


def _pad_channels(v, cp):
    return jnp.pad(v, (0, cp - v.shape[0]))


def bn_fold(stats_partial, gamma, beta, count):
    """Fold training-mode batch stats + gamma/beta into scale/shift (1, Cp)."""
    s = jnp.sum(stats_partial, axis=0)                 # (2, Cp)
    inv = 1.0 / count
    mean = s[0] * inv
    var = jnp.maximum(s[1] * inv - mean * mean, 0.0)
    scale = gamma * lax.rsqrt(var + BN_EPS)
    shift = beta - mean * scale
    cp = gamma.shape[0]
    return scale.reshape(1, cp), shift.reshape(1, cp)


@jax.jit
def residual_block_forward(x_nchw, params):
    """Forward of Residual_block (downsample=None, stride=1, k=3, pad=1)."""
    n, c, h, w = x_nchw.shape
    co = params["w1"].shape[0]
    # TODO(synk): downsample / stride>1 branch not implemented (module default None).
    assert c == co, "identity skip requires in_channel == out_channel"
    cp = _round_up(max(c, co), 128)        # lane-dense, MXU-friendly channel pad
    p = n * h * w

    x_nhwc = jnp.transpose(x_nchw, (0, 2, 3, 1))
    x_cpad = jnp.pad(x_nhwc, ((0, 0), (0, 0), (0, 0), (0, cp - c)))   # f32

    w1 = pack_conv_weight(params["w1"], cp)
    w2 = pack_conv_weight(params["w2"], cp)
    g1 = _pad_channels(params["bn1_gamma"], cp)
    be1 = _pad_channels(params["bn1_beta"], cp)
    g2 = _pad_channels(params["bn2_gamma"], cp)
    be2 = _pad_channels(params["bn2_beta"], cp)
    cb2 = _pad_channels(params["b2"], cp).reshape(1, cp)

    # ---- conv1 (bias=False) + batch stats ------------------------------------
    y1, part1 = conv_stats(x_cpad, w1)
    scale1, shift1 = bn_fold(part1, g1, be1, count=p)

    # ---- conv2 (bias) with BN1+ReLU fused onto its input, + batch stats ------
    y2, part2 = conv_stats(y1, w2, bias=cb2, prebn=(scale1, shift1))
    scale2, shift2 = bn_fold(part2, g2, be2, count=p)

    # ---- BN2 + residual + ReLU ------------------------------------------------
    out = bn_act(y2.reshape(p, cp), scale2, shift2,
                 residual=x_cpad.reshape(p, cp))

    out = out[:, :co].reshape(n, h, w, co)
    return jnp.transpose(out, (0, 3, 1, 2))            # NHWC -> NCHW


# ----------------------------------------------------------------------------
# Pure-JAX reference (silent correctness check) + param init.
# ----------------------------------------------------------------------------
def reference_forward(x_nchw, params, conv_dtype=jnp.float32):
    def conv(x, w, b=None):
        y = lax.conv_general_dilated(
            x.astype(conv_dtype), w.astype(conv_dtype),
            window_strides=(1, 1), padding=((1, 1), (1, 1)),
            dimension_numbers=("NCHW", "OIHW", "NCHW"),
            preferred_element_type=jnp.float32)
        if b is not None:
            y = y + b.reshape(1, -1, 1, 1)
        return y

    def bn(x, g, b):
        mean = jnp.mean(x, axis=(0, 2, 3), keepdims=True)
        var = jnp.mean((x - mean) ** 2, axis=(0, 2, 3), keepdims=True)
        return (x - mean) * lax.rsqrt(var + BN_EPS) * g.reshape(1, -1, 1, 1) \
            + b.reshape(1, -1, 1, 1)

    a1 = jnp.maximum(bn(conv(x_nchw, params["w1"]),
                        params["bn1_gamma"], params["bn1_beta"]), 0.0)
    out = bn(conv(a1, params["w2"], params["b2"]),
             params["bn2_gamma"], params["bn2_beta"])
    return jnp.maximum(out + x_nchw, 0.0)


def init_params(key, in_ch, out_ch, k=3):
    k1, k2, k3 = jax.random.split(key, 3)
    bound1 = 1.0 / jnp.sqrt(in_ch * k * k)
    bound2 = 1.0 / jnp.sqrt(out_ch * k * k)
    return {
        "w1": jax.random.uniform(k1, (out_ch, in_ch, k, k), jnp.float32, -bound1, bound1),
        "w2": jax.random.uniform(k2, (out_ch, out_ch, k, k), jnp.float32, -bound2, bound2),
        "b2": jax.random.uniform(k3, (out_ch,), jnp.float32, -bound2, bound2),
        "bn1_gamma": jnp.ones((out_ch,), jnp.float32),
        "bn1_beta": jnp.zeros((out_ch,), jnp.float32),
        "bn2_gamma": jnp.ones((out_ch,), jnp.float32),
        "bn2_beta": jnp.zeros((out_ch,), jnp.float32),
    }


if __name__ == "__main__":
    key = jax.random.PRNGKey(0)
    kx, kp = jax.random.split(key)

    N, C, H, W = 2, 4, 16, 16                 # in_channel == out_channel, stride=1
    x = jax.random.normal(kx, (N, C, H, W), jnp.float32)
    params = init_params(kp, in_ch=C, out_ch=C)

    out = jax.block_until_ready(residual_block_forward(x, params))
    assert out.shape == (N, C, H, W)

    # Strict check against a reference with matched bf16 conv-operand rounding,
    # plus a looser check against the exact f32 module semantics.
    ref_match = reference_forward(x, params, conv_dtype=MATMUL_DTYPE)
    ref_exact = reference_forward(x, params, conv_dtype=jnp.float32)
    err_match = float(jnp.max(jnp.abs(out - ref_match)))
    err_exact = float(jnp.max(jnp.abs(out - ref_exact)))
    assert jnp.allclose(out, ref_match, atol=1e-2, rtol=1e-2), err_match
    assert jnp.allclose(out, ref_exact, atol=5e-2, rtol=5e-2), err_exact

    print("KERNEL_OK")
</pallas_src>

<mosaic_0001>
module attributes {stable_mosaic.version = 11 : i64} {
  func.func @_k(%arg0: i32, %arg1: memref<8x128xf32, #tpu.memory_space<vmem>>, %arg2: memref<8x128xf32, #tpu.memory_space<vmem>>, %arg3: memref<8x128xf32, #tpu.memory_space<vmem>>) attributes {dimension_semantics = [#tpu.dimension_semantics<arbitrary>], iteration_bounds = array<i64: 2>, scalar_prefetch = 0 : i64, scratch_operands = 0 : i64, tpu.core_type = #tpu.core_type<tc>, window_params = [{transform_indices = @transform_0, window_bounds = array<i64: 8, 128>}, {pipeline_mode = #tpu.pipeline_mode<synchronous>, transform_indices = @transform_1, window_bounds = array<i64: 8, 128>}, {transform_indices = @transform_2, window_bounds = array<i64: 8, 128>}]} {
    %c0 = arith.constant 0 : index
    %c0_0 = arith.constant 0 : index
    %0 = vector.load %arg1[%c0, %c0_0] : memref<8x128xf32, #tpu.memory_space<vmem>>, vector<8x128xf32>
    %c0_1 = arith.constant 0 : index
    %c0_2 = arith.constant 0 : index
    %1 = vector.load %arg2[%c0_1, %c0_2] : memref<8x128xf32, #tpu.memory_space<vmem>>, vector<8x128xf32>
    %2 = arith.addf %0, %1 : vector<8x128xf32>
    %c0_3 = arith.constant 0 : index
    %c0_4 = arith.constant 0 : index
    %3 = vector.load %arg3[%c0_3, %c0_4] : memref<8x128xf32, #tpu.memory_space<vmem>>, vector<8x128xf32>
    tpu.vector_store %arg3[%c0_3, %c0_4], %2 {strides = array<i32>} : memref<8x128xf32, #tpu.memory_space<vmem>>, vector<8x128xf32>,
    return
  }
  func.func @transform_0(%arg0: i32) -> (i32, i32) {
    %c0_i32 = arith.constant 0 : i32
    %c0_i32_0 = arith.constant 0 : i32
    return %arg0, %c0_i32 : i32, i32
  }
  func.func @transform_1(%arg0: i32) -> (i32, i32) {
    %c0_i32 = arith.constant 0 : i32
    %c0_i32_0 = arith.constant 0 : i32
    %c0_i32_1 = arith.constant 0 : i32
    return %c0_i32, %c0_i32_0 : i32, i32
  }
  func.func @transform_2(%arg0: i32) -> (i32, i32) {
    %c0_i32 = arith.constant 0 : i32
    %c0_i32_0 = arith.constant 0 : i32
    return %arg0, %c0_i32 : i32, i32
  }
}

module attributes {stable_mosaic.version = 11 : i64} {
  func.func @conv_stats_kernel(%arg0: i32, %arg1: memref<1x16x16x128xf32, #tpu.memory_space<vmem>>, %arg2: memref<3x3x128x128xbf16, #tpu.memory_space<vmem>>, %arg3: memref<1x16x16x128xf32, #tpu.memory_space<vmem>>, %arg4: memref<1x2x128xf32, #tpu.memory_space<vmem>>, %arg5: memref<18x18x128xf32, #tpu.memory_space<vmem>>) attributes {dimension_semantics = [#tpu.dimension_semantics<parallel>], iteration_bounds = array<i64: 2>, scalar_prefetch = 0 : i64, scratch_operands = 1 : i64, tpu.core_type = #tpu.core_type<tc>, window_params = [{transform_indices = @transform_0, window_bounds = array<i64: 1, 16, 16, 128>}, {pipeline_mode = #tpu.pipeline_mode<synchronous>, transform_indices = @transform_1, window_bounds = array<i64: 3, 3, 128, 128>}, {transform_indices = @transform_2, window_bounds = array<i64: 1, 16, 16, 128>}, {transform_indices = @transform_3, window_bounds = array<i64: 1, 2, 128>}]} {
    %c0 = arith.constant 0 : index
    %c0_0 = arith.constant 0 : index
    %c0_1 = arith.constant 0 : index
    %c0_2 = arith.constant 0 : index
    %0 = vector.load %arg1[%c0, %c0_0, %c0_1, %c0_2] : memref<1x16x16x128xf32, #tpu.memory_space<vmem>>, vector<1x16x16x128xf32>
    %1 = vector.shape_cast %0 : vector<1x16x16x128xf32> to vector<16x16x128xf32>
    %cst = arith.constant 0.000000e+00 : f32
    %2 = vector.broadcast %cst : f32 to vector<18x18x128xf32>
    %c0_3 = arith.constant 0 : index
    %c0_4 = arith.constant 0 : index
    %c0_5 = arith.constant 0 : index
    %3 = vector.load %arg5[%c0_3, %c0_4, %c0_5] : memref<18x18x128xf32, #tpu.memory_space<vmem>>, vector<18x18x128xf32>
    tpu.vector_store %arg5[%c0_3, %c0_4, %c0_5], %2 {strides = array<i32>} : memref<18x18x128xf32, #tpu.memory_space<vmem>>, vector<18x18x128xf32>,
    %c1 = arith.constant 1 : index
    %c1_6 = arith.constant 1 : index
    %c0_7 = arith.constant 0 : index
    %4 = vector.load %arg5[%c1, %c1_6, %c0_7] : memref<18x18x128xf32, #tpu.memory_space<vmem>>, vector<16x16x128xf32>
    tpu.vector_store %arg5[%c1, %c1_6, %c0_7], %1 {strides = array<i32>} : memref<18x18x128xf32, #tpu.memory_space<vmem>>, vector<16x16x128xf32>,
    %cst_8 = arith.constant 0.000000e+00 : f32
    %5 = vector.broadcast %cst_8 : f32 to vector<256x128xf32>
    %c0_9 = arith.constant 0 : index
    %c0_10 = arith.constant 0 : index
    %c0_11 = arith.constant 0 : index
    %6 = vector.load %arg5[%c0_9, %c0_10, %c0_11] : memref<18x18x128xf32, #tpu.memory_space<vmem>>, vector<16x16x128xf32>
    %7 = vector.shape_cast %6 : vector<16x16x128xf32> to vector<256x128xf32>
    %8 = arith.truncf %7 : vector<256x128xf32> to vector<256x128xbf16>
    %c0_12 = arith.constant 0 : index
    %c0_13 = arith.constant 0 : index
    %c0_14 = arith.constant 0 : index
    %c0_15 = arith.constant 0 : index
    %9 = vector.load %arg2[%c0_12, %c0_13, %c0_14, %c0_15] : memref<3x3x128x128xbf16, #tpu.memory_space<vmem>>, vector<1x1x128x128xbf16>
    %10 = vector.shape_cast %9 : vector<1x1x128x128xbf16> to vector<128x128xbf16>
    %cst_16 = arith.constant dense<0.000000e+00> : vector<256x128xf32>
    %11 = tpu.matmul %8, %10, %cst_16 {dimension_numbers = #tpu.dot_dimension_numbers<[1], [0], [0], [1], [0, 0, 1, 1], [], []>} : vector<256x128xbf16>, vector<128x128xbf16>, vector<256x128xf32> -> vector<256x128xf32>
    %12 = arith.addf %5, %11 : vector<256x128xf32>
    %c0_17 = arith.constant 0 : index
    %c1_18 = arith.constant 1 : index
    %c0_19 = arith.constant 0 : index
    %13 = vector.load %arg5[%c0_17, %c1_18, %c0_19] : memref<18x18x128xf32, #tpu.memory_space<vmem>>, vector<16x16x128xf32>
    %14 = vector.shape_cast %13 : vector<16x16x128xf32> to vector<256x128xf32>
    %15 = arith.truncf %14 : vector<256x128xf32> to vector<256x128xbf16>
    %c0_20 = arith.constant 0 : index
    %c1_21 = arith.constant 1 : index
    %c0_22 = arith.constant 0 : index
    %c0_23 = arith.constant 0 : index
    %16 = vector.load %arg2[%c0_20, %c1_21, %c0_22, %c0_23] : memref<3x3x128x128xbf16, #tpu.memory_space<vmem>>, vector<1x1x128x128xbf16>
    %17 = vector.shape_cast %16 : vector<1x1x128x128xbf16> to vector<128x128xbf16>
    %cst_24 = arith.constant dense<0.000000e+00> : vector<256x128xf32>
    %18 = tpu.matmul %15, %17, %cst_24 {dimension_numbers = #tpu.dot_dimension_numbers<[1], [0], [0], [1], [0, 0, 1, 1], [], []>} : vector<256x128xbf16>, vector<128x128xbf16>, vector<256x128xf32> -> vector<256x128xf32>
    %19 = arith.addf %12, %18 : vector<256x128xf32>
    %c0_25 = arith.constant 0 : index
    %c2 = arith.constant 2 : index
    %c0_26 = arith.constant 0 : index
    %20 = vector.load %arg5[%c0_25, %c2, %c0_26] : memref<18x18x128xf32, #tpu.memory_space<vmem>>, vector<16x16x128xf32>
    %21 = vector.shape_cast %20 : vector<16x16x128xf32> to vector<256x128xf32>
    %22 = arith.truncf %21 : vector<256x128xf32> to vector<256x128xbf16>
    %c0_27 = arith.constant 0 : index
    %c2_28 = arith.constant 2 : index
    %c0_29 = arith.constant 0 : index
    %c0_30 = arith.constant 0 : index
    %23 = vector.load %arg2[%c0_27, %c2_28, %c0_29, %c0_30] : memref<3x3x128x128xbf16, #tpu.memory_space<vmem>>, vector<1x1x128x128xbf16>
    %24 = vector.shape_cast %23 : vector<1x1x128x128xbf16> to vector<128x128xbf16>
    %cst_31 = arith.constant dense<0.000000e+00> : vector<256x128xf32>
    %25 = tpu.matmul %22, %24, %cst_31 {dimension_numbers = #tpu.dot_dimension_numbers<[1], [0], [0], [1], [0, 0, 1, 1], [], []>} : vector<256x128xbf16>, vector<128x128xbf16>, vector<256x128xf32> -> vector<256x128xf32>
    %26 = arith.addf %19, %25 : vector<256x128xf32>
    %c1_32 = arith.constant 1 : index
    %c0_33 = arith.constant 0 : index
    %c0_34 = arith.constant 0 : index
    %27 = vector.load %arg5[%c1_32, %c0_33, %c0_34] : memref<18x18x128xf32, #tpu.memory_space<vmem>>, vector<16x16x128xf32>
    %28 = vector.shape_cast %27 : vector<16x16x128xf32> to vector<256x128xf32>
    %29 = arith.truncf %28 : vector<256x128xf32> to vector<256x128xbf16>
    %c1_35 = arith.constant 1 : index
    %c0_36 = arith.constant 0 : index
    %c0_37 = arith.constant 0 : index
    %c0_38 = arith.constant 0 : index
    %30 = vector.load %arg2[%c1_35, %c0_36, %c0_37, %c0_38] : memref<3x3x128x128xbf16, #tpu.memory_space<vmem>>, vector<1x1x128x128xbf16>
    %31 = vector.shape_cast %30 : vector<1x1x128x128xbf16> to vector<128x128xbf16>
    %cst_39 = arith.constant dense<0.000000e+00> : vector<256x128xf32>
    %32 = tpu.matmul %29, %31, %cst_39 {dimension_numbers = #tpu.dot_dimension_numbers<[1], [0], [0], [1], [0, 0, 1, 1], [], []>} : vector<256x128xbf16>, vector<128x128xbf16>, vector<256x128xf32> -> vector<256x128xf32>
    %33 = arith.addf %26, %32 : vector<256x128xf32>
    %c1_40 = arith.constant 1 : index
    %c1_41 = arith.constant 1 : index
    %c0_42 = arith.constant 0 : index
    %34 = vector.load %arg5[%c1_40, %c1_41, %c0_42] : memref<18x18x128xf32, #tpu.memory_space<vmem>>, vector<16x16x128xf32>
    %35 = vector.shape_cast %34 : vector<16x16x128xf32> to vector<256x128xf32>
    %36 = arith.truncf %35 : vector<256x128xf32> to vector<256x128xbf16>
    %c1_43 = arith.constant 1 : index
    %c1_44 = arith.constant 1 : index
    %c0_45 = arith.constant 0 : index
    %c0_46 = arith.constant 0 : index
    %37 = vector.load %arg2[%c1_43, %c1_44, %c0_45, %c0_46] : memref<3x3x128x128xbf16, #tpu.memory_space<vmem>>, vector<1x1x128x128xbf16>
    %38 = vector.shape_cast %37 : vector<1x1x128x128xbf16> to vector<128x128xbf16>
    %cst_47 = arith.constant dense<0.000000e+00> : vector<256x128xf32>
    %39 = tpu.matmul %36, %38, %cst_47 {dimension_numbers = #tpu.dot_dimension_numbers<[1], [0], [0], [1], [0, 0, 1, 1], [], []>} : vector<256x128xbf16>, vector<128x128xbf16>, vector<256x128xf32> -> vector<256x128xf32>
    %40 = arith.addf %33, %39 : vector<256x128xf32>
    %c1_48 = arith.constant 1 : index
    %c2_49 = arith.constant 2 : index
    %c0_50 = arith.constant 0 : index
    %41 = vector.load %arg5[%c1_48, %c2_49, %c0_50] : memref<18x18x128xf32, #tpu.memory_space<vmem>>, vector<16x16x128xf32>
    %42 = vector.shape_cast %41 : vector<16x16x128xf32> to vector<256x128xf32>
    %43 = arith.truncf %42 : vector<256x128xf32> to vector<256x128xbf16>
    %c1_51 = arith.constant 1 : index
    %c2_52 = arith.constant 2 : index
    %c0_53 = arith.constant 0 : index
    %c0_54 = arith.constant 0 : index
    %44 = vector.load %arg2[%c1_51, %c2_52, %c0_53, %c0_54] : memref<3x3x128x128xbf16, #tpu.memory_space<vmem>>, vector<1x1x128x128xbf16>
    %45 = vector.shape_cast %44 : vector<1x1x128x128xbf16> to vector<128x128xbf16>
    %cst_55 = arith.constant dense<0.000000e+00> : vector<256x128xf32>
    %46 = tpu.matmul %43, %45, %cst_55 {dimension_numbers = #tpu.dot_dimension_numbers<[1], [0], [0], [1], [0, 0, 1, 1], [], []>} : vector<256x128xbf16>, vector<128x128xbf16>, vector<256x128xf32> -> vector<256x128xf32>
    %47 = arith.addf %40, %46 : vector<256x128xf32>
    %c2_56 = arith.constant 2 : index
    %c0_57 = arith.constant 0 : index
    %c0_58 = arith.constant 0 : index
    %48 = vector.load %arg5[%c2_56, %c0_57, %c0_58] : memref<18x18x128xf32, #tpu.memory_space<vmem>>, vector<16x16x128xf32>
    %49 = vector.shape_cast %48 : vector<16x16x128xf32> to vector<256x128xf32>
    %50 = arith.truncf %49 : vector<256x128xf32> to vector<256x128xbf16>
    %c2_59 = arith.constant 2 : index
    %c0_60 = arith.constant 0 : index
    %c0_61 = arith.constant 0 : index
    %c0_62 = arith.constant 0 : index
    %51 = vector.load %arg2[%c2_59, %c0_60, %c0_61, %c0_62] : memref<3x3x128x128xbf16, #tpu.memory_space<vmem>>, vector<1x1x128x128xbf16>
    %52 = vector.shape_cast %51 : vector<1x1x128x128xbf16> to vector<128x128xbf16>
    %cst_63 = arith.constant dense<0.000000e+00> : vector<256x128xf32>
    %53 = tpu.matmul %50, %52, %cst_63 {dimension_numbers = #tpu.dot_dimension_numbers<[1], [0], [0], [1], [0, 0, 1, 1], [], []>} : vector<256x128xbf16>, vector<128x128xbf16>, vector<256x128xf32> -> vector<256x128xf32>
    %54 = arith.addf %47, %53 : vector<256x128xf32>
    %c2_64 = arith.constant 2 : index
    %c1_65 = arith.constant 1 : index
    %c0_66 = arith.constant 0 : index
    %55 = vector.load %arg5[%c2_64, %c1_65, %c0_66] : memref<18x18x128xf32, #tpu.memory_space<vmem>>, vector<16x16x128xf32>
    %56 = vector.shape_cast %55 : vector<16x16x128xf32> to vector<256x128xf32>
    %57 = arith.truncf %56 : vector<256x128xf32> to vector<256x128xbf16>
    %c2_67 = arith.constant 2 : index
    %c1_68 = arith.constant 1 : index
    %c0_69 = arith.constant 0 : index
    %c0_70 = arith.constant 0 : index
    %58 = vector.load %arg2[%c2_67, %c1_68, %c0_69, %c0_70] : memref<3x3x128x128xbf16, #tpu.memory_space<vmem>>, vector<1x1x128x128xbf16>
    %59 = vector.shape_cast %58 : vector<1x1x128x128xbf16> to vector<128x128xbf16>
    %cst_71 = arith.constant dense<0.000000e+00> : vector<256x128xf32>
    %60 = tpu.matmul %57, %59, %cst_71 {dimension_numbers = #tpu.dot_dimension_numbers<[1], [0], [0], [1], [0, 0, 1, 1], [], []>} : vector<256x128xbf16>, vector<128x128xbf16>, vector<256x128xf32> -> vector<256x128xf32>
    %61 = arith.addf %54, %60 : vector<256x128xf32>
    %c2_72 = arith.constant 2 : index
    %c2_73 = arith.constant 2 : index
    %c0_74 = arith.constant 0 : index
    %62 = vector.load %arg5[%c2_72, %c2_73, %c0_74] : memref<18x18x128xf32, #tpu.memory_space<vmem>>, vector<16x16x128xf32>
    %63 = vector.shape_cast %62 : vector<16x16x128xf32> to vector<256x128xf32>
    %64 = arith.truncf %63 : vector<256x128xf32> to vector<256x128xbf16>
    %c2_75 = arith.constant 2 : index
    %c2_76 = arith.constant 2 : index
    %c0_77 = arith.constant 0 : index
    %c0_78 = arith.constant 0 : index
    %65 = vector.load %arg2[%c2_75, %c2_76, %c0_77, %c0_78] : memref<3x3x128x128xbf16, #tpu.memory_space<vmem>>, vector<1x1x128x128xbf16>
    %66 = vector.shape_cast %65 : vector<1x1x128x128xbf16> to vector<128x128xbf16>
    %cst_79 = arith.constant dense<0.000000e+00> : vector<256x128xf32>
    %67 = tpu.matmul %64, %66, %cst_79 {dimension_numbers = #tpu.dot_dimension_numbers<[1], [0], [0], [1], [0, 0, 1, 1], [], []>} : vector<256x128xbf16>, vector<128x128xbf16>, vector<256x128xf32> -> vector<256x128xf32>
    %68 = arith.addf %61, %67 : vector<256x128xf32>
    %69 = vector.shape_cast %68 : vector<256x128xf32> to vector<16x16x128xf32>
    %c0_80 = arith.constant 0 : index
    %c0_81 = arith.constant 0 : index
    %c0_82 = arith.constant 0 : index
    %c0_83 = arith.constant 0 : index
    %70 = vector.load %arg3[%c0_80, %c0_81, %c0_82, %c0_83] : memref<1x16x16x128xf32, #tpu.memory_space<vmem>>, vector<1x16x16x128xf32>
    %71 = vector.shape_cast %70 : vector<1x16x16x128xf32> to vector<16x16x128xf32>
    %72 = vector.shape_cast %69 : vector<16x16x128xf32> to vector<1x16x16x128xf32>
    tpu.vector_store %arg3[%c0_80, %c0_81, %c0_82, %c0_83], %72 {strides = array<i32>} : memref<1x16x16x128xf32, #tpu.memory_space<vmem>>, vector<1x16x16x128xf32>,
    %cst_84 = arith.constant dense<0.000000e+00> : vector<16x128xf32>
    %73 = vector.multi_reduction <add>, %69, %cst_84 [0] : vector<16x16x128xf32> to vector<16x128xf32>
    %cst_85 = arith.constant dense<0.000000e+00> : vector<128xf32>
    %74 = vector.multi_reduction <add>, %73, %cst_85 [0] : vector<16x128xf32> to vector<128xf32>
    %75 = vector.shape_cast %74 : vector<128xf32> to vector<1x128xf32>
    %76 = arith.mulf %69, %69 : vector<16x16x128xf32>
    %cst_86 = arith.constant dense<0.000000e+00> : vector<16x128xf32>
    %77 = vector.multi_reduction <add>, %76, %cst_86 [0] : vector<16x16x128xf32> to vector<16x128xf32>
    %cst_87 = arith.constant dense<0.000000e+00> : vector<128xf32>
    %78 = vector.multi_reduction <add>, %77, %cst_87 [0] : vector<16x128xf32> to vector<128xf32>
    %79 = vector.shape_cast %78 : vector<128xf32> to vector<1x128xf32>
    %80 = tpu.concatenate %75, %79 in 0 : vector<1x128xf32>, vector<1x128xf32> -> vector<2x128xf32>
    %c0_88 = arith.constant 0 : index
    %c0_89 = arith.constant 0 : index
    %c0_90 = arith.constant 0 : index
    %81 = vector.load %arg4[%c0_88, %c0_89, %c0_90] : memref<1x2x128xf32, #tpu.memory_space<vmem>>, vector<1x2x128xf32>
    %82 = vector.shape_cast %81 : vector<1x2x128xf32> to vector<2x128xf32>
    %83 = vector.shape_cast %80 : vector<2x128xf32> to vector<1x2x128xf32>
    tpu.vector_store %arg4[%c0_88, %c0_89, %c0_90], %83 {strides = array<i32>} : memref<1x2x128xf32, #tpu.memory_space<vmem>>, vector<1x2x128xf32>,
    return
  }
  func.func @transform_0(%arg0: i32) -> (i32, i32, i32, i32) {
    %c0_i32 = arith.constant 0 : i32
    %c0_i32_0 = arith.constant 0 : i32
    %c0_i32_1 = arith.constant 0 : i32
    %c0_i32_2 = arith.constant 0 : i32
    return %arg0, %c0_i32, %c0_i32_0, %c0_i32_1 : i32, i32, i32, i32
  }
  func.func @transform_1(%arg0: i32) -> (i32, i32, i32, i32) {
    %c0_i32 = arith.constant 0 : i32
    %c0_i32_0 = arith.constant 0 : i32
    %c0_i32_1 = arith.constant 0 : i32
    %c0_i32_2 = arith.constant 0 : i32
    %c0_i32_3 = arith.constant 0 : i32
    return %c0_i32, %c0_i32_0, %c0_i32_1, %c0_i32_2 : i32, i32, i32, i32
  }
  func.func @transform_2(%arg0: i32) -> (i32, i32, i32, i32) {
    %c0_i32 = arith.constant 0 : i32
    %c0_i32_0 = arith.constant 0 : i32
    %c0_i32_1 = arith.constant 0 : i32
    %c0_i32_2 = arith.constant 0 : i32
    return %arg0, %c0_i32, %c0_i32_0, %c0_i32_1 : i32, i32, i32, i32
  }
  func.func @transform_3(%arg0: i32) -> (i32, i32, i32) {
    %c0_i32 = arith.constant 0 : i32
    %c0_i32_0 = arith.constant 0 : i32
    %c0_i32_1 = arith.constant 0 : i32
    return %arg0, %c0_i32, %c0_i32_0 : i32, i32, i32
  }
}

module attributes {stable_mosaic.version = 11 : i64} {
  func.func @conv_stats_kernel(%arg0: i32, %arg1: memref<1x16x16x128xf32, #tpu.memory_space<vmem>>, %arg2: memref<3x3x128x128xbf16, #tpu.memory_space<vmem>>, %arg3: memref<1x128xf32, #tpu.memory_space<vmem>>, %arg4: memref<1x128xf32, #tpu.memory_space<vmem>>, %arg5: memref<1x128xf32, #tpu.memory_space<vmem>>, %arg6: memref<1x16x16x128xf32, #tpu.memory_space<vmem>>, %arg7: memref<1x2x128xf32, #tpu.memory_space<vmem>>, %arg8: memref<18x18x128xf32, #tpu.memory_space<vmem>>) attributes {dimension_semantics = [#tpu.dimension_semantics<parallel>], iteration_bounds = array<i64: 2>, scalar_prefetch = 0 : i64, scratch_operands = 1 : i64, tpu.core_type = #tpu.core_type<tc>, window_params = [{transform_indices = @transform_0, window_bounds = array<i64: 1, 16, 16, 128>}, {pipeline_mode = #tpu.pipeline_mode<synchronous>, transform_indices = @transform_1, window_bounds = array<i64: 3, 3, 128, 128>}, {pipeline_mode = #tpu.pipeline_mode<synchronous>, transform_indices = @transform_2, window_bounds = array<i64: 1, 128>}, {pipeline_mode = #tpu.pipeline_mode<synchronous>, transform_indices = @transform_3, window_bounds = array<i64: 1, 128>}, {pipeline_mode = #tpu.pipeline_mode<synchronous>, transform_indices = @transform_4, window_bounds = array<i64: 1, 128>}, {transform_indices = @transform_5, window_bounds = array<i64: 1, 16, 16, 128>}, {transform_indices = @transform_6, window_bounds = array<i64: 1, 2, 128>}]} {
    %c0 = arith.constant 0 : index
    %c0_0 = arith.constant 0 : index
    %c0_1 = arith.constant 0 : index
    %c0_2 = arith.constant 0 : index
    %0 = vector.load %arg1[%c0, %c0_0, %c0_1, %c0_2] : memref<1x16x16x128xf32, #tpu.memory_space<vmem>>, vector<1x16x16x128xf32>
    %1 = vector.shape_cast %0 : vector<1x16x16x128xf32> to vector<16x16x128xf32>
    %c0_3 = arith.constant 0 : index
    %c0_4 = arith.constant 0 : index
    %2 = vector.load %arg3[%c0_3, %c0_4] : memref<1x128xf32, #tpu.memory_space<vmem>>, vector<1x128xf32>
    %3 = vector.shape_cast %2 : vector<1x128xf32> to vector<1x1x128xf32>
    %c0_5 = arith.constant 0 : index
    %c0_6 = arith.constant 0 : index
    %4 = vector.load %arg4[%c0_5, %c0_6] : memref<1x128xf32, #tpu.memory_space<vmem>>, vector<1x128xf32>
    %5 = vector.shape_cast %4 : vector<1x128xf32> to vector<1x1x128xf32>
    %6 = vector.broadcast %3 : vector<1x1x128xf32> to vector<16x16x128xf32>
    %7 = arith.mulf %1, %6 : vector<16x16x128xf32>
    %8 = vector.broadcast %5 : vector<1x1x128xf32> to vector<16x16x128xf32>
    %9 = arith.addf %7, %8 : vector<16x16x128xf32>
    %cst = arith.constant 0.000000e+00 : f32
    %10 = vector.broadcast %cst : f32 to vector<16x16x128xf32>
    %11 = arith.maximumf %9, %10 : vector<16x16x128xf32>
    %cst_7 = arith.constant 0.000000e+00 : f32
    %12 = vector.broadcast %cst_7 : f32 to vector<18x18x128xf32>
    %c0_8 = arith.constant 0 : index
    %c0_9 = arith.constant 0 : index
    %c0_10 = arith.constant 0 : index
    %13 = vector.load %arg8[%c0_8, %c0_9, %c0_10] : memref<18x18x128xf32, #tpu.memory_space<vmem>>, vector<18x18x128xf32>
    tpu.vector_store %arg8[%c0_8, %c0_9, %c0_10], %12 {strides = array<i32>} : memref<18x18x128xf32, #tpu.memory_space<vmem>>, vector<18x18x128xf32>,
    %c1 = arith.constant 1 : index
    %c1_11 = arith.constant 1 : index
    %c0_12 = arith.constant 0 : index
    %14 = vector.load %arg8[%c1, %c1_11, %c0_12] : memref<18x18x128xf32, #tpu.memory_space<vmem>>, vector<16x16x128xf32>
    tpu.vector_store %arg8[%c1, %c1_11, %c0_12], %11 {strides = array<i32>} : memref<18x18x128xf32, #tpu.memory_space<vmem>>, vector<16x16x128xf32>,
    %cst_13 = arith.constant 0.000000e+00 : f32
    %15 = vector.broadcast %cst_13 : f32 to vector<256x128xf32>
    %c0_14 = arith.constant 0 : index
    %c0_15 = arith.constant 0 : index
    %c0_16 = arith.constant 0 : index
    %16 = vector.load %arg8[%c0_14, %c0_15, %c0_16] : memref<18x18x128xf32, #tpu.memory_space<vmem>>, vector<16x16x128xf32>
    %17 = vector.shape_cast %16 : vector<16x16x128xf32> to vector<256x128xf32>
    %18 = arith.truncf %17 : vector<256x128xf32> to vector<256x128xbf16>
    %c0_17 = arith.constant 0 : index
    %c0_18 = arith.constant 0 : index
    %c0_19 = arith.constant 0 : index
    %c0_20 = arith.constant 0 : index
    %19 = vector.load %arg2[%c0_17, %c0_18, %c0_19, %c0_20] : memref<3x3x128x128xbf16, #tpu.memory_space<vmem>>, vector<1x1x128x128xbf16>
    %20 = vector.shape_cast %19 : vector<1x1x128x128xbf16> to vector<128x128xbf16>
    %cst_21 = arith.constant dense<0.000000e+00> : vector<256x128xf32>
    %21 = tpu.matmul %18, %20, %cst_21 {dimension_numbers = #tpu.dot_dimension_numbers<[1], [0], [0], [1], [0, 0, 1, 1], [], []>} : vector<256x128xbf16>, vector<128x128xbf16>, vector<256x128xf32> -> vector<256x128xf32>
    %22 = arith.addf %15, %21 : vector<256x128xf32>
    %c0_22 = arith.constant 0 : index
    %c1_23 = arith.constant 1 : index
    %c0_24 = arith.constant 0 : index
    %23 = vector.load %arg8[%c0_22, %c1_23, %c0_24] : memref<18x18x128xf32, #tpu.memory_space<vmem>>, vector<16x16x128xf32>
    %24 = vector.shape_cast %23 : vector<16x16x128xf32> to vector<256x128xf32>
    %25 = arith.truncf %24 : vector<256x128xf32> to vector<256x128xbf16>
    %c0_25 = arith.constant 0 : index
    %c1_26 = arith.constant 1 : index
    %c0_27 = arith.constant 0 : index
    %c0_28 = arith.constant 0 : index
    %26 = vector.load %arg2[%c0_25, %c1_26, %c0_27, %c0_28] : memref<3x3x128x128xbf16, #tpu.memory_space<vmem>>, vector<1x1x128x128xbf16>
    %27 = vector.shape_cast %26 : vector<1x1x128x128xbf16> to vector<128x128xbf16>
    %cst_29 = arith.constant dense<0.000000e+00> : vector<256x128xf32>
    %28 = tpu.matmul %25, %27, %cst_29 {dimension_numbers = #tpu.dot_dimension_numbers<[1], [0], [0], [1], [0, 0, 1, 1], [], []>} : vector<256x128xbf16>, vector<128x128xbf16>, vector<256x128xf32> -> vector<256x128xf32>
    %29 = arith.addf %22, %28 : vector<256x128xf32>
    %c0_30 = arith.constant 0 : index
    %c2 = arith.constant 2 : index
    %c0_31 = arith.constant 0 : index
    %30 = vector.load %arg8[%c0_30, %c2, %c0_31] : memref<18x18x128xf32, #tpu.memory_space<vmem>>, vector<16x16x128xf32>
    %31 = vector.shape_cast %30 : vector<16x16x128xf32> to vector<256x128xf32>
    %32 = arith.truncf %31 : vector<256x128xf32> to vector<256x128xbf16>
    %c0_32 = arith.constant 0 : index
    %c2_33 = arith.constant 2 : index
    %c0_34 = arith.constant 0 : index
    %c0_35 = arith.constant 0 : index
    %33 = vector.load %arg2[%c0_32, %c2_33, %c0_34, %c0_35] : memref<3x3x128x128xbf16, #tpu.memory_space<vmem>>, vector<1x1x128x128xbf16>
    %34 = vector.shape_cast %33 : vector<1x1x128x128xbf16> to vector<128x128xbf16>
    %cst_36 = arith.constant dense<0.000000e+00> : vector<256x128xf32>
    %35 = tpu.matmul %32, %34, %cst_36 {dimension_numbers = #tpu.dot_dimension_numbers<[1], [0], [0], [1], [0, 0, 1, 1], [], []>} : vector<256x128xbf16>, vector<128x128xbf16>, vector<256x128xf32> -> vector<256x128xf32>
    %36 = arith.addf %29, %35 : vector<256x128xf32>
    %c1_37 = arith.constant 1 : index
    %c0_38 = arith.constant 0 : index
    %c0_39 = arith.constant 0 : index
    %37 = vector.load %arg8[%c1_37, %c0_38, %c0_39] : memref<18x18x128xf32, #tpu.memory_space<vmem>>, vector<16x16x128xf32>
    %38 = vector.shape_cast %37 : vector<16x16x128xf32> to vector<256x128xf32>
    %39 = arith.truncf %38 : vector<256x128xf32> to vector<256x128xbf16>
    %c1_40 = arith.constant 1 : index
    %c0_41 = arith.constant 0 : index
    %c0_42 = arith.constant 0 : index
    %c0_43 = arith.constant 0 : index
    %40 = vector.load %arg2[%c1_40, %c0_41, %c0_42, %c0_43] : memref<3x3x128x128xbf16, #tpu.memory_space<vmem>>, vector<1x1x128x128xbf16>
    %41 = vector.shape_cast %40 : vector<1x1x128x128xbf16> to vector<128x128xbf16>
    %cst_44 = arith.constant dense<0.000000e+00> : vector<256x128xf32>
    %42 = tpu.matmul %39, %41, %cst_44 {dimension_numbers = #tpu.dot_dimension_numbers<[1], [0], [0], [1], [0, 0, 1, 1], [], []>} : vector<256x128xbf16>, vector<128x128xbf16>, vector<256x128xf32> -> vector<256x128xf32>
    %43 = arith.addf %36, %42 : vector<256x128xf32>
    %c1_45 = arith.constant 1 : index
    %c1_46 = arith.constant 1 : index
    %c0_47 = arith.constant 0 : index
    %44 = vector.load %arg8[%c1_45, %c1_46, %c0_47] : memref<18x18x128xf32, #tpu.memory_space<vmem>>, vector<16x16x128xf32>
    %45 = vector.shape_cast %44 : vector<16x16x128xf32> to vector<256x128xf32>
    %46 = arith.truncf %45 : vector<256x128xf32> to vector<256x128xbf16>
    %c1_48 = arith.constant 1 : index
    %c1_49 = arith.constant 1 : index
    %c0_50 = arith.constant 0 : index
    %c0_51 = arith.constant 0 : index
    %47 = vector.load %arg2[%c1_48, %c1_49, %c0_50, %c0_51] : memref<3x3x128x128xbf16, #tpu.memory_space<vmem>>, vector<1x1x128x128xbf16>
    %48 = vector.shape_cast %47 : vector<1x1x128x128xbf16> to vector<128x128xbf16>
    %cst_52 = arith.constant dense<0.000000e+00> : vector<256x128xf32>
    %49 = tpu.matmul %46, %48, %cst_52 {dimension_numbers = #tpu.dot_dimension_numbers<[1], [0], [0], [1], [0, 0, 1, 1], [], []>} : vector<256x128xbf16>, vector<128x128xbf16>, vector<256x128xf32> -> vector<256x128xf32>
    %50 = arith.addf %43, %49 : vector<256x128xf32>
    %c1_53 = arith.constant 1 : index
    %c2_54 = arith.constant 2 : index
    %c0_55 = arith.constant 0 : index
    %51 = vector.load %arg8[%c1_53, %c2_54, %c0_55] : memref<18x18x128xf32, #tpu.memory_space<vmem>>, vector<16x16x128xf32>
    %52 = vector.shape_cast %51 : vector<16x16x128xf32> to vector<256x128xf32>
    %53 = arith.truncf %52 : vector<256x128xf32> to vector<256x128xbf16>
    %c1_56 = arith.constant 1 : index
    %c2_57 = arith.constant 2 : index
    %c0_58 = arith.constant 0 : index
    %c0_59 = arith.constant 0 : index
    %54 = vector.load %arg2[%c1_56, %c2_57, %c0_58, %c0_59] : memref<3x3x128x128xbf16, #tpu.memory_space<vmem>>, vector<1x1x128x128xbf16>
    %55 = vector.shape_cast %54 : vector<1x1x128x128xbf16> to vector<128x128xbf16>
    %cst_60 = arith.constant dense<0.000000e+00> : vector<256x128xf32>
    %56 = tpu.matmul %53, %55, %cst_60 {dimension_numbers = #tpu.dot_dimension_numbers<[1], [0], [0], [1], [0, 0, 1, 1], [], []>} : vector<256x128xbf16>, vector<128x128xbf16>, vector<256x128xf32> -> vector<256x128xf32>
    %57 = arith.addf %50, %56 : vector<256x128xf32>
    %c2_61 = arith.constant 2 : index
    %c0_62 = arith.constant 0 : index
    %c0_63 = arith.constant 0 : index
    %58 = vector.load %arg8[%c2_61, %c0_62, %c0_63] : memref<18x18x128xf32, #tpu.memory_space<vmem>>, vector<16x16x128xf32>
    %59 = vector.shape_cast %58 : vector<16x16x128xf32> to vector<256x128xf32>
    %60 = arith.truncf %59 : vector<256x128xf32> to vector<256x128xbf16>
    %c2_64 = arith.constant 2 : index
    %c0_65 = arith.constant 0 : index
    %c0_66 = arith.constant 0 : index
    %c0_67 = arith.constant 0 : index
    %61 = vector.load %arg2[%c2_64, %c0_65, %c0_66, %c0_67] : memref<3x3x128x128xbf16, #tpu.memory_space<vmem>>, vector<1x1x128x128xbf16>
    %62 = vector.shape_cast %61 : vector<1x1x128x128xbf16> to vector<128x128xbf16>
    %cst_68 = arith.constant dense<0.000000e+00> : vector<256x128xf32>
    %63 = tpu.matmul %60, %62, %cst_68 {dimension_numbers = #tpu.dot_dimension_numbers<[1], [0], [0], [1], [0, 0, 1, 1], [], []>} : vector<256x128xbf16>, vector<128x128xbf16>, vector<256x128xf32> -> vector<256x128xf32>
    %64 = arith.addf %57, %63 : vector<256x128xf32>
    %c2_69 = arith.constant 2 : index
    %c1_70 = arith.constant 1 : index
    %c0_71 = arith.constant 0 : index
    %65 = vector.load %arg8[%c2_69, %c1_70, %c0_71] : memref<18x18x128xf32, #tpu.memory_space<vmem>>, vector<16x16x128xf32>
    %66 = vector.shape_cast %65 : vector<16x16x128xf32> to vector<256x128xf32>
    %67 = arith.truncf %66 : vector<256x128xf32> to vector<256x128xbf16>
    %c2_72 = arith.constant 2 : index
    %c1_73 = arith.constant 1 : index
    %c0_74 = arith.constant 0 : index
    %c0_75 = arith.constant 0 : index
    %68 = vector.load %arg2[%c2_72, %c1_73, %c0_74, %c0_75] : memref<3x3x128x128xbf16, #tpu.memory_space<vmem>>, vector<1x1x128x128xbf16>
    %69 = vector.shape_cast %68 : vector<1x1x128x128xbf16> to vector<128x128xbf16>
    %cst_76 = arith.constant dense<0.000000e+00> : vector<256x128xf32>
    %70 = tpu.matmul %67, %69, %cst_76 {dimension_numbers = #tpu.dot_dimension_numbers<[1], [0], [0], [1], [0, 0, 1, 1], [], []>} : vector<256x128xbf16>, vector<128x128xbf16>, vector<256x128xf32> -> vector<256x128xf32>
    %71 = arith.addf %64, %70 : vector<256x128xf32>
    %c2_77 = arith.constant 2 : index
    %c2_78 = arith.constant 2 : index
    %c0_79 = arith.constant 0 : index
    %72 = vector.load %arg8[%c2_77, %c2_78, %c0_79] : memref<18x18x128xf32, #tpu.memory_space<vmem>>, vector<16x16x128xf32>
    %73 = vector.shape_cast %72 : vector<16x16x128xf32> to vector<256x128xf32>
    %74 = arith.truncf %73 : vector<256x128xf32> to vector<256x128xbf16>
    %c2_80 = arith.constant 2 : index
    %c2_81 = arith.constant 2 : index
    %c0_82 = arith.constant 0 : index
    %c0_83 = arith.constant 0 : index
    %75 = vector.load %arg2[%c2_80, %c2_81, %c0_82, %c0_83] : memref<3x3x128x128xbf16, #tpu.memory_space<vmem>>, vector<1x1x128x128xbf16>
    %76 = vector.shape_cast %75 : vector<1x1x128x128xbf16> to vector<128x128xbf16>
    %cst_84 = arith.constant dense<0.000000e+00> : vector<256x128xf32>
    %77 = tpu.matmul %74, %76, %cst_84 {dimension_numbers = #tpu.dot_dimension_numbers<[1], [0], [0], [1], [0, 0, 1, 1], [], []>} : vector<256x128xbf16>, vector<128x128xbf16>, vector<256x128xf32> -> vector<256x128xf32>
    %78 = arith.addf %71, %77 : vector<256x128xf32>
    %79 = vector.shape_cast %78 : vector<256x128xf32> to vector<16x16x128xf32>
    %c0_85 = arith.constant 0 : index
    %c0_86 = arith.constant 0 : index
    %80 = vector.load %arg5[%c0_85, %c0_86] : memref<1x128xf32, #tpu.memory_space<vmem>>, vector<1x128xf32>
    %81 = vector.shape_cast %80 : vector<1x128xf32> to vector<1x1x128xf32>
    %82 = vector.broadcast %81 : vector<1x1x128xf32> to vector<16x16x128xf32>
    %83 = arith.addf %79, %82 : vector<16x16x128xf32>
    %c0_87 = arith.constant 0 : index
    %c0_88 = arith.constant 0 : index
    %c0_89 = arith.constant 0 : index
    %c0_90 = arith.constant 0 : index
    %84 = vector.load %arg6[%c0_87, %c0_88, %c0_89, %c0_90] : memref<1x16x16x128xf32, #tpu.memory_space<vmem>>, vector<1x16x16x128xf32>
    %85 = vector.shape_cast %84 : vector<1x16x16x128xf32> to vector<16x16x128xf32>
    %86 = vector.shape_cast %83 : vector<16x16x128xf32> to vector<1x16x16x128xf32>
    tpu.vector_store %arg6[%c0_87, %c0_88, %c0_89, %c0_90], %86 {strides = array<i32>} : memref<1x16x16x128xf32, #tpu.memory_space<vmem>>, vector<1x16x16x128xf32>,
    %cst_91 = arith.constant dense<0.000000e+00> : vector<16x128xf32>
    %87 = vector.multi_reduction <add>, %83, %cst_91 [0] : vector<16x16x128xf32> to vector<16x128xf32>
    %cst_92 = arith.constant dense<0.000000e+00> : vector<128xf32>
    %88 = vector.multi_reduction <add>, %87, %cst_92 [0] : vector<16x128xf32> to vector<128xf32>
    %89 = vector.shape_cast %88 : vector<128xf32> to vector<1x128xf32>
    %90 = arith.mulf %83, %83 : vector<16x16x128xf32>
    %cst_93 = arith.constant dense<0.000000e+00> : vector<16x128xf32>
    %91 = vector.multi_reduction <add>, %90, %cst_93 [0] : vector<16x16x128xf32> to vector<16x128xf32>
    %cst_94 = arith.constant dense<0.000000e+00> : vector<128xf32>
    %92 = vector.multi_reduction <add>, %91, %cst_94 [0] : vector<16x128xf32> to vector<128xf32>
    %93 = vector.shape_cast %92 : vector<128xf32> to vector<1x128xf32>
    %94 = tpu.concatenate %89, %93 in 0 : vector<1x128xf32>, vector<1x128xf32> -> vector<2x128xf32>
    %c0_95 = arith.constant 0 : index
    %c0_96 = arith.constant 0 : index
    %c0_97 = arith.constant 0 : index
    %95 = vector.load %arg7[%c0_95, %c0_96, %c0_97] : memref<1x2x128xf32, #tpu.memory_space<vmem>>, vector<1x2x128xf32>
    %96 = vector.shape_cast %95 : vector<1x2x128xf32> to vector<2x128xf32>
    %97 = vector.shape_cast %94 : vector<2x128xf32> to vector<1x2x128xf32>
    tpu.vector_store %arg7[%c0_95, %c0_96, %c0_97], %97 {strides = array<i32>} : memref<1x2x128xf32, #tpu.memory_space<vmem>>, vector<1x2x128xf32>,
    return
  }
  func.func @transform_0(%arg0: i32) -> (i32, i32, i32, i32) {
    %c0_i32 = arith.constant 0 : i32
    %c0_i32_0 = arith.constant 0 : i32
    %c0_i32_1 = arith.constant 0 : i32
    %c0_i32_2 = arith.constant 0 : i32
    return %arg0, %c0_i32, %c0_i32_0, %c0_i32_1 : i32, i32, i32, i32
  }
  func.func @transform_1(%arg0: i32) -> (i32, i32, i32, i32) {
    %c0_i32 = arith.constant 0 : i32
    %c0_i32_0 = arith.constant 0 : i32
    %c0_i32_1 = arith.constant 0 : i32
    %c0_i32_2 = arith.constant 0 : i32
    %c0_i32_3 = arith.constant 0 : i32
    return %c0_i32, %c0_i32_0, %c0_i32_1, %c0_i32_2 : i32, i32, i32, i32
  }
  func.func @transform_2(%arg0: i32) -> (i32, i32) {
    %c0_i32 = arith.constant 0 : i32
    %c0_i32_0 = arith.constant 0 : i32
    %c0_i32_1 = arith.constant 0 : i32
    return %c0_i32, %c0_i32_0 : i32, i32
  }
  func.func @transform_3(%arg0: i32) -> (i32, i32) {
    %c0_i32 = arith.constant 0 : i32
    %c0_i32_0 = arith.constant 0 : i32
    %c0_i32_1 = arith.constant 0 : i32
    return %c0_i32, %c0_i32_0 : i32, i32
  }
  func.func @transform_4(%arg0: i32) -> (i32, i32) {
    %c0_i32 = arith.constant 0 : i32
    %c0_i32_0 = arith.constant 0 : i32
    %c0_i32_1 = arith.constant 0 : i32
    return %c0_i32, %c0_i32_0 : i32, i32
  }
  func.func @transform_5(%arg0: i32) -> (i32, i32, i32, i32) {
    %c0_i32 = arith.constant 0 : i32
    %c0_i32_0 = arith.constant 0 : i32
    %c0_i32_1 = arith.constant 0 : i32
    %c0_i32_2 = arith.constant 0 : i32
    return %arg0, %c0_i32, %c0_i32_0, %c0_i32_1 : i32, i32, i32, i32
  }
  func.func @transform_6(%arg0: i32) -> (i32, i32, i32) {
    %c0_i32 = arith.constant 0 : i32
    %c0_i32_0 = arith.constant 0 : i32
    %c0_i32_1 = arith.constant 0 : i32
    return %arg0, %c0_i32, %c0_i32_0 : i32, i32, i32
  }
}

module attributes {stable_mosaic.version = 11 : i64} {
  func.func @bn_act_kernel(%arg0: i32, %arg1: memref<512x128xf32, #tpu.memory_space<vmem>>, %arg2: memref<1x128xf32, #tpu.memory_space<vmem>>, %arg3: memref<1x128xf32, #tpu.memory_space<vmem>>, %arg4: memref<512x128xf32, #tpu.memory_space<vmem>>, %arg5: memref<512x128xf32, #tpu.memory_space<vmem>>) attributes {dimension_semantics = [#tpu.dimension_semantics<parallel>], iteration_bounds = array<i64: 1>, scalar_prefetch = 0 : i64, scratch_operands = 0 : i64, tpu.core_type = #tpu.core_type<tc>, window_params = [{transform_indices = @transform_0, window_bounds = array<i64: 512, 128>}, {pipeline_mode = #tpu.pipeline_mode<synchronous>, transform_indices = @transform_1, window_bounds = array<i64: 1, 128>}, {pipeline_mode = #tpu.pipeline_mode<synchronous>, transform_indices = @transform_2, window_bounds = array<i64: 1, 128>}, {transform_indices = @transform_3, window_bounds = array<i64: 512, 128>}, {transform_indices = @transform_4, window_bounds = array<i64: 512, 128>}]} {
    %c0 = arith.constant 0 : index
    %c0_0 = arith.constant 0 : index
    %0 = vector.load %arg1[%c0, %c0_0] : memref<512x128xf32, #tpu.memory_space<vmem>>, vector<512x128xf32>
    %c0_1 = arith.constant 0 : index
    %c0_2 = arith.constant 0 : index
    %1 = vector.load %arg2[%c0_1, %c0_2] : memref<1x128xf32, #tpu.memory_space<vmem>>, vector<1x128xf32>
    %2 = vector.broadcast %1 : vector<1x128xf32> to vector<512x128xf32>
    %3 = arith.mulf %0, %2 : vector<512x128xf32>
    %c0_3 = arith.constant 0 : index
    %c0_4 = arith.constant 0 : index
    %4 = vector.load %arg3[%c0_3, %c0_4] : memref<1x128xf32, #tpu.memory_space<vmem>>, vector<1x128xf32>
    %5 = vector.broadcast %4 : vector<1x128xf32> to vector<512x128xf32>
    %6 = arith.addf %3, %5 : vector<512x128xf32>
    %c0_5 = arith.constant 0 : index
    %c0_6 = arith.constant 0 : index
    %7 = vector.load %arg4[%c0_5, %c0_6] : memref<512x128xf32, #tpu.memory_space<vmem>>, vector<512x128xf32>
    %8 = arith.addf %6, %7 : vector<512x128xf32>
    %cst = arith.constant 0.000000e+00 : f32
    %9 = vector.broadcast %cst : f32 to vector<512x128xf32>
    %10 = arith.maximumf %8, %9 : vector<512x128xf32>
    %c0_7 = arith.constant 0 : index
    %c0_8 = arith.constant 0 : index
    %11 = vector.load %arg5[%c0_7, %c0_8] : memref<512x128xf32, #tpu.memory_space<vmem>>, vector<512x128xf32>
    tpu.vector_store %arg5[%c0_7, %c0_8], %10 {strides = array<i32>} : memref<512x128xf32, #tpu.memory_space<vmem>>, vector<512x128xf32>,
    return
  }
  func.func @transform_0(%arg0: i32) -> (i32, i32) {
    %c0_i32 = arith.constant 0 : i32
    %c0_i32_0 = arith.constant 0 : i32
    return %arg0, %c0_i32 : i32, i32
  }
  func.func @transform_1(%arg0: i32) -> (i32, i32) {
    %c0_i32 = arith.constant 0 : i32
    %c0_i32_0 = arith.constant 0 : i32
    %c0_i32_1 = arith.constant 0 : i32
    return %c0_i32, %c0_i32_0 : i32, i32
  }
  func.func @transform_2(%arg0: i32) -> (i32, i32) {
    %c0_i32 = arith.constant 0 : i32
    %c0_i32_0 = arith.constant 0 : i32
    %c0_i32_1 = arith.constant 0 : i32
    return %c0_i32, %c0_i32_0 : i32, i32
  }
  func.func @transform_3(%arg0: i32) -> (i32, i32) {
    %c0_i32 = arith.constant 0 : i32
    %c0_i32_0 = arith.constant 0 : i32
    return %arg0, %c0_i32 : i32, i32
  }
  func.func @transform_4(%arg0: i32) -> (i32, i32) {
    %c0_i32 = arith.constant 0 : i32
    %c0_i32_0 = arith.constant 0 : i32
    return %arg0, %c0_i32 : i32, i32
  }
}

</mosaic_0001>

<bundles_post_ra>
// kernel: tpu_custom_call.1
= control target key start
LH: loop header
LB: loop body
LE: loop exit
PB: predicated region body
PF: predicated region fallthrough
CT: control target
= control target key end

     0   :  { %7 = vsyncpa [#allocation3], 0  ;;  %s649_s0 = inlined_call_operand.hbm [shape: f32[16,128], index: 0, kind: input, shape index: {}]   ;;  %s650_s1 = inlined_call_operand.hbm [shape: f32[8,128], index: 1, kind: input, shape index: {}]   ;;  %s651_s2 = inlined_call_operand.hbm [shape: f32[16,128], index: 2, kind: output, shape index: {}]  }
   0x1   :  { %9 = vsyncpa [#allocation3 + $0x1], 0 }
   0x2   :  { %10 = vsyncpa [#allocation6], 0 }
   0x3   :  { %11 = vsyncpa [#allocation4], 0 }
   0x4   :  { %13 = vsyncpa [#allocation4 + $0x1], 0  ;;  %s483_s9 = smov 0   ;;  %s485_s10 = smov 0  }
   0x5   :  { %s487_s11 = smov 0   ;;  %s489_s12 = smov 0  }
   0x6 LB: > { %s504_s13 = sadd.s32 4294967295, %s463_s12   ;;  %s270_s14 = sadd.s32 4294967294, %s463_s12   ;;  %s463_s12 = sphi %s489_s12, %s674_s12   ;;  %s459_s11 = sphi %s487_s11, %s673_s11   ;;  %s455_s10 = sphi %s485_s10, %s672_s10   ;;  %s451_s9 = sphi %s483_s9, %s671_s9  }
   0x7   : > { %p39_p0 = scmp.ne.s32.totalorder %s455_s10, %s451_s9  ;;  %p652_p1 = scmp.eq.s32.totalorder %s504_s13, 0 }
   0x8   : > { %p90_p3 = scmp.eq.s32.totalorder %s270_s14, 1  ;;  %p271_p5 = scmp.ge.s32.totalorder %s463_s12, 1 }
   0x9   : > { %p513_p4 = por %p652_p1, %p39_p0  ;;  %p97_p7 = scmp.lt.s32.totalorder %s463_s12, 3 }
   0xa   : > { %p518_p6 = por %p90_p3, %p39_p0  ;;  %s465_s18 = smov [#allocation5]  }
   0xb   : > { %s656_s15 = scalar_select %p513_p4, 1, 0 }
   0xc   : > { %s657_s16 = scalar_select %p518_p6, 1, 0 }
   0xd   : > { %p523_p8 = pnand %p271_p5, %p97_p7  ;;  %s110_s19 = sshll.u32 %s465_s18, 4  ;;  %s111_s19 = int_to_ptr.vmem [resolvable:$true] %s110_s19 }
   0xe   : > { %s531_s20 = sadd.s32 1, %s463_s12   ;;  %s26_s24 = sadd.s32 1, %s459_s11 }
   0xf   : > { %s658_s17 = scalar_select %p523_p8, 1, 0 }
  0x10   : > { %p292_p10 = pneg %p523_p8  ;;  %s23_s22 = ssub.s32 %s463_s12, %s531_s20 }
  0x11   : > { %p541_p12 = scmp.eq.s32.totalorder %s23_s22, 0  ;;  %p33_p13 = scmp.ne.s32.totalorder %s459_s11, %s455_s10 }
  0x12   : > { %p535_p11 = pnand %p292_p10, %p652_p1  ;;  %s352_s25 = scalar_lea.vmem %s111_s19, 128 }
  0x13   : > { %p353_p3 = scmp.ne.s32.totalorder %s111_s19, %s352_s25  ;;  %p360_p9 = scmp.lt.s32.totalorder %s111_s19, %s111_s19 }
  0x14   : > { %p343_p0 = pneg %p535_p11  ;;  %p361_p2 = scmp.lt.s32.totalorder %s352_s25, %s352_s25 }
  0x16   : > { %p355_p5 = pnand %p353_p3, %p343_p0  ;;  %p362_p10 = por %p361_p2, %p360_p9 }
  0x18   : > { %p356_p7 = pneg %p355_p5 }
  0x1a   : > { %p363_p1 = pnand %p362_p10, %p356_p7 }
  0x1c   : > { %366 = shalt.err (!%p363_p1)
}
  0x1d   : > { %295 = dma.hbm_to_vmem [thread:$0]  (!%p535_p11), %s650_s1, 128, %s111_s19, [#allocation6]  }
  0x1e   : > { %s558_s28 = scalar_select %p541_p12, %s459_s11, %s26_s24  }
  0x1f   : > { %p34_p1 = scmp.eq.s32.totalorder %s463_s12, 0  ;;  %p661_p2 = scmp.eq.s32.totalorder %s504_s13, 1 }
  0x20   : > { %p305_p0 = scmp.lt.s32.totalorder %s463_s12, 2  ;;  %s121_s30 = sand.u32 1, %s459_s11  }
  0x21   : > { %p566_p9 = por %p661_p2, %p33_p13  ;;  %p35_p3 = por %p34_p1, %p33_p13 }
  0x22   : > { %s274_s3 = sshll.u32 %s121_s30, 3  ;;  %s275_s4 = sshll.u32 %s463_s12, 7 }
  0x23   : > { %s662_s29 = scalar_select %p566_p9, 1, 0 }
  0x24   : > { %s579_s7 = scalar_lea.hbm %s649_s0, %s275_s4  ;;  %s125_s8 = scalar_lea.vmem [#allocation2], %s274_s3 }
  0x25   : > { %s132_s14 = sshll.u32 %s125_s8, 4  ;;  %p581_p11 = pnand %p305_p0, %p35_p3  ;;  %s133_s14 = int_to_ptr.vmem [resolvable:$true] %s132_s14 }
  0x26   : > { %s122_s19 = scalar_lea.sflag [#allocation3], %s121_s30  ;;  %s367_s21 = scalar_lea.hbm %s579_s7, 128 }
  0x27   : > { %p368_p12 = scmp.ne.s32.totalorder %s579_s7, %s367_s21  ;;  %p369_p13 = pneg %p581_p11 }
  0x28   : > { %s372_s24 = scalar_lea.hbm %s649_s0, 256  ;;  %p373_p10 = scmp.lt.s32.totalorder %s579_s7, %s649_s0 }
  0x29   : > { %p370_p5 = pnand %p369_p13, %p368_p12  ;;  %p374_p1 = scmp.lt.s32.totalorder %s372_s24, %s367_s21 }
  0x2b   : > { %p371_p7 = pneg %p370_p5  ;;  %p375_p2 = por %p374_p1, %p373_p10 }
  0x2d   : > { %p376_p0 = pnand %p375_p2, %p371_p7 }
  0x2f   : > { %379 = shalt.err (!%p376_p0)
}
  0x30   : > { %s380_s27 = scalar_lea.vmem %s133_s14, 128  ;;  %s466_s30 = smov [#allocation2]  }
  0x31   : > { %p381_p3 = scmp.ne.s32.totalorder %s133_s14, %s380_s27  ;;  %s385_s3 = sshll.u32 %s466_s30, 4  ;;  %s386_s3 = int_to_ptr.vmem [resolvable:$false] %s385_s3 }
  0x32   : > { %s387_s4 = scalar_lea.vmem %s386_s3, 256  ;;  %p388_p12 = scmp.lt.s32.totalorder %s133_s14, %s386_s3 }
  0x33   : > { %p383_p6 = pnand %p381_p3, %p369_p13  ;;  %p389_p5 = scmp.lt.s32.totalorder %s387_s4, %s380_s27 }
  0x35   : > { %p384_p9 = pneg %p383_p6  ;;  %p390_p4 = por %p389_p5, %p388_p12 }
  0x37   : > { %p391_p8 = pnand %p390_p4, %p384_p9 }
  0x39   : > { %394 = shalt.err (!%p391_p8)
}
  0x3a   : > { %299 = dma.hbm_to_vmem [thread:$0]  (!%p581_p11), %s579_s7, 128, %s133_s14, %s122_s19  }
  0x3b   : > { %p664_p7 = scmp.ne.s32.totalorder %s658_s17, 0 }
  0x3c   : > { %s602_s5 = sand.u32 (!%p664_p7), 1, %s455_s10   ;;  %p665_p6 = scmp.ne.s32.totalorder (!%p664_p7), %s656_s15, 0 }
  0x3d   : > { %141 = sbr.rel (%p664_p7) target bundleno = 95 (0x5f), region = 28  ;;  %s277_s6 = sshll.u32 (!%p664_p7), %s602_s5, 3 }
  0x3e   : > { %s144_s8 = scalar_lea.sflag (!%p664_p7), [#allocation3], %s602_s5  ;;  %s147_s21 = scalar_lea.vmem (!%p664_p7), [#allocation2], %s277_s6 }
  0x42   : > { %438 = dma.done.wait (%p665_p6), %s144_s8, 128  }
  0x43   : > { %440 = vsyncadd (%p665_p6), %s144_s8, 4294967168  ;;  %p666_p4 = scmp.eq.s32.totalorder %s504_s13, 0 }
  0x45   : > { %442 = dma.done.wait (%p666_p4), [#allocation6], 128   ;;  %p667_p8 = pmov %p666_p4 }
  0x46   : > { %s171_s17 = scalar_lea.vmem [#allocation7], %s277_s6  ;;  %s281_s14 = sshll.u32 %s504_s13, 7  ;;  %v172_v0 = vld [vmem:[%s147_s21] sm:$0xff]  ;;  %v173_v1 = vld [vmem:[#allocation5] sm:$0xff] }
  0x47   : > { %444 = vsyncadd (%p667_p8), [#allocation6], 4294967168  ;;  %s190_s7 = sshll.u32 %s171_s17, 4  ;;  %v174_v2 = vadd.f32 %v173_v1, %v172_v0  ;;  %s188_s15 = scalar_lea.hbm %s651_s2, %s281_s14  ;;  %s191_s7 = int_to_ptr.vmem [resolvable:$true] %s190_s7 }
  0x48   : > { %s177_s22 = scalar_lea.sflag [#allocation4], %s602_s5  ;;  %s395_s23 = scalar_lea.vmem %s191_s7, 128 }
  0x49   : > { %175 = vst [vmem:[%s171_s17] sm:$0xff] %v174_v2  ;;  %p396_p9 = scmp.ne.s32.totalorder %s191_s7, %s395_s23  ;;  %p668_p11 = scmp.ne.s32.totalorder %s662_s29, 0 }
  0x4a   : > { %s467_s24 = smov [#allocation7]  }
  0x4b   : > { %p397_p13 = pnand %p396_p9, %p668_p11  ;;  %s399_s25 = sshll.u32 %s467_s24, 4  ;;  %s400_s25 = int_to_ptr.vmem [resolvable:$false] %s399_s25 }
  0x4c   : > { %s401_s26 = scalar_lea.vmem %s400_s25, 256  ;;  %p402_p1 = scmp.lt.s32.totalorder %s191_s7, %s400_s25 }
  0x4d   : > { %p398_p10 = pneg %p397_p13  ;;  %p403_p2 = scmp.lt.s32.totalorder %s401_s26, %s395_s23 }
  0x4f   : > { %p404_p0 = por %p403_p2, %p402_p1 }
  0x51   : > { %p405_p3 = pnand %p404_p0, %p398_p10 }
  0x53   : > { %408 = shalt.err (!%p405_p3)
}
  0x54   : > { %s409_s13 = scalar_lea.hbm %s188_s15, 128  ;;  %s413_s3 = scalar_lea.hbm %s651_s2, 256 }
  0x55   : > { %p410_p12 = scmp.ne.s32.totalorder %s188_s15, %s409_s13  ;;  %p414_p6 = scmp.lt.s32.totalorder %s188_s15, %s651_s2 }
  0x56   : > { %p415_p4 = scmp.lt.s32.totalorder %s413_s3, %s409_s13 }
  0x57   : > { %p411_p5 = pnand %p410_p12, %p668_p11 }
  0x58   : > { %p416_p8 = por %p415_p4, %p414_p6 }
  0x59   : > { %p412_p7 = pneg %p411_p5 }
  0x5b   : > { %p417_p9 = pnand %p416_p8, %p412_p7 }
  0x5d   : > { %420 = shalt.err (!%p417_p9)
}
  0x5e   : > { %290 = dma.vmem_to_hbm [thread:$0]  (%p668_p11), %s191_s7, 128, %s188_s15, %s177_s22  }
  0x5f PF: > { %s202_s6 = sand.u32 1, %s451_s9   ;;  %p669_p13 = scmp.ne.s32.totalorder %s657_s16, 0 }
  0x60   : > { %p670_p10 = scmp.ge.s32.totalorder %s463_s12, 2  ;;  %s203_s8 = scalar_lea.sflag [#allocation4], %s202_s6 }
  0x62   : > { %p301_p1 = pnand %p670_p10, %p669_p13 }
  0x64   : > { %p302_p2 = pneg %p301_p1 }
  0x66   : > { %446 = dma.done.wait (%p302_p2), %s203_s8, 128  }
  0x67   : > { %448 = vsyncadd (%p302_p2), %s203_s8, 4294967168  ;;  %p16_p0 = scmp.ge.s32.totalorder %s531_s20, 4   ;;  %s671_s9 = smov %s455_s10 }
  0x68   : > { %s672_s10 = smov %s459_s11  ;;  %s673_s11 = smov %s558_s28 }
  0x69   : > { %s674_s12 = smov %s531_s20  ;;  %18 = sbr.rel (!%p16_p0) target bundleno = 6 (0x6), region = 77 }
  0x6e   :  { %208 = vsyncpa [#allocation3], 1 }
  0x6f   :  { %210 = vsyncpa [#allocation3 + $0x1], 1 }
  0x70   :  { %211 = vsyncpa [#allocation6], 1 }
  0x71   :  { %212 = vsyncpa [#allocation4], 1 }
  0x72   :  { %214 = vsyncpa [#allocation4 + $0x1], 1 }

// kernel: residual_block_forward.5
= control target key start
LH: loop header
LB: loop body
LE: loop exit
PB: predicated region body
PF: predicated region fallthrough
CT: control target
= control target key end

     0   :  { %s1224_s0 = inlined_call_operand.vmem [shape: f32[512,128], index: 0, kind: input, shape index: {}]   ;;  %s1225_s1 = inlined_call_operand.vmem [shape: f32[1,128], index: 1, kind: input, shape index: {}]   ;;  %s1226_s2 = inlined_call_operand.vmem [shape: f32[1,128], index: 2, kind: input, shape index: {}]   ;;  %s1227_s3 = inlined_call_operand.vmem [shape: f32[512,128], index: 3, kind: input, shape index: {}]   ;;  %s1228_s4 = inlined_call_operand.vmem [shape: f32[512,128], index: 4, kind: output, shape index: {}]  }
   0x1   :  { %v17_v0 = vld [vmem:[%s1224_s0] sm:$0xff]  ;;  %v18_v4 = vld [vmem:[%s1224_s0 + $0x8] sm:$0xff]  ;;  %v19_v7 = vld [vmem:[%s1224_s0 + $0x10] sm:$0xff] }
   0x2   :  { %v516_v1 = vld [vmem:[%s1225_s1] ss:$0 sm:$0xff]  ;;  %v20_v8 = vld [vmem:[%s1224_s0 + $0x18] sm:$0xff]  ;;  %v224_v10 = vld [vmem:[%s1227_s3 + $0x8] sm:$0xff] }
   0x3   :  { %v521_v2 = vld [vmem:[%s1226_s2] ss:$0 sm:$0xff]  ;;  %v88_v3 = vmul.f32 %v516_v1, %v17_v0  ;;  %v89_v6 = vmul.f32 %v516_v1, %v18_v4  ;;  %v90_v11 = vmul.f32 %v516_v1, %v19_v7  ;;  %v225_v12 = vld [vmem:[%s1227_s3 + $0x10] sm:$0xff]  ;;  %v91_v13 = vmul.f32 %v516_v1, %v20_v8  ;;  %v226_v16 = vld [vmem:[%s1227_s3 + $0x18] sm:$0xff] }
   0x4   :  { %v223_v5 = vld [vmem:[%s1227_s3] sm:$0xff]  ;;  %v22_v18 = vld [vmem:[%s1224_s0 + $0x28] sm:$0xff]  ;;  %v23_v19 = vld [vmem:[%s1224_s0 + $0x30] sm:$0xff] }
   0x5   :  { %v159_v9 = vadd.f32 %v521_v2, %v88_v3  ;;  %v21_v14 = vld [vmem:[%s1224_s0 + $0x20] sm:$0xff]  ;;  %v160_v15 = vadd.f32 %v521_v2, %v89_v6  ;;  %v161_v21 = vadd.f32 %v521_v2, %v90_v11  ;;  %v162_v22 = vadd.f32 %v521_v2, %v91_v13  ;;  %v24_v25 = vld [vmem:[%s1224_s0 + $0x38] sm:$0xff]  ;;  %v228_v28 = vld [vmem:[%s1227_s3 + $0x28] sm:$0xff] }
   0x6   :  { %v92_v17 = vmul.f32 %v516_v1, %v21_v14  ;;  %v227_v23 = vld [vmem:[%s1227_s3 + $0x20] sm:$0xff]  ;;  %v93_v24 = vmul.f32 %v516_v1, %v22_v18  ;;  %v94_v29 = vmul.f32 %v516_v1, %v23_v19  ;;  %v95_v30 = vmul.f32 %v516_v1, %v24_v25  ;;  %v229_v36 = vld [vmem:[%s1227_s3 + $0x30] sm:$0xff]  ;;  %v230_v37 = vld [vmem:[%s1227_s3 + $0x38] sm:$0xff] }
   0x7   :  { %v287_v20 = vadd.f32 %v223_v5, %v159_v9  ;;  %v288_v26 = vadd.f32 %v224_v10, %v160_v15  ;;  %v25_v31 = vld [vmem:[%s1224_s0 + $0x40] sm:$0xff]  ;;  %v289_v33 = vadd.f32 %v225_v12, %v161_v21  ;;  %v290_v34 = vadd.f32 %v226_v16, %v162_v22  ;;  %v26_v38 = vld [vmem:[%s1224_s0 + $0x48] sm:$0xff]  ;;  %v27_v43 = vld [vmem:[%s1224_s0 + $0x50] sm:$0xff] }
   0x8   :  { %v163_v27 = vadd.f32 %v521_v2, %v92_v17  ;;  %v164_v35 = vadd.f32 %v521_v2, %v93_v24  ;;  %v165_v41 = vadd.f32 %v521_v2, %v94_v29  ;;  %v166_v42 = vadd.f32 %v521_v2, %v95_v30  ;;  %v28_v44 = vld [vmem:[%s1224_s0 + $0x58] sm:$0xff]  ;;  %v29_v49 = vld [vmem:[%s1224_s0 + $0x60] sm:$0xff]  ;;  %v30_v55 = vld [vmem:[%s1224_s0 + $0x68] sm:$0xff] }
   0x9   :  { %v351_v32 = vmax.f32 %v287_v20, 0.0  ;;  %v352_v39 = vmax.f32 %v288_v26, 0.0  ;;  %v353_v45 = vmax.f32 %v289_v33, 0.0  ;;  %v354_v46 = vmax.f32 %v290_v34, 0.0  ;;  %v231_v53 = vld [vmem:[%s1227_s3 + $0x40] sm:$0xff]  ;;  %v232_v58 = vld [vmem:[%s1227_s3 + $0x48] sm:$0xff] }
   0xa   :  { %v291_v40 = vadd.f32 %v227_v23, %v163_v27  ;;  %v292_v47 = vadd.f32 %v228_v28, %v164_v35  ;;  %v96_v48 = vmul.f32 %v516_v1, %v25_v31  ;;  %v293_v51 = vadd.f32 %v229_v36, %v165_v41  ;;  %v31_v61 = vld [vmem:[%s1224_s0 + $0x70] sm:$0xff]  ;;  %v32_v62 = vld [vmem:[%s1224_s0 + $0x78] sm:$0xff]  ;;  %v235_v10 = vld [vmem:[%s1227_s3 + $0x60] sm:$0xff] }
   0xb   :  { %415 = vst [vmem:[%s1228_s4] sm:$0xff] %v351_v32  ;;  %416 = vst [vmem:[%s1228_s4 + $0x8] sm:$0xff] %v352_v39  ;;  %v294_v52 = vadd.f32 %v230_v37, %v166_v42  ;;  %v97_v54 = vmul.f32 %v516_v1, %v26_v38  ;;  %v98_v59 = vmul.f32 %v516_v1, %v27_v43  ;;  %v233_v4 = vld [vmem:[%s1227_s3 + $0x50] sm:$0xff]  ;;  %v234_v5 = vld [vmem:[%s1227_s3 + $0x58] sm:$0xff] }
   0xc   :  { %v355_v50 = vmax.f32 %v291_v40, 0.0  ;;  %417 = vst [vmem:[%s1228_s4 + $0x10] sm:$0xff] %v353_v45  ;;  %418 = vst [vmem:[%s1228_s4 + $0x18] sm:$0xff] %v354_v46  ;;  %v356_v56 = vmax.f32 %v292_v47, 0.0  ;;  %v167_v57 = vadd.f32 %v521_v2, %v96_v48  ;;  %v99_v60 = vmul.f32 %v516_v1, %v28_v44  ;;  %v236_v14 = vld [vmem:[%s1227_s3 + $0x68] sm:$0xff]  ;;  %v33_v17 = vld [vmem:[%s1224_s0 + $0x80] sm:$0xff] }
   0xd   :  { %v357_v63 = vmax.f32 %v293_v51, 0.0  ;;  %v358_v0 = vmax.f32 %v294_v52, 0.0  ;;  %v168_v3 = vadd.f32 %v521_v2, %v97_v54  ;;  %v100_v6 = vmul.f32 %v516_v1, %v29_v49  ;;  %v237_v22 = vld [vmem:[%s1227_s3 + $0x70] sm:$0xff]  ;;  %v238_v23 = vld [vmem:[%s1227_s3 + $0x78] sm:$0xff]  ;;  %v34_v24 = vld [vmem:[%s1224_s0 + $0x88] sm:$0xff] }
   0xe   :  { %419 = vst [vmem:[%s1228_s4 + $0x20] sm:$0xff] %v355_v50  ;;  %420 = vst [vmem:[%s1228_s4 + $0x28] sm:$0xff] %v356_v56  ;;  %v295_v7 = vadd.f32 %v231_v53, %v167_v57  ;;  %v169_v8 = vadd.f32 %v521_v2, %v98_v59  ;;  %v170_v9 = vadd.f32 %v521_v2, %v99_v60  ;;  %v35_v29 = vld [vmem:[%s1224_s0 + $0x90] sm:$0xff]  ;;  %v36_v30 = vld [vmem:[%s1224_s0 + $0x98] sm:$0xff] }
   0xf   :  { %v101_v11 = vmul.f32 %v516_v1, %v30_v55  ;;  %421 = vst [vmem:[%s1228_s4 + $0x30] sm:$0xff] %v357_v63  ;;  %422 = vst [vmem:[%s1228_s4 + $0x38] sm:$0xff] %v358_v0  ;;  %v296_v12 = vadd.f32 %v232_v58, %v168_v3  ;;  %v171_v13 = vadd.f32 %v521_v2, %v100_v6  ;;  %v37_v35 = vld [vmem:[%s1224_s0 + $0xa0] sm:$0xff]  ;;  %v38_v41 = vld [vmem:[%s1224_s0 + $0xa8] sm:$0xff] }
  0x10   :  { %v102_v15 = vmul.f32 %v516_v1, %v31_v61  ;;  %v103_v16 = vmul.f32 %v516_v1, %v32_v62  ;;  %v359_v18 = vmax.f32 %v295_v7, 0.0  ;;  %v297_v19 = vadd.f32 %v233_v4, %v169_v8  ;;  %v239_v39 = vld [vmem:[%s1227_s3 + $0x80] sm:$0xff]  ;;  %v240_v44 = vld [vmem:[%s1227_s3 + $0x88] sm:$0xff]  ;;  %v39_v47 = vld [vmem:[%s1224_s0 + $0xb0] sm:$0xff] }
  0x11   :  { %v298_v20 = vadd.f32 %v234_v5, %v170_v9  ;;  %v172_v21 = vadd.f32 %v521_v2, %v101_v11  ;;  %v360_v25 = vmax.f32 %v296_v12, 0.0  ;;  %v299_v26 = vadd.f32 %v235_v10, %v171_v13  ;;  %v40_v48 = vld [vmem:[%s1224_s0 + $0xb8] sm:$0xff]  ;;  %v241_v52 = vld [vmem:[%s1227_s3 + $0x90] sm:$0xff]  ;;  %v243_v58 = vld [vmem:[%s1227_s3 + $0xa0] sm:$0xff] }
  0x12   :  { %v173_v27 = vadd.f32 %v521_v2, %v102_v15  ;;  %v174_v28 = vadd.f32 %v521_v2, %v103_v16  ;;  %423 = vst [vmem:[%s1228_s4 + $0x40] sm:$0xff] %v359_v18  ;;  %v361_v31 = vmax.f32 %v297_v19, 0.0  ;;  %v104_v34 = vmul.f32 %v516_v1, %v33_v17  ;;  %v242_v53 = vld [vmem:[%s1227_s3 + $0x98] sm:$0xff]  ;;  %v244_v62 = vld [vmem:[%s1227_s3 + $0xa8] sm:$0xff]  ;;  %v41_v3 = vld [vmem:[%s1224_s0 + $0xc0] sm:$0xff] }
  0x13   :  { %v362_v32 = vmax.f32 %v298_v20, 0.0  ;;  %v300_v33 = vadd.f32 %v236_v14, %v172_v21  ;;  %424 = vst [vmem:[%s1228_s4 + $0x48] sm:$0xff] %v360_v25  ;;  %v363_v36 = vmax.f32 %v299_v26, 0.0  ;;  %v105_v40 = vmul.f32 %v516_v1, %v34_v24  ;;  %v245_v8 = vld [vmem:[%s1227_s3 + $0xb0] sm:$0xff]  ;;  %v246_v9 = vld [vmem:[%s1227_s3 + $0xb8] sm:$0xff]  ;;  %v42_v10 = vld [vmem:[%s1224_s0 + $0xc8] sm:$0xff] }
  0x14   :  { %v301_v37 = vadd.f32 %v237_v22, %v173_v27  ;;  %v302_v38 = vadd.f32 %v238_v23, %v174_v28  ;;  %425 = vst [vmem:[%s1228_s4 + $0x50] sm:$0xff] %v361_v31  ;;  %v175_v43 = vadd.f32 %v521_v2, %v104_v34  ;;  %v106_v45 = vmul.f32 %v516_v1, %v35_v29  ;;  %v43_v15 = vld [vmem:[%s1224_s0 + $0xd0] sm:$0xff]  ;;  %v44_v16 = vld [vmem:[%s1224_s0 + $0xd8] sm:$0xff]  ;;  %v45_v21 = vld [vmem:[%s1224_s0 + $0xe0] sm:$0xff] }
  0x15   :  { %426 = vst [vmem:[%s1228_s4 + $0x58] sm:$0xff] %v362_v32  ;;  %v364_v42 = vmax.f32 %v300_v33, 0.0  ;;  %v107_v46 = vmul.f32 %v516_v1, %v36_v30  ;;  %427 = vst [vmem:[%s1228_s4 + $0x60] sm:$0xff] %v363_v36  ;;  %v176_v51 = vadd.f32 %v521_v2, %v105_v40  ;;  %v108_v54 = vmul.f32 %v516_v1, %v37_v35  ;;  %v247_v25 = vld [vmem:[%s1227_s3 + $0xc0] sm:$0xff]  ;;  %v46_v27 = vld [vmem:[%s1224_s0 + $0xe8] sm:$0xff] }
  0x16   :  { %v365_v49 = vmax.f32 %v301_v37, 0.0  ;;  %v366_v50 = vmax.f32 %v302_v38, 0.0  ;;  %v303_v55 = vadd.f32 %v239_v39, %v175_v43  ;;  %v177_v56 = vadd.f32 %v521_v2, %v106_v45  ;;  %v248_v30 = vld [vmem:[%s1227_s3 + $0xc8] sm:$0xff]  ;;  %v47_v33 = vld [vmem:[%s1224_s0 + $0xf0] sm:$0xff]  ;;  %v48_v34 = vld [vmem:[%s1224_s0 + $0xf8] sm:$0xff] }
  0x17   :  { %428 = vst [vmem:[%s1228_s4 + $0x68] sm:$0xff] %v364_v42  ;;  %v178_v57 = vadd.f32 %v521_v2, %v107_v46  ;;  %v109_v59 = vmul.f32 %v516_v1, %v38_v41  ;;  %v304_v60 = vadd.f32 %v240_v44, %v176_v51  ;;  %v179_v61 = vadd.f32 %v521_v2, %v108_v54  ;;  %v249_v38 = vld [vmem:[%s1227_s3 + $0xd0] sm:$0xff]  ;;  %v250_v39 = vld [vmem:[%s1227_s3 + $0xd8] sm:$0xff]  ;;  %v251_v44 = vld [vmem:[%s1227_s3 + $0xe0] sm:$0xff] }
  0x18   :  { %429 = vst [vmem:[%s1228_s4 + $0x70] sm:$0xff] %v365_v49  ;;  %430 = vst [vmem:[%s1228_s4 + $0x78] sm:$0xff] %v366_v50  ;;  %v110_v63 = vmul.f32 %v516_v1, %v39_v47  ;;  %v111_v0 = vmul.f32 %v516_v1, %v40_v48  ;;  %v367_v4 = vmax.f32 %v303_v55, 0.0  ;;  %v305_v5 = vadd.f32 %v241_v52, %v177_v56  ;;  %v252_v48 = vld [vmem:[%s1227_s3 + $0xe8] sm:$0xff]  ;;  %v49_v51 = vld [vmem:[%s1224_s0 + $0x100] sm:$0xff] }
  0x19   :  { %v306_v6 = vadd.f32 %v242_v53, %v178_v57  ;;  %v180_v7 = vadd.f32 %v521_v2, %v109_v59  ;;  %v368_v11 = vmax.f32 %v304_v60, 0.0  ;;  %v307_v12 = vadd.f32 %v243_v58, %v179_v61  ;;  %v253_v56 = vld [vmem:[%s1227_s3 + $0xf0] sm:$0xff]  ;;  %v254_v57 = vld [vmem:[%s1227_s3 + $0xf8] sm:$0xff]  ;;  %v50_v58 = vld [vmem:[%s1224_s0 + $0x108] sm:$0xff] }
  0x1a   :  { %v181_v13 = vadd.f32 %v521_v2, %v110_v63  ;;  %v182_v14 = vadd.f32 %v521_v2, %v111_v0  ;;  %431 = vst [vmem:[%s1228_s4 + $0x80] sm:$0xff] %v367_v4  ;;  %v369_v17 = vmax.f32 %v305_v5, 0.0  ;;  %v112_v20 = vmul.f32 %v516_v1, %v41_v3  ;;  %v51_v63 = vld [vmem:[%s1224_s0 + $0x110] sm:$0xff]  ;;  %v52_v0 = vld [vmem:[%s1224_s0 + $0x118] sm:$0xff] }
  0x1b   :  { %v370_v18 = vmax.f32 %v306_v6, 0.0  ;;  %v308_v19 = vadd.f32 %v244_v62, %v180_v7  ;;  %432 = vst [vmem:[%s1228_s4 + $0x88] sm:$0xff] %v368_v11  ;;  %v371_v22 = vmax.f32 %v307_v12, 0.0  ;;  %v113_v26 = vmul.f32 %v516_v1, %v42_v10  ;;  %v53_v7 = vld [vmem:[%s1224_s0 + $0x120] sm:$0xff] }
  0x1c   :  { %v309_v23 = vadd.f32 %v245_v8, %v181_v13  ;;  %v310_v24 = vadd.f32 %v246_v9, %v182_v14  ;;  %433 = vst [vmem:[%s1228_s4 + $0x90] sm:$0xff] %v369_v17  ;;  %v183_v29 = vadd.f32 %v521_v2, %v112_v20  ;;  %v114_v31 = vmul.f32 %v516_v1, %v43_v15  ;;  %v255_v11 = vld [vmem:[%s1227_s3 + $0x100] sm:$0xff]  ;;  %v54_v13 = vld [vmem:[%s1224_s0 + $0x128] sm:$0xff]  ;;  %v56_v20 = vld [vmem:[%s1224_s0 + $0x138] sm:$0xff] }
  0x1d   :  { %434 = vst [vmem:[%s1228_s4 + $0x98] sm:$0xff] %v370_v18  ;;  %v372_v28 = vmax.f32 %v308_v19, 0.0  ;;  %v115_v32 = vmul.f32 %v516_v1, %v44_v16  ;;  %435 = vst [vmem:[%s1228_s4 + $0xa0] sm:$0xff] %v371_v22  ;;  %v184_v37 = vadd.f32 %v521_v2, %v113_v26  ;;  %v116_v40 = vmul.f32 %v516_v1, %v45_v21  ;;  %v256_v16 = vld [vmem:[%s1227_s3 + $0x108] sm:$0xff]  ;;  %v55_v19 = vld [vmem:[%s1224_s0 + $0x130] sm:$0xff] }
  0x1e   :  { %v373_v35 = vmax.f32 %v309_v23, 0.0  ;;  %v374_v36 = vmax.f32 %v310_v24, 0.0  ;;  %v311_v41 = vadd.f32 %v247_v25, %v183_v29  ;;  %v185_v42 = vadd.f32 %v521_v2, %v114_v31  ;;  %v257_v24 = vld [vmem:[%s1227_s3 + $0x110] sm:$0xff]  ;;  %v258_v25 = vld [vmem:[%s1227_s3 + $0x118] sm:$0xff] }
  0x1f   :  { %436 = vst [vmem:[%s1228_s4 + $0xa8] sm:$0xff] %v372_v28  ;;  %v186_v43 = vadd.f32 %v521_v2, %v115_v32  ;;  %v117_v45 = vmul.f32 %v516_v1, %v46_v27  ;;  %v312_v46 = vadd.f32 %v248_v30, %v184_v37  ;;  %v187_v47 = vadd.f32 %v521_v2, %v116_v40  ;;  %v259_v30 = vld [vmem:[%s1227_s3 + $0x120] sm:$0xff] }
  0x20   :  { %437 = vst [vmem:[%s1228_s4 + $0xb0] sm:$0xff] %v373_v35  ;;  %438 = vst [vmem:[%s1228_s4 + $0xb8] sm:$0xff] %v374_v36  ;;  %v118_v49 = vmul.f32 %v516_v1, %v47_v33  ;;  %v119_v50 = vmul.f32 %v516_v1, %v48_v34  ;;  %v375_v52 = vmax.f32 %v311_v41, 0.0  ;;  %v313_v53 = vadd.f32 %v249_v38, %v185_v42  ;;  %v260_v34 = vld [vmem:[%s1227_s3 + $0x128] sm:$0xff]  ;;  %v57_v37 = vld [vmem:[%s1224_s0 + $0x140] sm:$0xff] }
  0x21   :  { %v314_v54 = vadd.f32 %v250_v39, %v186_v43  ;;  %v188_v55 = vadd.f32 %v521_v2, %v117_v45  ;;  %v376_v59 = vmax.f32 %v312_v46, 0.0  ;;  %v315_v60 = vadd.f32 %v251_v44, %v187_v47  ;;  %v261_v42 = vld [vmem:[%s1227_s3 + $0x130] sm:$0xff]  ;;  %v262_v43 = vld [vmem:[%s1227_s3 + $0x138] sm:$0xff]  ;;  %v58_v44 = vld [vmem:[%s1224_s0 + $0x148] sm:$0xff] }
  0x22   :  { %v189_v61 = vadd.f32 %v521_v2, %v118_v49  ;;  %v190_v62 = vadd.f32 %v521_v2, %v119_v50  ;;  %439 = vst [vmem:[%s1228_s4 + $0xc0] sm:$0xff] %v375_v52  ;;  %v377_v3 = vmax.f32 %v313_v53, 0.0  ;;  %v120_v6 = vmul.f32 %v516_v1, %v49_v51  ;;  %v59_v49 = vld [vmem:[%s1224_s0 + $0x150] sm:$0xff]  ;;  %v60_v50 = vld [vmem:[%s1224_s0 + $0x158] sm:$0xff] }
  0x23   :  { %v378_v4 = vmax.f32 %v314_v54, 0.0  ;;  %v316_v5 = vadd.f32 %v252_v48, %v188_v55  ;;  %440 = vst [vmem:[%s1228_s4 + $0xc8] sm:$0xff] %v376_v59  ;;  %v379_v8 = vmax.f32 %v315_v60, 0.0  ;;  %v121_v12 = vmul.f32 %v516_v1, %v50_v58  ;;  %v61_v55 = vld [vmem:[%s1224_s0 + $0x160] sm:$0xff] }
  0x24   :  { %v317_v9 = vadd.f32 %v253_v56, %v189_v61  ;;  %v318_v10 = vadd.f32 %v254_v57, %v190_v62  ;;  %441 = vst [vmem:[%s1228_s4 + $0xd0] sm:$0xff] %v377_v3  ;;  %v191_v15 = vadd.f32 %v521_v2, %v120_v6  ;;  %v122_v17 = vmul.f32 %v516_v1, %v51_v63  ;;  %v263_v59 = vld [vmem:[%s1227_s3 + $0x140] sm:$0xff]  ;;  %v62_v61 = vld [vmem:[%s1224_s0 + $0x168] sm:$0xff]  ;;  %v64_v6 = vld [vmem:[%s1224_s0 + $0x178] sm:$0xff] }
  0x25   :  { %442 = vst [vmem:[%s1228_s4 + $0xd8] sm:$0xff] %v378_v4  ;;  %v380_v14 = vmax.f32 %v316_v5, 0.0  ;;  %v123_v18 = vmul.f32 %v516_v1, %v52_v0  ;;  %443 = vst [vmem:[%s1228_s4 + $0xe0] sm:$0xff] %v379_v8  ;;  %v192_v23 = vadd.f32 %v521_v2, %v121_v12  ;;  %v124_v26 = vmul.f32 %v516_v1, %v53_v7  ;;  %v264_v0 = vld [vmem:[%s1227_s3 + $0x148] sm:$0xff]  ;;  %v63_v5 = vld [vmem:[%s1224_s0 + $0x170] sm:$0xff] }
  0x26   :  { %v381_v21 = vmax.f32 %v317_v9, 0.0  ;;  %v382_v22 = vmax.f32 %v318_v10, 0.0  ;;  %v319_v27 = vadd.f32 %v255_v11, %v191_v15  ;;  %v193_v28 = vadd.f32 %v521_v2, %v122_v17  ;;  %v265_v10 = vld [vmem:[%s1227_s3 + $0x150] sm:$0xff]  ;;  %v266_v11 = vld [vmem:[%s1227_s3 + $0x158] sm:$0xff] }
  0x27   :  { %444 = vst [vmem:[%s1228_s4 + $0xe8] sm:$0xff] %v380_v14  ;;  %v194_v29 = vadd.f32 %v521_v2, %v123_v18  ;;  %v125_v31 = vmul.f32 %v516_v1, %v54_v13  ;;  %v320_v32 = vadd.f32 %v256_v16, %v192_v23  ;;  %v195_v33 = vadd.f32 %v521_v2, %v124_v26  ;;  %v267_v16 = vld [vmem:[%s1227_s3 + $0x160] sm:$0xff] }
  0x28   :  { %445 = vst [vmem:[%s1228_s4 + $0xf0] sm:$0xff] %v381_v21  ;;  %446 = vst [vmem:[%s1228_s4 + $0xf8] sm:$0xff] %v382_v22  ;;  %v126_v35 = vmul.f32 %v516_v1, %v55_v19  ;;  %v127_v36 = vmul.f32 %v516_v1, %v56_v20  ;;  %v383_v38 = vmax.f32 %v319_v27, 0.0  ;;  %v321_v39 = vadd.f32 %v257_v24, %v193_v28  ;;  %v268_v20 = vld [vmem:[%s1227_s3 + $0x168] sm:$0xff]  ;;  %v65_v23 = vld [vmem:[%s1224_s0 + $0x180] sm:$0xff] }
  0x29   :  { %v322_v40 = vadd.f32 %v258_v25, %v194_v29  ;;  %v196_v41 = vadd.f32 %v521_v2, %v125_v31  ;;  %v384_v45 = vmax.f32 %v320_v32, 0.0  ;;  %v323_v46 = vadd.f32 %v259_v30, %v195_v33  ;;  %v269_v28 = vld [vmem:[%s1227_s3 + $0x170] sm:$0xff]  ;;  %v270_v29 = vld [vmem:[%s1227_s3 + $0x178] sm:$0xff]  ;;  %v66_v30 = vld [vmem:[%s1224_s0 + $0x188] sm:$0xff] }
  0x2a   :  { %v197_v47 = vadd.f32 %v521_v2, %v126_v35  ;;  %v198_v48 = vadd.f32 %v521_v2, %v127_v36  ;;  %447 = vst [vmem:[%s1228_s4 + $0x100] sm:$0xff] %v383_v38  ;;  %v385_v51 = vmax.f32 %v321_v39, 0.0  ;;  %v128_v54 = vmul.f32 %v516_v1, %v57_v37  ;;  %v67_v35 = vld [vmem:[%s1224_s0 + $0x190] sm:$0xff]  ;;  %v68_v36 = vld [vmem:[%s1224_s0 + $0x198] sm:$0xff] }
  0x2b   :  { %v386_v52 = vmax.f32 %v322_v40, 0.0  ;;  %v324_v53 = vadd.f32 %v260_v34, %v196_v41  ;;  %448 = vst [vmem:[%s1228_s4 + $0x108] sm:$0xff] %v384_v45  ;;  %v387_v56 = vmax.f32 %v323_v46, 0.0  ;;  %v129_v60 = vmul.f32 %v516_v1, %v58_v44  ;;  %v69_v41 = vld [vmem:[%s1224_s0 + $0x1a0] sm:$0xff] }
  0x2c   :  { %v325_v57 = vadd.f32 %v261_v42, %v197_v47  ;;  %v326_v58 = vadd.f32 %v262_v43, %v198_v48  ;;  %449 = vst [vmem:[%s1228_s4 + $0x110] sm:$0xff] %v385_v51  ;;  %v199_v63 = vadd.f32 %v521_v2, %v128_v54  ;;  %v130_v3 = vmul.f32 %v516_v1, %v59_v49  ;;  %v271_v45 = vld [vmem:[%s1227_s3 + $0x180] sm:$0xff]  ;;  %v70_v47 = vld [vmem:[%s1224_s0 + $0x1a8] sm:$0xff]  ;;  %v72_v54 = vld [vmem:[%s1224_s0 + $0x1b8] sm:$0xff] }
  0x2d   :  { %450 = vst [vmem:[%s1228_s4 + $0x118] sm:$0xff] %v386_v52  ;;  %v388_v62 = vmax.f32 %v324_v53, 0.0  ;;  %v131_v4 = vmul.f32 %v516_v1, %v60_v50  ;;  %451 = vst [vmem:[%s1228_s4 + $0x120] sm:$0xff] %v387_v56  ;;  %v200_v9 = vadd.f32 %v521_v2, %v129_v60  ;;  %v132_v12 = vmul.f32 %v516_v1, %v61_v55  ;;  %v272_v50 = vld [vmem:[%s1227_s3 + $0x188] sm:$0xff]  ;;  %v71_v53 = vld [vmem:[%s1224_s0 + $0x1b0] sm:$0xff] }
  0x2e   :  { %v389_v7 = vmax.f32 %v325_v57, 0.0  ;;  %v390_v8 = vmax.f32 %v326_v58, 0.0  ;;  %v327_v13 = vadd.f32 %v263_v59, %v199_v63  ;;  %v201_v14 = vadd.f32 %v521_v2, %v130_v3  ;;  %v273_v58 = vld [vmem:[%s1227_s3 + $0x190] sm:$0xff]  ;;  %v274_v59 = vld [vmem:[%s1227_s3 + $0x198] sm:$0xff] }
  0x2f   :  { %452 = vst [vmem:[%s1228_s4 + $0x128] sm:$0xff] %v388_v62  ;;  %v202_v15 = vadd.f32 %v521_v2, %v131_v4  ;;  %v133_v17 = vmul.f32 %v516_v1, %v62_v61  ;;  %v328_v18 = vadd.f32 %v264_v0, %v200_v9  ;;  %v203_v19 = vadd.f32 %v521_v2, %v132_v12  ;;  %v275_v0 = vld [vmem:[%s1227_s3 + $0x1a0] sm:$0xff] }
  0x30   :  { %453 = vst [vmem:[%s1228_s4 + $0x130] sm:$0xff] %v389_v7  ;;  %454 = vst [vmem:[%s1228_s4 + $0x138] sm:$0xff] %v390_v8  ;;  %v134_v21 = vmul.f32 %v516_v1, %v63_v5  ;;  %v135_v22 = vmul.f32 %v516_v1, %v64_v6  ;;  %v391_v24 = vmax.f32 %v327_v13, 0.0  ;;  %v329_v25 = vadd.f32 %v265_v10, %v201_v14  ;;  %v276_v6 = vld [vmem:[%s1227_s3 + $0x1a8] sm:$0xff]  ;;  %v73_v9 = vld [vmem:[%s1224_s0 + $0x1c0] sm:$0xff] }
  0x31   :  { %v330_v26 = vadd.f32 %v266_v11, %v202_v15  ;;  %v204_v27 = vadd.f32 %v521_v2, %v133_v17  ;;  %v392_v31 = vmax.f32 %v328_v18, 0.0  ;;  %v331_v32 = vadd.f32 %v267_v16, %v203_v19  ;;  %v277_v14 = vld [vmem:[%s1227_s3 + $0x1b0] sm:$0xff]  ;;  %v278_v15 = vld [vmem:[%s1227_s3 + $0x1b8] sm:$0xff]  ;;  %v74_v16 = vld [vmem:[%s1224_s0 + $0x1c8] sm:$0xff] }
  0x32   :  { %v205_v33 = vadd.f32 %v521_v2, %v134_v21  ;;  %v206_v34 = vadd.f32 %v521_v2, %v135_v22  ;;  %455 = vst [vmem:[%s1228_s4 + $0x140] sm:$0xff] %v391_v24  ;;  %v393_v37 = vmax.f32 %v329_v25, 0.0  ;;  %v136_v40 = vmul.f32 %v516_v1, %v65_v23  ;;  %v75_v21 = vld [vmem:[%s1224_s0 + $0x1d0] sm:$0xff]  ;;  %v76_v22 = vld [vmem:[%s1224_s0 + $0x1d8] sm:$0xff] }
  0x33   :  { %v394_v38 = vmax.f32 %v330_v26, 0.0  ;;  %v332_v39 = vadd.f32 %v268_v20, %v204_v27  ;;  %456 = vst [vmem:[%s1228_s4 + $0x148] sm:$0xff] %v392_v31  ;;  %v395_v42 = vmax.f32 %v331_v32, 0.0  ;;  %v137_v46 = vmul.f32 %v516_v1, %v66_v30  ;;  %v77_v27 = vld [vmem:[%s1224_s0 + $0x1e0] sm:$0xff] }
  0x34   :  { %v333_v43 = vadd.f32 %v269_v28, %v205_v33  ;;  %v334_v44 = vadd.f32 %v270_v29, %v206_v34  ;;  %457 = vst [vmem:[%s1228_s4 + $0x150] sm:$0xff] %v393_v37  ;;  %v207_v49 = vadd.f32 %v521_v2, %v136_v40  ;;  %v138_v51 = vmul.f32 %v516_v1, %v67_v35  ;;  %v279_v31 = vld [vmem:[%s1227_s3 + $0x1c0] sm:$0xff]  ;;  %v78_v33 = vld [vmem:[%s1224_s0 + $0x1e8] sm:$0xff]  ;;  %v80_v40 = vld [vmem:[%s1224_s0 + $0x1f8] sm:$0xff] }
  0x35   :  { %458 = vst [vmem:[%s1228_s4 + $0x158] sm:$0xff] %v394_v38  ;;  %v396_v48 = vmax.f32 %v332_v39, 0.0  ;;  %v139_v52 = vmul.f32 %v516_v1, %v68_v36  ;;  %459 = vst [vmem:[%s1228_s4 + $0x160] sm:$0xff] %v395_v42  ;;  %v208_v57 = vadd.f32 %v521_v2, %v137_v46  ;;  %v140_v60 = vmul.f32 %v516_v1, %v69_v41  ;;  %v280_v36 = vld [vmem:[%s1227_s3 + $0x1c8] sm:$0xff]  ;;  %v79_v39 = vld [vmem:[%s1224_s0 + $0x1f0] sm:$0xff] }
  0x36   :  { %v397_v55 = vmax.f32 %v333_v43, 0.0  ;;  %v398_v56 = vmax.f32 %v334_v44, 0.0  ;;  %v335_v61 = vadd.f32 %v271_v45, %v207_v49  ;;  %v209_v62 = vadd.f32 %v521_v2, %v138_v51  ;;  %v281_v44 = vld [vmem:[%s1227_s3 + $0x1d0] sm:$0xff]  ;;  %v282_v45 = vld [vmem:[%s1227_s3 + $0x1d8] sm:$0xff] }
  0x37   :  { %460 = vst [vmem:[%s1228_s4 + $0x168] sm:$0xff] %v396_v48  ;;  %v210_v63 = vadd.f32 %v521_v2, %v139_v52  ;;  %v141_v3 = vmul.f32 %v516_v1, %v70_v47  ;;  %v336_v4 = vadd.f32 %v272_v50, %v208_v57  ;;  %v211_v5 = vadd.f32 %v521_v2, %v140_v60  ;;  %v283_v50 = vld [vmem:[%s1227_s3 + $0x1e0] sm:$0xff] }
  0x38   :  { %461 = vst [vmem:[%s1228_s4 + $0x170] sm:$0xff] %v397_v55  ;;  %462 = vst [vmem:[%s1228_s4 + $0x178] sm:$0xff] %v398_v56  ;;  %v142_v7 = vmul.f32 %v516_v1, %v71_v53  ;;  %v143_v8 = vmul.f32 %v516_v1, %v72_v54  ;;  %v399_v10 = vmax.f32 %v335_v61, 0.0  ;;  %v337_v11 = vadd.f32 %v273_v58, %v209_v62  ;;  %v284_v54 = vld [vmem:[%s1227_s3 + $0x1e8] sm:$0xff]  ;;  %v285_v61 = vld [vmem:[%s1227_s3 + $0x1f0] sm:$0xff] }
  0x39   :  { %v338_v12 = vadd.f32 %v274_v59, %v210_v63  ;;  %v212_v13 = vadd.f32 %v521_v2, %v141_v3  ;;  %v400_v17 = vmax.f32 %v336_v4, 0.0  ;;  %v339_v18 = vadd.f32 %v275_v0, %v211_v5  ;;  %v286_v62 = vld [vmem:[%s1227_s3 + $0x1f8] sm:$0xff] }
  0x3a   :  { %v213_v19 = vadd.f32 %v521_v2, %v142_v7  ;;  %v214_v20 = vadd.f32 %v521_v2, %v143_v8  ;;  %463 = vst [vmem:[%s1228_s4 + $0x180] sm:$0xff] %v399_v10  ;;  %v401_v23 = vmax.f32 %v337_v11, 0.0  ;;  %v144_v26 = vmul.f32 %v516_v1, %v73_v9 }
  0x3b   :  { %v402_v24 = vmax.f32 %v338_v12, 0.0  ;;  %v340_v25 = vadd.f32 %v276_v6, %v212_v13  ;;  %464 = vst [vmem:[%s1228_s4 + $0x188] sm:$0xff] %v400_v17  ;;  %v403_v28 = vmax.f32 %v339_v18, 0.0  ;;  %v145_v32 = vmul.f32 %v516_v1, %v74_v16 }
  0x3c   :  { %v341_v29 = vadd.f32 %v277_v14, %v213_v19  ;;  %v342_v30 = vadd.f32 %v278_v15, %v214_v20  ;;  %465 = vst [vmem:[%s1228_s4 + $0x190] sm:$0xff] %v401_v23  ;;  %v215_v35 = vadd.f32 %v521_v2, %v144_v26  ;;  %v146_v37 = vmul.f32 %v516_v1, %v75_v21 }
  0x3d   :  { %466 = vst [vmem:[%s1228_s4 + $0x198] sm:$0xff] %v402_v24  ;;  %v404_v34 = vmax.f32 %v340_v25, 0.0  ;;  %v147_v38 = vmul.f32 %v516_v1, %v76_v22  ;;  %467 = vst [vmem:[%s1228_s4 + $0x1a0] sm:$0xff] %v403_v28  ;;  %v216_v43 = vadd.f32 %v521_v2, %v145_v32  ;;  %v148_v46 = vmul.f32 %v516_v1, %v77_v27 }
  0x3e   :  { %v405_v41 = vmax.f32 %v341_v29, 0.0  ;;  %v406_v42 = vmax.f32 %v342_v30, 0.0  ;;  %v343_v47 = vadd.f32 %v279_v31, %v215_v35  ;;  %v217_v48 = vadd.f32 %v521_v2, %v146_v37 }
  0x3f   :  { %468 = vst [vmem:[%s1228_s4 + $0x1a8] sm:$0xff] %v404_v34  ;;  %v218_v49 = vadd.f32 %v521_v2, %v147_v38  ;;  %v149_v51 = vmul.f32 %v516_v1, %v78_v33  ;;  %v344_v52 = vadd.f32 %v280_v36, %v216_v43  ;;  %v219_v53 = vadd.f32 %v521_v2, %v148_v46 }
  0x40   :  { %469 = vst [vmem:[%s1228_s4 + $0x1b0] sm:$0xff] %v405_v41  ;;  %470 = vst [vmem:[%s1228_s4 + $0x1b8] sm:$0xff] %v406_v42  ;;  %v150_v55 = vmul.f32 %v516_v1, %v79_v39  ;;  %v151_v56 = vmul.f32 %v516_v1, %v80_v40  ;;  %v407_v57 = vmax.f32 %v343_v47, 0.0  ;;  %v345_v58 = vadd.f32 %v281_v44, %v217_v48 }
  0x41   :  { %v346_v59 = vadd.f32 %v282_v45, %v218_v49  ;;  %v220_v60 = vadd.f32 %v521_v2, %v149_v51  ;;  %v408_v63 = vmax.f32 %v344_v52, 0.0  ;;  %v347_v0 = vadd.f32 %v283_v50, %v219_v53 }
  0x42   :  { %v221_v3 = vadd.f32 %v521_v2, %v150_v55  ;;  %v222_v4 = vadd.f32 %v521_v2, %v151_v56  ;;  %471 = vst [vmem:[%s1228_s4 + $0x1c0] sm:$0xff] %v407_v57  ;;  %v409_v1 = vmax.f32 %v345_v58, 0.0 }
  0x43   :  { %v410_v5 = vmax.f32 %v346_v59, 0.0  ;;  %v348_v6 = vadd.f32 %v284_v54, %v220_v60  ;;  %472 = vst [vmem:[%s1228_s4 + $0x1c8] sm:$0xff] %v408_v63  ;;  %v411_v7 = vmax.f32 %v347_v0, 0.0 }
  0x44   :  { %v349_v8 = vadd.f32 %v285_v61, %v221_v3  ;;  %v350_v9 = vadd.f32 %v286_v62, %v222_v4  ;;  %473 = vst [vmem:[%s1228_s4 + $0x1d0] sm:$0xff] %v409_v1 }
  0x45   :  { %474 = vst [vmem:[%s1228_s4 + $0x1d8] sm:$0xff] %v410_v5  ;;  %v412_v2 = vmax.f32 %v348_v6, 0.0  ;;  %475 = vst [vmem:[%s1228_s4 + $0x1e0] sm:$0xff] %v411_v7 }
  0x46   :  { %v413_v10 = vmax.f32 %v349_v8, 0.0  ;;  %v414_v11 = vmax.f32 %v350_v9, 0.0 }
  0x47   :  { %476 = vst [vmem:[%s1228_s4 + $0x1e8] sm:$0xff] %v412_v2 }
  0x48   :  { %477 = vst [vmem:[%s1228_s4 + $0x1f0] sm:$0xff] %v413_v10  ;;  %478 = vst [vmem:[%s1228_s4 + $0x1f8] sm:$0xff] %v414_v11 }

// kernel: residual_block_forward.3
= control target key start
LH: loop header
LB: loop body
LE: loop exit
PB: predicated region body
PF: predicated region fallthrough
CT: control target
= control target key end

     0   :  { %s4209_s12 = smov 0   ;;  %s5315_s0 = inlined_call_operand.vmem [shape: f32[2,16,16,128], index: 0, kind: input, shape index: {}]   ;;  %s5316_s1 = inlined_call_operand.vmem [shape: bf16[3,3,128,128], index: 1, kind: input, shape index: {}]   ;;  %s5317_s2 = inlined_call_operand.vmem [shape: f32[2,16,16,128], index: 2, kind: output, shape index: {0}]   ;;  %s5318_s3 = inlined_call_operand.vmem [shape: f32[2,2,128], index: 3, kind: output, shape index: {1}]  }
   0x1 LB: > { %s3219_s13 = sadd.s32 4294967295, %s4185_s12   ;;  %p3223_p0 = scmp.ge.s32.totalorder %s4185_s12, 1  ;;  %s4185_s12 = sphi %s4209_s12, %s14_s12  }
   0x2   : > { %p140_p1 = scmp.lt.s32.totalorder %s4185_s12, 3 }
   0x4   : > { %p141_p2 = pnand %p3223_p0, %p140_p1 }
   0x6   : > { %144 = sbr.rel (%p141_p2) target bundleno = 549 (0x225), region = 28 }
   0xb   : > { %v4106_v0 = vld [vmem:[%s5316_s1 + $0x78] sm:$0xff]   ;;  %v4223_v1 = vld [vmem:[%s5316_s1 + $0x70] sm:$0xff]   ;;  %v4187_v2 = vmov 0.0   ;;  %p168_p3 = scmp.lt.s32.totalorder %s3219_s13, 1  ;;  %v4108_v3 = vld [vmem:[%s5316_s1 + $0x68] sm:$0xff]   ;;  %vm3130_vm0 = vcmask 1040384  }
   0xc   : > { %215 = vst [vmem:[#allocation2] sm:$0xff] %v4187_v2  ;;  %216 = vst [vmem:[#allocation2 + $0x8] sm:$0xff] %v4187_v2  ;;  %3649 = vmatprep.subr.bf16.mxu0 %v4106_v0  ;;  %4081 = vmatprep.subr.bf16.mxu1 %v4106_v0  ;;  %v4109_v4 = vld [vmem:[%s5316_s1 + $0x60] sm:$0xff]   ;;  %v4110_v15 = vld [vmem:[%s5316_s1 + $0x58] sm:$0xff]  }
   0xd   : > { %217 = vst [vmem:[#allocation2 + $0x10] sm:$0x3] %v4187_v2  ;;  %218 = vst [vmem:[#allocation2 + $0x18] sm:$0xff] %v4187_v2  ;;  %3650 = vmatpush3.bf16.msra.mxu0 %v4106_v0  ;;  %4089 = vmatpush3.bf16.msra.mxu1 %v4106_v0  ;;  %s5400_s13 = smov (!%p168_p3, %s3219_s13), 1  ;;  %v4111_v16 = vld [vmem:[%s5316_s1 + $0x50] sm:$0xff]   ;;  %v4112_v25 = vld [vmem:[%s5316_s1 + $0x48] sm:$0xff]  }
   0xe   : > { %219 = vst [vmem:[#allocation2 + $0x20] sm:$0xff] %v4187_v2  ;;  %220 = vst [vmem:[#allocation2 + $0x28] sm:$0x3] %v4187_v2  ;;  %3651 = vmatprep.subr.bf16.mxu0 %v4223_v1  ;;  %4082 = vmatprep.subr.bf16.mxu1 %v4223_v1  ;;  %s3431_s20 = sshll.u32 %s5400_s13, 8  ;;  %v4113_v34 = vld [vmem:[%s5316_s1 + $0x40] sm:$0xff]   ;;  %v4114_v35 = vld [vmem:[%s5316_s1 + $0x38] sm:$0xff]  }
   0xf   : > { %221 = vst [vmem:[#allocation2 + $0x30] sm:$0xff] %v4187_v2  ;;  %222 = vst [vmem:[#allocation2 + $0x38] sm:$0xff] %v4187_v2  ;;  %s4242_s23 = scalar_lea.vmem %s5315_s0, %s3431_s20  ;;  %v4115_v36 = vld [vmem:[%s5316_s1 + $0xb8] sm:$0xff]   ;;  %v4116_v47 = vld [vmem:[%s5316_s1 + $0x30] sm:$0xff]   ;;  %s5190_s22 = scalar_lea.vmem %s5317_s2, %s3431_s20 }
  0x10   : > { %223 = vst [vmem:[#allocation2 + $0x40] sm:$0x3] %v4187_v2  ;;  %224 = vst [vmem:[#allocation2 + $0x48] sm:$0xff] %v4187_v2  ;;  %v197_v7 = vld [vmem:[%s4242_s23 + $0x70] sm:$0xff]  ;;  %v198_v9 = vld [vmem:[%s4242_s23 + $0x78] sm:$0xff]  ;;  %s3228_s20 = sshll.u32 %s5400_s13, 1 }
  0x11   : > { %225 = vst [vmem:[#allocation2 + $0x50] sm:$0xff] %v4187_v2  ;;  %226 = vst [vmem:[#allocation2 + $0x58] sm:$0x3] %v4187_v2  ;;  %3652 = vmatpush3.bf16.msra.mxu0 %v4223_v1  ;;  %4090 = vmatpush3.bf16.msra.mxu1 %v4223_v1  ;;  %v4252_v10 = vld [vmem:[%s4242_s23] sm:$0xff]  ;;  %v4255_v11 = vld [vmem:[%s4242_s23 + $0x8] sm:$0xff]  ;;  %v4257_v12 = vpack.c.bf16 %v198_v9, %v197_v7  ;;  %s181_s26 = scalar_lea.vmem %s5318_s3, %s3228_s20 }
  0x12   : > { %227 = vst [vmem:[#allocation2 + $0x60] sm:$0xff] %v4187_v2  ;;  %228 = vst [vmem:[#allocation2 + $0x68] sm:$0xff] %v4187_v2  ;;  %3653 = vmatprep.subr.bf16.mxu0 %v4108_v3  ;;  %4083 = vmatprep.subr.bf16.mxu1 %v4108_v3  ;;  %v4262_v13 = vld [vmem:[%s4242_s23 + $0x80] sm:$0xff]  ;;  %v4265_v14 = vld [vmem:[%s4242_s23 + $0x88] sm:$0xff]  ;;  %v4373_v43 = vpack.c.bf16 %v4255_v11, %v4252_v10 }
  0x13   : > { %229 = vst [vmem:[#allocation2 + $0x70] sm:$0x3] %v4187_v2  ;;  %230 = vst [vmem:[#allocation2 + $0x78] sm:$0xff] %v4187_v2  ;;  %v366_v5 = vld [vmem:[#allocation2 + $0x1] sm:$0xff]  ;;  %3681 = vmatprep.mubr.bf16.mxu1 %v4257_v12  ;;  %v4277_v17 = vld [vmem:[%s4242_s23 + $0x10] sm:$0xff]  ;;  %v4377_v44 = vpack.c.bf16 %v4265_v14, %v4262_v13 }
  0x14   : > { %231 = vst [vmem:[#allocation2 + $0x80] sm:$0xff] %v4187_v2  ;;  %232 = vst [vmem:[#allocation2 + $0x88] sm:$0x3] %v4187_v2  ;;  %v367_v6 = vld [vmem:[#allocation2 + $0x9] sm:$0xff]  ;;  %v4280_v18 = vld [vmem:[%s4242_s23 + $0x18] sm:$0xff] }
  0x15   : > { %233 = vst [vmem:[#allocation2 + $0x90] sm:$0xff] %v4187_v2  ;;  %234 = vst [vmem:[#allocation2 + $0x98] sm:$0xff] %v4187_v2  ;;  %v398_v8 = vpack.c.bf16 %v367_v6, %v366_v5  ;;  %3654 = vmatpush3.bf16.msra.mxu0 %v4108_v3  ;;  %4091 = vmatpush3.bf16.msra.mxu1 %v4108_v3  ;;  %v4284_v19 = vld [vmem:[%s4242_s23 + $0x90] sm:$0xff]  ;;  %v4287_v20 = vld [vmem:[%s4242_s23 + $0x98] sm:$0xff]  ;;  %v4394_v49 = vpack.c.bf16 %v4280_v18, %v4277_v17 }
  0x16   : > { %235 = vst [vmem:[#allocation2 + $0xa0] sm:$0x3] %v4187_v2  ;;  %236 = vst [vmem:[#allocation2 + $0xa8] sm:$0xff] %v4187_v2  ;;  %3655 = vmatprep.subr.bf16.mxu0 %v4109_v4  ;;  %4084 = vmatprep.subr.bf16.mxu1 %v4109_v4  ;;  %v4293_v21 = vld [vmem:[%s4242_s23 + $0x20] sm:$0xff]  ;;  %v4296_v22 = vld [vmem:[%s4242_s23 + $0x28] sm:$0xff]  ;;  %v4398_v50 = vpack.c.bf16 %v4287_v20, %v4284_v19 }
  0x17   : > { %237 = vst [vmem:[#allocation2 + $0xb0] sm:$0xff] %v4187_v2  ;;  %238 = vst [vmem:[#allocation2 + $0xb8] sm:$0x3] %v4187_v2  ;;  %3665 = vmatprep.mubr.bf16.mxu0 %v398_v8  ;;  %v4299_v23 = vld [vmem:[%s4242_s23 + $0xa0] sm:$0xff]  ;;  %v4304_v24 = vld [vmem:[%s4242_s23 + $0xa8] sm:$0xff]  ;;  %v4412_v53 = vpack.c.bf16 %v4296_v22, %v4293_v21 }
  0x18   : > { %239 = vst [vmem:[#allocation2 + $0xc0] sm:$0xff] %v4187_v2  ;;  %240 = vst [vmem:[#allocation2 + $0xc8] sm:$0xff] %v4187_v2  ;;  %v4312_v26 = vld [vmem:[%s4242_s23 + $0x30] sm:$0xff]  ;;  %v4315_v27 = vld [vmem:[%s4242_s23 + $0x38] sm:$0xff]  ;;  %v4416_v54 = vpack.c.bf16 %v4304_v24, %v4299_v23 }
  0x19   : > { %241 = vst [vmem:[#allocation2 + $0xd0] sm:$0x3] %v4187_v2  ;;  %242 = vst [vmem:[#allocation2 + $0xd8] sm:$0xff] %v4187_v2  ;;  %3656 = vmatpush3.bf16.msra.mxu0 %v4109_v4  ;;  %4092 = vmatpush3.bf16.msra.mxu1 %v4109_v4  ;;  %v4320_v28 = vld [vmem:[%s4242_s23 + $0xb0] sm:$0xff]  ;;  %v4323_v29 = vld [vmem:[%s4242_s23 + $0xb8] sm:$0xff]  ;;  %v4426_v57 = vpack.c.bf16 %v4315_v27, %v4312_v26 }
  0x1a   : > { %243 = vst [vmem:[#allocation2 + $0xe0] sm:$0xff] %v4187_v2  ;;  %244 = vst [vmem:[#allocation2 + $0xe8] sm:$0x3] %v4187_v2  ;;  %3657 = vmatprep.subr.bf16.mxu0 %v4110_v15  ;;  %4085 = vmatprep.subr.bf16.mxu1 %v4110_v15  ;;  %v4326_v30 = vld [vmem:[%s4242_s23 + $0x40] sm:$0xff]  ;;  %v4331_v31 = vld [vmem:[%s4242_s23 + $0x48] sm:$0xff]  ;;  %v4430_v58 = vpack.c.bf16 %v4323_v29, %v4320_v28 }
  0x1b   : > { %245 = vst [vmem:[#allocation2 + $0xf0] sm:$0xff] %v4187_v2  ;;  %246 = vst [vmem:[#allocation2 + $0xf8] sm:$0xff] %v4187_v2  ;;  %v4335_v32 = vld [vmem:[%s4242_s23 + $0xc0] sm:$0xff]  ;;  %v4338_v33 = vld [vmem:[%s4242_s23 + $0xc8] sm:$0xff]  ;;  %v4444_v61 = vpack.c.bf16 %v4331_v31, %v4326_v30 }
  0x1c   : > { %247 = vst [vmem:[#allocation2 + $0x100] sm:$0x3] %v4187_v2  ;;  %248 = vst [vmem:[#allocation2 + $0x108] sm:$0xff] %v4187_v2  ;;  %v4353_v37 = vld [vmem:[%s4242_s23 + $0x50] sm:$0xff]  ;;  %v4356_v38 = vld [vmem:[%s4242_s23 + $0x58] sm:$0xff]  ;;  %v4448_v62 = vpack.c.bf16 %v4338_v33, %v4335_v32 }
  0x1d   : > { %249 = vst [vmem:[#allocation2 + $0x110] sm:$0xff] %v4187_v2  ;;  %250 = vst [vmem:[#allocation2 + $0x118] sm:$0x3] %v4187_v2  ;;  %3658 = vmatpush3.bf16.msra.mxu0 %v4110_v15  ;;  %4093 = vmatpush3.bf16.msra.mxu1 %v4110_v15  ;;  %v4359_v39 = vld [vmem:[%s4242_s23 + $0xd0] sm:$0xff]  ;;  %v210_v40 = vld [vmem:[%s4242_s23 + $0xd8] sm:$0xff]  ;;  %v4458_v1 = vpack.c.bf16 %v4356_v38, %v4353_v37 }
  0x1e   : > { %251 = vst [vmem:[#allocation2 + $0x120] sm:$0xff] %v4187_v2  ;;  %252 = vst [vmem:[#allocation2 + $0x128] sm:$0xff] %v4187_v2  ;;  %3659 = vmatprep.subr.bf16.mxu0 %v4111_v16  ;;  %4086 = vmatprep.subr.bf16.mxu1 %v4111_v16  ;;  %v4366_v41 = vld [vmem:[%s4242_s23 + $0x60] sm:$0xff]  ;;  %v4369_v42 = vld [vmem:[%s4242_s23 + $0x68] sm:$0xff] }
  0x1f   : > { %253 = vst [vmem:[#allocation2 + $0x130] sm:$0x3] %v4187_v2  ;;  %254 = vst [vmem:[#allocation2 + $0x138] sm:$0xff] %v4187_v2  ;;  %v4382_v45 = vld [vmem:[%s4242_s23 + $0xe0] sm:$0xff]  ;;  %v212_v46 = vld [vmem:[%s4242_s23 + $0xe8] sm:$0xff]  ;;  %v4475_v5 = vpack.c.bf16 %v4369_v42, %v4366_v41 }
  0x20   : > { %255 = vst [vmem:[#allocation2 + $0x140] sm:$0xff] %v4187_v2  ;;  %256 = vst [vmem:[#allocation2 + $0x148] sm:$0x3] %v4187_v2  ;;  %v4117_v48 = vld [vmem:[%s5316_s1 + $0xb0] sm:$0xff]   ;;  %v4118_v51 = vld [vmem:[%s5316_s1 + $0x28] sm:$0xff]   ;;  %v4478_v6 = vpack.c.bf16 %v212_v46, %v4382_v45 }
  0x21   : > { %257 = vst [vmem:[#allocation2 + $0x150] sm:$0xff] %v4187_v2  ;;  %258 = vst [vmem:[#allocation2 + $0x158] sm:$0xff] %v4187_v2  ;;  %3660 = vmatpush3.bf16.msra.mxu0 %v4111_v16  ;;  %4094 = vmatpush3.bf16.msra.mxu1 %v4111_v16  ;;  %v4119_v52 = vld [vmem:[%s5316_s1 + $0xa8] sm:$0xff]   ;;  %v4120_v55 = vld [vmem:[%s5316_s1 + $0x20] sm:$0xff]  }
  0x22   : > { %259 = vst [vmem:[#allocation2 + $0x160] sm:$0x3] %v4187_v2  ;;  %260 = vst [vmem:[#allocation2 + $0x168] sm:$0xff] %v4187_v2  ;;  %3661 = vmatprep.subr.bf16.mxu0 %v4112_v25  ;;  %4087 = vmatprep.subr.bf16.mxu1 %v4112_v25  ;;  %v4121_v56 = vld [vmem:[%s5316_s1 + $0xa0] sm:$0xff]   ;;  %v4122_v59 = vld [vmem:[%s5316_s1 + $0x18] sm:$0xff]  }
  0x23   : > { %261 = vst [vmem:[#allocation2 + $0x170] sm:$0xff] %v4187_v2  ;;  %262 = vst [vmem:[#allocation2 + $0x178] sm:$0x3] %v4187_v2  ;;  %v4123_v60 = vld [vmem:[%s5316_s1 + $0x98] sm:$0xff]   ;;  %v4124_v63 = vld [vmem:[%s5316_s1 + $0x10] sm:$0xff]  }
  0x24   : > { %263 = vst [vmem:[#allocation2 + $0x180] sm:$0xff] %v4187_v2  ;;  %264 = vst [vmem:[#allocation2 + $0x188] sm:$0xff] %v4187_v2  ;;  %v4125_v0 = vld [vmem:[%s5316_s1 + $0x90] sm:$0xff]   ;;  %v4126_v3 = vld [vmem:[%s5316_s1 + $0x8] sm:$0xff]  }
  0x25   : > { %265 = vst [vmem:[#allocation2 + $0x190] sm:$0x3] %v4187_v2  ;;  %266 = vst [vmem:[#allocation2 + $0x198] sm:$0xff] %v4187_v2  ;;  %3662 = vmatpush3.bf16.msra.mxu0 %v4112_v25  ;;  %4095 = vmatpush3.bf16.msra.mxu1 %v4112_v25  ;;  %v4127_v4 = vld [vmem:[%s5316_s1 + $0x88] sm:$0xff]  }
  0x26   : > { %267 = vst [vmem:[#allocation2 + $0x1a0] sm:$0xff] %v4187_v2  ;;  %268 = vst [vmem:[#allocation2 + $0x1a8] sm:$0x3] %v4187_v2  ;;  %3663 = vmatprep.subr.bf16.mxu0 %v4113_v34  ;;  %4088 = vmatprep.subr.bf16.mxu1 %v4113_v34  ;;  %v4461_v2 = vpack.c.bf16 %v210_v40, %v4359_v39  ;;  %v850_v8 = vld [vmem:[#allocation2 + $0xa] sm:$0xff] }
  0x27   : > { %284 = vst [vmem:[#allocation2 + $0xc1] sm:$0xff] %v197_v7  ;;  %285 = vst [vmem:[#allocation2 + $0xc9] sm:$0xff] %v198_v9  ;;  %v849_v7 = vld [vmem:[#allocation2 + $0x2] sm:$0xff] }
  0x28   : > { %270 = vst [vmem:[#allocation2 + $0x19] sm:$0xff] %v4252_v10  ;;  %271 = vst [vmem:[#allocation2 + $0x21] sm:$0xff] %v4255_v11  ;;  %v4128_v9 = vld [vmem:[%s5316_s1] sm:$0xff]   ;;  %v881_v11 = vpack.c.bf16 %v850_v8, %v849_v7 }
  0x29   : > { %286 = vst [vmem:[#allocation2 + $0xd9] sm:$0xff] %v4262_v13  ;;  %287 = vst [vmem:[#allocation2 + $0xe1] sm:$0xff] %v4265_v14  ;;  %3664 = vmatpush3.bf16.msra.mxu0 %v4113_v34  ;;  %4096 = vmatpush3.bf16.msra.mxu1 %v4113_v34  ;;  %v4129_v10 = vld [vmem:[%s5316_s1 + $0x80] sm:$0xff]  }
  0x2a   : > { %272 = vst [vmem:[#allocation2 + $0x31] sm:$0xff] %v4277_v17  ;;  %273 = vst [vmem:[#allocation2 + $0x39] sm:$0xff] %v4280_v18  ;;  %3697 = vmatprep.subr.bf16.mxu1 %v4114_v35  ;;  %3745 = vmatprep.subr.bf16.mxu0 %v4115_v36  ;;  %v4130_v17 = vld [vmem:[%s5316_s1 + $0xf8] sm:$0xff]  }
  0x2b   : > { %288 = vst [vmem:[#allocation2 + $0xf1] sm:$0xff] %v4284_v19  ;;  %289 = vst [vmem:[#allocation2 + $0xf9] sm:$0xff] %v4287_v20  ;;  %v4131_v18 = vld [vmem:[%s5316_s1 + $0x138] sm:$0xff]  }
  0x2c   : > { %274 = vst [vmem:[#allocation2 + $0x49] sm:$0xff] %v4293_v21  ;;  %275 = vst [vmem:[#allocation2 + $0x51] sm:$0xff] %v4296_v22  ;;  %3666 = vmatmul.mubr.bf16.vlgmr.msra.gmra.mxu0 %v4373_v43  ;;  %3682 = vmatmul.mubr.bf16.vlgmr.msra.gmra.mxu1 %v4377_v44  ;;  %v4188_v22 = vmov 0.0|0.0  }
  0x2d   : > { %290 = vst [vmem:[#allocation2 + $0x109] sm:$0xff] %v4299_v23  ;;  %291 = vst [vmem:[#allocation2 + $0x111] sm:$0xff] %v4304_v24  ;;  %3698 = vmatpush3.bf16.msra.mxu1 %v4114_v35  ;;  %3746 = vmatpush3.bf16.msra.mxu0 %v4115_v36 }
  0x2e   : > { %276 = vst [vmem:[#allocation2 + $0x61] sm:$0xff] %v4312_v26  ;;  %277 = vst [vmem:[#allocation2 + $0x69] sm:$0xff] %v4315_v27  ;;  %3699 = vmatprep.subr.bf16.mxu1 %v4116_v47  ;;  %3747 = vmatprep.subr.bf16.mxu0 %v4117_v48 }
  0x2f   : > { %292 = vst [vmem:[#allocation2 + $0x121] sm:$0xff] %v4320_v28  ;;  %293 = vst [vmem:[#allocation2 + $0x129] sm:$0xff] %v4323_v29  ;;  %3669 = vmatprep.mubr.bf16.mxu0 %v4394_v49  ;;  %3685 = vmatprep.mubr.bf16.mxu1 %v4398_v50  ;;  %v304_v13 = vld [vmem:[#allocation2 + $0x18] sm:$0xff]  ;;  %v305_v14 = vld [vmem:[#allocation2 + $0x20] sm:$0xff] }
  0x30   : > { %278 = vst [vmem:[#allocation2 + $0x79] sm:$0xff] %v4326_v30  ;;  %279 = vst [vmem:[#allocation2 + $0x81] sm:$0xff] %v4331_v31  ;;  %v851_v15 = vld [vmem:[#allocation2 + $0x1a] sm:$0xff]  ;;  %v852_v16 = vld [vmem:[#allocation2 + $0x22] sm:$0xff]  ;;  %v4494_v24 = vpack.c.bf16 %v305_v14, %v304_v13 }
  0x31   : > { %294 = vst [vmem:[#allocation2 + $0x139] sm:$0xff] %v4335_v32  ;;  %295 = vst [vmem:[#allocation2 + $0x141] sm:$0xff] %v4338_v33  ;;  %3700 = vmatpush3.bf16.msra.mxu1 %v4116_v47  ;;  %3748 = vmatpush3.bf16.msra.mxu0 %v4117_v48  ;;  %v306_v19 = vld [vmem:[#allocation2 + $0x30] sm:$0xff]  ;;  %v307_v20 = vld [vmem:[#allocation2 + $0x38] sm:$0xff]  ;;  %v4496_v25 = vpack.c.bf16 %v852_v16, %v851_v15 }
  0x32   : > { %280 = vst [vmem:[#allocation2 + $0x91] sm:$0xff] %v4353_v37  ;;  %281 = vst [vmem:[#allocation2 + $0x99] sm:$0xff] %v4356_v38  ;;  %3701 = vmatprep.subr.bf16.mxu1 %v4118_v51  ;;  %3749 = vmatprep.subr.bf16.mxu0 %v4119_v52  ;;  %v853_v21 = vld [vmem:[#allocation2 + $0x32] sm:$0xff]  ;;  %v854_v23 = vld [vmem:[#allocation2 + $0x3a] sm:$0xff]  ;;  %v4498_v26 = vpack.c.bf16 %v307_v20, %v306_v19 }
  0x33   : > { %296 = vst [vmem:[#allocation2 + $0x151] sm:$0xff] %v4359_v39  ;;  %297 = vst [vmem:[#allocation2 + $0x159] sm:$0xff] %v210_v40  ;;  %v4500_v27 = vpack.c.bf16 %v854_v23, %v853_v21  ;;  %v4132_v28 = vld [vmem:[%s5316_s1 + $0xf0] sm:$0xff]   ;;  %v308_v29 = vld [vmem:[#allocation2 + $0x48] sm:$0xff] }
  0x34   : > { %282 = vst [vmem:[#allocation2 + $0xa9] sm:$0xff] %v4366_v41  ;;  %283 = vst [vmem:[#allocation2 + $0xb1] sm:$0xff] %v4369_v42  ;;  %3670 = vmatmul.mubr.bf16.gmra.mxu0 %v4412_v53  ;;  %3686 = vmatmul.mubr.bf16.gmra.mxu1 %v4416_v54  ;;  %v309_v30 = vld [vmem:[#allocation2 + $0x50] sm:$0xff]  ;;  %v4134_v38 = vld [vmem:[%s5316_s1 + $0xe8] sm:$0xff]  }
  0x35   : > { %298 = vst [vmem:[#allocation2 + $0x169] sm:$0xff] %v4382_v45  ;;  %299 = vst [vmem:[#allocation2 + $0x171] sm:$0xff] %v212_v46  ;;  %3702 = vmatpush3.bf16.msra.mxu1 %v4118_v51  ;;  %3750 = vmatpush3.bf16.msra.mxu0 %v4119_v52  ;;  %v4133_v31 = vld [vmem:[%s5316_s1 + $0x130] sm:$0xff]   ;;  %v310_v34 = vld [vmem:[#allocation2 + $0x60] sm:$0xff]  ;;  %v4518_v40 = vpack.c.bf16 %v309_v30, %v308_v29 }
  0x36   : > { %3703 = vmatprep.subr.bf16.mxu1 %v4120_v55  ;;  %3751 = vmatprep.subr.bf16.mxu0 %v4121_v56  ;;  %v855_v32 = vld [vmem:[#allocation2 + $0x4a] sm:$0xff]  ;;  %v856_v33 = vld [vmem:[#allocation2 + $0x52] sm:$0xff]  ;;  %v857_v36 = vld [vmem:[#allocation2 + $0x62] sm:$0xff] }
  0x37   : > { %3673 = vmatprep.mubr.bf16.mxu0 %v4426_v57  ;;  %3689 = vmatprep.mubr.bf16.mxu1 %v4430_v58  ;;  %v311_v35 = vld [vmem:[#allocation2 + $0x68] sm:$0xff]  ;;  %v4520_v41 = vpack.c.bf16 %v856_v33, %v855_v32  ;;  %v4136_v46 = vld [vmem:[%s5316_s1 + $0xe0] sm:$0xff]   ;;  %v312_v47 = vld [vmem:[#allocation2 + $0x78] sm:$0xff] }
  0x38   : > { %v858_v37 = vld [vmem:[#allocation2 + $0x6a] sm:$0xff]  ;;  %v4522_v42 = vpack.c.bf16 %v311_v35, %v310_v34  ;;  %v313_v48 = vld [vmem:[#allocation2 + $0x80] sm:$0xff]  ;;  %v320_v35 = vld [vmem:[#allocation2 + $0xd8] sm:$0xff] }
  0x39   : > { %3704 = vmatpush3.bf16.msra.mxu1 %v4120_v55  ;;  %3752 = vmatpush3.bf16.msra.mxu0 %v4121_v56  ;;  %v4135_v39 = vld [vmem:[%s5316_s1 + $0x128] sm:$0xff]   ;;  %v4524_v45 = vpack.c.bf16 %v858_v37, %v857_v36  ;;  %v859_v51 = vld [vmem:[#allocation2 + $0x7a] sm:$0xff]  ;;  %v314_v56 = vld [vmem:[#allocation2 + $0x90] sm:$0xff] }
  0x3a   : > { %3705 = vmatprep.subr.bf16.mxu1 %v4122_v59  ;;  %3753 = vmatprep.subr.bf16.mxu0 %v4123_v60  ;;  %v860_v52 = vld [vmem:[#allocation2 + $0x82] sm:$0xff]  ;;  %v4141_v16 = vld [vmem:[%s5316_s1 + $0x110] sm:$0xff]   ;;  %v867_v37 = vld [vmem:[#allocation2 + $0xda] sm:$0xff] }
  0x3b   : > { %v4137_v55 = vld [vmem:[%s5316_s1 + $0x120] sm:$0xff]   ;;  %v4544_v7 = vpack.c.bf16 %v860_v52, %v859_v51  ;;  %v317_v13 = vld [vmem:[#allocation2 + $0xb0] sm:$0xff]  ;;  %v4142_v21 = vld [vmem:[%s5316_s1 + $0xc8] sm:$0xff]  }
  0x3c   : > { %3674 = vmatmul.mubr.bf16.gmra.mxu0 %v4444_v61  ;;  %3690 = vmatmul.mubr.bf16.gmra.mxu1 %v4448_v62  ;;  %v863_v14 = vld [vmem:[#allocation2 + $0xaa] sm:$0xff]  ;;  %v864_v15 = vld [vmem:[#allocation2 + $0xb2] sm:$0xff]  ;;  %v865_v19 = vld [vmem:[#allocation2 + $0xc2] sm:$0xff] }
  0x3d   : > { %3706 = vmatpush3.bf16.msra.mxu1 %v4122_v59  ;;  %3754 = vmatpush3.bf16.msra.mxu0 %v4123_v60  ;;  %v315_v59 = vld [vmem:[#allocation2 + $0x98] sm:$0xff]  ;;  %v866_v20 = vld [vmem:[#allocation2 + $0xca] sm:$0xff]  ;;  %v4570_v30 = vpack.c.bf16 %v864_v15, %v863_v14  ;;  %v4144_v34 = vld [vmem:[%s5316_s1 + $0xc0] sm:$0xff]  }
  0x3e   : > { %3707 = vmatprep.subr.bf16.mxu1 %v4124_v63  ;;  %3755 = vmatprep.subr.bf16.mxu0 %v4125_v0  ;;  %v861_v60 = vld [vmem:[#allocation2 + $0x92] sm:$0xff]  ;;  %v4546_v8 = vpack.c.bf16 %v315_v59, %v314_v56  ;;  %v4576_v33 = vpack.c.bf16 %v866_v20, %v865_v19  ;;  %v321_v36 = vld [vmem:[#allocation2 + $0xe0] sm:$0xff]  ;;  %v327_v14 = vld [vmem:[#allocation2 + $0x128] sm:$0xff] }
  0x3f   : > { %3677 = vmatprep.mubr.bf16.mxu0 %v4458_v1  ;;  %3693 = vmatprep.mubr.bf16.mxu1 %v4461_v2  ;;  %v213_v23 = vld [vmem:[%s4242_s23 + $0xf0] sm:$0xff]  ;;  %v870_v51 = vld [vmem:[#allocation2 + $0xfa] sm:$0xff]  ;;  %v4594_v56 = vpack.c.bf16 %v321_v36, %v320_v35  ;;  %v873_v15 = vld [vmem:[#allocation2 + $0x122] sm:$0xff] }
  0x40   : > { %300 = vst [vmem:[#allocation2 + $0x181] sm:$0xff] %v213_v23  ;;  %v4146_v52 = vld [vmem:[%s5316_s1 + $0x178] sm:$0xff]  }
  0x41   : > { %3708 = vmatpush3.bf16.msra.mxu1 %v4124_v63  ;;  %3756 = vmatpush3.bf16.msra.mxu0 %v4125_v0  ;;  %v862_v63 = vld [vmem:[#allocation2 + $0x9a] sm:$0xff]  ;;  %v877_v36 = vld [vmem:[#allocation2 + $0x152] sm:$0xff] }
  0x42   : > { %3709 = vmatprep.subr.bf16.mxu1 %v4126_v3  ;;  %3757 = vmatprep.subr.bf16.mxu0 %v4127_v4  ;;  %v4138_v0 = vld [vmem:[%s5316_s1 + $0xd8] sm:$0xff]  }
  0x43   : > { %v331_v35 = vld [vmem:[#allocation2 + $0x158] sm:$0xff] }
  0x44   : > { %3678 = vmatmul.mubr.bf16.gmra.mxu0 %v4475_v5  ;;  %3694 = vmatmul.mubr.bf16.gmra.mxu1 %v4478_v6 }
  0x45   : > { %3710 = vmatpush3.bf16.msra.mxu1 %v4126_v3  ;;  %3758 = vmatpush3.bf16.msra.mxu0 %v4127_v4  ;;  %v4139_v3 = vld [vmem:[%s5316_s1 + $0x118] sm:$0xff]   ;;  %v4542_v4 = vpack.c.bf16 %v313_v48, %v312_v47 }
  0x46   : > { %3711 = vmatprep.subr.bf16.mxu1 %v4128_v9  ;;  %3759 = vmatprep.subr.bf16.mxu0 %v4129_v10  ;;  %v323_v47 = vld [vmem:[#allocation2 + $0xf8] sm:$0xff] }
  0x47   : > { %3713 = vmatprep.mubr.bf16.mxu1 %v4188_v22  ;;  %3761 = vmatprep.mubr.bf16.mxu0 %v881_v11  ;;  %v316_v11 = vld [vmem:[#allocation2 + $0xa8] sm:$0xff]  ;;  %v869_v48 = vld [vmem:[#allocation2 + $0xf2] sm:$0xff] }
  0x48   : > { %v4143_v22 = vld [vmem:[%s5316_s1 + $0x108] sm:$0xff]   ;;  %v4568_v29 = vpack.c.bf16 %v317_v13, %v316_v11  ;;  %v872_v11 = vld [vmem:[#allocation2 + $0x112] sm:$0xff]  ;;  %v326_v13 = vld [vmem:[#allocation2 + $0x120] sm:$0xff] }
  0x49   : > { %3712 = vmatpush3.bf16.msra.mxu1 %v4128_v9  ;;  %3760 = vmatpush3.bf16.msra.mxu0 %v4129_v10  ;;  %v4548_v9 = vpack.c.bf16 %v862_v63, %v861_v60  ;;  %v4140_v10 = vld [vmem:[%s5316_s1 + $0xd0] sm:$0xff]   ;;  %v4600_v63 = vpack.c.bf16 %v870_v51, %v869_v48  ;;  %v4610_v19 = vpack.c.bf16 %v327_v14, %v326_v13  ;;  %v332_v48 = vld [vmem:[#allocation2 + $0x168] sm:$0xff] }
  0x4a   : > { %3793 = vmatprep.subr.bf16.mxu1 %v4130_v17  ;;  %3841 = vmatprep.subr.bf16.mxu0 %v4131_v18  ;;  %v333_v51 = vld [vmem:[#allocation2 + $0x170] sm:$0xff] }
  0x4b   : > { %v4148_v13 = vld [vmem:[%s5316_s1 + $0x170] sm:$0xff]  }
  0x4c   : > { %3714 = vmatmul.mubr.bf16.vlgmr.msra.gmra.mxu1 %v4494_v24  ;;  %3762 = vmatmul.mubr.bf16.vlgmr.msra.gmra.mxu0 %v4496_v25  ;;  %v4149_v14 = vld [vmem:[%s5316_s1 + $0x1b0] sm:$0xff]  }
  0x4d   : > { %3794 = vmatpush3.bf16.msra.mxu1 %v4130_v17  ;;  %3842 = vmatpush3.bf16.msra.mxu0 %v4131_v18  ;;  %v318_v17 = vld [vmem:[#allocation2 + $0xc0] sm:$0xff]  ;;  %v319_v18 = vld [vmem:[#allocation2 + $0xc8] sm:$0xff] }
  0x4e   : > { %3717 = vmatprep.mubr.bf16.mxu1 %v4498_v26  ;;  %3765 = vmatprep.mubr.bf16.mxu0 %v4500_v27  ;;  %v4574_v32 = vpack.c.bf16 %v319_v18, %v318_v17 }
  0x4f   : > { %3795 = vmatprep.subr.bf16.mxu1 %v4132_v28  ;;  %3843 = vmatprep.subr.bf16.mxu0 %v4133_v31 }
  0x51   : > { %3796 = vmatpush3.bf16.msra.mxu1 %v4132_v28  ;;  %3844 = vmatpush3.bf16.msra.mxu0 %v4133_v31  ;;  %v214_v28 = vld [vmem:[%s4242_s23 + $0xf8] sm:$0xff] }
  0x52   : > { %3797 = vmatprep.subr.bf16.mxu1 %v4134_v38  ;;  %3845 = vmatprep.subr.bf16.mxu0 %v4135_v39  ;;  %301 = vst [vmem:[#allocation2 + $0x189] sm:$0xff] %v214_v28  ;;  %v4572_v31 = vpack.c.bf16 %v214_v28, %v213_v23  ;;  %v875_v23 = vld [vmem:[#allocation2 + $0x13a] sm:$0xff]  ;;  %v876_v28 = vld [vmem:[#allocation2 + $0x142] sm:$0xff] }
  0x54   : > { %3718 = vmatmul.mubr.bf16.gmra.mxu1 %v4518_v40  ;;  %3766 = vmatmul.mubr.bf16.gmra.mxu0 %v4520_v41 }
  0x55   : > { %3721 = vmatprep.mubr.bf16.mxu1 %v4522_v42  ;;  %3769 = vmatprep.mubr.bf16.mxu0 %v4524_v45 }
  0x56   : > { %3798 = vmatpush3.bf16.msra.mxu1 %v4134_v38  ;;  %3846 = vmatpush3.bf16.msra.mxu0 %v4135_v39  ;;  %v868_v38 = vld [vmem:[#allocation2 + $0xe2] sm:$0xff] }
  0x57   : > { %3799 = vmatprep.subr.bf16.mxu1 %v4136_v46  ;;  %3847 = vmatprep.subr.bf16.mxu0 %v4137_v55  ;;  %v4145_v39 = vld [vmem:[%s5316_s1 + $0x100] sm:$0xff]   ;;  %v4596_v59 = vpack.c.bf16 %v868_v38, %v867_v37 }
  0x58   : > { %v878_v37 = vld [vmem:[#allocation2 + $0x15a] sm:$0xff] }
  0x5a   : > { %3800 = vmatpush3.bf16.msra.mxu1 %v4136_v46  ;;  %3848 = vmatpush3.bf16.msra.mxu0 %v4137_v55  ;;  %v322_v46 = vld [vmem:[#allocation2 + $0xf0] sm:$0xff]  ;;  %v4147_v55 = vld [vmem:[%s5316_s1 + $0x1b8] sm:$0xff]  }
  0x5b   : > { %3801 = vmatprep.subr.bf16.mxu1 %v4138_v0  ;;  %3849 = vmatprep.subr.bf16.mxu0 %v4139_v3  ;;  %v4598_v60 = vpack.c.bf16 %v323_v47, %v322_v46  ;;  %v4624_v47 = vpack.c.bf16 %v878_v37, %v877_v36  ;;  %v1797_v36 = vld [vmem:[#allocation2 + $0x182] sm:$0xff]  ;;  %v1798_v37 = vld [vmem:[#allocation2 + $0x18a] sm:$0xff] }
  0x5c   : > { %3722 = vmatmul.mubr.bf16.gmra.mxu1 %v4542_v4  ;;  %3770 = vmatmul.mubr.bf16.gmra.mxu0 %v4544_v7 }
  0x5d   : > { %3725 = vmatprep.mubr.bf16.mxu1 %v4546_v8  ;;  %3773 = vmatprep.mubr.bf16.mxu0 %v4548_v9 }
  0x5e   : > { %3802 = vmatpush3.bf16.msra.mxu1 %v4138_v0  ;;  %3850 = vmatpush3.bf16.msra.mxu0 %v4139_v3  ;;  %v324_v0 = vld [vmem:[#allocation2 + $0x108] sm:$0xff]  ;;  %v325_v3 = vld [vmem:[#allocation2 + $0x110] sm:$0xff] }
  0x5f   : > { %3803 = vmatprep.subr.bf16.mxu1 %v4140_v10  ;;  %3851 = vmatprep.subr.bf16.mxu0 %v4141_v16  ;;  %v4606_v17 = vpack.c.bf16 %v325_v3, %v324_v0  ;;  %v879_v0 = vld [vmem:[#allocation2 + $0x16a] sm:$0xff]  ;;  %v880_v3 = vld [vmem:[#allocation2 + $0x172] sm:$0xff] }
  0x62   : > { %3804 = vmatpush3.bf16.msra.mxu1 %v4140_v10  ;;  %3852 = vmatpush3.bf16.msra.mxu0 %v4141_v16  ;;  %v871_v10 = vld [vmem:[#allocation2 + $0x10a] sm:$0xff] }
  0x63   : > { %3805 = vmatprep.subr.bf16.mxu1 %v4142_v21  ;;  %3853 = vmatprep.subr.bf16.mxu0 %v4143_v22  ;;  %v874_v16 = vld [vmem:[#allocation2 + $0x12a] sm:$0xff]  ;;  %v4608_v18 = vpack.c.bf16 %v872_v11, %v871_v10  ;;  %v4630_v10 = vpack.c.bf16 %v333_v51, %v332_v48  ;;  %v4632_v11 = vpack.c.bf16 %v880_v3, %v879_v0  ;;  %v2381_v48 = vld [vmem:[#allocation2 + $0x39] sm:$0xff] }
  0x64   : > { %3726 = vmatmul.mubr.bf16.gmra.mxu1 %v4568_v29  ;;  %3774 = vmatmul.mubr.bf16.gmra.mxu0 %v4570_v30  ;;  %v4612_v20 = vpack.c.bf16 %v874_v16, %v873_v15  ;;  %v4158_v15 = vld [vmem:[%s5316_s1 + $0x148] sm:$0xff]   ;;  %v2686_v51 = vld [vmem:[#allocation2 + $0x32] sm:$0xff]  ;;  %v2687_v0 = vld [vmem:[#allocation2 + $0x3a] sm:$0xff] }
  0x65   : > { %3729 = vmatprep.mubr.bf16.mxu1 %v4574_v32  ;;  %3777 = vmatprep.mubr.bf16.mxu0 %v4576_v33  ;;  %v4159_v16 = vld [vmem:[%s5316_s1 + $0x188] sm:$0xff]  }
  0x66   : > { %3806 = vmatpush3.bf16.msra.mxu1 %v4142_v21  ;;  %3854 = vmatpush3.bf16.msra.mxu0 %v4143_v22  ;;  %v328_v21 = vld [vmem:[#allocation2 + $0x138] sm:$0xff]  ;;  %v329_v22 = vld [vmem:[#allocation2 + $0x140] sm:$0xff] }
  0x67   : > { %3807 = vmatprep.subr.bf16.mxu1 %v4144_v34  ;;  %3855 = vmatprep.subr.bf16.mxu0 %v4145_v39  ;;  %v4618_v38 = vpack.c.bf16 %v329_v22, %v328_v21  ;;  %v4162_v21 = vld [vmem:[%s5316_s1 + $0x1f8] sm:$0xff]  }
  0x68   : > { %v4163_v22 = vld [vmem:[%s5316_s1 + $0x238] sm:$0xff]  }
  0x6a   : > { %3808 = vmatpush3.bf16.msra.mxu1 %v4144_v34  ;;  %3856 = vmatpush3.bf16.msra.mxu0 %v4145_v39  ;;  %v330_v34 = vld [vmem:[#allocation2 + $0x150] sm:$0xff]  ;;  %v4620_v39 = vpack.c.bf16 %v876_v28, %v875_v23 }
  0x6b   : > { %3889 = vmatprep.subr.bf16.mxu1 %v4146_v52  ;;  %3937 = vmatprep.subr.bf16.mxu0 %v4147_v55  ;;  %v4622_v46 = vpack.c.bf16 %v331_v35, %v330_v34 }
  0x6c   : > { %3730 = vmatmul.mubr.bf16.gmra.mxu1 %v4594_v56  ;;  %3778 = vmatmul.mubr.bf16.gmra.mxu0 %v4596_v59 }
  0x6d   : > { %3733 = vmatprep.mubr.bf16.mxu1 %v4598_v60  ;;  %3781 = vmatprep.mubr.bf16.mxu0 %v4600_v63 }
  0x74   : > { %3734 = vmatmul.mubr.bf16.gmra.mxu1 %v4606_v17  ;;  %3782 = vmatmul.mubr.bf16.gmra.mxu0 %v4608_v18 }
  0x75   : > { %3737 = vmatprep.mubr.bf16.mxu1 %v4610_v19  ;;  %3785 = vmatprep.mubr.bf16.mxu0 %v4612_v20 }
  0x7c   : > { %3738 = vmatmul.mubr.bf16.gmra.mxu1 %v4618_v38  ;;  %3786 = vmatmul.mubr.bf16.gmra.mxu0 %v4620_v39 }
  0x7d   : > { %3741 = vmatprep.mubr.bf16.mxu1 %v4622_v46  ;;  %3789 = vmatprep.mubr.bf16.mxu0 %v4624_v47 }
  0x84   : > { %3742 = vmatmul.mubr.bf16.gmra.mxu1 %v4630_v10  ;;  %3790 = vmatmul.mubr.bf16.gmra.mxu0 %v4632_v11 }
  0x85   : > { %3809 = vmatprep.mubr.bf16.mxu1 %v4494_v24  ;;  %3857 = vmatprep.mubr.bf16.mxu0 %v4373_v43  ;;  %v4150_v43 = vld [vmem:[%s5316_s1 + $0x168] sm:$0xff]  }
  0x86   : > { %v4151_v24 = vld [vmem:[%s5316_s1 + $0x1a8] sm:$0xff]  }
  0x8c   : > { %3810 = vmatmul.mubr.bf16.vlgmr.msra.gmra.mxu1 %v4498_v26  ;;  %3858 = vmatmul.mubr.bf16.vlgmr.msra.gmra.mxu0 %v4394_v49  ;;  %v4152_v49 = vld [vmem:[%s5316_s1 + $0x160] sm:$0xff]  }
  0x8d   : > { %3890 = vmatpush3.bf16.msra.mxu1 %v4146_v52  ;;  %3938 = vmatpush3.bf16.msra.mxu0 %v4147_v55  ;;  %v4154_v52 = vld [vmem:[%s5316_s1 + $0x158] sm:$0xff]  }
  0x8e   : > { %3813 = vmatprep.mubr.bf16.mxu1 %v4518_v40  ;;  %3861 = vmatprep.mubr.bf16.mxu0 %v4412_v53  ;;  %v4153_v53 = vld [vmem:[%s5316_s1 + $0x1a0] sm:$0xff]   ;;  %v4155_v55 = vld [vmem:[%s5316_s1 + $0x198] sm:$0xff]  }
  0x8f   : > { %3891 = vmatprep.subr.bf16.mxu1 %v4148_v13  ;;  %3939 = vmatprep.subr.bf16.mxu0 %v4149_v14 }
  0x91   : > { %3892 = vmatpush3.bf16.msra.mxu1 %v4148_v13  ;;  %3940 = vmatpush3.bf16.msra.mxu0 %v4149_v14 }
  0x92   : > { %3893 = vmatprep.subr.bf16.mxu1 %v4150_v43  ;;  %3941 = vmatprep.subr.bf16.mxu0 %v4151_v24 }
  0x94   : > { %3814 = vmatmul.mubr.bf16.gmra.mxu1 %v4522_v42  ;;  %3862 = vmatmul.mubr.bf16.gmra.mxu0 %v4426_v57  ;;  %v4156_v57 = vld [vmem:[%s5316_s1 + $0x150] sm:$0xff]  }
  0x95   : > { %3817 = vmatprep.mubr.bf16.mxu1 %v4542_v4  ;;  %3865 = vmatprep.mubr.bf16.mxu0 %v4444_v61  ;;  %v4157_v61 = vld [vmem:[%s5316_s1 + $0x190] sm:$0xff]  }
  0x96   : > { %3894 = vmatpush3.bf16.msra.mxu1 %v4150_v43  ;;  %3942 = vmatpush3.bf16.msra.mxu0 %v4151_v24  ;;  %v2718_v43 = vpack.c.bf16 %v2687_v0, %v2686_v51  ;;  %v2695_v51 = vld [vmem:[#allocation2 + $0x9a] sm:$0xff] }
  0x97   : > { %3895 = vmatprep.subr.bf16.mxu1 %v4152_v49  ;;  %3943 = vmatprep.subr.bf16.mxu0 %v4153_v53 }
  0x9a   : > { %3896 = vmatpush3.bf16.msra.mxu1 %v4152_v49  ;;  %3944 = vmatpush3.bf16.msra.mxu0 %v4153_v53 }
  0x9b   : > { %3897 = vmatprep.subr.bf16.mxu1 %v4154_v52  ;;  %3945 = vmatprep.subr.bf16.mxu0 %v4155_v55 }
  0x9c   : > { %3818 = vmatmul.mubr.bf16.gmra.mxu1 %v4546_v8  ;;  %3866 = vmatmul.mubr.bf16.gmra.mxu0 %v4458_v1  ;;  %v4160_v1 = vld [vmem:[%s5316_s1 + $0x140] sm:$0xff]  }
  0x9d   : > { %3821 = vmatprep.mubr.bf16.mxu1 %v4568_v29  ;;  %3869 = vmatprep.mubr.bf16.mxu0 %v4475_v5  ;;  %v4161_v5 = vld [vmem:[%s5316_s1 + $0x180] sm:$0xff]  }
  0x9e   : > { %3898 = vmatpush3.bf16.msra.mxu1 %v4154_v52  ;;  %3946 = vmatpush3.bf16.msra.mxu0 %v4155_v55  ;;  %v2382_v55 = vld [vmem:[#allocation2 + $0x49] sm:$0xff] }
  0x9f   : > { %3899 = vmatprep.subr.bf16.mxu1 %v4156_v57  ;;  %3947 = vmatprep.subr.bf16.mxu0 %v4157_v61 }
  0xa2   : > { %3900 = vmatpush3.bf16.msra.mxu1 %v4156_v57  ;;  %3948 = vmatpush3.bf16.msra.mxu0 %v4157_v61  ;;  %v2383_v57 = vld [vmem:[#allocation2 + $0x51] sm:$0xff] }
  0xa3   : > { %3901 = vmatprep.subr.bf16.mxu1 %v4158_v15  ;;  %3949 = vmatprep.subr.bf16.mxu0 %v4159_v16  ;;  %v2688_v61 = vld [vmem:[#allocation2 + $0x4a] sm:$0xff] }
  0xa4   : > { %3822 = vmatmul.mubr.bf16.gmra.mxu1 %v4574_v32  ;;  %3870 = vmatmul.mubr.bf16.gmra.mxu0 %v4257_v12  ;;  %v1185_v12 = vld [vmem:[#allocation2 + $0x180] sm:$0xff] }
  0xa5   : > { %3825 = vmatprep.mubr.bf16.mxu1 %v4594_v56  ;;  %3873 = vmatprep.mubr.bf16.mxu0 %v4377_v44  ;;  %v1186_v44 = vld [vmem:[#allocation2 + $0x188] sm:$0xff] }
  0xa6   : > { %3902 = vmatpush3.bf16.msra.mxu1 %v4158_v15  ;;  %3950 = vmatpush3.bf16.msra.mxu0 %v4159_v16  ;;  %v2689_v15 = vld [vmem:[#allocation2 + $0x52] sm:$0xff]  ;;  %v2384_v16 = vld [vmem:[#allocation2 + $0x61] sm:$0xff] }
  0xa7   : > { %3903 = vmatprep.subr.bf16.mxu1 %v4160_v1  ;;  %3951 = vmatprep.subr.bf16.mxu0 %v4161_v5 }
  0xaa   : > { %3904 = vmatpush3.bf16.msra.mxu1 %v4160_v1  ;;  %3952 = vmatpush3.bf16.msra.mxu0 %v4161_v5 }
  0xab   : > { %3985 = vmatprep.subr.bf16.mxu1 %v4162_v21  ;;  %4033 = vmatprep.subr.bf16.mxu0 %v4163_v22 }
  0xac   : > { %3826 = vmatmul.mubr.bf16.gmra.mxu1 %v4598_v60  ;;  %3874 = vmatmul.mubr.bf16.gmra.mxu0 %v4398_v50  ;;  %v4714_v50 = vpack.c.bf16 %v1186_v44, %v1185_v12  ;;  %v2691_v12 = vld [vmem:[#allocation2 + $0x6a] sm:$0xff] }
  0xad   : > { %3829 = vmatprep.mubr.bf16.mxu1 %v4606_v17  ;;  %3877 = vmatprep.mubr.bf16.mxu0 %v4416_v54  ;;  %v4164_v54 = vld [vmem:[%s5316_s1 + $0x1f0] sm:$0xff]  }
  0xb4   : > { %3830 = vmatmul.mubr.bf16.gmra.mxu1 %v4610_v19  ;;  %3878 = vmatmul.mubr.bf16.gmra.mxu0 %v4430_v58  ;;  %v4165_v58 = vld [vmem:[%s5316_s1 + $0x230] sm:$0xff]  }
  0xb5   : > { %3833 = vmatprep.mubr.bf16.mxu1 %v4618_v38  ;;  %3881 = vmatprep.mubr.bf16.mxu0 %v4448_v62  ;;  %v4166_v62 = vld [vmem:[%s5316_s1 + $0x1e8] sm:$0xff]  }
  0xbc   : > { %3834 = vmatmul.mubr.bf16.gmra.mxu1 %v4622_v46  ;;  %3882 = vmatmul.mubr.bf16.gmra.mxu0 %v4461_v2  ;;  %v4167_v2 = vld [vmem:[%s5316_s1 + $0x228] sm:$0xff]  }
  0xbd   : > { %3837 = vmatprep.mubr.bf16.mxu1 %v4630_v10  ;;  %3885 = vmatprep.mubr.bf16.mxu0 %v4478_v6  ;;  %v4168_v6 = vld [vmem:[%s5316_s1 + $0x1e0] sm:$0xff]  }
  0xc4   : > { %3838 = vmatmul.mubr.bf16.gmra.mxu1 %v4714_v50  ;;  %3886 = vmatmul.mubr.bf16.gmra.mxu0 %v4572_v31 }
  0xc5   : > { %3905 = vmatprep.mubr.bf16.mxu1 %v4496_v25  ;;  %3953 = vmatprep.mubr.bf16.mxu0 %v4498_v26  ;;  %v4169_v25 = vld [vmem:[%s5316_s1 + $0x220] sm:$0xff]   ;;  %v4170_v26 = vld [vmem:[%s5316_s1 + $0x1d8] sm:$0xff]  }
  0xcc   : > { %3906 = vmatmul.mubr.bf16.vlgmr.msra.gmra.mxu1 %v4500_v27  ;;  %3954 = vmatmul.mubr.bf16.vlgmr.msra.gmra.mxu0 %v4518_v40  ;;  %v4171_v27 = vld [vmem:[%s5316_s1 + $0x218] sm:$0xff]   ;;  %v4172_v40 = vld [vmem:[%s5316_s1 + $0x1d0] sm:$0xff]  }
  0xcd   : > { %3986 = vmatpush3.bf16.msra.mxu1 %v4162_v21  ;;  %4034 = vmatpush3.bf16.msra.mxu0 %v4163_v22  ;;  %v2385_v21 = vld [vmem:[#allocation2 + $0x69] sm:$0xff] }
  0xce   : > { %3909 = vmatprep.mubr.bf16.mxu1 %v4520_v41  ;;  %3957 = vmatprep.mubr.bf16.mxu0 %v4522_v42  ;;  %v4173_v41 = vld [vmem:[%s5316_s1 + $0x210] sm:$0xff]   ;;  %v4174_v42 = vld [vmem:[%s5316_s1 + $0x1c8] sm:$0xff]  }
  0xcf   : > { %3987 = vmatprep.subr.bf16.mxu1 %v4164_v54  ;;  %4035 = vmatprep.subr.bf16.mxu0 %v4165_v58  ;;  %v2690_v22 = vld [vmem:[#allocation2 + $0x62] sm:$0xff] }
  0xd1   : > { %3988 = vmatpush3.bf16.msra.mxu1 %v4164_v54  ;;  %4036 = vmatpush3.bf16.msra.mxu0 %v4165_v58  ;;  %v2413_v54 = vpack.c.bf16 %v2383_v57, %v2382_v55  ;;  %v2719_v58 = vpack.c.bf16 %v2689_v15, %v2688_v61 }
  0xd2   : > { %3989 = vmatprep.subr.bf16.mxu1 %v4166_v62  ;;  %4037 = vmatprep.subr.bf16.mxu0 %v4167_v2 }
  0xd4   : > { %3910 = vmatmul.mubr.bf16.gmra.mxu1 %v4524_v45  ;;  %3958 = vmatmul.mubr.bf16.gmra.mxu0 %v4542_v4  ;;  %v4175_v45 = vld [vmem:[%s5316_s1 + $0x208] sm:$0xff]   ;;  %v4176_v4 = vld [vmem:[%s5316_s1 + $0x1c0] sm:$0xff]  }
  0xd5   : > { %3913 = vmatprep.mubr.bf16.mxu1 %v4544_v7  ;;  %3961 = vmatprep.mubr.bf16.mxu0 %v4546_v8  ;;  %v4177_v7 = vld [vmem:[%s5316_s1 + $0x200] sm:$0xff]  }
  0xd6   : > { %3990 = vmatpush3.bf16.msra.mxu1 %v4166_v62  ;;  %4038 = vmatpush3.bf16.msra.mxu0 %v4167_v2  ;;  %v2414_v62 = vpack.c.bf16 %v2385_v21, %v2384_v16  ;;  %v2720_v2 = vpack.c.bf16 %v2691_v12, %v2690_v22 }
  0xd7   : > { %3991 = vmatprep.subr.bf16.mxu1 %v4168_v6  ;;  %4039 = vmatprep.subr.bf16.mxu0 %v4169_v25 }
  0xda   : > { %3992 = vmatpush3.bf16.msra.mxu1 %v4168_v6  ;;  %4040 = vmatpush3.bf16.msra.mxu0 %v4169_v25 }
  0xdb   : > { %3993 = vmatprep.subr.bf16.mxu1 %v4170_v26  ;;  %4041 = vmatprep.subr.bf16.mxu0 %v4171_v27 }
  0xdc   : > { %3914 = vmatmul.mubr.bf16.gmra.mxu1 %v4548_v9  ;;  %3962 = vmatmul.mubr.bf16.gmra.mxu0 %v4568_v29 }
  0xdd   : > { %3917 = vmatprep.mubr.bf16.mxu1 %v4570_v30  ;;  %3965 = vmatprep.mubr.bf16.mxu0 %v4574_v32 }
  0xde   : > { %3994 = vmatpush3.bf16.msra.mxu1 %v4170_v26  ;;  %4042 = vmatpush3.bf16.msra.mxu0 %v4171_v27 }
  0xdf   : > { %3995 = vmatprep.subr.bf16.mxu1 %v4172_v40  ;;  %4043 = vmatprep.subr.bf16.mxu0 %v4173_v41 }
  0xe2   : > { %3996 = vmatpush3.bf16.msra.mxu1 %v4172_v40  ;;  %4044 = vmatpush3.bf16.msra.mxu0 %v4173_v41  ;;  %v2386_v40 = vld [vmem:[#allocation2 + $0x79] sm:$0xff]  ;;  %v2387_v41 = vld [vmem:[#allocation2 + $0x81] sm:$0xff] }
  0xe3   : > { %3997 = vmatprep.subr.bf16.mxu1 %v4174_v42  ;;  %4045 = vmatprep.subr.bf16.mxu0 %v4175_v45 }
  0xe4   : > { %3918 = vmatmul.mubr.bf16.gmra.mxu1 %v4576_v33  ;;  %3966 = vmatmul.mubr.bf16.gmra.mxu0 %v4594_v56 }
  0xe5   : > { %3921 = vmatprep.mubr.bf16.mxu1 %v4596_v59  ;;  %3969 = vmatprep.mubr.bf16.mxu0 %v4598_v60 }
  0xe6   : > { %3998 = vmatpush3.bf16.msra.mxu1 %v4174_v42  ;;  %4046 = vmatpush3.bf16.msra.mxu0 %v4175_v45  ;;  %v2692_v45 = vld [vmem:[#allocation2 + $0x7a] sm:$0xff] }
  0xe7   : > { %3999 = vmatprep.subr.bf16.mxu1 %v4176_v4  ;;  %4047 = vmatprep.subr.bf16.mxu0 %v4177_v7 }
  0xea   : > { %4000 = vmatpush3.bf16.msra.mxu1 %v4176_v4  ;;  %4048 = vmatpush3.bf16.msra.mxu0 %v4177_v7  ;;  %v2693_v4 = vld [vmem:[#allocation2 + $0x82] sm:$0xff]  ;;  %v2388_v7 = vld [vmem:[#allocation2 + $0x91] sm:$0xff] }
  0xeb   : > { %v2721_v55 = vpack.c.bf16 %v2693_v4, %v2692_v45  ;;  %v2393_v45 = vld [vmem:[#allocation2 + $0xc9] sm:$0xff] }
  0xec   : > { %v4778_v8 = vpop.f32.mrf.mxu0  ;;  %v4780_v9 = vpop.f32.mrf.mxu1  ;;  %3922 = vmatmul.mubr.bf16.gmra.mxu1 %v4600_v63  ;;  %3970 = vmatmul.mubr.bf16.gmra.mxu0 %v4606_v17  ;;  %v2698_v4 = vld [vmem:[#allocation2 + $0xc2] sm:$0xff] }
  0xed   : > { %3925 = vmatprep.mubr.bf16.mxu1 %v4608_v18  ;;  %3973 = vmatprep.mubr.bf16.mxu0 %v4610_v19 }
  0xee   : > { %v4786_v29 = vpop.f32.mrf.mxu0  ;;  %v4788_v30 = vpop.f32.mrf.mxu1 }
  0xf0   : > { %v4790_v32 = vpop.f32.mrf.mxu0  ;;  %v4792_v33 = vpop.f32.mrf.mxu1 }
  0xf2   : > { %v4794_v56 = vpop.f32.mrf.mxu0  ;;  %v4796_v59 = vpop.f32.mrf.mxu1 }
  0xf4   : > { %v4798_v60 = vpop.f32.mrf.mxu0  ;;  %v4800_v63 = vpop.f32.mrf.mxu1  ;;  %3926 = vmatmul.mubr.bf16.gmra.mxu1 %v4612_v20  ;;  %3974 = vmatmul.mubr.bf16.gmra.mxu0 %v4618_v38  ;;  %v2380_v38 = vld [vmem:[#allocation2 + $0x31] sm:$0xff] }
  0xf5   : > { %3929 = vmatprep.mubr.bf16.mxu1 %v4620_v39  ;;  %3977 = vmatprep.mubr.bf16.mxu0 %v4622_v46  ;;  %v2412_v14 = vpack.c.bf16 %v2381_v48, %v2380_v38  ;;  %v2389_v38 = vld [vmem:[#allocation2 + $0x99] sm:$0xff] }
  0xf6   : > { %v4806_v17 = vpop.f32.mrf.mxu0  ;;  %v4808_v18 = vpop.f32.mrf.mxu1  ;;  %v2694_v48 = vld [vmem:[#allocation2 + $0x92] sm:$0xff]  ;;  %v2416_v61 = vpack.c.bf16 %v2389_v38, %v2388_v7 }
  0xf7   : > { %v2722_v15 = vpack.c.bf16 %v2695_v51, %v2694_v48 }
  0xf8   : > { %v4810_v19 = vpop.f32.mrf.mxu0  ;;  %v4812_v23 = vpop.f32.mrf.mxu1 }
  0xfa   : > { %v4814_v28 = vpop.f32.mrf.mxu0  ;;  %v4816_v34 = vpop.f32.mrf.mxu1 }
  0xfc   : > { %v4818_v35 = vpop.f32.mrf.mxu0  ;;  %v4820_v20 = vpop.f32.mrf.mxu1  ;;  %3930 = vmatmul.mubr.bf16.gmra.mxu1 %v4624_v47  ;;  %3978 = vmatmul.mubr.bf16.gmra.mxu0 %v4630_v10  ;;  %v4834_v47 = vpack.c.bf16 %v1798_v37, %v1797_v36  ;;  %v4178_v10 = vld [vmem:[#allocation2] sm:$0xff] }
  0xfd   : > { %3933 = vmatprep.mubr.bf16.mxu1 %v4632_v11  ;;  %3981 = vmatprep.mubr.bf16.mxu0 %v4714_v50  ;;  %v2121_v11 = vpack.c.bf16 %v4178_v10, %v4178_v10 }
  0xfe   : > { %v4826_v39 = vpop.f32.mrf.mxu0  ;;  %v4828_v46 = vpop.f32.mrf.mxu1 }
 0x100   : > { %v4830_v3 = vpop.f32.mrf.mxu0  ;;  %v4832_v13 = vpop.f32.mrf.mxu1 }
 0x102   : > { %v4836_v24 = vpop.f32.mrf.mxu0  ;;  %v4838_v49 = vpop.f32.mrf.mxu1 }
 0x104   : > { %v4840_v53 = vpop.f32.mrf.mxu0  ;;  %v4842_v52 = vpop.f32.mrf.mxu1  ;;  %3934 = vmatmul.mubr.bf16.gmra.mxu1 %v4834_v47  ;;  %3982 = vmatmul.mubr.bf16.gmra.mxu0 %v2121_v11 }
 0x105   : > { %4001 = vmatprep.mubr.bf16.mxu1 %v2412_v14  ;;  %4049 = vmatprep.mubr.bf16.mxu0 %v2718_v43  ;;  %v2415_v43 = vpack.c.bf16 %v2387_v41, %v2386_v40  ;;  %v2392_v40 = vld [vmem:[#allocation2 + $0xc1] sm:$0xff] }
 0x106   : > { %v4845_v1 = vpop.f32.mrf.mxu0  ;;  %v4847_v5 = vpop.f32.mrf.mxu1 }
 0x108   : > { %v4849_v44 = vpop.f32.mrf.mxu0  ;;  %v4851_v50 = vpop.f32.mrf.mxu1 }
 0x10a   : > { %v4853_v6 = vpop.f32.mrf.mxu0  ;;  %v4855_v25 = vpop.f32.mrf.mxu1 }
 0x10c   : > { %v3715_v26 = vpop.f32.mrf.mxu1  ;;  %v3763_v27 = vpop.f32.mrf.mxu0  ;;  %4002 = vmatmul.mubr.bf16.vlgmr.msra.gmra.mxu1 %v2413_v54  ;;  %4050 = vmatmul.mubr.bf16.vlgmr.msra.gmra.mxu0 %v2719_v58 }
 0x10d   : > { %v731_v42 = vadd.f32 %v3715_v26, %v4778_v8  ;;  %4005 = vmatprep.mubr.bf16.mxu1 %v2414_v62  ;;  %4053 = vmatprep.mubr.bf16.mxu0 %v2720_v2  ;;  %v2391_v62 = vld [vmem:[#allocation2 + $0xb1] sm:$0xff] }
 0x10e   : > { %v722_v36 = vpop.f32.mrf.mxu1  ;;  %v996_v37 = vpop.f32.mrf.mxu0 }
 0x10f   : > { %v4858_v0 = vadd.f32 %v3763_v27, %v731_v42  ;;  %v723_v10 = vadd.f32 %v722_v36, %v4786_v29  ;;  %v2390_v29 = vld [vmem:[#allocation2 + $0xa9] sm:$0xff]  ;;  %v2697_v27 = vld [vmem:[#allocation2 + $0xb2] sm:$0xff] }
 0x110   : > { %v3716_v11 = vpop.f32.mrf.mxu1  ;;  %v3764_v14 = vpop.f32.mrf.mxu0  ;;  %v2417_v48 = vpack.c.bf16 %v2391_v62, %v2390_v29  ;;  %v2396_v29 = vld [vmem:[#allocation2 + $0xf1] sm:$0xff] }
 0x111   : > { %v4861_v57 = vadd.f32 %v996_v37, %v723_v10  ;;  %v734_v8 = vadd.f32 %v3716_v11, %v4790_v32  ;;  %v2696_v32 = vld [vmem:[#allocation2 + $0xaa] sm:$0xff]  ;;  %v2418_v11 = vpack.c.bf16 %v2393_v45, %v2392_v40 }
 0x112   : > { %v725_v16 = vpop.f32.mrf.mxu1  ;;  %v999_v21 = vpop.f32.mrf.mxu0  ;;  %v2723_v51 = vpack.c.bf16 %v2697_v27, %v2696_v32  ;;  %v2397_v32 = vld [vmem:[#allocation2 + $0xf9] sm:$0xff] }
 0x113   : > { %v4864_v22 = vadd.f32 %v3764_v14, %v734_v8  ;;  %v726_v12 = vadd.f32 %v725_v16, %v4794_v56  ;;  %v2699_v56 = vld [vmem:[#allocation2 + $0xca] sm:$0xff]  ;;  %v2702_v27 = vld [vmem:[#allocation2 + $0xf2] sm:$0xff] }
 0x114   : > { %v3719_v54 = vpop.f32.mrf.mxu1  ;;  %v3767_v58 = vpop.f32.mrf.mxu0  ;;  %4006 = vmatmul.mubr.bf16.gmra.mxu1 %v2415_v43  ;;  %4054 = vmatmul.mubr.bf16.gmra.mxu0 %v2721_v55  ;;  %v2724_v14 = vpack.c.bf16 %v2699_v56, %v2698_v4 }
 0x115   : > { %v4867_v2 = vadd.f32 %v999_v21, %v726_v12  ;;  %v747_v26 = vadd.f32 %v3719_v54, %v4798_v60  ;;  %4009 = vmatprep.mubr.bf16.mxu1 %v2416_v61  ;;  %4057 = vmatprep.mubr.bf16.mxu0 %v2722_v15  ;;  %v2395_v21 = vld [vmem:[#allocation2 + $0xe1] sm:$0xff] }
 0x116   : > { %v738_v41 = vpop.f32.mrf.mxu1  ;;  %v1012_v42 = vpop.f32.mrf.mxu0 }
 0x117   : > { %v4870_v7 = vadd.f32 %v3767_v58, %v747_v26  ;;  %v739_v36 = vadd.f32 %v738_v41, %v4806_v17  ;;  %v2394_v17 = vld [vmem:[#allocation2 + $0xd9] sm:$0xff]  ;;  %v2701_v58 = vld [vmem:[#allocation2 + $0xe2] sm:$0xff] }
 0x118   : > { %v3720_v37 = vpop.f32.mrf.mxu1  ;;  %v3768_v38 = vpop.f32.mrf.mxu0  ;;  %v2419_v4 = vpack.c.bf16 %v2395_v21, %v2394_v17  ;;  %v2400_v17 = vld [vmem:[#allocation2 + $0x121] sm:$0xff] }
 0x119   : > { %v4873_v10 = vadd.f32 %v1012_v42, %v739_v36  ;;  %v750_v60 = vadd.f32 %v3720_v37, %v4810_v19  ;;  %v2700_v19 = vld [vmem:[#allocation2 + $0xda] sm:$0xff]  ;;  %v2420_v37 = vpack.c.bf16 %v2397_v32, %v2396_v29 }
 0x11a   : > { %v741_v43 = vpop.f32.mrf.mxu1  ;;  %v1015_v55 = vpop.f32.mrf.mxu0  ;;  %v2725_v56 = vpack.c.bf16 %v2701_v58, %v2700_v19  ;;  %v2401_v19 = vld [vmem:[#allocation2 + $0x129] sm:$0xff] }
 0x11b   : > { %v4876_v8 = vadd.f32 %v3768_v38, %v750_v60  ;;  %v742_v61 = vadd.f32 %v741_v43, %v4814_v28  ;;  %v2703_v28 = vld [vmem:[#allocation2 + $0xfa] sm:$0xff]  ;;  %v2706_v58 = vld [vmem:[#allocation2 + $0x122] sm:$0xff] }
 0x11c   : > { %v3723_v15 = vpop.f32.mrf.mxu1  ;;  %v3771_v16 = vpop.f32.mrf.mxu0  ;;  %4010 = vmatmul.mubr.bf16.gmra.mxu1 %v2417_v48  ;;  %4058 = vmatmul.mubr.bf16.gmra.mxu0 %v2723_v51  ;;  %v2726_v38 = vpack.c.bf16 %v2703_v28, %v2702_v27 }
 0x11d   : > { %v4879_v12 = vadd.f32 %v1015_v55, %v742_v61  ;;  %v763_v54 = vadd.f32 %v3723_v15, %v4818_v35  ;;  %4013 = vmatprep.mubr.bf16.mxu1 %v2418_v11  ;;  %4061 = vmatprep.mubr.bf16.mxu0 %v2724_v14  ;;  %v2399_v55 = vld [vmem:[#allocation2 + $0x111] sm:$0xff] }
 0x11e   : > { %v754_v62 = vpop.f32.mrf.mxu1  ;;  %v1028_v26 = vpop.f32.mrf.mxu0 }
 0x11f   : > { %v4882_v40 = vadd.f32 %v3771_v16, %v763_v54  ;;  %v755_v41 = vadd.f32 %v754_v62, %v4826_v39  ;;  %v2398_v39 = vld [vmem:[#allocation2 + $0x109] sm:$0xff]  ;;  %v2705_v16 = vld [vmem:[#allocation2 + $0x112] sm:$0xff] }
 0x120   : > { %v3724_v42 = vpop.f32.mrf.mxu1  ;;  %v3772_v45 = vpop.f32.mrf.mxu0  ;;  %v2421_v27 = vpack.c.bf16 %v2399_v55, %v2398_v39  ;;  %v2404_v39 = vld [vmem:[#allocation2 + $0x151] sm:$0xff] }
 0x121   : > { %v4885_v36 = vadd.f32 %v1028_v26, %v755_v41  ;;  %v766_v35 = vadd.f32 %v3724_v42, %v4830_v3  ;;  %v2704_v3 = vld [vmem:[#allocation2 + $0x10a] sm:$0xff]  ;;  %v2422_v42 = vpack.c.bf16 %v2401_v19, %v2400_v17 }
 0x122   : > { %v757_v48 = vpop.f32.mrf.mxu1  ;;  %v1031_v51 = vpop.f32.mrf.mxu0  ;;  %v2727_v28 = vpack.c.bf16 %v2705_v16, %v2704_v3  ;;  %v2405_v3 = vld [vmem:[#allocation2 + $0x159] sm:$0xff] }
 0x123   : > { %v4888_v60 = vadd.f32 %v3772_v45, %v766_v35  ;;  %v758_v11 = vadd.f32 %v757_v48, %v4836_v24  ;;  %v2707_v24 = vld [vmem:[#allocation2 + $0x12a] sm:$0xff]  ;;  %v2710_v16 = vld [vmem:[#allocation2 + $0x152] sm:$0xff] }
 0x124   : > { %v3727_v14 = vpop.f32.mrf.mxu1  ;;  %v3775_v43 = vpop.f32.mrf.mxu0  ;;  %4014 = vmatmul.mubr.bf16.gmra.mxu1 %v2419_v4  ;;  %4062 = vmatmul.mubr.bf16.gmra.mxu0 %v2725_v56  ;;  %v2728_v45 = vpack.c.bf16 %v2707_v24, %v2706_v58 }
 0x125   : > { %v4891_v61 = vadd.f32 %v1031_v51, %v758_v11  ;;  %v779_v15 = vadd.f32 %v3727_v14, %v4840_v53  ;;  %4017 = vmatprep.mubr.bf16.mxu1 %v2420_v37  ;;  %4065 = vmatprep.mubr.bf16.mxu0 %v2726_v38  ;;  %v2403_v51 = vld [vmem:[#allocation2 + $0x141] sm:$0xff] }
 0x126   : > { %v770_v21 = vpop.f32.mrf.mxu1  ;;  %v1044_v54 = vpop.f32.mrf.mxu0 }
 0x127   : > { %v4894_v29 = vadd.f32 %v3775_v43, %v779_v15  ;;  %v771_v62 = vadd.f32 %v770_v21, %v4845_v1  ;;  %v2402_v1 = vld [vmem:[#allocation2 + $0x139] sm:$0xff]  ;;  %v2709_v43 = vld [vmem:[#allocation2 + $0x142] sm:$0xff] }
 0x128   : > { %v3728_v26 = vpop.f32.mrf.mxu1  ;;  %v3776_v32 = vpop.f32.mrf.mxu0  ;;  %v2423_v58 = vpack.c.bf16 %v2403_v51, %v2402_v1 }
 0x129   : > { %v4897_v41 = vadd.f32 %v1044_v54, %v771_v62  ;;  %v782_v53 = vadd.f32 %v3728_v26, %v4849_v44  ;;  %v2708_v44 = vld [vmem:[#allocation2 + $0x13a] sm:$0xff]  ;;  %v2424_v26 = vpack.c.bf16 %v2405_v3, %v2404_v39 }
 0x12a   : > { %v773_v4 = vpop.f32.mrf.mxu1  ;;  %v1047_v56 = vpop.f32.mrf.mxu0  ;;  %v2729_v24 = vpack.c.bf16 %v2709_v43, %v2708_v44 }
 0x12b   : > { %v4900_v35 = vadd.f32 %v3776_v32, %v782_v53  ;;  %v774_v37 = vadd.f32 %v773_v4, %v4853_v6  ;;  %v2711_v6 = vld [vmem:[#allocation2 + $0x15a] sm:$0xff] }
 0x12c   : > { %v3731_v38 = vpop.f32.mrf.mxu1  ;;  %v3779_v48 = vpop.f32.mrf.mxu0  ;;  %4018 = vmatmul.mubr.bf16.gmra.mxu1 %v2421_v27  ;;  %4066 = vmatmul.mubr.bf16.gmra.mxu0 %v2727_v28  ;;  %v2730_v32 = vpack.c.bf16 %v2711_v6, %v2710_v16 }
 0x12d   : > { %v4903_v11 = vadd.f32 %v1047_v56, %v774_v37  ;;  %v795_v14 = vadd.f32 %v3731_v38, %v4780_v9  ;;  %4021 = vmatprep.mubr.bf16.mxu1 %v2422_v42  ;;  %4069 = vmatprep.mubr.bf16.mxu0 %v2728_v45  ;;  %v2712_v38 = vld [vmem:[#allocation2 + $0x16a] sm:$0xff] }
 0x12e   : > { %v786_v55 = vpop.f32.mrf.mxu1  ;;  %v1060_v15 = vpop.f32.mrf.mxu0 }
 0x12f   : > { %v4906_v17 = vadd.f32 %v3779_v48, %v795_v14  ;;  %v787_v21 = vadd.f32 %v786_v55, %v4788_v30  ;;  %v2406_v30 = vld [vmem:[#allocation2 + $0x169] sm:$0xff]  ;;  %v2713_v48 = vld [vmem:[#allocation2 + $0x172] sm:$0xff] }
 0x130   : > { %v3732_v54 = vpop.f32.mrf.mxu1  ;;  %v3780_v19 = vpop.f32.mrf.mxu0  ;;  %v2731_v55 = vpack.c.bf16 %v2713_v48, %v2712_v38 }
 0x131   : > { %v4909_v62 = vadd.f32 %v1060_v15, %v787_v21  ;;  %v798_v9 = vadd.f32 %v3732_v54, %v4792_v33  ;;  %v2407_v33 = vld [vmem:[#allocation2 + $0x171] sm:$0xff] }
 0x132   : > { %v789_v27 = vpop.f32.mrf.mxu1  ;;  %v1063_v28 = vpop.f32.mrf.mxu0  ;;  %v2425_v39 = vpack.c.bf16 %v2407_v33, %v2406_v30 }
 0x133   : > { %v4912_v53 = vadd.f32 %v3780_v19, %v798_v9  ;;  %v790_v42 = vadd.f32 %v789_v27, %v4796_v59  ;;  %v2716_v9 = vld [vmem:[#allocation2 + $0x19a] sm:$0xff] }
 0x134   : > { %v3735_v45 = vpop.f32.mrf.mxu1  ;;  %v3783_v4 = vpop.f32.mrf.mxu0  ;;  %4022 = vmatmul.mubr.bf16.gmra.mxu1 %v2423_v58  ;;  %4070 = vmatmul.mubr.bf16.gmra.mxu0 %v2729_v24  ;;  %v2410_v58 = vld [vmem:[#allocation2 + $0x199] sm:$0xff] }
 0x135   : > { %v4915_v56 = vadd.f32 %v1063_v28, %v790_v42  ;;  %v811_v37 = vadd.f32 %v3735_v45, %v4800_v63  ;;  %4025 = vmatprep.mubr.bf16.mxu1 %v2424_v26  ;;  %4073 = vmatprep.mubr.bf16.mxu0 %v2730_v32  ;;  %v2717_v26 = vld [vmem:[#allocation2 + $0x1a2] sm:$0xff] }
 0x136   : > { %v802_v1 = vpop.f32.mrf.mxu1  ;;  %v1076_v51 = vpop.f32.mrf.mxu0  ;;  %v2733_v30 = vpack.c.bf16 %v2717_v26, %v2716_v9 }
 0x137   : > { %v4918_v14 = vadd.f32 %v3783_v4, %v811_v37  ;;  %v803_v59 = vadd.f32 %v802_v1, %v4808_v18 }
 0x138   : > { %v3736_v44 = vpop.f32.mrf.mxu1  ;;  %v3784_v43 = vpop.f32.mrf.mxu0 }
 0x139   : > { %v4921_v15 = vadd.f32 %v1076_v51, %v803_v59  ;;  %v814_v3 = vadd.f32 %v3736_v44, %v4812_v23  ;;  %v2411_v23 = vld [vmem:[#allocation2 + $0x1a1] sm:$0xff] }
 0x13a   : > { %v805_v63 = vpop.f32.mrf.mxu1  ;;  %v1079_v16 = vpop.f32.mrf.mxu0  ;;  %v2427_v4 = vpack.c.bf16 %v2411_v23, %v2410_v58 }
 0x13b   : > { %v4924_v6 = vadd.f32 %v3784_v43, %v814_v3  ;;  %v806_v21 = vadd.f32 %v805_v63, %v4816_v34 }
 0x13c   : > { %v3739_v54 = vpop.f32.mrf.mxu1  ;;  %v3787_v19 = vpop.f32.mrf.mxu0  ;;  %4026 = vmatmul.mubr.bf16.gmra.mxu1 %v2425_v39  ;;  %4074 = vmatmul.mubr.bf16.gmra.mxu0 %v2731_v55 }
 0x13d   : > { %v4927_v18 = vadd.f32 %v1079_v16, %v806_v21  ;;  %v827_v24 = vadd.f32 %v3739_v54, %v4820_v20  ;;  %4029 = vmatprep.mubr.bf16.mxu1 %v4572_v31  ;;  %4077 = vmatprep.mubr.bf16.mxu0 %v4834_v47 }
 0x13e   : > { %v818_v32 = vpop.f32.mrf.mxu1  ;;  %v1092_v27 = vpop.f32.mrf.mxu0 }
 0x13f   : > { %v4932_v28 = vadd.f32 %v3787_v19, %v827_v24  ;;  %v819_v34 = vadd.f32 %v818_v32, %v4828_v46 }
 0x140   : > { %v3740_v42 = vpop.f32.mrf.mxu1  ;;  %v3788_v45 = vpop.f32.mrf.mxu0 }
 0x141   : > { %v4935_v37 = vadd.f32 %v1092_v27, %v819_v34  ;;  %v830_v20 = vadd.f32 %v3740_v42, %v4832_v13 }
 0x142   : > { %v821_v31 = vpop.f32.mrf.mxu1  ;;  %v1095_v33 = vpop.f32.mrf.mxu0 }
 0x143   : > { %v4938_v47 = vadd.f32 %v3788_v45, %v830_v20  ;;  %v822_v38 = vadd.f32 %v821_v31, %v4838_v49 }
 0x144   : > { %v3743_v48 = vpop.f32.mrf.mxu1  ;;  %v3791_v1 = vpop.f32.mrf.mxu0  ;;  %4030 = vmatmul.mubr.bf16.gmra.mxu1 %v2427_v4  ;;  %4078 = vmatmul.mubr.bf16.gmra.mxu0 %v2733_v30 }
 0x145   : > { %v4941_v51 = vadd.f32 %v1095_v33, %v822_v38  ;;  %v843_v46 = vadd.f32 %v3743_v48, %v4842_v52 }
 0x146   : > { %v834_v59 = vpop.f32.mrf.mxu1  ;;  %v1108_v44 = vpop.f32.mrf.mxu0 }
 0x147   : > { %v4944_v43 = vadd.f32 %v3791_v1, %v843_v46  ;;  %v835_v13 = vadd.f32 %v834_v59, %v4847_v5 }
 0x148   : > { %v3744_v39 = vpop.f32.mrf.mxu1  ;;  %v3792_v55 = vpop.f32.mrf.mxu0 }
 0x149   : > { %v4947_v3 = vadd.f32 %v1108_v44, %v835_v13  ;;  %v846_v49 = vadd.f32 %v3744_v39, %v4851_v50 }
 0x14a   : > { %v837_v63 = vpop.f32.mrf.mxu1  ;;  %v1111_v16 = vpop.f32.mrf.mxu0 }
 0x14b   : > { %v4950_v21 = vadd.f32 %v3792_v55, %v846_v49  ;;  %v838_v54 = vadd.f32 %v837_v63, %v4855_v25 }
 0x14c   : > { %v3811_v19 = vpop.f32.mrf.mxu1  ;;  %v3859_v52 = vpop.f32.mrf.mxu0 }
 0x14d   : > { %v4953_v58 = vadd.f32 %v1111_v16, %v838_v54  ;;  %v1431_v24 = vadd.f32 %v3811_v19, %v4858_v0 }
 0x14e   : > { %v1302_v23 = vpop.f32.mrf.mxu1  ;;  %v1608_v5 = vpop.f32.mrf.mxu0 }
 0x14f   : > { %v4956_v9 = vadd.f32 %v3859_v52, %v1431_v24  ;;  %v1429_v26 = vadd.f32 %v1302_v23, %v4861_v57 }
 0x150   : > { %v3812_v32 = vpop.f32.mrf.mxu1  ;;  %v3860_v50 = vpop.f32.mrf.mxu0 }
 0x151   : > { %v4959_v27 = vadd.f32 %v1608_v5, %v1429_v26  ;;  %v1432_v34 = vadd.f32 %v3812_v32, %v4864_v22 }
 0x152   : > { %v1305_v42 = vpop.f32.mrf.mxu1  ;;  %v1611_v25 = vpop.f32.mrf.mxu0 }
 0x153   : > { %v4962_v45 = vadd.f32 %v3860_v50, %v1432_v34  ;;  %v1430_v4 = vadd.f32 %v1305_v42, %v4867_v2 }
 0x154   : > { %v3815_v30 = vpop.f32.mrf.mxu1  ;;  %v3863_v0 = vpop.f32.mrf.mxu0 }
 0x155   : > { %v4965_v20 = vadd.f32 %v1611_v25, %v1430_v4  ;;  %v1435_v31 = vadd.f32 %v3815_v30, %v4870_v7 }
 0x156   : > { %v1318_v33 = vpop.f32.mrf.mxu1  ;;  %v1624_v57 = vpop.f32.mrf.mxu0 }
 0x157   : > { %v4968_v38 = vadd.f32 %v3863_v0, %v1435_v31  ;;  %v1433_v48 = vadd.f32 %v1318_v33, %v4873_v10 }
 0x158   : > { %v3816_v1 = vpop.f32.mrf.mxu1  ;;  %v3864_v22 = vpop.f32.mrf.mxu0 }
 0x159   : > { %v4971_v46 = vadd.f32 %v1624_v57, %v1433_v48  ;;  %v1436_v59 = vadd.f32 %v3816_v1, %v4876_v8 }
 0x15a   : > { %v1321_v44 = vpop.f32.mrf.mxu1  ;;  %v1627_v2 = vpop.f32.mrf.mxu0 }
 0x15b   : > { %v4974_v13 = vadd.f32 %v3864_v22, %v1436_v59  ;;  %v1434_v39 = vadd.f32 %v1321_v44, %v4879_v12 }
 0x15c   : > { %v3819_v55 = vpop.f32.mrf.mxu1  ;;  %v3867_v7 = vpop.f32.mrf.mxu0 }
 0x15d   : > { %v4977_v49 = vadd.f32 %v1627_v2, %v1434_v39  ;;  %v1439_v63 = vadd.f32 %v3819_v55, %v4882_v40 }
 0x15e   : > { %v1334_v16 = vpop.f32.mrf.mxu1  ;;  %v1640_v10 = vpop.f32.mrf.mxu0 }
 0x15f   : > { %v4980_v54 = vadd.f32 %v3867_v7, %v1439_v63  ;;  %v1437_v19 = vadd.f32 %v1334_v16, %v4885_v36 }
 0x160   : > { %v3820_v52 = vpop.f32.mrf.mxu1  ;;  %v3868_v8 = vpop.f32.mrf.mxu0 }
 0x161   : > { %v4983_v24 = vadd.f32 %v1640_v10, %v1437_v19  ;;  %v1440_v23 = vadd.f32 %v3820_v52, %v4888_v60 }
 0x162   : > { %v1337_v5 = vpop.f32.mrf.mxu1  ;;  %v1643_v12 = vpop.f32.mrf.mxu0 }
 0x163   : > { %v4986_v26 = vadd.f32 %v3868_v8, %v1440_v23  ;;  %v1438_v32 = vadd.f32 %v1337_v5, %v4891_v61 }
 0x164   : > { %v3823_v50 = vpop.f32.mrf.mxu1  ;;  %v3871_v40 = vpop.f32.mrf.mxu0 }
 0x165   : > { %v4989_v34 = vadd.f32 %v1643_v12, %v1438_v32  ;;  %v1443_v42 = vadd.f32 %v3823_v50, %v4894_v29 }
 0x166   : > { %v1350_v25 = vpop.f32.mrf.mxu1  ;;  %v1656_v36 = vpop.f32.mrf.mxu0 }
 0x167   : > { %v4992_v4 = vadd.f32 %v3871_v40, %v1443_v42  ;;  %v1441_v30 = vadd.f32 %v1350_v25, %v4897_v41 }
 0x168   : > { %v3824_v0 = vpop.f32.mrf.mxu1  ;;  %v3872_v60 = vpop.f32.mrf.mxu0 }
 0x169   : > { %v4995_v31 = vadd.f32 %v1656_v36, %v1441_v30  ;;  %v1444_v33 = vadd.f32 %v3824_v0, %v4900_v35 }
 0x16a   : > { %v1353_v57 = vpop.f32.mrf.mxu1  ;;  %v1659_v61 = vpop.f32.mrf.mxu0 }
 0x16b   : > { %v4998_v48 = vadd.f32 %v3872_v60, %v1444_v33  ;;  %v1442_v1 = vadd.f32 %v1353_v57, %v4903_v11 }
 0x16c   : > { %v3827_v22 = vpop.f32.mrf.mxu1  ;;  %v3875_v29 = vpop.f32.mrf.mxu0 }
 0x16d   : > { %v5001_v59 = vadd.f32 %v1659_v61, %v1442_v1  ;;  %v1447_v44 = vadd.f32 %v3827_v22, %v4906_v17 }
 0x16e   : > { %v1366_v2 = vpop.f32.mrf.mxu1  ;;  %v1672_v41 = vpop.f32.mrf.mxu0 }
 0x16f   : > { %v5004_v39 = vadd.f32 %v3875_v29, %v1447_v44  ;;  %v1445_v55 = vadd.f32 %v1366_v2, %v4909_v62 }
 0x170   : > { %v3828_v7 = vpop.f32.mrf.mxu1  ;;  %v3876_v35 = vpop.f32.mrf.mxu0 }
 0x171   : > { %v5007_v63 = vadd.f32 %v1672_v41, %v1445_v55  ;;  %v1448_v16 = vadd.f32 %v3828_v7, %v4912_v53 }
 0x172   : > { %v1369_v10 = vpop.f32.mrf.mxu1  ;;  %v1675_v11 = vpop.f32.mrf.mxu0 }
 0x173   : > { %v5010_v19 = vadd.f32 %v3876_v35, %v1448_v16  ;;  %v1446_v52 = vadd.f32 %v1369_v10, %v4915_v56 }
 0x174   : > { %v3831_v8 = vpop.f32.mrf.mxu1  ;;  %v3879_v17 = vpop.f32.mrf.mxu0 }
 0x175   : > { %5319 = vst [vmem:[#allocation3_spill] sm:$0xff] %v5010_v19  ;;  %v5013_v23 = vadd.f32 %v1675_v11, %v1446_v52  ;;  %v1451_v5 = vadd.f32 %v3831_v8, %v4918_v14 }
 0x176   : > { %v1382_v12 = vpop.f32.mrf.mxu1  ;;  %v1688_v62 = vpop.f32.mrf.mxu0 }
 0x177   : > { %5320 = vst [vmem:[#allocation4_spill] sm:$0xff] %v5013_v23  ;;  %v5016_v32 = vadd.f32 %v3879_v17, %v1451_v5  ;;  %v1449_v50 = vadd.f32 %v1382_v12, %v4921_v15 }
 0x178   : > { %v3832_v40 = vpop.f32.mrf.mxu1  ;;  %v3880_v53 = vpop.f32.mrf.mxu0 }
 0x179   : > { %5321 = vst [vmem:[#allocation5_spill] sm:$0xff] %v5016_v32  ;;  %v5019_v42 = vadd.f32 %v1688_v62, %v1449_v50  ;;  %v1452_v25 = vadd.f32 %v3832_v40, %v4924_v6 }
 0x17a   : > { %v1385_v36 = vpop.f32.mrf.mxu1  ;;  %v1691_v56 = vpop.f32.mrf.mxu0 }
 0x17b   : > { %5322 = vst [vmem:[#allocation6_spill] sm:$0xff] %v5019_v42  ;;  %v5022_v30 = vadd.f32 %v3880_v53, %v1452_v25  ;;  %v1450_v0 = vadd.f32 %v1385_v36, %v4927_v18 }
 0x17c   : > { %v3835_v60 = vpop.f32.mrf.mxu1  ;;  %v3883_v14 = vpop.f32.mrf.mxu0 }
 0x17d   : > { %5323 = vst [vmem:[#allocation7_spill] sm:$0xff] %v5022_v30  ;;  %v5025_v33 = vadd.f32 %v1691_v56, %v1450_v0  ;;  %v1455_v57 = vadd.f32 %v3835_v60, %v4932_v28 }
 0x17e   : > { %v1398_v61 = vpop.f32.mrf.mxu1  ;;  %v1704_v15 = vpop.f32.mrf.mxu0 }
 0x17f   : > { %5324 = vst [vmem:[#allocation8_spill] sm:$0xff] %v5025_v33  ;;  %v5028_v1 = vadd.f32 %v3883_v14, %v1455_v57  ;;  %v1453_v22 = vadd.f32 %v1398_v61, %v4935_v37 }
 0x180   : > { %v3836_v29 = vpop.f32.mrf.mxu1  ;;  %v3884_v6 = vpop.f32.mrf.mxu0 }
 0x181   : > { %5325 = vst [vmem:[#allocation9_spill] sm:$0xff] %v5028_v1  ;;  %v5031_v44 = vadd.f32 %v1704_v15, %v1453_v22  ;;  %v1456_v2 = vadd.f32 %v3836_v29, %v4938_v47 }
 0x182   : > { %v1401_v41 = vpop.f32.mrf.mxu1  ;;  %v1707_v18 = vpop.f32.mrf.mxu0 }
 0x183   : > { %5326 = vst [vmem:[#allocation10_spill] sm:$0xff] %v5031_v44  ;;  %v5034_v55 = vadd.f32 %v3884_v6, %v1456_v2  ;;  %v1454_v7 = vadd.f32 %v1401_v41, %v4941_v51 }
 0x184   : > { %v3839_v35 = vpop.f32.mrf.mxu1  ;;  %v3887_v28 = vpop.f32.mrf.mxu0 }
 0x185   : > { %5327 = vst [vmem:[#allocation11_spill] sm:$0xff] %v5034_v55  ;;  %v5037_v16 = vadd.f32 %v1707_v18, %v1454_v7  ;;  %v1459_v10 = vadd.f32 %v3839_v35, %v4944_v43 }
 0x186   : > { %v1414_v11 = vpop.f32.mrf.mxu1  ;;  %v1720_v37 = vpop.f32.mrf.mxu0 }
 0x187   : > { %5328 = vst [vmem:[#allocation12_spill] sm:$0xff] %v5037_v16  ;;  %v5040_v52 = vadd.f32 %v3887_v28, %v1459_v10  ;;  %v1457_v8 = vadd.f32 %v1414_v11, %v4947_v3 }
 0x188   : > { %v3840_v17 = vpop.f32.mrf.mxu1  ;;  %v3888_v47 = vpop.f32.mrf.mxu0 }
 0x189   : > { %5329 = vst [vmem:[#allocation13_spill] sm:$0xff] %v5040_v52  ;;  %v5043_v5 = vadd.f32 %v1720_v37, %v1457_v8  ;;  %v1460_v12 = vadd.f32 %v3840_v17, %v4950_v21 }
 0x18a   : > { %v1417_v62 = vpop.f32.mrf.mxu1  ;;  %v1723_v51 = vpop.f32.mrf.mxu0 }
 0x18b   : > { %5330 = vst [vmem:[#allocation14_spill] sm:$0xff] %v5043_v5  ;;  %v5046_v50 = vadd.f32 %v3888_v47, %v1460_v12  ;;  %v1458_v40 = vadd.f32 %v1417_v62, %v4953_v58 }
 0x18c   : > { %v3907_v53 = vpop.f32.mrf.mxu1  ;;  %v5049_v43 = vpop.f32.mrf.mxu0 }
 0x18d   : > { %5331 = vst [vmem:[#allocation15_spill] sm:$0xff] %v5046_v50  ;;  %v5051_v25 = vadd.f32 %v1723_v51, %v1458_v40 }
 0x18e   : > { %v1914_v36 = vpop.f32.mrf.mxu1  ;;  %v5053_v56 = vpop.f32.mrf.mxu0 }
 0x18f   : > { %5332 = vst [vmem:[#allocation16_spill] sm:$0xff] %v5051_v25 }
 0x190   : > { %v5055_v3 = vpop.f32.mrf.mxu1  ;;  %v5057_v0 = vpop.f32.mrf.mxu0 }
 0x192   : > { %v5059_v60 = vpop.f32.mrf.mxu1  ;;  %v5061_v21 = vpop.f32.mrf.mxu0 }
 0x194   : > { %v5063_v14 = vpop.f32.mrf.mxu1  ;;  %v5065_v57 = vpop.f32.mrf.mxu0 }
 0x196   : > { %v5067_v58 = vpop.f32.mrf.mxu1  ;;  %v5069_v61 = vpop.f32.mrf.mxu0 }
 0x198   : > { %v5071_v15 = vpop.f32.mrf.mxu1  ;;  %v5073_v22 = vpop.f32.mrf.mxu0 }
 0x19a   : > { %v5075_v29 = vpop.f32.mrf.mxu1  ;;  %v5077_v6 = vpop.f32.mrf.mxu0 }
 0x19c   : > { %v5079_v2 = vpop.f32.mrf.mxu1  ;;  %v5081_v41 = vpop.f32.mrf.mxu0 }
 0x19e   : > { %v5083_v18 = vpop.f32.mrf.mxu1  ;;  %v5085_v7 = vpop.f32.mrf.mxu0 }
 0x1a0   : > { %v5087_v35 = vpop.f32.mrf.mxu1  ;;  %v5089_v28 = vpop.f32.mrf.mxu0 }
 0x1a2   : > { %v5091_v10 = vpop.f32.mrf.mxu1  ;;  %v5093_v11 = vpop.f32.mrf.mxu0 }
 0x1a4   : > { %v5095_v37 = vpop.f32.mrf.mxu1  ;;  %v5097_v8 = vpop.f32.mrf.mxu0 }
 0x1a6   : > { %v5099_v17 = vpop.f32.mrf.mxu1  ;;  %v5101_v47 = vpop.f32.mrf.mxu0 }
 0x1a8   : > { %v5103_v12 = vpop.f32.mrf.mxu1  ;;  %v5105_v62 = vpop.f32.mrf.mxu0 }
 0x1aa   : > { %v5107_v51 = vpop.f32.mrf.mxu1  ;;  %v5109_v40 = vpop.f32.mrf.mxu0 }
 0x1ac   : > { %v5111_v25 = vpop.f32.mrf.mxu1  ;;  %v5113_v50 = vpop.f32.mrf.mxu0 }
 0x1ae   : > { %v5115_v5 = vpop.f32.mrf.mxu1  ;;  %v5117_v52 = vpop.f32.mrf.mxu0 }
 0x1af   : > { %5333 = vst [vmem:[#allocation17_spill] sm:$0xff] %v5117_v52 }
 0x1b0   : > { %v5119_v16 = vpop.f32.mrf.mxu1  ;;  %v5121_v55 = vpop.f32.mrf.mxu0 }
 0x1b1   : > { %5334 = vst [vmem:[#allocation18_spill] sm:$0xff] %v5119_v16  ;;  %5335 = vst [vmem:[#allocation19_spill] sm:$0xff] %v5121_v55 }
 0x1b2   : > { %v5123_v44 = vpop.f32.mrf.mxu1  ;;  %v5125_v1 = vpop.f32.mrf.mxu0 }
 0x1b3   : > { %5336 = vst [vmem:[#allocation20_spill] sm:$0xff] %v5123_v44  ;;  %5337 = vst [vmem:[#allocation21_spill] sm:$0xff] %v5125_v1 }
 0x1b4   : > { %v5127_v33 = vpop.f32.mrf.mxu1  ;;  %v5129_v30 = vpop.f32.mrf.mxu0 }
 0x1b5   : > { %5338 = vst [vmem:[#allocation22_spill] sm:$0xff] %v5127_v33  ;;  %5339 = vst [vmem:[#allocation23_spill] sm:$0xff] %v5129_v30 }
 0x1b6   : > { %v5131_v42 = vpop.f32.mrf.mxu1  ;;  %v5133_v32 = vpop.f32.mrf.mxu0 }
 0x1b7   : > { %5340 = vst [vmem:[#allocation24_spill] sm:$0xff] %v5131_v42  ;;  %5341 = vst [vmem:[#allocation25_spill] sm:$0xff] %v5133_v32 }
 0x1b8   : > { %v5135_v23 = vpop.f32.mrf.mxu1  ;;  %v5137_v19 = vpop.f32.mrf.mxu0 }
 0x1b9   : > { %5342 = vst [vmem:[#allocation26_spill] sm:$0xff] %v5135_v23  ;;  %5343 = vst [vmem:[#allocation27_spill] sm:$0xff] %v5137_v19 }
 0x1ba   : > { %v5139_v52 = vpop.f32.mrf.mxu1  ;;  %v5141_v16 = vpop.f32.mrf.mxu0 }
 0x1bb   : > { %5344 = vst [vmem:[#allocation28_spill] sm:$0xff] %v5139_v52  ;;  %5345 = vst [vmem:[#allocation29_spill] sm:$0xff] %v5141_v16 }
 0x1bc   : > { %v5143_v55 = vpop.f32.mrf.mxu1  ;;  %v5145_v44 = vpop.f32.mrf.mxu0 }
 0x1bd   : > { %5346 = vst [vmem:[#allocation30_spill] sm:$0xff] %v5143_v55  ;;  %5347 = vst [vmem:[#allocation31_spill] sm:$0xff] %v5145_v44 }
 0x1be   : > { %v5147_v1 = vpop.f32.mrf.mxu1  ;;  %v5149_v33 = vpop.f32.mrf.mxu0 }
 0x1bf   : > { %5348 = vst [vmem:[#allocation32_spill] sm:$0xff] %v5147_v1  ;;  %5349 = vst [vmem:[#allocation33_spill] sm:$0xff] %v5149_v33  ;;  %v2043_v1 = vadd.f32 %v3907_v53, %v4956_v9  ;;  %v2042_v9 = vadd.f32 %v5059_v60, %v4965_v20  ;;  %v2045_v20 = vadd.f32 %v5067_v58, %v4971_v46 }
 0x1c0   : > { %v5151_v30 = vpop.f32.mrf.mxu1  ;;  %v5153_v42 = vpop.f32.mrf.mxu0 }
 0x1c1   : > { %5350 = vst [vmem:[#allocation34_spill] sm:$0xff] %v5151_v30  ;;  %5351 = vst [vmem:[#allocation35_spill] sm:$0xff] %v5153_v42  ;;  %v2041_v42 = vadd.f32 %v1914_v36, %v4959_v27  ;;  %v2047_v27 = vadd.f32 %v5063_v14, %v4968_v38  ;;  %v2349_v38 = vadd.f32 %v5061_v21, %v2042_v9 }
 0x1c2   : > { %v5155_v32 = vpop.f32.mrf.mxu1  ;;  %v5157_v23 = vpop.f32.mrf.mxu0  ;;  %v2048_v14 = vadd.f32 %v5071_v15, %v4974_v13  ;;  %v2352_v21 = vadd.f32 %v5069_v61, %v2045_v20 }
 0x1c3   : > { %5352 = vst [vmem:[#allocation36_spill] sm:$0xff] %v5155_v32  ;;  %5353 = vst [vmem:[#allocation37_spill] sm:$0xff] %v5157_v23  ;;  %v2354_v60 = vadd.f32 %v5065_v57, %v2047_v27 }
 0x1c4   : > { %v5159_v19 = vpop.f32.mrf.mxu1  ;;  %v5161_v52 = vpop.f32.mrf.mxu0  ;;  %v2355_v15 = vadd.f32 %v5073_v22, %v2048_v14 }
 0x1c5   : > { %5354 = vst [vmem:[#allocation38_spill] sm:$0xff] %v5159_v19  ;;  %5355 = vst [vmem:[#allocation39_spill] sm:$0xff] %v5161_v52  ;;  %v2350_v19 = vadd.f32 %v5049_v43, %v2043_v1  ;;  %v2044_v52 = vadd.f32 %v5055_v3, %v4962_v45 }
 0x1c6   : > { %v5163_v16 = vpop.f32.mrf.mxu1  ;;  %v5165_v44 = vpop.f32.mrf.mxu0 }
 0x1c7   : > { %5356 = vst [vmem:[#allocation40_spill] sm:$0xff] %v5163_v16  ;;  %5357 = vst [vmem:[#allocation41_spill] sm:$0xff] %v5165_v44  ;;  %v2348_v44 = vadd.f32 %v5053_v56, %v2041_v42  ;;  %v2351_v43 = vadd.f32 %v5057_v0, %v2044_v52 }
 0x1c8   : > { %v5168_v33 = vpop.f32.mrf.mxu1  ;;  %v5170_v30 = vpop.f32.mrf.mxu0 }
 0x1ca   : > { %v5173_v32 = vpop.f32.mrf.mxu1  ;;  %v5175_v23 = vpop.f32.mrf.mxu0 }
 0x1cb   : > { %5358 = vst [vmem:[#allocation42_spill] sm:$0xff] %v5175_v23 }
 0x1cc   : > { %v4003_v16 = vpop.f32.mrf.mxu1  ;;  %v4051_v55 = vpop.f32.mrf.mxu0 }
 0x1cd   : > { %v2656_v53 = vadd.f32 %v4003_v16, %v2350_v19 }
 0x1ce   : > { %v2527_v1 = vpop.f32.mrf.mxu1  ;;  %v2833_v45 = vpop.f32.mrf.mxu0 }
 0x1cf   : > { %v2962_v42 = vadd.f32 %v4051_v55, %v2656_v53  ;;  %v2654_v36 = vadd.f32 %v2527_v1, %v2348_v44  ;;  %v2046_v1 = vadd.f32 %v5075_v29, %v4977_v49  ;;  %v2049_v49 = vadd.f32 %v5083_v18, %v4983_v24 }
 0x1d0   : > { %v4004_v19 = vpop.f32.mrf.mxu1  ;;  %v4052_v16 = vpop.f32.mrf.mxu0 }
 0x1d1   : > { %2994 = vst [vmem:[%s5190_s22 + $0x10] sm:$0xff] %v2962_v42  ;;  %v2960_v56 = vadd.f32 %v2833_v45, %v2654_v36  ;;  %v2657_v3 = vadd.f32 %v4004_v19, %v2351_v43  ;;  %v3063_v23 = vmul.f32 %v2962_v42, %v2962_v42  ;;  %v2051_v45 = vadd.f32 %v5079_v2, %v4980_v54 }
 0x1d2   : > { %v2530_v52 = vpop.f32.mrf.mxu1  ;;  %v2836_v55 = vpop.f32.mrf.mxu0 }
 0x1d3   : > { %2992 = vst [vmem:[%s5190_s22] sm:$0xff] %v2960_v56  ;;  %v3024_v44 = vadd.f32 %v2962_v42, %v2960_v56  ;;  %v3061_v0 = vmul.f32 %v2960_v56, %v2960_v56  ;;  %v2963_v46 = vadd.f32 %v4052_v16, %v2657_v3  ;;  %v2655_v58 = vadd.f32 %v2530_v52, %v2349_v38 }
 0x1d4   : > { %v4007_v9 = vpop.f32.mrf.mxu1  ;;  %v4055_v53 = vpop.f32.mrf.mxu0  ;;  %v2353_v38 = vadd.f32 %v5077_v6, %v2046_v1  ;;  %v2358_v2 = vadd.f32 %v5081_v41, %v2051_v45  ;;  %v2052_v3 = vadd.f32 %v5087_v35, %v4986_v26  ;;  %v2356_v6 = vadd.f32 %v5085_v7, %v2049_v49 }
 0x1d5   : > { %v3093_v57 = vadd.f32 %v3063_v23, %v3061_v0  ;;  %2995 = vst [vmem:[%s5190_s22 + $0x18] sm:$0xff] %v2963_v46  ;;  %v2961_v27 = vadd.f32 %v2836_v55, %v2655_v58  ;;  %v2660_v13 = vadd.f32 %v4007_v9, %v2354_v60  ;;  %v3064_v43 = vmul.f32 %v2963_v46, %v2963_v46 }
 0x1d6   : > { %v2543_v42 = vpop.f32.mrf.mxu1  ;;  %v2849_v36 = vpop.f32.mrf.mxu0  ;;  %v2050_v58 = vadd.f32 %v5091_v10, %v4989_v34  ;;  %v2359_v26 = vadd.f32 %v5089_v28, %v2052_v3  ;;  %v2055_v35 = vadd.f32 %v5095_v37, %v4992_v4  ;;  %v2053_v34 = vadd.f32 %v5099_v17, %v4995_v31 }
 0x1d7   : > { %2993 = vst [vmem:[%s5190_s22 + $0x8] sm:$0xff] %v2961_v27  ;;  %v3039_v61 = vadd.f32 %v2963_v46, %v2961_v27  ;;  %v3062_v20 = vmul.f32 %v2961_v27, %v2961_v27  ;;  %v2966_v19 = vadd.f32 %v4055_v53, %v2660_v13  ;;  %v2658_v16 = vadd.f32 %v2543_v42, %v2352_v21 }
 0x1d8   : > { %v4008_v23 = vpop.f32.mrf.mxu1  ;;  %v4056_v29 = vpop.f32.mrf.mxu0  ;;  %v2059_v3 = vadd.f32 %v5111_v25, %v5004_v39 }
 0x1d9   : > { %v3108_v22 = vadd.f32 %v3064_v43, %v3062_v20  ;;  %2998 = vst [vmem:[%s5190_s22 + $0x30] sm:$0xff] %v2966_v19  ;;  %v2964_v56 = vadd.f32 %v2849_v36, %v2658_v16  ;;  %v2661_v54 = vadd.f32 %v4008_v23, %v2355_v15  ;;  %v2357_v43 = vadd.f32 %v5093_v11, %v2050_v58 }
 0x1da   : > { %v2546_v60 = vpop.f32.mrf.mxu1  ;;  %v2852_v14 = vpop.f32.mrf.mxu0  ;;  %v2362_v36 = vadd.f32 %v5097_v8, %v2055_v35  ;;  %v2360_v11 = vadd.f32 %v5101_v47, %v2053_v34  ;;  %v2054_v8 = vadd.f32 %v5107_v51, %v5001_v59  ;;  %v2057_v59 = vadd.f32 %v5115_v5, %v5007_v63 }
 0x1db   : > { %2996 = vst [vmem:[%s5190_s22 + $0x20] sm:$0xff] %v2964_v56  ;;  %v3025_v52 = vadd.f32 %v3024_v44, %v2964_v56  ;;  %v3065_v55 = vmul.f32 %v2964_v56, %v2964_v56  ;;  %v2967_v24 = vadd.f32 %v4056_v29, %v2661_v54  ;;  %v2659_v18 = vadd.f32 %v2546_v60, %v2353_v38 }
 0x1dc   : > { %v4011_v0 = vpop.f32.mrf.mxu1  ;;  %v4059_v46 = vpop.f32.mrf.mxu0  ;;  %v3067_v44 = vmul.f32 %v2966_v19, %v2966_v19 }
 0x1dd   : > { %v3094_v21 = vadd.f32 %v3093_v57, %v3065_v55  ;;  %2999 = vst [vmem:[%s5190_s22 + $0x38] sm:$0xff] %v2967_v24  ;;  %v2965_v41 = vadd.f32 %v2852_v14, %v2659_v18  ;;  %v2664_v9 = vadd.f32 %v4011_v0, %v2358_v2  ;;  %v3026_v27 = vadd.f32 %v3025_v52, %v2966_v19 }
 0x1de   : > { %v2559_v53 = vpop.f32.mrf.mxu1  ;;  %v2865_v1 = vpop.f32.mrf.mxu0  ;;  %v3068_v20 = vmul.f32 %v2967_v24, %v2967_v24 }
 0x1df   : > { %2997 = vst [vmem:[%s5190_s22 + $0x28] sm:$0xff] %v2965_v41  ;;  %v3040_v7 = vadd.f32 %v3039_v61, %v2965_v41  ;;  %v3066_v13 = vmul.f32 %v2965_v41, %v2965_v41  ;;  %v2970_v15 = vadd.f32 %v4059_v46, %v2664_v9  ;;  %v2662_v45 = vadd.f32 %v2559_v53, %v2356_v6  ;;  %v5359_v41 = vld [vmem:[#allocation3_spill] sm:$0xff]  ;;  %v5360_v9 = vld [vmem:[#allocation18_spill] sm:$0xff] }
 0x1e0   : > { %v3095_v10 = vadd.f32 %v3094_v21, %v3067_v44  ;;  %v4012_v57 = vpop.f32.mrf.mxu1  ;;  %v4060_v28 = vpop.f32.mrf.mxu0  ;;  %v2056_v61 = vadd.f32 %v5103_v12, %v4998_v48  ;;  %v2361_v46 = vadd.f32 %v5109_v40, %v2054_v8  ;;  %v2366_v21 = vadd.f32 %v5113_v50, %v2059_v3  ;;  %v5361_v40 = vld [vmem:[#allocation17_spill] sm:$0xff]  ;;  %v5362_v50 = vld [vmem:[#allocation4_spill] sm:$0xff] }
 0x1e1   : > { %v3109_v4 = vadd.f32 %v3108_v22, %v3066_v13  ;;  %3002 = vst [vmem:[%s5190_s22 + $0x50] sm:$0xff] %v2970_v15  ;;  %v2968_v37 = vadd.f32 %v2865_v1, %v2662_v45  ;;  %v2665_v42 = vadd.f32 %v4012_v57, %v2359_v26  ;;  %v3041_v49 = vadd.f32 %v3040_v7, %v2967_v24 }
 0x1e2   : > { %v2562_v19 = vpop.f32.mrf.mxu1  ;;  %v2868_v16 = vpop.f32.mrf.mxu0  ;;  %v2363_v2 = vadd.f32 %v5105_v62, %v2056_v61  ;;  %v3071_v60 = vmul.f32 %v2970_v15, %v2970_v15  ;;  %v2060_v26 = vadd.f32 %v5360_v9, %v5359_v41  ;;  %v2364_v13 = vadd.f32 %v5361_v40, %v2057_v59  ;;  %v5366_v61 = vld [vmem:[#allocation22_spill] sm:$0xff]  ;;  %v5377_v40 = vld [vmem:[#allocation9_spill] sm:$0xff] }
 0x1e3   : > { %3000 = vst [vmem:[%s5190_s22 + $0x40] sm:$0xff] %v2968_v37  ;;  %v3027_v31 = vadd.f32 %v3026_v27, %v2968_v37  ;;  %v3069_v17 = vmul.f32 %v2968_v37, %v2968_v37  ;;  %v2971_v23 = vadd.f32 %v4060_v28, %v2665_v42  ;;  %v2663_v29 = vadd.f32 %v2562_v19, %v2357_v43  ;;  %v5364_v37 = vld [vmem:[#allocation19_spill] sm:$0xff] }
 0x1e4   : > { %v3110_v38 = vadd.f32 %v3109_v4, %v3068_v20  ;;  %v4015_v22 = vpop.f32.mrf.mxu1  ;;  %v4063_v56 = vpop.f32.mrf.mxu0  ;;  %v2367_v42 = vadd.f32 %v5364_v37, %v2060_v26  ;;  %v5379_v37 = vld [vmem:[#allocation10_spill] sm:$0xff] }
 0x1e5   : > { %v3096_v48 = vadd.f32 %v3095_v10, %v3069_v17  ;;  %3003 = vst [vmem:[%s5190_s22 + $0x58] sm:$0xff] %v2971_v23  ;;  %v2969_v12 = vadd.f32 %v2868_v16, %v2663_v29  ;;  %v2668_v54 = vadd.f32 %v4015_v22, %v2362_v36  ;;  %v3028_v47 = vadd.f32 %v3027_v31, %v2970_v15  ;;  %v5363_v10 = vld [vmem:[#allocation20_spill] sm:$0xff]  ;;  %v5365_v36 = vld [vmem:[#allocation5_spill] sm:$0xff] }
 0x1e6   : > { %v2575_v14 = vpop.f32.mrf.mxu1  ;;  %v2881_v52 = vpop.f32.mrf.mxu0  ;;  %v3072_v35 = vmul.f32 %v2971_v23, %v2971_v23  ;;  %v2058_v57 = vadd.f32 %v5363_v10, %v5362_v50  ;;  %v2063_v20 = vadd.f32 %v5366_v61, %v5365_v36  ;;  %v5368_v22 = vld [vmem:[#allocation24_spill] sm:$0xff] }
 0x1e7   : > { %3001 = vst [vmem:[%s5190_s22 + $0x48] sm:$0xff] %v2969_v12  ;;  %v3042_v55 = vadd.f32 %v3041_v49, %v2969_v12  ;;  %v3070_v24 = vmul.f32 %v2969_v12, %v2969_v12  ;;  %v2974_v18 = vadd.f32 %v4063_v56, %v2668_v54  ;;  %v2666_v6 = vadd.f32 %v2575_v14, %v2360_v11  ;;  %v5369_v54 = vld [vmem:[#allocation21_spill] sm:$0xff] }
 0x1e8   : > { %v3097_v51 = vadd.f32 %v3096_v48, %v3071_v60  ;;  %v4016_v0 = vpop.f32.mrf.mxu1  ;;  %v4064_v62 = vpop.f32.mrf.mxu0 }
 0x1e9   : > { %v3111_v39 = vadd.f32 %v3110_v38, %v3070_v24  ;;  %3006 = vst [vmem:[%s5190_s22 + $0x70] sm:$0xff] %v2974_v18  ;;  %v2972_v25 = vadd.f32 %v2881_v52, %v2666_v6  ;;  %v2669_v58 = vadd.f32 %v4016_v0, %v2363_v2  ;;  %v3043_v1 = vadd.f32 %v3042_v55, %v2971_v23  ;;  %v5367_v38 = vld [vmem:[#allocation6_spill] sm:$0xff]  ;;  %v5370_v52 = vld [vmem:[#allocation23_spill] sm:$0xff] }
 0x1ea   : > { %v2578_v44 = vpop.f32.mrf.mxu1  ;;  %v2884_v53 = vpop.f32.mrf.mxu0  ;;  %v3075_v19 = vmul.f32 %v2974_v18, %v2974_v18  ;;  %v2061_v56 = vadd.f32 %v5368_v22, %v5367_v38  ;;  %v2365_v2 = vadd.f32 %v5369_v54, %v2058_v57  ;;  %v5371_v55 = vld [vmem:[#allocation7_spill] sm:$0xff]  ;;  %v5372_v24 = vld [vmem:[#allocation26_spill] sm:$0xff] }
 0x1eb   : > { %3004 = vst [vmem:[%s5190_s22 + $0x60] sm:$0xff] %v2972_v25  ;;  %v3029_v63 = vadd.f32 %v3028_v47, %v2972_v25  ;;  %v3073_v5 = vmul.f32 %v2972_v25, %v2972_v25  ;;  %v2975_v27 = vadd.f32 %v4064_v62, %v2669_v58  ;;  %v2667_v7 = vadd.f32 %v2578_v44, %v2361_v46  ;;  %v5373_v58 = vld [vmem:[#allocation25_spill] sm:$0xff]  ;;  %v5375_v44 = vld [vmem:[#allocation28_spill] sm:$0xff]  ;;  %v5383_v38 = vld [vmem:[#allocation11_spill] sm:$0xff] }
 0x1ec   : > { %v3112_v15 = vadd.f32 %v3111_v39, %v3072_v35  ;;  %v4019_v45 = vpop.f32.mrf.mxu1  ;;  %v4067_v34 = vpop.f32.mrf.mxu0  ;;  %v2370_v47 = vadd.f32 %v5370_v52, %v2063_v20  ;;  %v5374_v35 = vld [vmem:[#allocation8_spill] sm:$0xff]  ;;  %v5384_v22 = vld [vmem:[#allocation34_spill] sm:$0xff]  ;;  %v5385_v52 = vld [vmem:[#allocation33_spill] sm:$0xff] }
 0x1ed   : > { %v3098_v28 = vadd.f32 %v3097_v51, %v3073_v5  ;;  %3007 = vst [vmem:[%s5190_s22 + $0x78] sm:$0xff] %v2975_v27  ;;  %v2973_v43 = vadd.f32 %v2884_v53, %v2667_v7  ;;  %v2672_v4 = vadd.f32 %v4019_v45, %v2366_v21  ;;  %v3030_v31 = vadd.f32 %v3029_v63, %v2974_v18  ;;  %v5376_v7 = vld [vmem:[#allocation27_spill] sm:$0xff] }
 0x1ee   : > { %v2591_v16 = vpop.f32.mrf.mxu1  ;;  %v2897_v49 = vpop.f32.mrf.mxu0  ;;  %v2064_v18 = vadd.f32 %v5372_v24, %v5371_v55  ;;  %v3076_v6 = vmul.f32 %v2975_v27, %v2975_v27  ;;  %v2368_v21 = vadd.f32 %v5373_v58, %v2061_v56  ;;  %v2062_v53 = vadd.f32 %v5375_v44, %v5374_v35  ;;  %v5389_v58 = vld [vmem:[#allocation13_spill] sm:$0xff] }
 0x1ef   : > { %3005 = vst [vmem:[%s5190_s22 + $0x68] sm:$0xff] %v2973_v43  ;;  %v3044_v17 = vadd.f32 %v3043_v1, %v2973_v43  ;;  %v3074_v23 = vmul.f32 %v2973_v43, %v2973_v43  ;;  %v2978_v29 = vadd.f32 %v4067_v34, %v2672_v4  ;;  %v2670_v11 = vadd.f32 %v2591_v16, %v2364_v13  ;;  %v5378_v13 = vld [vmem:[#allocation30_spill] sm:$0xff]  ;;  %v5381_v16 = vld [vmem:[#allocation29_spill] sm:$0xff] }
 0x1f0   : > { %v3099_v8 = vadd.f32 %v3098_v28, %v3075_v19  ;;  %v4020_v48 = vpop.f32.mrf.mxu1  ;;  %v4068_v12 = vpop.f32.mrf.mxu0  ;;  %v2068_v56 = vadd.f32 %v5384_v22, %v5383_v38 }
 0x1f1   : > { %v3113_v3 = vadd.f32 %v3112_v15, %v3074_v23  ;;  %3010 = vst [vmem:[%s5190_s22 + $0x90] sm:$0xff] %v2978_v29  ;;  %v2976_v60 = vadd.f32 %v2897_v49, %v2670_v11  ;;  %v2673_v14 = vadd.f32 %v4020_v48, %v2367_v42  ;;  %v3045_v0 = vadd.f32 %v3044_v17, %v2975_v27  ;;  %v5380_v42 = vld [vmem:[#allocation32_spill] sm:$0xff]  ;;  %v5382_v11 = vld [vmem:[#allocation31_spill] sm:$0xff] }
 0x1f2   : > { %v2594_v59 = vpop.f32.mrf.mxu1  ;;  %v2900_v51 = vpop.f32.mrf.mxu0  ;;  %v2371_v27 = vadd.f32 %v5376_v7, %v2064_v18  ;;  %v2067_v15 = vadd.f32 %v5378_v13, %v5377_v40  ;;  %v3079_v45 = vmul.f32 %v2978_v29, %v2978_v29  ;;  %v2065_v36 = vadd.f32 %v5380_v42, %v5379_v37  ;;  %v5391_v7 = vld [vmem:[#allocation14_spill] sm:$0xff]  ;;  %v5395_v37 = vld [vmem:[#allocation15_spill] sm:$0xff] }
 0x1f3   : > { %3008 = vst [vmem:[%s5190_s22 + $0x80] sm:$0xff] %v2976_v60  ;;  %v3031_v62 = vadd.f32 %v3030_v31, %v2976_v60  ;;  %v3077_v46 = vmul.f32 %v2976_v60, %v2976_v60  ;;  %v2979_v39 = vadd.f32 %v4068_v12, %v2673_v14  ;;  %v2671_v25 = vadd.f32 %v2594_v59, %v2365_v2  ;;  %v5387_v59 = vld [vmem:[#allocation36_spill] sm:$0xff] }
 0x1f4   : > { %v3114_v41 = vadd.f32 %v3113_v3, %v3076_v6  ;;  %v4023_v9 = vpop.f32.mrf.mxu1  ;;  %v4071_v26 = vpop.f32.mrf.mxu0  ;;  %v2369_v49 = vadd.f32 %v5381_v16, %v2062_v53  ;;  %v5386_v6 = vld [vmem:[#allocation12_spill] sm:$0xff]  ;;  %v2072_v42 = vadd.f32 %v5168_v33, %v5395_v37 }
 0x1f5   : > { %v3100_v1 = vadd.f32 %v3099_v8, %v3077_v46  ;;  %3011 = vst [vmem:[%s5190_s22 + $0x98] sm:$0xff] %v2979_v39  ;;  %v2977_v63 = vadd.f32 %v2900_v51, %v2671_v25  ;;  %v2676_v5 = vadd.f32 %v4023_v9, %v2370_v47  ;;  %v3032_v10 = vadd.f32 %v3031_v62, %v2978_v29  ;;  %v5388_v25 = vld [vmem:[#allocation35_spill] sm:$0xff] }
 0x1f6   : > { %v2607_v34 = vpop.f32.mrf.mxu1  ;;  %v2913_v50 = vpop.f32.mrf.mxu0  ;;  %v2374_v29 = vadd.f32 %v5382_v11, %v2067_v15  ;;  %v3080_v8 = vmul.f32 %v2979_v39, %v2979_v39  ;;  %v2372_v47 = vadd.f32 %v5385_v52, %v2065_v36  ;;  %v2066_v51 = vadd.f32 %v5387_v59, %v5386_v6  ;;  %v5398_v59 = vld [vmem:[#allocation42_spill] sm:$0xff] }
 0x1f7   : > { %3009 = vst [vmem:[%s5190_s22 + $0x88] sm:$0xff] %v2977_v63  ;;  %v3046_v57 = vadd.f32 %v3045_v0, %v2977_v63  ;;  %v3078_v28 = vmul.f32 %v2977_v63, %v2977_v63  ;;  %v2982_v43 = vadd.f32 %v4071_v26, %v2676_v5  ;;  %v2674_v4 = vadd.f32 %v2607_v34, %v2368_v21  ;;  %v5390_v21 = vld [vmem:[#allocation38_spill] sm:$0xff]  ;;  %v5393_v34 = vld [vmem:[#allocation37_spill] sm:$0xff] }
 0x1f8   : > { %v3101_v61 = vadd.f32 %v3100_v1, %v3079_v45  ;;  %v4024_v20 = vpop.f32.mrf.mxu1  ;;  %v4072_v19 = vpop.f32.mrf.mxu0 }
 0x1f9   : > { %v3115_v31 = vadd.f32 %v3114_v41, %v3078_v28  ;;  %3014 = vst [vmem:[%s5190_s22 + $0xb0] sm:$0xff] %v2982_v43  ;;  %v2980_v17 = vadd.f32 %v2913_v50, %v2674_v4  ;;  %v2677_v23 = vadd.f32 %v4024_v20, %v2371_v27  ;;  %v3047_v54 = vadd.f32 %v3046_v57, %v2979_v39  ;;  %v5392_v27 = vld [vmem:[#allocation40_spill] sm:$0xff]  ;;  %v5394_v4 = vld [vmem:[#allocation39_spill] sm:$0xff] }
 0x1fa   : > { %v2610_v48 = vpop.f32.mrf.mxu1  ;;  %v2916_v12 = vpop.f32.mrf.mxu0  ;;  %v2375_v39 = vadd.f32 %v5388_v25, %v2068_v56  ;;  %v2071_v41 = vadd.f32 %v5390_v21, %v5389_v58  ;;  %v3083_v9 = vmul.f32 %v2982_v43, %v2982_v43  ;;  %v2069_v40 = vadd.f32 %v5392_v27, %v5391_v7  ;;  %v5397_v56 = vld [vmem:[#allocation16_spill] sm:$0xff] }
 0x1fb   : > { %3012 = vst [vmem:[%s5190_s22 + $0xa0] sm:$0xff] %v2980_v17  ;;  %v3033_v2 = vadd.f32 %v3032_v10, %v2980_v17  ;;  %v3081_v3 = vmul.f32 %v2980_v17, %v2980_v17  ;;  %v2983_v60 = vadd.f32 %v4072_v19, %v2677_v23  ;;  %v2675_v14 = vadd.f32 %v2610_v48, %v2369_v49  ;;  %v5396_v23 = vld [vmem:[#allocation41_spill] sm:$0xff] }
 0x1fc   : > { %v3116_v55 = vadd.f32 %v3115_v31, %v3080_v8  ;;  %v4027_v24 = vpop.f32.mrf.mxu1  ;;  %v4075_v18 = vpop.f32.mrf.mxu0  ;;  %v2373_v50 = vadd.f32 %v5393_v34, %v2066_v51  ;;  %v2376_v11 = vadd.f32 %v5396_v23, %v2069_v40  ;;  %v2070_v8 = vadd.f32 %v5173_v32, %v5397_v56 }
 0x1fd   : > { %v3102_v0 = vadd.f32 %v3101_v61, %v3081_v3  ;;  %3015 = vst [vmem:[%s5190_s22 + $0xb8] sm:$0xff] %v2983_v60  ;;  %v2981_v62 = vadd.f32 %v2916_v12, %v2675_v14  ;;  %v2680_v46 = vadd.f32 %v4027_v24, %v2374_v29  ;;  %v3034_v44 = vadd.f32 %v3033_v2, %v2982_v43 }
 0x1fe   : > { %v2623_v26 = vpop.f32.mrf.mxu1  ;;  %v2929_v35 = vpop.f32.mrf.mxu0  ;;  %v2378_v43 = vadd.f32 %v5394_v4, %v2071_v41  ;;  %v3084_v36 = vmul.f32 %v2983_v60, %v2983_v60  ;;  %v2377_v51 = vadd.f32 %v5398_v59, %v2070_v8 }
 0x1ff   : > { %3013 = vst [vmem:[%s5190_s22 + $0xa8] sm:$0xff] %v2981_v62  ;;  %v3048_v53 = vadd.f32 %v3047_v54, %v2981_v62  ;;  %v3082_v1 = vmul.f32 %v2981_v62, %v2981_v62  ;;  %v2986_v63 = vadd.f32 %v4075_v18, %v2680_v46  ;;  %v2678_v5 = vadd.f32 %v2623_v26, %v2372_v47 }
 0x200   : > { %v3103_v13 = vadd.f32 %v3102_v0, %v3083_v9  ;;  %v4028_v15 = vpop.f32.mrf.mxu1  ;;  %v4076_v45 = vpop.f32.mrf.mxu0  ;;  %v2379_v54 = vadd.f32 %v5170_v30, %v2072_v42 }
 0x201   : > { %v3117_v10 = vadd.f32 %v3116_v55, %v3082_v1  ;;  %3018 = vst [vmem:[%s5190_s22 + $0xd0] sm:$0xff] %v2986_v63  ;;  %v2984_v57 = vadd.f32 %v2929_v35, %v2678_v5  ;;  %v2681_v28 = vadd.f32 %v4028_v15, %v2375_v39  ;;  %v3049_v19 = vadd.f32 %v3048_v53, %v2983_v60 }
 0x202   : > { %v2626_v61 = vpop.f32.mrf.mxu1  ;;  %v2932_v20 = vpop.f32.mrf.mxu0  ;;  %v3087_v2 = vmul.f32 %v2986_v63, %v2986_v63 }
 0x203   : > { %3016 = vst [vmem:[%s5190_s22 + $0xc0] sm:$0xff] %v2984_v57  ;;  %v3035_v16 = vadd.f32 %v3034_v44, %v2984_v57  ;;  %v3085_v49 = vmul.f32 %v2984_v57, %v2984_v57  ;;  %v2987_v31 = vadd.f32 %v4076_v45, %v2681_v28  ;;  %v2679_v17 = vadd.f32 %v2626_v61, %v2373_v50 }
 0x204   : > { %v3118_v29 = vadd.f32 %v3117_v10, %v3084_v36  ;;  %v4031_v38 = vpop.f32.mrf.mxu1  ;;  %v4079_v22 = vpop.f32.mrf.mxu0 }
 0x205   : > { %v3104_v33 = vadd.f32 %v3103_v13, %v3085_v49  ;;  %3019 = vst [vmem:[%s5190_s22 + $0xd8] sm:$0xff] %v2987_v31  ;;  %v2985_v48 = vadd.f32 %v2932_v20, %v2679_v17  ;;  %v2684_v12 = vadd.f32 %v4031_v38, %v2378_v43  ;;  %v3036_v14 = vadd.f32 %v3035_v16, %v2986_v63 }
 0x206   : > { %v2639_v3 = vpop.f32.mrf.mxu1  ;;  %v2945_v60 = vpop.f32.mrf.mxu0  ;;  %v3088_v46 = vmul.f32 %v2987_v31, %v2987_v31 }
 0x207   : > { %3017 = vst [vmem:[%s5190_s22 + $0xc8] sm:$0xff] %v2985_v48  ;;  %v3050_v52 = vadd.f32 %v3049_v19, %v2985_v48  ;;  %v3086_v47 = vmul.f32 %v2985_v48, %v2985_v48  ;;  %v2990_v55 = vadd.f32 %v4079_v22, %v2684_v12  ;;  %v2682_v24 = vadd.f32 %v2639_v3, %v2376_v11 }
 0x208   : > { %v3105_v18 = vadd.f32 %v3104_v33, %v3087_v2  ;;  %v4032_v6 = vpop.f32.mrf.mxu1  ;;  %v4080_v32 = vpop.f32.mrf.mxu0 }
 0x209   : > { %v3119_v0 = vadd.f32 %v3118_v29, %v3086_v47  ;;  %3022 = vst [vmem:[%s5190_s22 + $0xf0] sm:$0xff] %v2990_v55  ;;  %v2988_v62 = vadd.f32 %v2945_v60, %v2682_v24  ;;  %v2685_v30 = vadd.f32 %v4032_v6, %v2379_v54  ;;  %v3051_v39 = vadd.f32 %v3050_v52, %v2987_v31 }
 0x20a   : > { %v2642_v25 = vpop.f32.mrf.mxu1  ;;  %v2948_v26 = vpop.f32.mrf.mxu0  ;;  %v3091_v44 = vmul.f32 %v2990_v55, %v2990_v55 }
 0x20b   : > { %3020 = vst [vmem:[%s5190_s22 + $0xe0] sm:$0xff] %v2988_v62  ;;  %v3037_v58 = vadd.f32 %v3036_v14, %v2988_v62  ;;  %v3089_v21 = vmul.f32 %v2988_v62, %v2988_v62  ;;  %v2991_v41 = vadd.f32 %v4080_v32, %v2685_v30  ;;  %v2683_v9 = vadd.f32 %v2642_v25, %v2377_v51 }
 0x20c   : > { %v3120_v35 = vadd.f32 %v3119_v0, %v3088_v46 }
 0x20d   : > { %v3038_v53 = vadd.f32 %v3037_v58, %v2990_v55  ;;  %v3106_v1 = vadd.f32 %v3105_v18, %v3089_v21  ;;  %3023 = vst [vmem:[%s5190_s22 + $0xf8] sm:$0xff] %v2991_v41  ;;  %v2989_v63 = vadd.f32 %v2948_v26, %v2683_v9  ;;  %v3092_v40 = vmul.f32 %v2991_v41, %v2991_v41 }
 0x20f   : > { %v3107_v5 = vadd.f32 %v3106_v1, %v3091_v44  ;;  %3021 = vst [vmem:[%s5190_s22 + $0xe8] sm:$0xff] %v2989_v63  ;;  %v3052_v7 = vadd.f32 %v3051_v39, %v2989_v63  ;;  %v3090_v27 = vmul.f32 %v2989_v63, %v2989_v63 }
 0x211   : > { %v3053_v13 = vadd.f32 %v3052_v7, %v2991_v41  ;;  %v3121_v15 = vadd.f32 %v3120_v35, %v3090_v27 }
 0x213   : > { %v3054_v45 = vadd.f32 %v3053_v13, %v3038_v53  ;;  %v3122_v34 = vadd.f32 %v3121_v15, %v3092_v40 }
 0x215   : > { %v3055_v50 = vrot.slane %v3054_v45, 4  ;;  %v3123_v10 = vadd.f32 %v3122_v34, %v3107_v5 }
 0x217   : > { %v3056_v57 = vadd.f32 %v3055_v50, %v3054_v45  ;;  %v3124_v28 = vrot.slane %v3123_v10, 4 }
 0x219   : > { %v3057_v4 = vrot.slane %v3056_v57, 2  ;;  %v3125_v43 = vadd.f32 %v3124_v28, %v3123_v10 }
 0x21b   : > { %v3058_v37 = vadd.f32 %v3057_v4, %v3056_v57  ;;  %v3126_v42 = vrot.slane %v3125_v43, 2 }
 0x21d   : > { %v3059_v36 = vrot.slane %v3058_v37, 1  ;;  %v3127_v61 = vadd.f32 %v3126_v42, %v3125_v43 }
 0x21f   : > { %v3128_v20 = vrot.slane %v3127_v61, 1  ;;  %v3060_v19 = vadd.f32 %v3059_v36, %v3058_v37 }
 0x221   : > { %v3129_v16 = vadd.f32 %v3128_v20, %v3127_v61 }
 0x223   : > { %v3131_v49 = vsel %vm3130_vm0, %v3060_v19, %v3129_v16 }
 0x224   : > { %3132 = vst [vmem:[%s181_s26] sm:$0x3] %v3131_v49 }
 0x225 PF: > { %s14_s12 = sadd.s32 1, %s4185_s12  }
 0x226   : > { %p11_p4 = scmp.ge.s32.totalorder %s14_s12, 4  }
 0x228   :  { %13 = sbr.rel (!%p11_p4) target bundleno = 1 (0x1), region = 80 }

// kernel: residual_block_forward.4
= control target key start
LH: loop header
LB: loop body
LE: loop exit
PB: predicated region body
PF: predicated region fallthrough
CT: control target
= control target key end

     0   :  { %s4457_s21 = smov 0   ;;  %s5736_s0 = inlined_call_operand.vmem [shape: f32[2,16,16,128], index: 0, kind: input, shape index: {}]   ;;  %s5737_s1 = inlined_call_operand.vmem [shape: bf16[3,3,128,128], index: 1, kind: input, shape index: {}]   ;;  %s5738_s2 = inlined_call_operand.vmem [shape: f32[1,128], index: 2, kind: input, shape index: {}]   ;;  %s5739_s3 = inlined_call_operand.vmem [shape: f32[1,128], index: 3, kind: input, shape index: {}]   ;;  %s5740_s4 = inlined_call_operand.vmem [shape: f32[1,128], index: 4, kind: input, shape index: {}]   ;;  %s5741_s5 = inlined_call_operand.vmem [shape: f32[2,16,16,128], index: 5, kind: output, shape index: {0}]   ;;  %s5742_s6 = inlined_call_operand.vmem [shape: f32[2,2,128], index: 6, kind: output, shape index: {1}]  }
   0x1 LB: > { %s3449_s22 = sadd.s32 4294967295, %s4418_s21   ;;  %p3453_p0 = scmp.ge.s32.totalorder %s4418_s21, 1  ;;  %s4418_s21 = sphi %s4457_s21, %s17_s21  }
   0x2   : > { %p215_p1 = scmp.lt.s32.totalorder %s4418_s21, 3 }
   0x4   : > { %p216_p2 = pnand %p3453_p0, %p215_p1 }
   0x6   : > { %219 = sbr.rel (%p216_p2) target bundleno = 551 (0x227), region = 40 }
   0xb   : > { %v4339_v0 = vld [vmem:[%s5737_s1 + $0x78] sm:$0xff]   ;;  %v4471_v1 = vld [vmem:[%s5737_s1 + $0x70] sm:$0xff]   ;;  %v4420_v2 = vmov 0.0   ;;  %p249_p3 = scmp.lt.s32.totalorder %s3449_s22, 1  ;;  %v4341_v3 = vld [vmem:[%s5737_s1 + $0x68] sm:$0xff]   ;;  %vm3360_vm0 = vcmask 1040384  }
   0xc   : > { %406 = vst [vmem:[#allocation2] sm:$0xff] %v4420_v2  ;;  %407 = vst [vmem:[#allocation2 + $0x8] sm:$0xff] %v4420_v2  ;;  %3882 = vmatprep.subr.bf16.mxu0 %v4339_v0  ;;  %4314 = vmatprep.subr.bf16.mxu1 %v4339_v0  ;;  %v4342_v4 = vld [vmem:[%s5737_s1 + $0x60] sm:$0xff]   ;;  %v4343_v21 = vld [vmem:[%s5737_s1 + $0x58] sm:$0xff]  }
   0xd   : > { %408 = vst [vmem:[#allocation2 + $0x10] sm:$0x3] %v4420_v2  ;;  %409 = vst [vmem:[#allocation2 + $0x18] sm:$0xff] %v4420_v2  ;;  %3883 = vmatpush3.bf16.msra.mxu0 %v4339_v0  ;;  %4322 = vmatpush3.bf16.msra.mxu1 %v4339_v0  ;;  %s5826_s22 = smov (!%p249_p3, %s3449_s22), 1  ;;  %v4502_v10 = vld [vmem:[%s5738_s2] ss:$0 sm:$0xff] }
   0xe   : > { %410 = vst [vmem:[#allocation2 + $0x20] sm:$0xff] %v4420_v2  ;;  %411 = vst [vmem:[#allocation2 + $0x28] sm:$0x3] %v4420_v2  ;;  %3884 = vmatprep.subr.bf16.mxu0 %v4471_v1  ;;  %4315 = vmatprep.subr.bf16.mxu1 %v4471_v1  ;;  %s3664_s29 = sshll.u32 %s5826_s22, 8  ;;  %v4507_v11 = vld [vmem:[%s5739_s3] ss:$0 sm:$0xff] }
   0xf   : > { %412 = vst [vmem:[#allocation2 + $0x30] sm:$0xff] %v4420_v2  ;;  %413 = vst [vmem:[#allocation2 + $0x38] sm:$0xff] %v4420_v2  ;;  %s4490_s8 = scalar_lea.vmem %s5736_s0, %s3664_s29  ;;  %v4344_v28 = vld [vmem:[%s5737_s1 + $0x50] sm:$0xff]   ;;  %v4345_v55 = vld [vmem:[%s5737_s1 + $0x48] sm:$0xff]   ;;  %s5582_s11 = scalar_lea.vmem %s5741_s5, %s3664_s29 }
  0x10   : > { %414 = vst [vmem:[#allocation2 + $0x40] sm:$0x3] %v4420_v2  ;;  %415 = vst [vmem:[#allocation2 + $0x48] sm:$0xff] %v4420_v2  ;;  %v278_v7 = vld [vmem:[%s4490_s8 + $0x70] sm:$0xff]  ;;  %v279_v9 = vld [vmem:[%s4490_s8 + $0x78] sm:$0xff]  ;;  %s3458_s29 = sshll.u32 %s5826_s22, 1 }
  0x11   : > { %416 = vst [vmem:[#allocation2 + $0x50] sm:$0xff] %v4420_v2  ;;  %417 = vst [vmem:[#allocation2 + $0x58] sm:$0x3] %v4420_v2  ;;  %3885 = vmatpush3.bf16.msra.mxu0 %v4471_v1  ;;  %4323 = vmatpush3.bf16.msra.mxu1 %v4471_v1  ;;  %v318_v12 = vmul.f32 %v4502_v10, %v278_v7  ;;  %v319_v13 = vmul.f32 %v4502_v10, %v279_v9  ;;  %v264_v14 = vld [vmem:[%s4490_s8] sm:$0xff]  ;;  %v265_v15 = vld [vmem:[%s4490_s8 + $0x8] sm:$0xff]  ;;  %s262_s14 = scalar_lea.vmem %s5742_s6, %s3458_s29 }
  0x12   : > { %418 = vst [vmem:[#allocation2 + $0x60] sm:$0xff] %v4420_v2  ;;  %419 = vst [vmem:[#allocation2 + $0x68] sm:$0xff] %v4420_v2  ;;  %3886 = vmatprep.subr.bf16.mxu0 %v4341_v3  ;;  %4316 = vmatprep.subr.bf16.mxu1 %v4341_v3  ;;  %v280_v16 = vld [vmem:[%s4490_s8 + $0x80] sm:$0xff]  ;;  %v304_v17 = vmul.f32 %v4502_v10, %v264_v14  ;;  %v305_v18 = vmul.f32 %v4502_v10, %v265_v15  ;;  %v281_v19 = vld [vmem:[%s4490_s8 + $0x88] sm:$0xff] }
  0x13   : > { %420 = vst [vmem:[#allocation2 + $0x70] sm:$0x3] %v4420_v2  ;;  %421 = vst [vmem:[#allocation2 + $0x78] sm:$0xff] %v4420_v2  ;;  %v557_v5 = vld [vmem:[#allocation2 + $0x1] sm:$0xff]  ;;  %v320_v20 = vmul.f32 %v4502_v10, %v280_v16  ;;  %v356_v22 = vadd.f32 %v4507_v11, %v318_v12  ;;  %v357_v23 = vadd.f32 %v4507_v11, %v319_v13  ;;  %v266_v35 = vld [vmem:[%s4490_s8 + $0x10] sm:$0xff] }
  0x14   : > { %422 = vst [vmem:[#allocation2 + $0x80] sm:$0xff] %v4420_v2  ;;  %423 = vst [vmem:[#allocation2 + $0x88] sm:$0x3] %v4420_v2  ;;  %v558_v6 = vld [vmem:[#allocation2 + $0x9] sm:$0xff]  ;;  %v321_v24 = vmul.f32 %v4502_v10, %v281_v19  ;;  %v4525_v25 = vadd.f32 %v4507_v11, %v304_v17  ;;  %v4528_v26 = vadd.f32 %v4507_v11, %v305_v18  ;;  %v267_v38 = vld [vmem:[%s4490_s8 + $0x18] sm:$0xff] }
  0x15   : > { %424 = vst [vmem:[#allocation2 + $0x90] sm:$0xff] %v4420_v2  ;;  %425 = vst [vmem:[#allocation2 + $0x98] sm:$0xff] %v4420_v2  ;;  %v589_v8 = vpack.c.bf16 %v558_v6, %v557_v5  ;;  %3887 = vmatpush3.bf16.msra.mxu0 %v4341_v3  ;;  %4324 = vmatpush3.bf16.msra.mxu1 %v4341_v3  ;;  %v4531_v27 = vadd.f32 %v4507_v11, %v320_v20  ;;  %v388_v29 = vmax.f32 %v356_v22, 0.0  ;;  %v282_v40 = vld [vmem:[%s4490_s8 + $0x90] sm:$0xff]  ;;  %v283_v41 = vld [vmem:[%s4490_s8 + $0x98] sm:$0xff] }
  0x16   : > { %426 = vst [vmem:[#allocation2 + $0xa0] sm:$0x3] %v4420_v2  ;;  %427 = vst [vmem:[#allocation2 + $0xa8] sm:$0xff] %v4420_v2  ;;  %3888 = vmatprep.subr.bf16.mxu0 %v4342_v4  ;;  %4317 = vmatprep.subr.bf16.mxu1 %v4342_v4  ;;  %v389_v30 = vmax.f32 %v357_v23, 0.0  ;;  %v4537_v31 = vadd.f32 %v4507_v11, %v321_v24  ;;  %v374_v32 = vmax.f32 %v4525_v25, 0.0  ;;  %v375_v33 = vmax.f32 %v4528_v26, 0.0 }
  0x17   : > { %428 = vst [vmem:[#allocation2 + $0xb0] sm:$0xff] %v4420_v2  ;;  %429 = vst [vmem:[#allocation2 + $0xb8] sm:$0x3] %v4420_v2  ;;  %3898 = vmatprep.mubr.bf16.mxu0 %v589_v8  ;;  %v390_v34 = vmax.f32 %v4531_v27, 0.0  ;;  %v306_v39 = vmul.f32 %v4502_v10, %v266_v35  ;;  %v307_v42 = vmul.f32 %v4502_v10, %v267_v38  ;;  %v268_v45 = vld [vmem:[%s4490_s8 + $0x20] sm:$0xff]  ;;  %v269_v46 = vld [vmem:[%s4490_s8 + $0x28] sm:$0xff] }
  0x18   : > { %430 = vst [vmem:[#allocation2 + $0xc0] sm:$0xff] %v4420_v2  ;;  %431 = vst [vmem:[#allocation2 + $0xc8] sm:$0xff] %v4420_v2  ;;  %v597_v36 = vpack.c.bf16 %v389_v30, %v388_v29  ;;  %v391_v37 = vmax.f32 %v4537_v31, 0.0  ;;  %v322_v43 = vmul.f32 %v4502_v10, %v282_v40  ;;  %v323_v44 = vmul.f32 %v4502_v10, %v283_v41  ;;  %v284_v47 = vld [vmem:[%s4490_s8 + $0xa0] sm:$0xff]  ;;  %v285_v51 = vld [vmem:[%s4490_s8 + $0xa8] sm:$0xff] }
  0x19   : > { %432 = vst [vmem:[#allocation2 + $0xd0] sm:$0x3] %v4420_v2  ;;  %433 = vst [vmem:[#allocation2 + $0xd8] sm:$0xff] %v4420_v2  ;;  %3889 = vmatpush3.bf16.msra.mxu0 %v4342_v4  ;;  %4325 = vmatpush3.bf16.msra.mxu1 %v4342_v4  ;;  %v4563_v48 = vadd.f32 %v4507_v11, %v306_v39  ;;  %v308_v49 = vmul.f32 %v4502_v10, %v268_v45  ;;  %v4595_v0 = vld [vmem:[%s5737_s1 + $0x40] sm:$0xff]   ;;  %v270_v4 = vld [vmem:[%s4490_s8 + $0x30] sm:$0xff] }
  0x1a   : > { %434 = vst [vmem:[#allocation2 + $0xe0] sm:$0xff] %v4420_v2  ;;  %435 = vst [vmem:[#allocation2 + $0xe8] sm:$0x3] %v4420_v2  ;;  %3890 = vmatprep.subr.bf16.mxu0 %v4343_v21  ;;  %4318 = vmatprep.subr.bf16.mxu1 %v4343_v21  ;;  %v309_v50 = vmul.f32 %v4502_v10, %v269_v46  ;;  %v4569_v52 = vadd.f32 %v4507_v11, %v307_v42  ;;  %v271_v6 = vld [vmem:[%s4490_s8 + $0x38] sm:$0xff]  ;;  %v286_v7 = vld [vmem:[%s4490_s8 + $0xb0] sm:$0xff] }
  0x1b   : > { %436 = vst [vmem:[#allocation2 + $0xf0] sm:$0xff] %v4420_v2  ;;  %437 = vst [vmem:[#allocation2 + $0xf8] sm:$0xff] %v4420_v2  ;;  %3914 = vmatprep.mubr.bf16.mxu1 %v597_v36  ;;  %v4572_v53 = vadd.f32 %v4507_v11, %v322_v43  ;;  %v4575_v54 = vadd.f32 %v4507_v11, %v323_v44  ;;  %v376_v56 = vmax.f32 %v4563_v48, 0.0  ;;  %v287_v8 = vld [vmem:[%s4490_s8 + $0xb8] sm:$0xff]  ;;  %v272_v14 = vld [vmem:[%s4490_s8 + $0x40] sm:$0xff] }
  0x1c   : > { %438 = vst [vmem:[#allocation2 + $0x100] sm:$0x3] %v4420_v2  ;;  %439 = vst [vmem:[#allocation2 + $0x108] sm:$0xff] %v4420_v2  ;;  %v4582_v57 = vadd.f32 %v4507_v11, %v308_v49  ;;  %v4585_v58 = vadd.f32 %v4507_v11, %v309_v50  ;;  %v324_v59 = vmul.f32 %v4502_v10, %v284_v47  ;;  %v377_v60 = vmax.f32 %v4569_v52, 0.0  ;;  %v273_v15 = vld [vmem:[%s4490_s8 + $0x48] sm:$0xff]  ;;  %v288_v16 = vld [vmem:[%s4490_s8 + $0xc0] sm:$0xff] }
  0x1d   : > { %440 = vst [vmem:[#allocation2 + $0x110] sm:$0xff] %v4420_v2  ;;  %441 = vst [vmem:[#allocation2 + $0x118] sm:$0x3] %v4420_v2  ;;  %3891 = vmatpush3.bf16.msra.mxu0 %v4343_v21  ;;  %4326 = vmatpush3.bf16.msra.mxu1 %v4343_v21  ;;  %v392_v61 = vmax.f32 %v4572_v53, 0.0  ;;  %v393_v62 = vmax.f32 %v4575_v54, 0.0  ;;  %v325_v63 = vmul.f32 %v4502_v10, %v285_v51  ;;  %v289_v24 = vld [vmem:[%s4490_s8 + $0xc8] sm:$0xff] }
  0x1e   : > { %442 = vst [vmem:[#allocation2 + $0x120] sm:$0xff] %v4420_v2  ;;  %443 = vst [vmem:[#allocation2 + $0x128] sm:$0xff] %v4420_v2  ;;  %3892 = vmatprep.subr.bf16.mxu0 %v4344_v28  ;;  %4319 = vmatprep.subr.bf16.mxu1 %v4344_v28  ;;  %v378_v1 = vmax.f32 %v4582_v57, 0.0  ;;  %v4602_v3 = vadd.f32 %v4507_v11, %v324_v59  ;;  %v310_v12 = vmul.f32 %v4502_v10, %v270_v4  ;;  %v4347_v25 = vld [vmem:[%s5737_s1 + $0x38] sm:$0xff]   ;;  %v274_v43 = vld [vmem:[%s4490_s8 + $0x50] sm:$0xff] }
  0x1f   : > { %444 = vst [vmem:[#allocation2 + $0x130] sm:$0x3] %v4420_v2  ;;  %445 = vst [vmem:[#allocation2 + $0x138] sm:$0xff] %v4420_v2  ;;  %v4612_v5 = vadd.f32 %v4507_v11, %v325_v63  ;;  %v311_v13 = vmul.f32 %v4502_v10, %v271_v6  ;;  %v326_v18 = vmul.f32 %v4502_v10, %v286_v7  ;;  %v4348_v26 = vld [vmem:[%s5737_s1 + $0xb8] sm:$0xff]   ;;  %v290_v50 = vld [vmem:[%s4490_s8 + $0xd0] sm:$0xff] }
  0x20   : > { %446 = vst [vmem:[#allocation2 + $0x140] sm:$0xff] %v4420_v2  ;;  %447 = vst [vmem:[#allocation2 + $0x148] sm:$0x3] %v4420_v2  ;;  %v394_v9 = vmax.f32 %v4602_v3, 0.0  ;;  %v327_v19 = vmul.f32 %v4502_v10, %v287_v8  ;;  %v312_v20 = vmul.f32 %v4502_v10, %v272_v14  ;;  %v4634_v21 = vadd.f32 %v4507_v11, %v310_v12  ;;  %v275_v44 = vld [vmem:[%s4490_s8 + $0x58] sm:$0xff]  ;;  %v276_v27 = vld [vmem:[%s4490_s8 + $0x60] sm:$0xff] }
  0x21   : > { %448 = vst [vmem:[#allocation2 + $0x150] sm:$0xff] %v4420_v2  ;;  %449 = vst [vmem:[#allocation2 + $0x158] sm:$0xff] %v4420_v2  ;;  %3893 = vmatpush3.bf16.msra.mxu0 %v4344_v28  ;;  %4327 = vmatpush3.bf16.msra.mxu1 %v4344_v28  ;;  %v395_v17 = vmax.f32 %v4612_v5, 0.0  ;;  %v4637_v22 = vadd.f32 %v4507_v11, %v311_v13  ;;  %v313_v23 = vmul.f32 %v4502_v10, %v273_v15  ;;  %v291_v51 = vld [vmem:[%s4490_s8 + $0xd8] sm:$0xff]  ;;  %v4349_v31 = vld [vmem:[%s5737_s1 + $0x30] sm:$0xff]  }
  0x22   : > { %450 = vst [vmem:[#allocation2 + $0x160] sm:$0x3] %v4420_v2  ;;  %451 = vst [vmem:[#allocation2 + $0x168] sm:$0xff] %v4420_v2  ;;  %3894 = vmatprep.subr.bf16.mxu0 %v4345_v55  ;;  %4320 = vmatprep.subr.bf16.mxu1 %v4345_v55  ;;  %v328_v28 = vmul.f32 %v4502_v10, %v288_v16  ;;  %v4654_v35 = vadd.f32 %v4507_v11, %v327_v19  ;;  %v277_v63 = vld [vmem:[%s4490_s8 + $0x68] sm:$0xff]  ;;  %v292_v48 = vld [vmem:[%s4490_s8 + $0xe0] sm:$0xff] }
  0x23   : > { %452 = vst [vmem:[#allocation2 + $0x170] sm:$0xff] %v4420_v2  ;;  %453 = vst [vmem:[#allocation2 + $0x178] sm:$0x3] %v4420_v2  ;;  %v4667_v36 = vadd.f32 %v4507_v11, %v312_v20  ;;  %v4670_v38 = vadd.f32 %v4507_v11, %v313_v23  ;;  %v329_v41 = vmul.f32 %v4502_v10, %v289_v24  ;;  %v4350_v52 = vld [vmem:[%s5737_s1 + $0xb0] sm:$0xff]   ;;  %v4351_v16 = vld [vmem:[%s5737_s1 + $0x28] sm:$0xff]  }
  0x24   : > { %454 = vst [vmem:[#allocation2 + $0x180] sm:$0xff] %v4420_v2  ;;  %455 = vst [vmem:[#allocation2 + $0x188] sm:$0xff] %v4420_v2  ;;  %v397_v40 = vmax.f32 %v4654_v35, 0.0  ;;  %v4676_v42 = vadd.f32 %v4507_v11, %v328_v28  ;;  %v598_v45 = vpack.c.bf16 %v391_v37, %v390_v34  ;;  %v314_v49 = vmul.f32 %v4502_v10, %v274_v43  ;;  %v4353_v57 = vld [vmem:[%s5737_s1 + $0x20] sm:$0xff]   ;;  %v4355_v5 = vld [vmem:[%s5737_s1 + $0x18] sm:$0xff]  }
  0x25   : > { %456 = vst [vmem:[#allocation2 + $0x190] sm:$0x3] %v4420_v2  ;;  %457 = vst [vmem:[#allocation2 + $0x198] sm:$0xff] %v4420_v2  ;;  %3895 = vmatpush3.bf16.msra.mxu0 %v4345_v55  ;;  %4328 = vmatpush3.bf16.msra.mxu1 %v4345_v55  ;;  %v382_v46 = vmax.f32 %v4667_v36, 0.0  ;;  %v383_v47 = vmax.f32 %v4670_v38, 0.0  ;;  %v315_v59 = vmul.f32 %v4502_v10, %v275_v44  ;;  %v4360_v36 = vld [vmem:[%s5737_s1 + $0x88] sm:$0xff]  }
  0x26   : > { %458 = vst [vmem:[#allocation2 + $0x1a0] sm:$0xff] %v4420_v2  ;;  %459 = vst [vmem:[#allocation2 + $0x1a8] sm:$0x3] %v4420_v2  ;;  %v379_v2 = vmax.f32 %v4585_v58, 0.0  ;;  %3896 = vmatprep.subr.bf16.mxu0 %v4595_v0  ;;  %4321 = vmatprep.subr.bf16.mxu1 %v4595_v0  ;;  %v398_v55 = vmax.f32 %v4676_v42, 0.0  ;;  %v331_v54 = vmul.f32 %v4502_v10, %v291_v51  ;;  %v4354_v58 = vld [vmem:[%s5737_s1 + $0xa0] sm:$0xff]  }
  0x27   : > { %475 = vst [vmem:[#allocation2 + $0xc1] sm:$0xff] %v388_v29  ;;  %476 = vst [vmem:[#allocation2 + $0xc9] sm:$0xff] %v389_v30  ;;  %v4646_v29 = vpack.c.bf16 %v375_v33, %v374_v32  ;;  %v4651_v30 = vadd.f32 %v4507_v11, %v326_v18  ;;  %v4735_v53 = vadd.f32 %v4507_v11, %v315_v59  ;;  %v4352_v18 = vld [vmem:[%s5737_s1 + $0xa8] sm:$0xff]  }
  0x28   : > { %461 = vst [vmem:[#allocation2 + $0x19] sm:$0xff] %v374_v32  ;;  %462 = vst [vmem:[#allocation2 + $0x21] sm:$0xff] %v375_v33  ;;  %v380_v32 = vmax.f32 %v4634_v21, 0.0  ;;  %v381_v33 = vmax.f32 %v4637_v22, 0.0  ;;  %v317_v8 = vmul.f32 %v4502_v10, %v277_v63  ;;  %v332_v12 = vmul.f32 %v4502_v10, %v292_v48  ;;  %v4357_v22 = vld [vmem:[%s5737_s1 + $0x10] sm:$0xff]  }
  0x29   : > { %477 = vst [vmem:[#allocation2 + $0xd9] sm:$0xff] %v390_v34  ;;  %478 = vst [vmem:[#allocation2 + $0xe1] sm:$0xff] %v391_v37  ;;  %v396_v39 = vmax.f32 %v4651_v30, 0.0  ;;  %3897 = vmatpush3.bf16.msra.mxu0 %v4595_v0  ;;  %4329 = vmatpush3.bf16.msra.mxu1 %v4595_v0  ;;  %v4703_v34 = vpack.c.bf16 %v377_v60, %v376_v56  ;;  %v4710_v37 = vadd.f32 %v4507_v11, %v329_v41  ;;  %v4358_v30 = vld [vmem:[%s5737_s1 + $0x90] sm:$0xff]   ;;  %v4421_v48 = vmov 0.0|0.0  }
  0x2a   : > { %463 = vst [vmem:[#allocation2 + $0x31] sm:$0xff] %v376_v56  ;;  %464 = vst [vmem:[#allocation2 + $0x39] sm:$0xff] %v377_v60  ;;  %3930 = vmatprep.subr.bf16.mxu1 %v4347_v25  ;;  %3978 = vmatprep.subr.bf16.mxu0 %v4348_v26  ;;  %v599_v56 = vpack.c.bf16 %v393_v62, %v392_v61  ;;  %v4728_v60 = vadd.f32 %v4507_v11, %v314_v49  ;;  %v385_v13 = vmax.f32 %v4735_v53, 0.0  ;;  %v1041_v42 = vld [vmem:[#allocation2 + $0xa] sm:$0xff] }
  0x2b   : > { %479 = vst [vmem:[#allocation2 + $0xf1] sm:$0xff] %v392_v61  ;;  %480 = vst [vmem:[#allocation2 + $0xf9] sm:$0xff] %v393_v62  ;;  %v330_v0 = vmul.f32 %v4502_v10, %v290_v50  ;;  %v399_v4 = vmax.f32 %v4710_v37, 0.0  ;;  %v316_v61 = vmul.f32 %v4502_v10, %v276_v27  ;;  %v293_v62 = vld [vmem:[%s4490_s8 + $0xe8] sm:$0xff]  ;;  %v369_v14 = vadd.f32 %v4507_v11, %v331_v54  ;;  %v4363_v37 = vld [vmem:[%s5737_s1 + $0xf8] sm:$0xff]  }
  0x2c   : > { %465 = vst [vmem:[#allocation2 + $0x49] sm:$0xff] %v378_v1  ;;  %466 = vst [vmem:[#allocation2 + $0x51] sm:$0xff] %v379_v2  ;;  %3899 = vmatmul.mubr.bf16.vlgmr.msra.gmra.mxu0 %v4646_v29  ;;  %3915 = vmatmul.mubr.bf16.vlgmr.msra.gmra.mxu1 %v598_v45  ;;  %v384_v6 = vmax.f32 %v4728_v60, 0.0  ;;  %v355_v20 = vadd.f32 %v4507_v11, %v317_v8  ;;  %v333_v23 = vmul.f32 %v4502_v10, %v293_v62  ;;  %v4366_v8 = vld [vmem:[%s5737_s1 + $0x130] sm:$0xff]  }
  0x2d   : > { %481 = vst [vmem:[#allocation2 + $0x109] sm:$0xff] %v394_v9  ;;  %482 = vst [vmem:[#allocation2 + $0x111] sm:$0xff] %v395_v17  ;;  %v4743_v7 = vadd.f32 %v4507_v11, %v330_v0  ;;  %3931 = vmatpush3.bf16.msra.mxu1 %v4347_v25  ;;  %3979 = vmatpush3.bf16.msra.mxu0 %v4348_v26  ;;  %v4752_v15 = vadd.f32 %v4507_v11, %v316_v61  ;;  %v401_v25 = vmax.f32 %v369_v14, 0.0 }
  0x2e   : > { %467 = vst [vmem:[#allocation2 + $0x61] sm:$0xff] %v380_v32  ;;  %468 = vst [vmem:[#allocation2 + $0x69] sm:$0xff] %v381_v33  ;;  %3932 = vmatprep.subr.bf16.mxu1 %v4349_v31  ;;  %3980 = vmatprep.subr.bf16.mxu0 %v4350_v52  ;;  %v370_v24 = vadd.f32 %v4507_v11, %v332_v12  ;;  %v4769_v28 = vpack.c.bf16 %v379_v2, %v378_v1  ;;  %v387_v43 = vmax.f32 %v355_v20, 0.0 }
  0x2f   : > { %483 = vst [vmem:[#allocation2 + $0x121] sm:$0xff] %v396_v39  ;;  %484 = vst [vmem:[#allocation2 + $0x129] sm:$0xff] %v397_v40  ;;  %v400_v19 = vmax.f32 %v4743_v7, 0.0  ;;  %3902 = vmatprep.mubr.bf16.mxu0 %v4703_v34  ;;  %3918 = vmatprep.mubr.bf16.mxu1 %v599_v56  ;;  %v386_v26 = vmax.f32 %v4752_v15, 0.0  ;;  %v600_v41 = vpack.c.bf16 %v395_v17, %v394_v9  ;;  %v4356_v9 = vld [vmem:[%s5737_s1 + $0x98] sm:$0xff]   ;;  %v496_v51 = vld [vmem:[#allocation2 + $0x20] sm:$0xff] }
  0x30   : > { %469 = vst [vmem:[#allocation2 + $0x79] sm:$0xff] %v382_v46  ;;  %470 = vst [vmem:[#allocation2 + $0x81] sm:$0xff] %v383_v47  ;;  %v371_v44 = vadd.f32 %v4507_v11, %v333_v23  ;;  %v402_v45 = vmax.f32 %v370_v24, 0.0  ;;  %v4787_v2 = vpack.c.bf16 %v381_v33, %v380_v32  ;;  %v4793_v3 = vpack.c.bf16 %v397_v40, %v396_v39  ;;  %v4359_v33 = vld [vmem:[%s5737_s1 + $0x8] sm:$0xff]   ;;  %v495_v50 = vld [vmem:[#allocation2 + $0x18] sm:$0xff] }
  0x31   : > { %485 = vst [vmem:[#allocation2 + $0x139] sm:$0xff] %v398_v55  ;;  %486 = vst [vmem:[#allocation2 + $0x141] sm:$0xff] %v399_v4  ;;  %3933 = vmatpush3.bf16.msra.mxu1 %v4349_v31  ;;  %3981 = vmatpush3.bf16.msra.mxu0 %v4350_v52  ;;  %v4808_v17 = vpack.c.bf16 %v383_v47, %v382_v46  ;;  %v4814_v21 = vpack.c.bf16 %v399_v4, %v398_v55  ;;  %v1040_v40 = vld [vmem:[#allocation2 + $0x2] sm:$0xff]  ;;  %v1042_v27 = vld [vmem:[#allocation2 + $0x1a] sm:$0xff] }
  0x32   : > { %471 = vst [vmem:[#allocation2 + $0x91] sm:$0xff] %v384_v6  ;;  %472 = vst [vmem:[#allocation2 + $0x99] sm:$0xff] %v385_v13  ;;  %3934 = vmatprep.subr.bf16.mxu1 %v4351_v16  ;;  %3982 = vmatprep.subr.bf16.mxu0 %v4352_v18  ;;  %v403_v1 = vmax.f32 %v371_v44, 0.0  ;;  %v4822_v35 = vpack.c.bf16 %v385_v13, %v384_v6  ;;  %v4824_v32 = vpack.c.bf16 %v401_v25, %v400_v19  ;;  %v4361_v46 = vld [vmem:[%s5737_s1] sm:$0xff]   ;;  %v4364_v55 = vld [vmem:[%s5737_s1 + $0x138] sm:$0xff]  }
  0x33   : > { %487 = vst [vmem:[#allocation2 + $0x151] sm:$0xff] %v400_v19  ;;  %488 = vst [vmem:[#allocation2 + $0x159] sm:$0xff] %v401_v25  ;;  %v4836_v38 = vpack.c.bf16 %v387_v43, %v386_v26  ;;  %v4362_v47 = vld [vmem:[%s5737_s1 + $0x80] sm:$0xff]   ;;  %v1072_v49 = vpack.c.bf16 %v1041_v42, %v1040_v40  ;;  %v497_v59 = vld [vmem:[#allocation2 + $0x30] sm:$0xff]  ;;  %v4854_v60 = vpack.c.bf16 %v496_v51, %v495_v50 }
  0x34   : > { %473 = vst [vmem:[#allocation2 + $0xa9] sm:$0xff] %v386_v26  ;;  %474 = vst [vmem:[#allocation2 + $0xb1] sm:$0xff] %v387_v43  ;;  %3903 = vmatmul.mubr.bf16.gmra.mxu0 %v4769_v28  ;;  %3919 = vmatmul.mubr.bf16.gmra.mxu1 %v600_v41  ;;  %v4838_v39 = vpack.c.bf16 %v403_v1, %v402_v45  ;;  %v1043_v31 = vld [vmem:[#allocation2 + $0x22] sm:$0xff]  ;;  %v498_v63 = vld [vmem:[#allocation2 + $0x38] sm:$0xff] }
  0x35   : > { %489 = vst [vmem:[#allocation2 + $0x169] sm:$0xff] %v402_v45  ;;  %490 = vst [vmem:[#allocation2 + $0x171] sm:$0xff] %v403_v1  ;;  %3935 = vmatpush3.bf16.msra.mxu1 %v4351_v16  ;;  %3983 = vmatpush3.bf16.msra.mxu0 %v4352_v18  ;;  %v1044_v52 = vld [vmem:[#allocation2 + $0x32] sm:$0xff]  ;;  %v1045_v56 = vld [vmem:[#allocation2 + $0x3a] sm:$0xff]  ;;  %v4856_v0 = vpack.c.bf16 %v1043_v31, %v1042_v27  ;;  %v4858_v4 = vpack.c.bf16 %v498_v63, %v497_v59 }
  0x36   : > { %3936 = vmatprep.subr.bf16.mxu1 %v4353_v57  ;;  %3984 = vmatprep.subr.bf16.mxu0 %v4354_v58  ;;  %v4860_v53 = vpack.c.bf16 %v1045_v56, %v1044_v52  ;;  %v499_v54 = vld [vmem:[#allocation2 + $0x48] sm:$0xff]  ;;  %v500_v61 = vld [vmem:[#allocation2 + $0x50] sm:$0xff]  ;;  %v501_v12 = vld [vmem:[#allocation2 + $0x60] sm:$0xff] }
  0x37   : > { %3906 = vmatprep.mubr.bf16.mxu0 %v4787_v2  ;;  %3922 = vmatprep.mubr.bf16.mxu1 %v4793_v3  ;;  %v1046_v62 = vld [vmem:[#allocation2 + $0x4a] sm:$0xff]  ;;  %v1047_v6 = vld [vmem:[#allocation2 + $0x52] sm:$0xff]  ;;  %v1048_v14 = vld [vmem:[#allocation2 + $0x62] sm:$0xff]  ;;  %v4878_v19 = vpack.c.bf16 %v500_v61, %v499_v54 }
  0x38   : > { %v4365_v7 = vld [vmem:[%s5737_s1 + $0xf0] sm:$0xff]   ;;  %v502_v13 = vld [vmem:[#allocation2 + $0x68] sm:$0xff]  ;;  %v4880_v20 = vpack.c.bf16 %v1047_v6, %v1046_v62  ;;  %v4369_v25 = vld [vmem:[%s5737_s1 + $0xe0] sm:$0xff]  }
  0x39   : > { %3937 = vmatpush3.bf16.msra.mxu1 %v4353_v57  ;;  %3985 = vmatpush3.bf16.msra.mxu0 %v4354_v58  ;;  %v1049_v15 = vld [vmem:[#allocation2 + $0x6a] sm:$0xff]  ;;  %v4882_v23 = vpack.c.bf16 %v502_v13, %v501_v12  ;;  %v503_v26 = vld [vmem:[#allocation2 + $0x78] sm:$0xff]  ;;  %v504_v41 = vld [vmem:[#allocation2 + $0x80] sm:$0xff] }
  0x3a   : > { %3938 = vmatprep.subr.bf16.mxu1 %v4355_v5  ;;  %3986 = vmatprep.subr.bf16.mxu0 %v4356_v9  ;;  %v4367_v16 = vld [vmem:[%s5737_s1 + $0xe8] sm:$0xff]   ;;  %v4884_v24 = vpack.c.bf16 %v1049_v15, %v1048_v14  ;;  %v1050_v43 = vld [vmem:[#allocation2 + $0x7a] sm:$0xff]  ;;  %v505_v57 = vld [vmem:[#allocation2 + $0x90] sm:$0xff] }
  0x3b   : > { %v4368_v18 = vld [vmem:[%s5737_s1 + $0x128] sm:$0xff]   ;;  %v4370_v45 = vld [vmem:[%s5737_s1 + $0x120] sm:$0xff]   ;;  %v506_v58 = vld [vmem:[#allocation2 + $0x98] sm:$0xff] }
  0x3c   : > { %3907 = vmatmul.mubr.bf16.gmra.mxu0 %v4808_v17  ;;  %3923 = vmatmul.mubr.bf16.gmra.mxu1 %v4814_v21  ;;  %v1051_v44 = vld [vmem:[#allocation2 + $0x82] sm:$0xff]  ;;  %v1052_v1 = vld [vmem:[#allocation2 + $0x92] sm:$0xff] }
  0x3d   : > { %3939 = vmatpush3.bf16.msra.mxu1 %v4355_v5  ;;  %3987 = vmatpush3.bf16.msra.mxu0 %v4356_v9  ;;  %v1053_v5 = vld [vmem:[#allocation2 + $0x9a] sm:$0xff]  ;;  %v507_v42 = vld [vmem:[#allocation2 + $0xa8] sm:$0xff]  ;;  %v4374_v50 = vld [vmem:[%s5737_s1 + $0x110] sm:$0xff]  }
  0x3e   : > { %3940 = vmatprep.subr.bf16.mxu1 %v4357_v22  ;;  %3988 = vmatprep.subr.bf16.mxu0 %v4358_v30  ;;  %v4371_v9 = vld [vmem:[%s5737_s1 + $0xd8] sm:$0xff]   ;;  %v4908_v40 = vpack.c.bf16 %v1053_v5, %v1052_v1  ;;  %v509_v27 = vld [vmem:[#allocation2 + $0xc0] sm:$0xff]  ;;  %v510_v31 = vld [vmem:[#allocation2 + $0xc8] sm:$0xff] }
  0x3f   : > { %3910 = vmatprep.mubr.bf16.mxu0 %v4822_v35  ;;  %3926 = vmatprep.mubr.bf16.mxu1 %v4824_v32  ;;  %v1055_v51 = vld [vmem:[#allocation2 + $0xb2] sm:$0xff]  ;;  %v4375_v59 = vld [vmem:[%s5737_s1 + $0xc8] sm:$0xff]   ;;  %v4930_v56 = vpack.c.bf16 %v510_v31, %v509_v27  ;;  %v4377_v61 = vld [vmem:[%s5737_s1 + $0xc0] sm:$0xff]  }
  0x40   : > { %v4376_v63 = vld [vmem:[%s5737_s1 + $0x108] sm:$0xff]   ;;  %v511_v62 = vld [vmem:[#allocation2 + $0xd8] sm:$0xff]  ;;  %v512_v6 = vld [vmem:[#allocation2 + $0xe0] sm:$0xff] }
  0x41   : > { %3941 = vmatpush3.bf16.msra.mxu1 %v4357_v22  ;;  %3989 = vmatpush3.bf16.msra.mxu0 %v4358_v30  ;;  %v4372_v22 = vld [vmem:[%s5737_s1 + $0x118] sm:$0xff]   ;;  %v4902_v30 = vpack.c.bf16 %v504_v41, %v503_v26  ;;  %v4378_v12 = vld [vmem:[%s5737_s1 + $0x100] sm:$0xff]   ;;  %v294_v13 = vld [vmem:[%s4490_s8 + $0xf0] sm:$0xff] }
  0x42   : > { %3942 = vmatprep.subr.bf16.mxu1 %v4359_v33  ;;  %3990 = vmatprep.subr.bf16.mxu0 %v4360_v36  ;;  %v513_v14 = vld [vmem:[#allocation2 + $0xf0] sm:$0xff]  ;;  %v514_v15 = vld [vmem:[#allocation2 + $0xf8] sm:$0xff]  ;;  %v1064_v27 = vld [vmem:[#allocation2 + $0x122] sm:$0xff] }
  0x43   : > { %v1061_v26 = vld [vmem:[#allocation2 + $0xfa] sm:$0xff]  ;;  %v4964_v5 = vpack.c.bf16 %v514_v15, %v513_v14  ;;  %v1065_v31 = vld [vmem:[#allocation2 + $0x12a] sm:$0xff] }
  0x44   : > { %3911 = vmatmul.mubr.bf16.gmra.mxu0 %v4836_v38  ;;  %3927 = vmatmul.mubr.bf16.gmra.mxu1 %v4838_v39  ;;  %v1069_v14 = vld [vmem:[#allocation2 + $0x15a] sm:$0xff] }
  0x45   : > { %3943 = vmatpush3.bf16.msra.mxu1 %v4359_v33  ;;  %3991 = vmatpush3.bf16.msra.mxu0 %v4360_v36  ;;  %v4904_v33 = vpack.c.bf16 %v1051_v44, %v1050_v43  ;;  %v4906_v36 = vpack.c.bf16 %v506_v58, %v505_v57  ;;  %v4951_v43 = vld [vmem:[%s5737_s1 + $0x178] sm:$0xff]   ;;  %v4960_v58 = vpack.c.bf16 %v512_v6, %v511_v62  ;;  %v520_v62 = vld [vmem:[#allocation2 + $0x140] sm:$0xff] }
  0x46   : > { %3944 = vmatprep.subr.bf16.mxu1 %v4361_v46  ;;  %3992 = vmatprep.subr.bf16.mxu0 %v4362_v47  ;;  %v1066_v6 = vld [vmem:[#allocation2 + $0x13a] sm:$0xff] }
  0x47   : > { %3946 = vmatprep.mubr.bf16.mxu1 %v4421_v48  ;;  %3994 = vmatprep.mubr.bf16.mxu0 %v1072_v49  ;;  %v4373_v49 = vld [vmem:[%s5737_s1 + $0xd0] sm:$0xff]  }
  0x49   : > { %3945 = vmatpush3.bf16.msra.mxu1 %v4361_v46  ;;  %3993 = vmatpush3.bf16.msra.mxu0 %v4362_v47  ;;  %v508_v46 = vld [vmem:[#allocation2 + $0xb0] sm:$0xff] }
  0x4a   : > { %4026 = vmatprep.subr.bf16.mxu1 %v4363_v37  ;;  %4074 = vmatprep.subr.bf16.mxu0 %v4364_v55  ;;  %v1054_v47 = vld [vmem:[#allocation2 + $0xaa] sm:$0xff]  ;;  %v4926_v48 = vpack.c.bf16 %v508_v46, %v507_v42 }
  0x4b   : > { %v4928_v52 = vpack.c.bf16 %v1055_v51, %v1054_v47  ;;  %v515_v42 = vld [vmem:[#allocation2 + $0x108] sm:$0xff]  ;;  %v516_v46 = vld [vmem:[#allocation2 + $0x110] sm:$0xff] }
  0x4c   : > { %3947 = vmatmul.mubr.bf16.vlgmr.msra.gmra.mxu1 %v4854_v60  ;;  %3995 = vmatmul.mubr.bf16.vlgmr.msra.gmra.mxu0 %v4856_v0  ;;  %v1062_v47 = vld [vmem:[#allocation2 + $0x10a] sm:$0xff] }
  0x4d   : > { %4027 = vmatpush3.bf16.msra.mxu1 %v4363_v37  ;;  %4075 = vmatpush3.bf16.msra.mxu0 %v4364_v55  ;;  %v1056_v37 = vld [vmem:[#allocation2 + $0xc2] sm:$0xff]  ;;  %v1057_v55 = vld [vmem:[#allocation2 + $0xca] sm:$0xff] }
  0x4e   : > { %3950 = vmatprep.mubr.bf16.mxu1 %v4858_v4  ;;  %3998 = vmatprep.mubr.bf16.mxu0 %v4860_v53  ;;  %v4932_v54 = vpack.c.bf16 %v1057_v55, %v1056_v37  ;;  %v518_v51 = vld [vmem:[#allocation2 + $0x128] sm:$0xff]  ;;  %v4976_v37 = vpack.c.bf16 %v516_v46, %v515_v42  ;;  %v4381_v42 = vld [vmem:[%s5737_s1 + $0x170] sm:$0xff]  }
  0x4f   : > { %4028 = vmatprep.subr.bf16.mxu1 %v4365_v7  ;;  %4076 = vmatprep.subr.bf16.mxu0 %v4366_v8  ;;  %v4382_v46 = vld [vmem:[%s5737_s1 + $0x1b0] sm:$0xff]  }
  0x51   : > { %4029 = vmatpush3.bf16.msra.mxu1 %v4365_v7  ;;  %4077 = vmatpush3.bf16.msra.mxu0 %v4366_v8  ;;  %v1058_v7 = vld [vmem:[#allocation2 + $0xda] sm:$0xff]  ;;  %v1059_v8 = vld [vmem:[#allocation2 + $0xe2] sm:$0xff] }
  0x52   : > { %4030 = vmatprep.subr.bf16.mxu1 %v4367_v16  ;;  %4078 = vmatprep.subr.bf16.mxu0 %v4368_v18 }
  0x54   : > { %3951 = vmatmul.mubr.bf16.gmra.mxu1 %v4878_v19  ;;  %3999 = vmatmul.mubr.bf16.gmra.mxu0 %v4880_v20 }
  0x55   : > { %3954 = vmatprep.mubr.bf16.mxu1 %v4882_v23  ;;  %4002 = vmatprep.mubr.bf16.mxu0 %v4884_v24 }
  0x56   : > { %4031 = vmatpush3.bf16.msra.mxu1 %v4367_v16  ;;  %4079 = vmatpush3.bf16.msra.mxu0 %v4368_v18  ;;  %v1060_v16 = vld [vmem:[#allocation2 + $0xf2] sm:$0xff] }
  0x57   : > { %4032 = vmatprep.subr.bf16.mxu1 %v4369_v25  ;;  %4080 = vmatprep.subr.bf16.mxu0 %v4370_v45  ;;  %v295_v18 = vld [vmem:[%s4490_s8 + $0xf8] sm:$0xff] }
  0x58   : > { %v335_v41 = vmul.f32 %v4502_v10, %v295_v18 }
  0x5a   : > { %4033 = vmatpush3.bf16.msra.mxu1 %v4369_v25  ;;  %4081 = vmatpush3.bf16.msra.mxu0 %v4370_v45  ;;  %v334_v25 = vmul.f32 %v4502_v10, %v294_v13  ;;  %v4957_v45 = vld [vmem:[%s5737_s1 + $0x1b8] sm:$0xff]   ;;  %v373_v57 = vadd.f32 %v4507_v11, %v335_v41  ;;  %v4962_v10 = vpack.c.bf16 %v1059_v8, %v1058_v7  ;;  %v1067_v7 = vld [vmem:[#allocation2 + $0x142] sm:$0xff]  ;;  %v521_v8 = vld [vmem:[#allocation2 + $0x150] sm:$0xff] }
  0x5b   : > { %4034 = vmatprep.subr.bf16.mxu1 %v4371_v9  ;;  %4082 = vmatprep.subr.bf16.mxu0 %v4372_v22  ;;  %v1068_v13 = vld [vmem:[#allocation2 + $0x152] sm:$0xff] }
  0x5c   : > { %3955 = vmatmul.mubr.bf16.gmra.mxu1 %v4902_v30  ;;  %4003 = vmatmul.mubr.bf16.gmra.mxu0 %v4904_v33  ;;  %v372_v44 = vadd.f32 %v4507_v11, %v334_v25  ;;  %v4994_v25 = vpack.c.bf16 %v1069_v14, %v1068_v13  ;;  %v524_v41 = vld [vmem:[#allocation2 + $0x170] sm:$0xff]  ;;  %v4395_v13 = vld [vmem:[%s5737_s1 + $0x1f8] sm:$0xff]  }
  0x5d   : > { %3958 = vmatprep.mubr.bf16.mxu1 %v4906_v36  ;;  %4006 = vmatprep.mubr.bf16.mxu0 %v4908_v40  ;;  %v4396_v14 = vld [vmem:[%s5737_s1 + $0x238] sm:$0xff]  }
  0x5e   : > { %4035 = vmatpush3.bf16.msra.mxu1 %v4371_v9  ;;  %4083 = vmatpush3.bf16.msra.mxu0 %v4372_v22  ;;  %v404_v1 = vmax.f32 %v372_v44, 0.0  ;;  %v4966_v9 = vpack.c.bf16 %v1061_v26, %v1060_v16  ;;  %v405_v22 = vmax.f32 %v373_v57, 0.0  ;;  %v4990_v16 = vpack.c.bf16 %v1067_v7, %v1066_v6  ;;  %v523_v26 = vld [vmem:[#allocation2 + $0x168] sm:$0xff]  ;;  %v1071_v57 = vld [vmem:[#allocation2 + $0x172] sm:$0xff] }
  0x5f   : > { %4036 = vmatprep.subr.bf16.mxu1 %v4373_v49  ;;  %4084 = vmatprep.subr.bf16.mxu0 %v4374_v50  ;;  %v1070_v44 = vld [vmem:[#allocation2 + $0x16a] sm:$0xff]  ;;  %v1671_v7 = vld [vmem:[#allocation2 + $0xf9] sm:$0xff] }
  0x60   : > { %491 = vst [vmem:[#allocation2 + $0x181] sm:$0xff] %v404_v1  ;;  %492 = vst [vmem:[#allocation2 + $0x189] sm:$0xff] %v405_v22  ;;  %v4970_v11 = vpack.c.bf16 %v405_v22, %v404_v1  ;;  %v5000_v1 = vpack.c.bf16 %v524_v41, %v523_v26  ;;  %v5002_v22 = vpack.c.bf16 %v1071_v57, %v1070_v44  ;;  %v1670_v6 = vld [vmem:[#allocation2 + $0xf1] sm:$0xff] }
  0x61   : > { %v5078_v26 = vpack.c.bf16 %v1671_v7, %v1670_v6  ;;  %v2573_v7 = vld [vmem:[#allocation2 + $0x49] sm:$0xff] }
  0x62   : > { %4037 = vmatpush3.bf16.msra.mxu1 %v4373_v49  ;;  %4085 = vmatpush3.bf16.msra.mxu0 %v4374_v50  ;;  %v1063_v49 = vld [vmem:[#allocation2 + $0x112] sm:$0xff]  ;;  %v517_v50 = vld [vmem:[#allocation2 + $0x120] sm:$0xff] }
  0x63   : > { %4038 = vmatprep.subr.bf16.mxu1 %v4375_v59  ;;  %4086 = vmatprep.subr.bf16.mxu0 %v4376_v63  ;;  %v4978_v55 = vpack.c.bf16 %v1063_v49, %v1062_v47  ;;  %v1666_v47 = vld [vmem:[#allocation2 + $0xc1] sm:$0xff]  ;;  %v1667_v49 = vld [vmem:[#allocation2 + $0xc9] sm:$0xff] }
  0x64   : > { %3959 = vmatmul.mubr.bf16.gmra.mxu1 %v4926_v48  ;;  %4007 = vmatmul.mubr.bf16.gmra.mxu0 %v4928_v52 }
  0x65   : > { %3962 = vmatprep.mubr.bf16.mxu1 %v4930_v56  ;;  %4010 = vmatprep.mubr.bf16.mxu0 %v4932_v54 }
  0x66   : > { %4039 = vmatpush3.bf16.msra.mxu1 %v4375_v59  ;;  %4087 = vmatpush3.bf16.msra.mxu0 %v4376_v63  ;;  %v4980_v59 = vpack.c.bf16 %v518_v51, %v517_v50  ;;  %v4982_v63 = vpack.c.bf16 %v1065_v31, %v1064_v27  ;;  %v1668_v50 = vld [vmem:[#allocation2 + $0xd9] sm:$0xff]  ;;  %v1669_v51 = vld [vmem:[#allocation2 + $0xe1] sm:$0xff]  ;;  %v5058_v31 = vpack.c.bf16 %v1667_v49, %v1666_v47 }
  0x67   : > { %4040 = vmatprep.subr.bf16.mxu1 %v4377_v61  ;;  %4088 = vmatprep.subr.bf16.mxu0 %v4378_v12  ;;  %v4391_v27 = vld [vmem:[%s5737_s1 + $0x148] sm:$0xff]   ;;  %v1376_v44 = vld [vmem:[#allocation2 + $0x180] sm:$0xff] }
  0x68   : > { %v1377_v57 = vld [vmem:[#allocation2 + $0x188] sm:$0xff]  ;;  %v2878_v47 = vld [vmem:[#allocation2 + $0x3a] sm:$0xff] }
  0x6a   : > { %4041 = vmatpush3.bf16.msra.mxu1 %v4377_v61  ;;  %4089 = vmatpush3.bf16.msra.mxu0 %v4378_v12  ;;  %v519_v61 = vld [vmem:[#allocation2 + $0x138] sm:$0xff] }
  0x6b   : > { %4122 = vmatprep.subr.bf16.mxu1 %v4951_v43  ;;  %4170 = vmatprep.subr.bf16.mxu0 %v4957_v45  ;;  %v522_v12 = vld [vmem:[#allocation2 + $0x158] sm:$0xff]  ;;  %v4988_v15 = vpack.c.bf16 %v520_v62, %v519_v61  ;;  %v5060_v61 = vpack.c.bf16 %v1669_v51, %v1668_v50  ;;  %v4394_v62 = vld [vmem:[%s5737_s1 + $0x180] sm:$0xff]  }
  0x6c   : > { %3963 = vmatmul.mubr.bf16.gmra.mxu1 %v4960_v58  ;;  %4011 = vmatmul.mubr.bf16.gmra.mxu0 %v4962_v10  ;;  %v4992_v18 = vpack.c.bf16 %v522_v12, %v521_v8  ;;  %v1672_v8 = vld [vmem:[#allocation2 + $0x109] sm:$0xff]  ;;  %v1673_v12 = vld [vmem:[#allocation2 + $0x111] sm:$0xff] }
  0x6d   : > { %3966 = vmatprep.mubr.bf16.mxu1 %v4964_v5  ;;  %4014 = vmatprep.mubr.bf16.mxu0 %v4966_v9  ;;  %v5080_v41 = vpack.c.bf16 %v1673_v12, %v1672_v8  ;;  %v2574_v8 = vld [vmem:[#allocation2 + $0x51] sm:$0xff] }
  0x6e   : > { %v2879_v12 = vld [vmem:[#allocation2 + $0x4a] sm:$0xff] }
  0x74   : > { %3967 = vmatmul.mubr.bf16.gmra.mxu1 %v4976_v37  ;;  %4015 = vmatmul.mubr.bf16.gmra.mxu0 %v4978_v55 }
  0x75   : > { %3970 = vmatprep.mubr.bf16.mxu1 %v4980_v59  ;;  %4018 = vmatprep.mubr.bf16.mxu0 %v4982_v63 }
  0x7c   : > { %3971 = vmatmul.mubr.bf16.gmra.mxu1 %v4988_v15  ;;  %4019 = vmatmul.mubr.bf16.gmra.mxu0 %v4990_v16 }
  0x7d   : > { %3974 = vmatprep.mubr.bf16.mxu1 %v4992_v18  ;;  %4022 = vmatprep.mubr.bf16.mxu0 %v4994_v25 }
  0x84   : > { %3975 = vmatmul.mubr.bf16.gmra.mxu1 %v5000_v1  ;;  %4023 = vmatmul.mubr.bf16.gmra.mxu0 %v5002_v22 }
  0x85   : > { %4042 = vmatprep.mubr.bf16.mxu1 %v4854_v60  ;;  %4090 = vmatprep.mubr.bf16.mxu0 %v4646_v29  ;;  %v4383_v29 = vld [vmem:[%s5737_s1 + $0x168] sm:$0xff]  }
  0x86   : > { %v4384_v60 = vld [vmem:[%s5737_s1 + $0x1a8] sm:$0xff]  }
  0x8c   : > { %4043 = vmatmul.mubr.bf16.vlgmr.msra.gmra.mxu1 %v4858_v4  ;;  %4091 = vmatmul.mubr.bf16.vlgmr.msra.gmra.mxu0 %v4703_v34  ;;  %v4385_v34 = vld [vmem:[%s5737_s1 + $0x160] sm:$0xff]  }
  0x8d   : > { %4123 = vmatpush3.bf16.msra.mxu1 %v4951_v43  ;;  %4171 = vmatpush3.bf16.msra.mxu0 %v4957_v45  ;;  %v4387_v43 = vld [vmem:[%s5737_s1 + $0x158] sm:$0xff]  }
  0x8e   : > { %4046 = vmatprep.mubr.bf16.mxu1 %v4878_v19  ;;  %4094 = vmatprep.mubr.bf16.mxu0 %v4769_v28  ;;  %v4386_v28 = vld [vmem:[%s5737_s1 + $0x1a0] sm:$0xff]   ;;  %v4388_v45 = vld [vmem:[%s5737_s1 + $0x198] sm:$0xff]  }
  0x8f   : > { %4124 = vmatprep.subr.bf16.mxu1 %v4381_v42  ;;  %4172 = vmatprep.subr.bf16.mxu0 %v4382_v46 }
  0x91   : > { %4125 = vmatpush3.bf16.msra.mxu1 %v4381_v42  ;;  %4173 = vmatpush3.bf16.msra.mxu0 %v4382_v46  ;;  %v5094_v42 = vpack.c.bf16 %v1377_v57, %v1376_v44 }
  0x92   : > { %4126 = vmatprep.subr.bf16.mxu1 %v4383_v29  ;;  %4174 = vmatprep.subr.bf16.mxu0 %v4384_v60 }
  0x94   : > { %4047 = vmatmul.mubr.bf16.gmra.mxu1 %v4882_v23  ;;  %4095 = vmatmul.mubr.bf16.gmra.mxu0 %v4787_v2  ;;  %v4389_v2 = vld [vmem:[%s5737_s1 + $0x150] sm:$0xff]  }
  0x95   : > { %4050 = vmatprep.mubr.bf16.mxu1 %v4902_v30  ;;  %4098 = vmatprep.mubr.bf16.mxu0 %v4808_v17  ;;  %v4390_v17 = vld [vmem:[%s5737_s1 + $0x190] sm:$0xff]  }
  0x96   : > { %4127 = vmatpush3.bf16.msra.mxu1 %v4383_v29  ;;  %4175 = vmatpush3.bf16.msra.mxu0 %v4384_v60 }
  0x97   : > { %4128 = vmatprep.subr.bf16.mxu1 %v4385_v34  ;;  %4176 = vmatprep.subr.bf16.mxu0 %v4386_v28 }
  0x9a   : > { %4129 = vmatpush3.bf16.msra.mxu1 %v4385_v34  ;;  %4177 = vmatpush3.bf16.msra.mxu0 %v4386_v28 }
  0x9b   : > { %4130 = vmatprep.subr.bf16.mxu1 %v4387_v43  ;;  %4178 = vmatprep.subr.bf16.mxu0 %v4388_v45 }
  0x9c   : > { %4051 = vmatmul.mubr.bf16.gmra.mxu1 %v4906_v36  ;;  %4099 = vmatmul.mubr.bf16.gmra.mxu0 %v4822_v35  ;;  %v4392_v35 = vld [vmem:[%s5737_s1 + $0x188] sm:$0xff]  }
  0x9d   : > { %4054 = vmatprep.mubr.bf16.mxu1 %v4926_v48  ;;  %4102 = vmatprep.mubr.bf16.mxu0 %v4836_v38  ;;  %v4393_v38 = vld [vmem:[%s5737_s1 + $0x140] sm:$0xff]  }
  0x9e   : > { %4131 = vmatpush3.bf16.msra.mxu1 %v4387_v43  ;;  %4179 = vmatpush3.bf16.msra.mxu0 %v4388_v45 }
  0x9f   : > { %4132 = vmatprep.subr.bf16.mxu1 %v4389_v2  ;;  %4180 = vmatprep.subr.bf16.mxu0 %v4390_v17 }
  0xa2   : > { %4133 = vmatpush3.bf16.msra.mxu1 %v4389_v2  ;;  %4181 = vmatpush3.bf16.msra.mxu0 %v4390_v17  ;;  %v2572_v2 = vld [vmem:[#allocation2 + $0x39] sm:$0xff] }
  0xa3   : > { %4134 = vmatprep.subr.bf16.mxu1 %v4391_v27  ;;  %4182 = vmatprep.subr.bf16.mxu0 %v4392_v35  ;;  %v2877_v17 = vld [vmem:[#allocation2 + $0x32] sm:$0xff] }
  0xa4   : > { %4055 = vmatmul.mubr.bf16.gmra.mxu1 %v4930_v56  ;;  %4103 = vmatmul.mubr.bf16.gmra.mxu0 %v5058_v31 }
  0xa5   : > { %4058 = vmatprep.mubr.bf16.mxu1 %v4960_v58  ;;  %4106 = vmatprep.mubr.bf16.mxu0 %v5060_v61 }
  0xa6   : > { %4135 = vmatpush3.bf16.msra.mxu1 %v4391_v27  ;;  %4183 = vmatpush3.bf16.msra.mxu0 %v4392_v35  ;;  %v2909_v27 = vpack.c.bf16 %v2878_v47, %v2877_v17 }
  0xa7   : > { %4136 = vmatprep.subr.bf16.mxu1 %v4393_v38  ;;  %4184 = vmatprep.subr.bf16.mxu0 %v4394_v62 }
  0xaa   : > { %4137 = vmatpush3.bf16.msra.mxu1 %v4393_v38  ;;  %4185 = vmatpush3.bf16.msra.mxu0 %v4394_v62 }
  0xab   : > { %4218 = vmatprep.subr.bf16.mxu1 %v4395_v13  ;;  %4266 = vmatprep.subr.bf16.mxu0 %v4396_v14 }
  0xac   : > { %4059 = vmatmul.mubr.bf16.gmra.mxu1 %v4964_v5  ;;  %4107 = vmatmul.mubr.bf16.gmra.mxu0 %v5078_v26 }
  0xad   : > { %4062 = vmatprep.mubr.bf16.mxu1 %v4976_v37  ;;  %4110 = vmatprep.mubr.bf16.mxu0 %v5080_v41 }
  0xb4   : > { %4063 = vmatmul.mubr.bf16.gmra.mxu1 %v4980_v59  ;;  %4111 = vmatmul.mubr.bf16.gmra.mxu0 %v4793_v3  ;;  %v4397_v3 = vld [vmem:[%s5737_s1 + $0x1f0] sm:$0xff]  }
  0xb5   : > { %4066 = vmatprep.mubr.bf16.mxu1 %v4988_v15  ;;  %4114 = vmatprep.mubr.bf16.mxu0 %v4814_v21  ;;  %v4398_v21 = vld [vmem:[%s5737_s1 + $0x230] sm:$0xff]  }
  0xbc   : > { %4067 = vmatmul.mubr.bf16.gmra.mxu1 %v4992_v18  ;;  %4115 = vmatmul.mubr.bf16.gmra.mxu0 %v4824_v32  ;;  %v4399_v32 = vld [vmem:[%s5737_s1 + $0x1e8] sm:$0xff]  }
  0xbd   : > { %4070 = vmatprep.mubr.bf16.mxu1 %v5000_v1  ;;  %4118 = vmatprep.mubr.bf16.mxu0 %v4838_v39  ;;  %v4400_v39 = vld [vmem:[%s5737_s1 + $0x228] sm:$0xff]  }
  0xc4   : > { %4071 = vmatmul.mubr.bf16.gmra.mxu1 %v5094_v42  ;;  %4119 = vmatmul.mubr.bf16.gmra.mxu0 %v4970_v11 }
  0xc5   : > { %4138 = vmatprep.mubr.bf16.mxu1 %v4856_v0  ;;  %4186 = vmatprep.mubr.bf16.mxu0 %v4858_v4  ;;  %v4401_v0 = vld [vmem:[%s5737_s1 + $0x1e0] sm:$0xff]  }
  0xc6   : > { %v4402_v4 = vld [vmem:[%s5737_s1 + $0x220] sm:$0xff]  }
  0xcc   : > { %4139 = vmatmul.mubr.bf16.vlgmr.msra.gmra.mxu1 %v4860_v53  ;;  %4187 = vmatmul.mubr.bf16.vlgmr.msra.gmra.mxu0 %v4878_v19  ;;  %v4403_v53 = vld [vmem:[%s5737_s1 + $0x1d8] sm:$0xff]  }
  0xcd   : > { %4219 = vmatpush3.bf16.msra.mxu1 %v4395_v13  ;;  %4267 = vmatpush3.bf16.msra.mxu0 %v4396_v14  ;;  %v4404_v19 = vld [vmem:[%s5737_s1 + $0x218] sm:$0xff]   ;;  %v2575_v14 = vld [vmem:[#allocation2 + $0x61] sm:$0xff] }
  0xce   : > { %4142 = vmatprep.mubr.bf16.mxu1 %v4880_v20  ;;  %4190 = vmatprep.mubr.bf16.mxu0 %v4882_v23  ;;  %v4405_v20 = vld [vmem:[%s5737_s1 + $0x1d0] sm:$0xff]  }
  0xcf   : > { %4220 = vmatprep.subr.bf16.mxu1 %v4397_v3  ;;  %4268 = vmatprep.subr.bf16.mxu0 %v4398_v21  ;;  %v4406_v23 = vld [vmem:[%s5737_s1 + $0x210] sm:$0xff]  }
  0xd0   : > { %v2880_v13 = vld [vmem:[#allocation2 + $0x52] sm:$0xff] }
  0xd1   : > { %4221 = vmatpush3.bf16.msra.mxu1 %v4397_v3  ;;  %4269 = vmatpush3.bf16.msra.mxu0 %v4398_v21  ;;  %v2881_v3 = vld [vmem:[#allocation2 + $0x62] sm:$0xff]  ;;  %v2882_v21 = vld [vmem:[#allocation2 + $0x6a] sm:$0xff] }
  0xd2   : > { %4222 = vmatprep.subr.bf16.mxu1 %v4399_v32  ;;  %4270 = vmatprep.subr.bf16.mxu0 %v4400_v39 }
  0xd4   : > { %4143 = vmatmul.mubr.bf16.gmra.mxu1 %v4884_v24  ;;  %4191 = vmatmul.mubr.bf16.gmra.mxu0 %v4902_v30  ;;  %v4407_v24 = vld [vmem:[%s5737_s1 + $0x1c8] sm:$0xff]  }
  0xd5   : > { %4146 = vmatprep.mubr.bf16.mxu1 %v4904_v33  ;;  %4194 = vmatprep.mubr.bf16.mxu0 %v4906_v36  ;;  %v4408_v30 = vld [vmem:[%s5737_s1 + $0x208] sm:$0xff]   ;;  %v4409_v33 = vld [vmem:[%s5737_s1 + $0x1c0] sm:$0xff]  }
  0xd6   : > { %4223 = vmatpush3.bf16.msra.mxu1 %v4399_v32  ;;  %4271 = vmatpush3.bf16.msra.mxu0 %v4400_v39  ;;  %v4410_v36 = vld [vmem:[%s5737_s1 + $0x200] sm:$0xff]  }
  0xd7   : > { %4224 = vmatprep.subr.bf16.mxu1 %v4401_v0  ;;  %4272 = vmatprep.subr.bf16.mxu0 %v4402_v4 }
  0xda   : > { %4225 = vmatpush3.bf16.msra.mxu1 %v4401_v0  ;;  %4273 = vmatpush3.bf16.msra.mxu0 %v4402_v4  ;;  %v2604_v0 = vpack.c.bf16 %v2574_v8, %v2573_v7  ;;  %v2910_v4 = vpack.c.bf16 %v2880_v13, %v2879_v12 }
  0xdb   : > { %4226 = vmatprep.subr.bf16.mxu1 %v4403_v53  ;;  %4274 = vmatprep.subr.bf16.mxu0 %v4404_v19 }
  0xdc   : > { %4147 = vmatmul.mubr.bf16.gmra.mxu1 %v4908_v40  ;;  %4195 = vmatmul.mubr.bf16.gmra.mxu0 %v4926_v48 }
  0xdd   : > { %4150 = vmatprep.mubr.bf16.mxu1 %v4928_v52  ;;  %4198 = vmatprep.mubr.bf16.mxu0 %v4930_v56 }
  0xde   : > { %4227 = vmatpush3.bf16.msra.mxu1 %v4403_v53  ;;  %4275 = vmatpush3.bf16.msra.mxu0 %v4404_v19  ;;  %v2911_v19 = vpack.c.bf16 %v2882_v21, %v2881_v3 }
  0xdf   : > { %4228 = vmatprep.subr.bf16.mxu1 %v4405_v20  ;;  %4276 = vmatprep.subr.bf16.mxu0 %v4406_v23 }
  0xe2   : > { %4229 = vmatpush3.bf16.msra.mxu1 %v4405_v20  ;;  %4277 = vmatpush3.bf16.msra.mxu0 %v4406_v23 }
  0xe3   : > { %4230 = vmatprep.subr.bf16.mxu1 %v4407_v24  ;;  %4278 = vmatprep.subr.bf16.mxu0 %v4408_v30 }
  0xe4   : > { %4151 = vmatmul.mubr.bf16.gmra.mxu1 %v4932_v54  ;;  %4199 = vmatmul.mubr.bf16.gmra.mxu0 %v4960_v58 }
  0xe5   : > { %4154 = vmatprep.mubr.bf16.mxu1 %v4962_v10  ;;  %4202 = vmatprep.mubr.bf16.mxu0 %v4964_v5 }
  0xe6   : > { %4231 = vmatpush3.bf16.msra.mxu1 %v4407_v24  ;;  %4279 = vmatpush3.bf16.msra.mxu0 %v4408_v30 }
  0xe7   : > { %4232 = vmatprep.subr.bf16.mxu1 %v4409_v33  ;;  %4280 = vmatprep.subr.bf16.mxu0 %v4410_v36 }
  0xea   : > { %4233 = vmatpush3.bf16.msra.mxu1 %v4409_v33  ;;  %4281 = vmatpush3.bf16.msra.mxu0 %v4410_v36  ;;  %v2577_v33 = vld [vmem:[#allocation2 + $0x79] sm:$0xff]  ;;  %v2578_v36 = vld [vmem:[#allocation2 + $0x81] sm:$0xff] }
  0xeb   : > { %v2606_v13 = vpack.c.bf16 %v2578_v36, %v2577_v33  ;;  %v2887_v36 = vld [vmem:[#allocation2 + $0xaa] sm:$0xff] }
  0xec   : > { %v5158_v40 = vpop.f32.mrf.mxu0  ;;  %v5160_v48 = vpop.f32.mrf.mxu1  ;;  %4155 = vmatmul.mubr.bf16.gmra.mxu1 %v4966_v9  ;;  %4203 = vmatmul.mubr.bf16.gmra.mxu0 %v4976_v37 }
  0xed   : > { %4158 = vmatprep.mubr.bf16.mxu1 %v4978_v55  ;;  %4206 = vmatprep.mubr.bf16.mxu0 %v4980_v59 }
  0xee   : > { %v5166_v52 = vpop.f32.mrf.mxu0  ;;  %v5168_v56 = vpop.f32.mrf.mxu1 }
  0xf0   : > { %v5170_v54 = vpop.f32.mrf.mxu0  ;;  %v5172_v58 = vpop.f32.mrf.mxu1 }
  0xf2   : > { %v5174_v10 = vpop.f32.mrf.mxu0  ;;  %v5176_v5 = vpop.f32.mrf.mxu1 }
  0xf4   : > { %v5178_v46 = vpop.f32.mrf.mxu0  ;;  %v5180_v9 = vpop.f32.mrf.mxu1  ;;  %4159 = vmatmul.mubr.bf16.gmra.mxu1 %v4982_v63  ;;  %4207 = vmatmul.mubr.bf16.gmra.mxu0 %v4988_v15  ;;  %v1988_v15 = vld [vmem:[#allocation2 + $0x182] sm:$0xff] }
  0xf5   : > { %4162 = vmatprep.mubr.bf16.mxu1 %v4990_v16  ;;  %4210 = vmatprep.mubr.bf16.mxu0 %v4992_v18  ;;  %v1989_v16 = vld [vmem:[#allocation2 + $0x18a] sm:$0xff] }
  0xf6   : > { %v5186_v37 = vpop.f32.mrf.mxu0  ;;  %v5188_v55 = vpop.f32.mrf.mxu1  ;;  %v2571_v18 = vld [vmem:[#allocation2 + $0x31] sm:$0xff] }
  0xf7   : > { %v2603_v51 = vpack.c.bf16 %v2572_v2, %v2571_v18  ;;  %v2884_v18 = vld [vmem:[#allocation2 + $0x82] sm:$0xff]  ;;  %v2579_v2 = vld [vmem:[#allocation2 + $0x91] sm:$0xff] }
  0xf8   : > { %v5190_v59 = vpop.f32.mrf.mxu0  ;;  %v5192_v29 = vpop.f32.mrf.mxu1 }
  0xfa   : > { %v5194_v60 = vpop.f32.mrf.mxu0  ;;  %v5196_v34 = vpop.f32.mrf.mxu1 }
  0xfc   : > { %v5198_v28 = vpop.f32.mrf.mxu0  ;;  %v5200_v63 = vpop.f32.mrf.mxu1  ;;  %4163 = vmatmul.mubr.bf16.gmra.mxu1 %v4994_v25  ;;  %4211 = vmatmul.mubr.bf16.gmra.mxu0 %v5000_v1  ;;  %v5214_v25 = vpack.c.bf16 %v1989_v16, %v1988_v15  ;;  %v4411_v1 = vld [vmem:[#allocation2] sm:$0xff] }
  0xfd   : > { %4166 = vmatprep.mubr.bf16.mxu1 %v5002_v22  ;;  %4214 = vmatprep.mubr.bf16.mxu0 %v5094_v42  ;;  %v2312_v22 = vpack.c.bf16 %v4411_v1, %v4411_v1  ;;  %v2576_v42 = vld [vmem:[#allocation2 + $0x69] sm:$0xff]  ;;  %v2883_v16 = vld [vmem:[#allocation2 + $0x7a] sm:$0xff] }
  0xfe   : > { %v5206_v43 = vpop.f32.mrf.mxu0  ;;  %v5208_v45 = vpop.f32.mrf.mxu1  ;;  %v2605_v53 = vpack.c.bf16 %v2576_v42, %v2575_v14  ;;  %v2580_v1 = vld [vmem:[#allocation2 + $0x99] sm:$0xff]  ;;  %v2912_v14 = vpack.c.bf16 %v2884_v18, %v2883_v16 }
  0xff   : > { %v2607_v3 = vpack.c.bf16 %v2580_v1, %v2579_v2  ;;  %v2888_v16 = vld [vmem:[#allocation2 + $0xb2] sm:$0xff] }
 0x100   : > { %v5210_v49 = vpop.f32.mrf.mxu0  ;;  %v5212_v50 = vpop.f32.mrf.mxu1 }
 0x102   : > { %v5216_v35 = vpop.f32.mrf.mxu0  ;;  %v5218_v38 = vpop.f32.mrf.mxu1 }
 0x104   : > { %v5220_v62 = vpop.f32.mrf.mxu0  ;;  %v5222_v6 = vpop.f32.mrf.mxu1  ;;  %4167 = vmatmul.mubr.bf16.gmra.mxu1 %v5214_v25  ;;  %4215 = vmatmul.mubr.bf16.gmra.mxu0 %v2312_v22  ;;  %v2885_v22 = vld [vmem:[#allocation2 + $0x92] sm:$0xff] }
 0x105   : > { %4234 = vmatprep.mubr.bf16.mxu1 %v2603_v51  ;;  %4282 = vmatprep.mubr.bf16.mxu0 %v2909_v27  ;;  %v2886_v51 = vld [vmem:[#allocation2 + $0x9a] sm:$0xff] }
 0x106   : > { %v5225_v44 = vpop.f32.mrf.mxu0  ;;  %v5227_v57 = vpop.f32.mrf.mxu1  ;;  %v2913_v21 = vpack.c.bf16 %v2886_v51, %v2885_v22 }
 0x108   : > { %v5229_v32 = vpop.f32.mrf.mxu0  ;;  %v5231_v39 = vpop.f32.mrf.mxu1 }
 0x10a   : > { %v5233_v20 = vpop.f32.mrf.mxu0  ;;  %v5235_v23 = vpop.f32.mrf.mxu1 }
 0x10c   : > { %v3948_v24 = vpop.f32.mrf.mxu1  ;;  %v3996_v30 = vpop.f32.mrf.mxu0  ;;  %4235 = vmatmul.mubr.bf16.vlgmr.msra.gmra.mxu1 %v2604_v0  ;;  %4283 = vmatmul.mubr.bf16.vlgmr.msra.gmra.mxu0 %v2910_v4 }
 0x10d   : > { %v922_v15 = vadd.f32 %v3948_v24, %v5158_v40  ;;  %4238 = vmatprep.mubr.bf16.mxu1 %v2605_v53  ;;  %4286 = vmatprep.mubr.bf16.mxu0 %v2911_v19 }
 0x10e   : > { %v913_v17 = vpop.f32.mrf.mxu1  ;;  %v1187_v47 = vpop.f32.mrf.mxu0 }
 0x10f   : > { %v5238_v27 = vadd.f32 %v3996_v30, %v922_v15  ;;  %v914_v7 = vadd.f32 %v913_v17, %v5166_v52  ;;  %v2581_v52 = vld [vmem:[#allocation2 + $0xa9] sm:$0xff] }
 0x110   : > { %v3949_v8 = vpop.f32.mrf.mxu1  ;;  %v3997_v12 = vpop.f32.mrf.mxu0  ;;  %v2889_v17 = vld [vmem:[#allocation2 + $0xc2] sm:$0xff] }
 0x111   : > { %v5241_v42 = vadd.f32 %v1187_v47, %v914_v7  ;;  %v925_v40 = vadd.f32 %v3949_v8, %v5170_v54  ;;  %v2582_v54 = vld [vmem:[#allocation2 + $0xb1] sm:$0xff]  ;;  %v2914_v8 = vpack.c.bf16 %v2888_v16, %v2887_v36 }
 0x112   : > { %v916_v0 = vpop.f32.mrf.mxu1  ;;  %v1190_v4 = vpop.f32.mrf.mxu0  ;;  %v2890_v47 = vld [vmem:[#allocation2 + $0xca] sm:$0xff]  ;;  %v2608_v7 = vpack.c.bf16 %v2582_v54, %v2581_v52  ;;  %v2894_v54 = vld [vmem:[#allocation2 + $0xfa] sm:$0xff] }
 0x113   : > { %v5244_v53 = vadd.f32 %v3997_v12, %v925_v40  ;;  %v917_v19 = vadd.f32 %v916_v0, %v5174_v10 }
 0x114   : > { %v3952_v24 = vpop.f32.mrf.mxu1  ;;  %v4000_v30 = vpop.f32.mrf.mxu0  ;;  %4239 = vmatmul.mubr.bf16.gmra.mxu1 %v2606_v13  ;;  %4287 = vmatmul.mubr.bf16.gmra.mxu0 %v2912_v14  ;;  %v2915_v13 = vpack.c.bf16 %v2890_v47, %v2889_v17 }
 0x115   : > { %v5247_v15 = vadd.f32 %v1190_v4, %v917_v19  ;;  %v938_v33 = vadd.f32 %v3952_v24, %v5178_v46  ;;  %4242 = vmatprep.mubr.bf16.mxu1 %v2607_v3  ;;  %4290 = vmatprep.mubr.bf16.mxu0 %v2913_v21  ;;  %v2891_v24 = vld [vmem:[#allocation2 + $0xda] sm:$0xff] }
 0x116   : > { %v929_v18 = vpop.f32.mrf.mxu1  ;;  %v1203_v2 = vpop.f32.mrf.mxu0 }
 0x117   : > { %v5250_v1 = vadd.f32 %v4000_v30, %v938_v33  ;;  %v930_v10 = vadd.f32 %v929_v18, %v5186_v37  ;;  %v2893_v33 = vld [vmem:[#allocation2 + $0xf2] sm:$0xff] }
 0x118   : > { %v3953_v22 = vpop.f32.mrf.mxu1  ;;  %v4001_v51 = vpop.f32.mrf.mxu0  ;;  %v2917_v47 = vpack.c.bf16 %v2894_v54, %v2893_v33 }
 0x119   : > { %v5253_v12 = vadd.f32 %v1203_v2, %v930_v10  ;;  %v941_v46 = vadd.f32 %v3953_v22, %v5190_v59  ;;  %v2892_v59 = vld [vmem:[#allocation2 + $0xe2] sm:$0xff] }
 0x11a   : > { %v932_v14 = vpop.f32.mrf.mxu1  ;;  %v1206_v40 = vpop.f32.mrf.mxu0  ;;  %v2916_v2 = vpack.c.bf16 %v2892_v59, %v2891_v24 }
 0x11b   : > { %v5256_v3 = vadd.f32 %v4001_v51, %v941_v46  ;;  %v933_v21 = vadd.f32 %v932_v14, %v5194_v60  ;;  %v2591_v14 = vld [vmem:[#allocation2 + $0x121] sm:$0xff] }
 0x11c   : > { %v3956_v0 = vpop.f32.mrf.mxu1  ;;  %v4004_v4 = vpop.f32.mrf.mxu0  ;;  %4243 = vmatmul.mubr.bf16.gmra.mxu1 %v2608_v7  ;;  %4291 = vmatmul.mubr.bf16.gmra.mxu0 %v2914_v8 }
 0x11d   : > { %v5259_v37 = vadd.f32 %v1206_v40, %v933_v21  ;;  %v954_v19 = vadd.f32 %v3956_v0, %v5198_v28  ;;  %4246 = vmatprep.mubr.bf16.mxu1 %v5058_v31  ;;  %4294 = vmatprep.mubr.bf16.mxu0 %v2915_v13  ;;  %v2896_v13 = vld [vmem:[#allocation2 + $0x112] sm:$0xff]  ;;  %v2592_v0 = vld [vmem:[#allocation2 + $0x129] sm:$0xff] }
 0x11e   : > { %v945_v30 = vpop.f32.mrf.mxu1  ;;  %v1219_v52 = vpop.f32.mrf.mxu0 }
 0x11f   : > { %v5263_v36 = vadd.f32 %v4004_v4, %v954_v19  ;;  %v946_v60 = vadd.f32 %v945_v30, %v5206_v43  ;;  %v2897_v4 = vld [vmem:[#allocation2 + $0x122] sm:$0xff] }
 0x120   : > { %v3957_v16 = vpop.f32.mrf.mxu1  ;;  %v4005_v18 = vpop.f32.mrf.mxu0 }
 0x121   : > { %v5266_v17 = vadd.f32 %v1219_v52, %v946_v60  ;;  %v957_v28 = vadd.f32 %v3957_v16, %v5210_v49  ;;  %v2895_v49 = vld [vmem:[#allocation2 + $0x10a] sm:$0xff] }
 0x122   : > { %v948_v31 = vpop.f32.mrf.mxu1  ;;  %v1222_v10 = vpop.f32.mrf.mxu0  ;;  %v2918_v30 = vpack.c.bf16 %v2896_v13, %v2895_v49  ;;  %v2596_v49 = vld [vmem:[#allocation2 + $0x159] sm:$0xff] }
 0x123   : > { %v5269_v22 = vadd.f32 %v4005_v18, %v957_v28  ;;  %v949_v51 = vadd.f32 %v948_v31, %v5216_v35  ;;  %v2898_v35 = vld [vmem:[#allocation2 + $0x12a] sm:$0xff]  ;;  %v2902_v13 = vld [vmem:[#allocation2 + $0x15a] sm:$0xff] }
 0x124   : > { %v3960_v7 = vpop.f32.mrf.mxu1  ;;  %v4008_v8 = vpop.f32.mrf.mxu0  ;;  %4247 = vmatmul.mubr.bf16.gmra.mxu1 %v5060_v61  ;;  %4295 = vmatmul.mubr.bf16.gmra.mxu0 %v2916_v2  ;;  %v2919_v33 = vpack.c.bf16 %v2898_v35, %v2897_v4 }
 0x125   : > { %v5273_v43 = vadd.f32 %v1222_v10, %v949_v51  ;;  %v970_v46 = vadd.f32 %v3960_v7, %v5220_v62  ;;  %4250 = vmatprep.mubr.bf16.mxu1 %v5078_v26  ;;  %4298 = vmatprep.mubr.bf16.mxu0 %v2917_v47  ;;  %v2613_v62 = vpack.c.bf16 %v2592_v0, %v2591_v14  ;;  %v2594_v47 = vld [vmem:[#allocation2 + $0x141] sm:$0xff]  ;;  %v2595_v7 = vld [vmem:[#allocation2 + $0x151] sm:$0xff] }
 0x126   : > { %v961_v40 = vpop.f32.mrf.mxu1  ;;  %v1235_v21 = vpop.f32.mrf.mxu0  ;;  %v2900_v51 = vld [vmem:[#allocation2 + $0x142] sm:$0xff] }
 0x127   : > { %v5277_v19 = vadd.f32 %v4008_v8, %v970_v46  ;;  %v962_v61 = vadd.f32 %v961_v40, %v5225_v44  ;;  %v2593_v44 = vld [vmem:[#allocation2 + $0x139] sm:$0xff] }
 0x128   : > { %v3961_v24 = vpop.f32.mrf.mxu1  ;;  %v4009_v59 = vpop.f32.mrf.mxu0  ;;  %v2614_v0 = vpack.c.bf16 %v2594_v47, %v2593_v44 }
 0x129   : > { %v5280_v52 = vadd.f32 %v1235_v21, %v962_v61  ;;  %v973_v26 = vadd.f32 %v3961_v24, %v5229_v32  ;;  %v2899_v32 = vld [vmem:[#allocation2 + $0x13a] sm:$0xff]  ;;  %v2615_v61 = vpack.c.bf16 %v2596_v49, %v2595_v7 }
 0x12a   : > { %v964_v54 = vpop.f32.mrf.mxu1  ;;  %v1238_v60 = vpop.f32.mrf.mxu0  ;;  %v2920_v4 = vpack.c.bf16 %v2900_v51, %v2899_v32 }
 0x12b   : > { %v5283_v16 = vadd.f32 %v4009_v59, %v973_v26  ;;  %v965_v18 = vadd.f32 %v964_v54, %v5233_v20  ;;  %v2901_v20 = vld [vmem:[#allocation2 + $0x152] sm:$0xff] }
 0x12c   : > { %v3964_v2 = vpop.f32.mrf.mxu1  ;;  %v4012_v28 = vpop.f32.mrf.mxu0  ;;  %4251 = vmatmul.mubr.bf16.gmra.mxu1 %v5080_v41  ;;  %4299 = vmatmul.mubr.bf16.gmra.mxu0 %v2918_v30  ;;  %v2921_v24 = vpack.c.bf16 %v2902_v13, %v2901_v20 }
 0x12d   : > { %v5287_v31 = vadd.f32 %v1238_v60, %v965_v18  ;;  %v986_v10 = vadd.f32 %v3964_v2, %v5160_v48  ;;  %4254 = vmatprep.mubr.bf16.mxu1 %v2613_v62  ;;  %4302 = vmatprep.mubr.bf16.mxu0 %v2919_v33  ;;  %v2903_v2 = vld [vmem:[#allocation2 + $0x16a] sm:$0xff] }
 0x12e   : > { %v977_v8 = vpop.f32.mrf.mxu1  ;;  %v1251_v46 = vpop.f32.mrf.mxu0 }
 0x12f   : > { %v5290_v14 = vadd.f32 %v4012_v28, %v986_v10  ;;  %v978_v41 = vadd.f32 %v977_v8, %v5168_v56  ;;  %v2597_v56 = vld [vmem:[#allocation2 + $0x169] sm:$0xff]  ;;  %v2904_v28 = vld [vmem:[#allocation2 + $0x172] sm:$0xff] }
 0x130   : > { %v3965_v40 = vpop.f32.mrf.mxu1  ;;  %v4013_v21 = vpop.f32.mrf.mxu0  ;;  %v2922_v8 = vpack.c.bf16 %v2904_v28, %v2903_v2 }
 0x131   : > { %v5293_v35 = vadd.f32 %v1251_v46, %v978_v41  ;;  %v989_v48 = vadd.f32 %v3965_v40, %v5172_v58  ;;  %v2598_v58 = vld [vmem:[#allocation2 + $0x171] sm:$0xff] }
 0x132   : > { %v980_v59 = vpop.f32.mrf.mxu1  ;;  %v1254_v30 = vpop.f32.mrf.mxu0  ;;  %v2616_v7 = vpack.c.bf16 %v2598_v58, %v2597_v56 }
 0x133   : > { %v5296_v26 = vadd.f32 %v4013_v21, %v989_v48  ;;  %v981_v62 = vadd.f32 %v980_v59, %v5176_v5  ;;  %v2907_v48 = vld [vmem:[#allocation2 + $0x19a] sm:$0xff] }
 0x134   : > { %v3968_v33 = vpop.f32.mrf.mxu1  ;;  %v4016_v54 = vpop.f32.mrf.mxu0  ;;  %4255 = vmatmul.mubr.bf16.gmra.mxu1 %v2614_v0  ;;  %4303 = vmatmul.mubr.bf16.gmra.mxu0 %v2920_v4  ;;  %v2601_v0 = vld [vmem:[#allocation2 + $0x199] sm:$0xff] }
 0x135   : > { %v5299_v60 = vadd.f32 %v1254_v30, %v981_v62  ;;  %v1002_v18 = vadd.f32 %v3968_v33, %v5180_v9  ;;  %4258 = vmatprep.mubr.bf16.mxu1 %v2615_v61  ;;  %4306 = vmatprep.mubr.bf16.mxu0 %v2921_v24  ;;  %v2908_v61 = vld [vmem:[#allocation2 + $0x1a2] sm:$0xff] }
 0x136   : > { %v993_v44 = vpop.f32.mrf.mxu1  ;;  %v1267_v47 = vpop.f32.mrf.mxu0  ;;  %v2924_v56 = vpack.c.bf16 %v2908_v61, %v2907_v48 }
 0x137   : > { %v5302_v10 = vadd.f32 %v4016_v54, %v1002_v18  ;;  %v994_v5 = vadd.f32 %v993_v44, %v5188_v55 }
 0x138   : > { %v3969_v32 = vpop.f32.mrf.mxu1  ;;  %v4017_v51 = vpop.f32.mrf.mxu0 }
 0x139   : > { %v5305_v46 = vadd.f32 %v1267_v47, %v994_v5  ;;  %v1005_v49 = vadd.f32 %v3969_v32, %v5192_v29  ;;  %v2602_v29 = vld [vmem:[#allocation2 + $0x1a1] sm:$0xff] }
 0x13a   : > { %v996_v9 = vpop.f32.mrf.mxu1  ;;  %v1270_v20 = vpop.f32.mrf.mxu0  ;;  %v2618_v54 = vpack.c.bf16 %v2602_v29, %v2601_v0 }
 0x13b   : > { %v5308_v13 = vadd.f32 %v4017_v51, %v1005_v49  ;;  %v997_v41 = vadd.f32 %v996_v9, %v5196_v34 }
 0x13c   : > { %v3972_v40 = vpop.f32.mrf.mxu1  ;;  %v4020_v21 = vpop.f32.mrf.mxu0  ;;  %4259 = vmatmul.mubr.bf16.gmra.mxu1 %v2616_v7  ;;  %4307 = vmatmul.mubr.bf16.gmra.mxu0 %v2922_v8 }
 0x13d   : > { %v5311_v55 = vadd.f32 %v1270_v20, %v997_v41  ;;  %v1018_v4 = vadd.f32 %v3972_v40, %v5200_v63  ;;  %4262 = vmatprep.mubr.bf16.mxu1 %v4970_v11  ;;  %4310 = vmatprep.mubr.bf16.mxu0 %v5214_v25 }
 0x13e   : > { %v1009_v24 = vpop.f32.mrf.mxu1  ;;  %v1283_v59 = vpop.f32.mrf.mxu0 }
 0x13f   : > { %v5316_v30 = vadd.f32 %v4020_v21, %v1018_v4  ;;  %v1010_v34 = vadd.f32 %v1009_v24, %v5208_v45 }
 0x140   : > { %v3973_v62 = vpop.f32.mrf.mxu1  ;;  %v4021_v33 = vpop.f32.mrf.mxu0 }
 0x141   : > { %v5319_v18 = vadd.f32 %v1283_v59, %v1010_v34  ;;  %v1021_v63 = vadd.f32 %v3973_v62, %v5212_v50 }
 0x142   : > { %v1012_v11 = vpop.f32.mrf.mxu1  ;;  %v1286_v58 = vpop.f32.mrf.mxu0 }
 0x143   : > { %v5322_v25 = vadd.f32 %v4021_v33, %v1021_v63  ;;  %v1013_v2 = vadd.f32 %v1012_v11, %v5218_v38 }
 0x144   : > { %v3976_v28 = vpop.f32.mrf.mxu1  ;;  %v4024_v44 = vpop.f32.mrf.mxu0  ;;  %4263 = vmatmul.mubr.bf16.gmra.mxu1 %v2618_v54  ;;  %4311 = vmatmul.mubr.bf16.gmra.mxu0 %v2924_v56 }
 0x145   : > { %v5325_v47 = vadd.f32 %v1286_v58, %v1013_v2  ;;  %v1034_v45 = vadd.f32 %v3976_v28, %v5222_v6 }
 0x146   : > { %v1025_v5 = vpop.f32.mrf.mxu1  ;;  %v1299_v32 = vpop.f32.mrf.mxu0 }
 0x147   : > { %v5328_v51 = vadd.f32 %v4024_v44, %v1034_v45  ;;  %v1026_v50 = vadd.f32 %v1025_v5, %v5227_v57 }
 0x148   : > { %v3977_v7 = vpop.f32.mrf.mxu1  ;;  %v4025_v8 = vpop.f32.mrf.mxu0 }
 0x149   : > { %v5331_v49 = vadd.f32 %v1299_v32, %v1026_v50  ;;  %v1037_v38 = vadd.f32 %v3977_v7, %v5231_v39 }
 0x14a   : > { %v1028_v9 = vpop.f32.mrf.mxu1  ;;  %v1302_v20 = vpop.f32.mrf.mxu0 }
 0x14b   : > { %v5334_v41 = vadd.f32 %v4025_v8, %v1037_v38  ;;  %v1029_v40 = vadd.f32 %v1028_v9, %v5235_v23 }
 0x14c   : > { %v4044_v21 = vpop.f32.mrf.mxu1  ;;  %v4092_v6 = vpop.f32.mrf.mxu0 }
 0x14d   : > { %v5337_v0 = vadd.f32 %v1302_v20, %v1029_v40  ;;  %v1622_v4 = vadd.f32 %v4044_v21, %v5238_v27 }
 0x14e   : > { %v1493_v29 = vpop.f32.mrf.mxu1  ;;  %v1799_v57 = vpop.f32.mrf.mxu0 }
 0x14f   : > { %v5340_v48 = vadd.f32 %v4092_v6, %v1622_v4  ;;  %v1620_v61 = vadd.f32 %v1493_v29, %v5241_v42 }
 0x150   : > { %v4045_v24 = vpop.f32.mrf.mxu1  ;;  %v4093_v39 = vpop.f32.mrf.mxu0 }
 0x151   : > { %v5343_v59 = vadd.f32 %v1799_v57, %v1620_v61  ;;  %v1623_v34 = vadd.f32 %v4045_v24, %v5244_v53 }
 0x152   : > { %v1496_v62 = vpop.f32.mrf.mxu1  ;;  %v1802_v23 = vpop.f32.mrf.mxu0 }
 0x153   : > { %v5346_v33 = vadd.f32 %v4093_v39, %v1623_v34  ;;  %v1621_v54 = vadd.f32 %v1496_v62, %v5247_v15 }
 0x154   : > { %v4048_v56 = vpop.f32.mrf.mxu1  ;;  %v4096_v27 = vpop.f32.mrf.mxu0 }
 0x155   : > { %v5349_v63 = vadd.f32 %v1802_v23, %v1621_v54  ;;  %v1626_v11 = vadd.f32 %v4048_v56, %v5250_v1 }
 0x156   : > { %v1509_v58 = vpop.f32.mrf.mxu1  ;;  %v1815_v42 = vpop.f32.mrf.mxu0 }
 0x157   : > { %v5352_v2 = vadd.f32 %v4096_v27, %v1626_v11  ;;  %v1624_v28 = vadd.f32 %v1509_v58, %v5253_v12 }
 0x158   : > { %v4049_v44 = vpop.f32.mrf.mxu1  ;;  %v4097_v53 = vpop.f32.mrf.mxu0 }
 0x159   : > { %v5355_v45 = vadd.f32 %v1815_v42, %v1624_v28  ;;  %v1627_v5 = vadd.f32 %v4049_v44, %v5256_v3 }
 0x15a   : > { %v1512_v32 = vpop.f32.mrf.mxu1  ;;  %v1818_v15 = vpop.f32.mrf.mxu0 }
 0x15b   : > { %v5358_v50 = vadd.f32 %v4097_v53, %v1627_v5  ;;  %v1625_v7 = vadd.f32 %v1512_v32, %v5259_v37 }
 0x15c   : > { %v4052_v8 = vpop.f32.mrf.mxu1  ;;  %v4100_v1 = vpop.f32.mrf.mxu0 }
 0x15d   : > { %v5361_v38 = vadd.f32 %v1818_v15, %v1625_v7  ;;  %v1630_v9 = vadd.f32 %v4052_v8, %v5263_v36 }
 0x15e   : > { %v1525_v20 = vpop.f32.mrf.mxu1  ;;  %v1831_v12 = vpop.f32.mrf.mxu0 }
 0x15f   : > { %v5364_v40 = vadd.f32 %v4100_v1, %v1630_v9  ;;  %v1628_v21 = vadd.f32 %v1525_v20, %v5266_v17 }
 0x160   : > { %v4053_v6 = vpop.f32.mrf.mxu1  ;;  %v4101_v3 = vpop.f32.mrf.mxu0 }
 0x161   : > { %v5367_v4 = vadd.f32 %v1831_v12, %v1628_v21  ;;  %v1631_v29 = vadd.f32 %v4053_v6, %v5269_v22 }
 0x162   : > { %v1528_v57 = vpop.f32.mrf.mxu1  ;;  %v1834_v37 = vpop.f32.mrf.mxu0 }
 0x163   : > { %v5370_v61 = vadd.f32 %v4101_v3, %v1631_v29  ;;  %v1629_v24 = vadd.f32 %v1528_v57, %v5273_v43 }
 0x164   : > { %v4056_v39 = vpop.f32.mrf.mxu1  ;;  %v4104_v36 = vpop.f32.mrf.mxu0 }
 0x165   : > { %v5373_v34 = vadd.f32 %v1834_v37, %v1629_v24  ;;  %v1634_v62 = vadd.f32 %v4056_v39, %v5277_v19 }
 0x166   : > { %v1541_v23 = vpop.f32.mrf.mxu1  ;;  %v1847_v17 = vpop.f32.mrf.mxu0 }
 0x167   : > { %v5376_v54 = vadd.f32 %v4104_v36, %v1634_v62  ;;  %v1632_v56 = vadd.f32 %v1541_v23, %v5280_v52 }
 0x168   : > { %v4057_v27 = vpop.f32.mrf.mxu1  ;;  %v4105_v22 = vpop.f32.mrf.mxu0 }
 0x169   : > { %v5379_v11 = vadd.f32 %v1847_v17, %v1632_v56  ;;  %v1635_v58 = vadd.f32 %v4057_v27, %v5283_v16 }
 0x16a   : > { %v1544_v42 = vpop.f32.mrf.mxu1  ;;  %v1850_v43 = vpop.f32.mrf.mxu0 }
 0x16b   : > { %v5382_v28 = vadd.f32 %v4105_v22, %v1635_v58  ;;  %v1633_v44 = vadd.f32 %v1544_v42, %v5287_v31 }
 0x16c   : > { %v4060_v53 = vpop.f32.mrf.mxu1  ;;  %v4108_v19 = vpop.f32.mrf.mxu0 }
 0x16d   : > { %v5385_v5 = vadd.f32 %v1850_v43, %v1633_v44  ;;  %v1638_v32 = vadd.f32 %v4060_v53, %v5290_v14 }
 0x16e   : > { %v1557_v15 = vpop.f32.mrf.mxu1  ;;  %v1863_v52 = vpop.f32.mrf.mxu0 }
 0x16f   : > { %v5388_v7 = vadd.f32 %v4108_v19, %v1638_v32  ;;  %v1636_v8 = vadd.f32 %v1557_v15, %v5293_v35 }
 0x170   : > { %v4061_v1 = vpop.f32.mrf.mxu1  ;;  %v4109_v16 = vpop.f32.mrf.mxu0 }
 0x171   : > { %v5391_v9 = vadd.f32 %v1863_v52, %v1636_v8  ;;  %v1639_v20 = vadd.f32 %v4061_v1, %v5296_v26 }
 0x172   : > { %v1560_v12 = vpop.f32.mrf.mxu1  ;;  %v1866_v31 = vpop.f32.mrf.mxu0 }
 0x173   : > { %v5394_v21 = vadd.f32 %v4109_v16, %v1639_v20  ;;  %v1637_v6 = vadd.f32 %v1560_v12, %v5299_v60 }
 0x174   : > { %v4064_v3 = vpop.f32.mrf.mxu1  ;;  %v4112_v14 = vpop.f32.mrf.mxu0 }
 0x175   : > { %5743 = vst [vmem:[#allocation3_spill] sm:$0xff] %v5394_v21  ;;  %v5397_v29 = vadd.f32 %v1866_v31, %v1637_v6  ;;  %v1642_v57 = vadd.f32 %v4064_v3, %v5302_v10 }
 0x176   : > { %v1573_v37 = vpop.f32.mrf.mxu1  ;;  %v1879_v35 = vpop.f32.mrf.mxu0 }
 0x177   : > { %5744 = vst [vmem:[#allocation4_spill] sm:$0xff] %v5397_v29  ;;  %v5400_v24 = vadd.f32 %v4112_v14, %v1642_v57  ;;  %v1640_v39 = vadd.f32 %v1573_v37, %v5305_v46 }
 0x178   : > { %v4065_v36 = vpop.f32.mrf.mxu1  ;;  %v4113_v26 = vpop.f32.mrf.mxu0 }
 0x179   : > { %5745 = vst [vmem:[#allocation5_spill] sm:$0xff] %v5400_v24  ;;  %v5403_v62 = vadd.f32 %v1879_v35, %v1640_v39  ;;  %v1643_v23 = vadd.f32 %v4065_v36, %v5308_v13 }
 0x17a   : > { %v1576_v17 = vpop.f32.mrf.mxu1  ;;  %v1882_v60 = vpop.f32.mrf.mxu0 }
 0x17b   : > { %5746 = vst [vmem:[#allocation6_spill] sm:$0xff] %v5403_v62  ;;  %v5406_v56 = vadd.f32 %v4113_v26, %v1643_v23  ;;  %v1641_v27 = vadd.f32 %v1576_v17, %v5311_v55 }
 0x17c   : > { %v4068_v22 = vpop.f32.mrf.mxu1  ;;  %v4116_v10 = vpop.f32.mrf.mxu0 }
 0x17d   : > { %5747 = vst [vmem:[#allocation7_spill] sm:$0xff] %v5406_v56  ;;  %v5409_v58 = vadd.f32 %v1882_v60, %v1641_v27  ;;  %v1646_v42 = vadd.f32 %v4068_v22, %v5316_v30 }
 0x17e   : > { %v1589_v43 = vpop.f32.mrf.mxu1  ;;  %v1895_v46 = vpop.f32.mrf.mxu0 }
 0x17f   : > { %5748 = vst [vmem:[#allocation8_spill] sm:$0xff] %v5409_v58  ;;  %v5412_v44 = vadd.f32 %v4116_v10, %v1646_v42  ;;  %v1644_v53 = vadd.f32 %v1589_v43, %v5319_v18 }
 0x180   : > { %v4069_v19 = vpop.f32.mrf.mxu1  ;;  %v4117_v13 = vpop.f32.mrf.mxu0 }
 0x181   : > { %5749 = vst [vmem:[#allocation9_spill] sm:$0xff] %v5412_v44  ;;  %v5415_v32 = vadd.f32 %v1895_v46, %v1644_v53  ;;  %v1647_v15 = vadd.f32 %v4069_v19, %v5322_v25 }
 0x182   : > { %v1592_v52 = vpop.f32.mrf.mxu1  ;;  %v1898_v55 = vpop.f32.mrf.mxu0 }
 0x183   : > { %5750 = vst [vmem:[#allocation10_spill] sm:$0xff] %v5415_v32  ;;  %v5418_v8 = vadd.f32 %v4117_v13, %v1647_v15  ;;  %v1645_v1 = vadd.f32 %v1592_v52, %v5325_v47 }
 0x184   : > { %v4072_v16 = vpop.f32.mrf.mxu1  ;;  %v4120_v30 = vpop.f32.mrf.mxu0 }
 0x185   : > { %5751 = vst [vmem:[#allocation11_spill] sm:$0xff] %v5418_v8  ;;  %v5421_v20 = vadd.f32 %v1898_v55, %v1645_v1  ;;  %v1650_v12 = vadd.f32 %v4072_v16, %v5328_v51 }
 0x186   : > { %v1605_v31 = vpop.f32.mrf.mxu1  ;;  %v1911_v18 = vpop.f32.mrf.mxu0 }
 0x187   : > { %5752 = vst [vmem:[#allocation12_spill] sm:$0xff] %v5421_v20  ;;  %v5424_v6 = vadd.f32 %v4120_v30, %v1650_v12  ;;  %v1648_v3 = vadd.f32 %v1605_v31, %v5331_v49 }
 0x188   : > { %v4073_v14 = vpop.f32.mrf.mxu1  ;;  %v4121_v25 = vpop.f32.mrf.mxu0 }
 0x189   : > { %5753 = vst [vmem:[#allocation13_spill] sm:$0xff] %v5424_v6  ;;  %v5427_v57 = vadd.f32 %v1911_v18, %v1648_v3  ;;  %v1651_v37 = vadd.f32 %v4073_v14, %v5334_v41 }
 0x18a   : > { %v1608_v35 = vpop.f32.mrf.mxu1  ;;  %v1914_v47 = vpop.f32.mrf.mxu0 }
 0x18b   : > { %5754 = vst [vmem:[#allocation14_spill] sm:$0xff] %v5427_v57  ;;  %v5430_v39 = vadd.f32 %v4121_v25, %v1651_v37  ;;  %v1649_v36 = vadd.f32 %v1608_v35, %v5337_v0 }
 0x18c   : > { %v4140_v26 = vpop.f32.mrf.mxu1  ;;  %v5433_v51 = vpop.f32.mrf.mxu0 }
 0x18d   : > { %5755 = vst [vmem:[#allocation15_spill] sm:$0xff] %v5430_v39  ;;  %v5435_v23 = vadd.f32 %v1914_v47, %v1649_v36 }
 0x18e   : > { %v2105_v17 = vpop.f32.mrf.mxu1  ;;  %v5437_v60 = vpop.f32.mrf.mxu0 }
 0x18f   : > { %5756 = vst [vmem:[#allocation16_spill] sm:$0xff] %v5435_v23 }
 0x190   : > { %v5439_v49 = vpop.f32.mrf.mxu1  ;;  %v5441_v27 = vpop.f32.mrf.mxu0 }
 0x192   : > { %v5443_v22 = vpop.f32.mrf.mxu1  ;;  %v5445_v41 = vpop.f32.mrf.mxu0 }
 0x194   : > { %v5447_v10 = vpop.f32.mrf.mxu1  ;;  %v5449_v42 = vpop.f32.mrf.mxu0 }
 0x196   : > { %v5451_v0 = vpop.f32.mrf.mxu1  ;;  %v5453_v43 = vpop.f32.mrf.mxu0 }
 0x198   : > { %v5455_v46 = vpop.f32.mrf.mxu1  ;;  %v5457_v53 = vpop.f32.mrf.mxu0 }
 0x19a   : > { %v5459_v19 = vpop.f32.mrf.mxu1  ;;  %v5461_v13 = vpop.f32.mrf.mxu0 }
 0x19c   : > { %v5463_v15 = vpop.f32.mrf.mxu1  ;;  %v5465_v52 = vpop.f32.mrf.mxu0 }
 0x19e   : > { %v5467_v55 = vpop.f32.mrf.mxu1  ;;  %v5469_v1 = vpop.f32.mrf.mxu0 }
 0x1a0   : > { %v5471_v16 = vpop.f32.mrf.mxu1  ;;  %v5473_v30 = vpop.f32.mrf.mxu0 }
 0x1a2   : > { %v5475_v12 = vpop.f32.mrf.mxu1  ;;  %v5477_v31 = vpop.f32.mrf.mxu0 }
 0x1a4   : > { %v5479_v18 = vpop.f32.mrf.mxu1  ;;  %v5481_v3 = vpop.f32.mrf.mxu0 }
 0x1a6   : > { %v5483_v14 = vpop.f32.mrf.mxu1  ;;  %v5485_v25 = vpop.f32.mrf.mxu0 }
 0x1a8   : > { %v5487_v37 = vpop.f32.mrf.mxu1  ;;  %v5489_v35 = vpop.f32.mrf.mxu0 }
 0x1aa   : > { %v5491_v47 = vpop.f32.mrf.mxu1  ;;  %v5493_v36 = vpop.f32.mrf.mxu0 }
 0x1ac   : > { %v5495_v23 = vpop.f32.mrf.mxu1  ;;  %v5497_v39 = vpop.f32.mrf.mxu0 }
 0x1ae   : > { %v5499_v57 = vpop.f32.mrf.mxu1  ;;  %v5501_v6 = vpop.f32.mrf.mxu0 }
 0x1af   : > { %5757 = vst [vmem:[#allocation17_spill] sm:$0xff] %v5501_v6 }
 0x1b0   : > { %v5503_v20 = vpop.f32.mrf.mxu1  ;;  %v5505_v8 = vpop.f32.mrf.mxu0 }
 0x1b1   : > { %5758 = vst [vmem:[#allocation18_spill] sm:$0xff] %v5503_v20  ;;  %5759 = vst [vmem:[#allocation19_spill] sm:$0xff] %v5505_v8 }
 0x1b2   : > { %v5507_v32 = vpop.f32.mrf.mxu1  ;;  %v5509_v44 = vpop.f32.mrf.mxu0 }
 0x1b3   : > { %5760 = vst [vmem:[#allocation20_spill] sm:$0xff] %v5507_v32  ;;  %5761 = vst [vmem:[#allocation21_spill] sm:$0xff] %v5509_v44 }
 0x1b4   : > { %v5511_v58 = vpop.f32.mrf.mxu1  ;;  %v5513_v56 = vpop.f32.mrf.mxu0 }
 0x1b5   : > { %5762 = vst [vmem:[#allocation22_spill] sm:$0xff] %v5511_v58  ;;  %5763 = vst [vmem:[#allocation23_spill] sm:$0xff] %v5513_v56 }
 0x1b6   : > { %v5515_v62 = vpop.f32.mrf.mxu1  ;;  %v5517_v24 = vpop.f32.mrf.mxu0 }
 0x1b7   : > { %5764 = vst [vmem:[#allocation24_spill] sm:$0xff] %v5515_v62  ;;  %5765 = vst [vmem:[#allocation25_spill] sm:$0xff] %v5517_v24 }
 0x1b8   : > { %v5519_v29 = vpop.f32.mrf.mxu1  ;;  %v5521_v21 = vpop.f32.mrf.mxu0 }
 0x1b9   : > { %5766 = vst [vmem:[#allocation26_spill] sm:$0xff] %v5519_v29  ;;  %5767 = vst [vmem:[#allocation27_spill] sm:$0xff] %v5521_v21 }
 0x1ba   : > { %v5523_v6 = vpop.f32.mrf.mxu1  ;;  %v5525_v20 = vpop.f32.mrf.mxu0 }
 0x1bb   : > { %5768 = vst [vmem:[#allocation28_spill] sm:$0xff] %v5523_v6  ;;  %5769 = vst [vmem:[#allocation29_spill] sm:$0xff] %v5525_v20 }
 0x1bc   : > { %v5527_v8 = vpop.f32.mrf.mxu1  ;;  %v5529_v32 = vpop.f32.mrf.mxu0 }
 0x1bd   : > { %5770 = vst [vmem:[#allocation30_spill] sm:$0xff] %v5527_v8  ;;  %5771 = vst [vmem:[#allocation31_spill] sm:$0xff] %v5529_v32  ;;  %v2234_v32 = vadd.f32 %v4140_v26, %v5340_v48  ;;  %v2233_v26 = vadd.f32 %v5443_v22, %v5349_v63 }
 0x1be   : > { %v5531_v44 = vpop.f32.mrf.mxu1  ;;  %v5533_v58 = vpop.f32.mrf.mxu0 }
 0x1bf   : > { %5772 = vst [vmem:[#allocation32_spill] sm:$0xff] %v5531_v44  ;;  %5773 = vst [vmem:[#allocation33_spill] sm:$0xff] %v5533_v58 }
 0x1c0   : > { %v5535_v56 = vpop.f32.mrf.mxu1  ;;  %v5537_v62 = vpop.f32.mrf.mxu0 }
 0x1c1   : > { %5774 = vst [vmem:[#allocation34_spill] sm:$0xff] %v5535_v56  ;;  %5775 = vst [vmem:[#allocation35_spill] sm:$0xff] %v5537_v62  ;;  %v2232_v62 = vadd.f32 %v2105_v17, %v5343_v59  ;;  %v5570_v59 = vld [vmem:[%s5740_s4] ss:$0 sm:$0xff] }
 0x1c2   : > { %v5539_v24 = vpop.f32.mrf.mxu1  ;;  %v5541_v29 = vpop.f32.mrf.mxu0 }
 0x1c3   : > { %5776 = vst [vmem:[#allocation36_spill] sm:$0xff] %v5539_v24  ;;  %5777 = vst [vmem:[#allocation37_spill] sm:$0xff] %v5541_v29  ;;  %v2541_v29 = vadd.f32 %v5433_v51, %v2234_v32  ;;  %v2539_v48 = vadd.f32 %v5437_v60, %v2232_v62  ;;  %v2236_v62 = vadd.f32 %v5451_v0, %v5355_v45 }
 0x1c4   : > { %v5543_v21 = vpop.f32.mrf.mxu1  ;;  %v5545_v6 = vpop.f32.mrf.mxu0 }
 0x1c5   : > { %5778 = vst [vmem:[#allocation38_spill] sm:$0xff] %v5545_v6  ;;  %v2235_v6 = vadd.f32 %v5439_v49, %v5346_v33  ;;  %v2238_v33 = vadd.f32 %v5447_v10, %v5352_v2  ;;  %v2239_v2 = vadd.f32 %v5455_v46, %v5358_v50  ;;  %v2237_v49 = vadd.f32 %v5459_v19, %v5361_v38 }
 0x1c6   : > { %v5547_v20 = vpop.f32.mrf.mxu1  ;;  %v5549_v8 = vpop.f32.mrf.mxu0  ;;  %v2543_v0 = vadd.f32 %v5453_v43, %v2236_v62 }
 0x1c7   : > { %5779 = vst [vmem:[#allocation39_spill] sm:$0xff] %v5547_v20  ;;  %5780 = vst [vmem:[#allocation40_spill] sm:$0xff] %v5549_v8  ;;  %v2542_v32 = vadd.f32 %v5441_v27, %v2235_v6  ;;  %v2546_v38 = vadd.f32 %v5457_v53, %v2239_v2 }
 0x1c8   : > { %v5552_v44 = vpop.f32.mrf.mxu1  ;;  %v5554_v58 = vpop.f32.mrf.mxu0 }
 0x1c9   : > { %5781 = vst [vmem:[#allocation41_spill] sm:$0xff] %v5554_v58 }
 0x1ca   : > { %v5557_v56 = vpop.f32.mrf.mxu1  ;;  %v5559_v24 = vpop.f32.mrf.mxu0 }
 0x1cb   : > { %5782 = vst [vmem:[#allocation42_spill] sm:$0xff] %v5557_v56  ;;  %5783 = vst [vmem:[#allocation43_spill] sm:$0xff] %v5559_v24 }
 0x1cc   : > { %v4236_v20 = vpop.f32.mrf.mxu1  ;;  %v4284_v8 = vpop.f32.mrf.mxu0 }
 0x1cd   : > { %v2847_v58 = vadd.f32 %v4236_v20, %v2541_v29  ;;  %v2540_v20 = vadd.f32 %v5445_v41, %v2233_v26  ;;  %v2545_v41 = vadd.f32 %v5449_v42, %v2238_v33  ;;  %v2544_v42 = vadd.f32 %v5461_v13, %v2237_v49 }
 0x1ce   : > { %v2718_v17 = vpop.f32.mrf.mxu1  ;;  %v3024_v24 = vpop.f32.mrf.mxu0 }
 0x1cf   : > { %v3153_v51 = vadd.f32 %v4284_v8, %v2847_v58  ;;  %v2845_v56 = vadd.f32 %v2718_v17, %v2539_v48 }
 0x1d0   : > { %v4237_v63 = vpop.f32.mrf.mxu1  ;;  %v4285_v29 = vpop.f32.mrf.mxu0 }
 0x1d1   : > { %v3192_v58 = vadd.f32 %v5570_v59, %v3153_v51  ;;  %v3151_v8 = vadd.f32 %v3024_v24, %v2845_v56  ;;  %v2848_v6 = vadd.f32 %v4237_v63, %v2542_v32  ;;  %v2242_v63 = vadd.f32 %v5463_v15, %v5364_v40 }
 0x1d2   : > { %v2721_v45 = vpop.f32.mrf.mxu1  ;;  %v3027_v60 = vpop.f32.mrf.mxu0 }
 0x1d3   : > { %3224 = vst [vmem:[%s5582_s11 + $0x10] sm:$0xff] %v3192_v58  ;;  %v3190_v27 = vadd.f32 %v5570_v59, %v3151_v8  ;;  %v3154_v22 = vadd.f32 %v4285_v29, %v2848_v6  ;;  %v2846_v10 = vadd.f32 %v2721_v45, %v2540_v20  ;;  %v3293_v24 = vmul.f32 %v3192_v58, %v3192_v58 }
 0x1d4   : > { %v4240_v56 = vpop.f32.mrf.mxu1  ;;  %v4288_v48 = vpop.f32.mrf.mxu0  ;;  %v2240_v29 = vadd.f32 %v5467_v55, %v5367_v4 }
 0x1d5   : > { %3222 = vst [vmem:[%s5582_s11] sm:$0xff] %v3190_v27  ;;  %v3254_v50 = vadd.f32 %v3192_v58, %v3190_v27  ;;  %v3291_v46 = vmul.f32 %v3190_v27, %v3190_v27  ;;  %v3193_v26 = vadd.f32 %v5570_v59, %v3154_v22  ;;  %v3152_v17 = vadd.f32 %v3027_v60, %v2846_v10 }
 0x1d6   : > { %v2851_v19 = vadd.f32 %v4240_v56, %v2545_v41  ;;  %v2734_v32 = vpop.f32.mrf.mxu1  ;;  %v3040_v51 = vpop.f32.mrf.mxu0  ;;  %v2243_v60 = vadd.f32 %v5471_v16, %v5370_v61  ;;  %v2549_v10 = vadd.f32 %v5465_v52, %v2242_v63  ;;  %v2547_v41 = vadd.f32 %v5469_v1, %v2240_v29 }
 0x1d7   : > { %v3323_v33 = vadd.f32 %v3293_v24, %v3291_v46  ;;  %3225 = vst [vmem:[%s5582_s11 + $0x18] sm:$0xff] %v3193_v26  ;;  %v3191_v43 = vadd.f32 %v5570_v59, %v3152_v17  ;;  %v2849_v62 = vadd.f32 %v2734_v32, %v2543_v0  ;;  %v3294_v20 = vmul.f32 %v3193_v26, %v3193_v26 }
 0x1d8   : > { %v3157_v58 = vadd.f32 %v4288_v48, %v2851_v19  ;;  %v4241_v8 = vpop.f32.mrf.mxu1  ;;  %v4289_v53 = vpop.f32.mrf.mxu0  ;;  %v2241_v0 = vadd.f32 %v5475_v12, %v5373_v34  ;;  %v2246_v52 = vadd.f32 %v5479_v18, %v5376_v54 }
 0x1d9   : > { %3223 = vst [vmem:[%s5582_s11 + $0x8] sm:$0xff] %v3191_v43  ;;  %v3269_v6 = vadd.f32 %v3193_v26, %v3191_v43  ;;  %v3292_v2 = vmul.f32 %v3191_v43, %v3191_v43  ;;  %v3155_v13 = vadd.f32 %v3040_v51, %v2849_v62  ;;  %v2852_v45 = vadd.f32 %v4241_v8, %v2546_v38 }
 0x1da   : > { %v3196_v49 = vadd.f32 %v5570_v59, %v3157_v58  ;;  %v2737_v40 = vpop.f32.mrf.mxu1  ;;  %v3043_v15 = vpop.f32.mrf.mxu0  ;;  %v2550_v26 = vadd.f32 %v5473_v30, %v2243_v60  ;;  %v2244_v51 = vadd.f32 %v5483_v14, %v5379_v11 }
 0x1db   : > { %v3338_v27 = vadd.f32 %v3294_v20, %v3292_v2  ;;  %v3194_v4 = vadd.f32 %v5570_v59, %v3155_v13  ;;  %v3158_v55 = vadd.f32 %v4289_v53, %v2852_v45  ;;  %v2850_v22 = vadd.f32 %v2737_v40, %v2544_v42 }
 0x1dc   : > { %3228 = vst [vmem:[%s5582_s11 + $0x30] sm:$0xff] %v3196_v49  ;;  %v4244_v24 = vpop.f32.mrf.mxu1  ;;  %v4292_v61 = vpop.f32.mrf.mxu0  ;;  %v3297_v34 = vmul.f32 %v3196_v49, %v3196_v49  ;;  %v2247_v45 = vadd.f32 %v5487_v37, %v5382_v28 }
 0x1dd   : > { %3226 = vst [vmem:[%s5582_s11 + $0x20] sm:$0xff] %v3194_v4  ;;  %v3255_v16 = vadd.f32 %v3254_v50, %v3194_v4  ;;  %v3295_v56 = vmul.f32 %v3194_v4, %v3194_v4  ;;  %v3197_v48 = vadd.f32 %v5570_v59, %v3158_v55  ;;  %v3156_v46 = vadd.f32 %v3043_v15, %v2850_v22 }
 0x1de   : > { %v2855_v1 = vadd.f32 %v4244_v24, %v2549_v10  ;;  %v2750_v17 = vpop.f32.mrf.mxu1  ;;  %v3056_v38 = vpop.f32.mrf.mxu0  ;;  %v2548_v50 = vadd.f32 %v5477_v31, %v2241_v0  ;;  %v2250_v22 = vadd.f32 %v5495_v23, %v5388_v7 }
 0x1df   : > { %v3324_v12 = vadd.f32 %v3323_v33, %v3295_v56  ;;  %3229 = vst [vmem:[%s5582_s11 + $0x38] sm:$0xff] %v3197_v48  ;;  %v3195_v19 = vadd.f32 %v5570_v59, %v3156_v46  ;;  %v2853_v32 = vadd.f32 %v2750_v17, %v2547_v41  ;;  %v3256_v30 = vadd.f32 %v3255_v16, %v3196_v49 }
 0x1e0   : > { %v3161_v42 = vadd.f32 %v4292_v61, %v2855_v1  ;;  %v4245_v43 = vpop.f32.mrf.mxu1  ;;  %v4293_v62 = vpop.f32.mrf.mxu0  ;;  %v2553_v33 = vadd.f32 %v5481_v3, %v2246_v52  ;;  %v3298_v20 = vmul.f32 %v3197_v48, %v3197_v48  ;;  %v2245_v3 = vadd.f32 %v5491_v47, %v5385_v5 }
 0x1e1   : > { %3227 = vst [vmem:[%s5582_s11 + $0x28] sm:$0xff] %v3195_v19  ;;  %v3270_v54 = vadd.f32 %v3269_v6, %v3195_v19  ;;  %v3296_v18 = vmul.f32 %v3195_v19, %v3195_v19  ;;  %v3159_v63 = vadd.f32 %v3056_v38, %v2853_v32  ;;  %v3325_v29 = vadd.f32 %v3324_v12, %v3297_v34 }
 0x1e2   : > { %v3200_v58 = vadd.f32 %v5570_v59, %v3161_v42  ;;  %v2856_v31 = vadd.f32 %v4245_v43, %v2550_v26  ;;  %v2753_v8 = vpop.f32.mrf.mxu1  ;;  %v3059_v53 = vpop.f32.mrf.mxu0  ;;  %v2551_v6 = vadd.f32 %v5485_v25, %v2244_v51  ;;  %v2554_v61 = vadd.f32 %v5489_v35, %v2247_v45  ;;  %v5785_v42 = vld [vmem:[#allocation3_spill] sm:$0xff] }
 0x1e3   : > { %v3339_v11 = vadd.f32 %v3338_v27, %v3296_v18  ;;  %v3198_v14 = vadd.f32 %v5570_v59, %v3159_v63  ;;  %v2854_v2 = vadd.f32 %v2753_v8, %v2548_v50  ;;  %v3271_v13 = vadd.f32 %v3270_v54, %v3197_v48  ;;  %v5784_v50 = vld [vmem:[#allocation17_spill] sm:$0xff]  ;;  %v5788_v54 = vld [vmem:[#allocation20_spill] sm:$0xff] }
 0x1e4   : > { %3232 = vst [vmem:[%s5582_s11 + $0x50] sm:$0xff] %v3200_v58  ;;  %v3162_v60 = vadd.f32 %v4293_v62, %v2856_v31  ;;  %v4248_v49 = vpop.f32.mrf.mxu1  ;;  %v4296_v40 = vpop.f32.mrf.mxu0  ;;  %v3301_v25 = vmul.f32 %v3200_v58, %v3200_v58  ;;  %v2552_v16 = vadd.f32 %v5493_v36, %v2245_v3  ;;  %v2248_v56 = vadd.f32 %v5499_v57, %v5391_v9  ;;  %v5787_v62 = vld [vmem:[#allocation4_spill] sm:$0xff]  ;;  %v5789_v8 = vld [vmem:[#allocation5_spill] sm:$0xff] }
 0x1e5   : > { %3230 = vst [vmem:[%s5582_s11 + $0x40] sm:$0xff] %v3198_v14  ;;  %v3257_v15 = vadd.f32 %v3256_v30, %v3198_v14  ;;  %v3299_v4 = vmul.f32 %v3198_v14, %v3198_v14  ;;  %v3160_v27 = vadd.f32 %v3059_v53, %v2854_v2  ;;  %v3340_v55 = vadd.f32 %v3339_v11, %v3298_v20  ;;  %v5786_v30 = vld [vmem:[#allocation18_spill] sm:$0xff] }
 0x1e6   : > { %v3201_v28 = vadd.f32 %v5570_v59, %v3162_v60  ;;  %v2859_v37 = vadd.f32 %v4248_v49, %v2553_v33  ;;  %v2766_v10 = vpop.f32.mrf.mxu1  ;;  %v3072_v5 = vpop.f32.mrf.mxu0  ;;  %v2557_v17 = vadd.f32 %v5497_v39, %v2250_v22  ;;  %v2555_v51 = vadd.f32 %v5784_v50, %v2248_v56  ;;  %v5790_v53 = vld [vmem:[#allocation22_spill] sm:$0xff] }
 0x1e7   : > { %v3326_v47 = vadd.f32 %v3325_v29, %v3299_v4  ;;  %v3199_v41 = vadd.f32 %v5570_v59, %v3160_v27  ;;  %v2857_v0 = vadd.f32 %v2766_v10, %v2551_v6  ;;  %v3258_v24 = vadd.f32 %v3257_v15, %v3200_v58  ;;  %v5791_v15 = vld [vmem:[#allocation19_spill] sm:$0xff]  ;;  %v5792_v27 = vld [vmem:[#allocation21_spill] sm:$0xff]  ;;  %v5793_v22 = vld [vmem:[#allocation6_spill] sm:$0xff] }
 0x1e8   : > { %3233 = vst [vmem:[%s5582_s11 + $0x58] sm:$0xff] %v3201_v28  ;;  %v3165_v7 = vadd.f32 %v4296_v40, %v2859_v37  ;;  %v4249_v23 = vpop.f32.mrf.mxu1  ;;  %v4297_v48 = vpop.f32.mrf.mxu0  ;;  %v3302_v38 = vmul.f32 %v3201_v28, %v3201_v28  ;;  %v2251_v43 = vadd.f32 %v5786_v30, %v5785_v42  ;;  %v2249_v39 = vadd.f32 %v5788_v54, %v5787_v62  ;;  %v5801_v54 = vld [vmem:[#allocation9_spill] sm:$0xff] }
 0x1e9   : > { %3231 = vst [vmem:[%s5582_s11 + $0x48] sm:$0xff] %v3199_v41  ;;  %v3272_v46 = vadd.f32 %v3271_v13, %v3199_v41  ;;  %v3300_v26 = vmul.f32 %v3199_v41, %v3199_v41  ;;  %v3163_v52 = vadd.f32 %v3072_v5, %v2857_v0  ;;  %v3327_v1 = vadd.f32 %v3326_v47, %v3301_v25  ;;  %v5794_v25 = vld [vmem:[#allocation24_spill] sm:$0xff] }
 0x1ea   : > { %v3204_v35 = vadd.f32 %v5570_v59, %v3165_v7  ;;  %v2860_v36 = vadd.f32 %v4249_v23, %v2554_v61  ;;  %v2769_v34 = vpop.f32.mrf.mxu1  ;;  %v3075_v12 = vpop.f32.mrf.mxu0  ;;  %v2254_v11 = vadd.f32 %v5790_v53, %v5789_v8  ;;  %v2558_v4 = vadd.f32 %v5791_v15, %v2251_v43  ;;  %v5795_v61 = vld [vmem:[#allocation23_spill] sm:$0xff] }
 0x1eb   : > { %v3341_v9 = vadd.f32 %v3340_v55, %v3300_v26  ;;  %v3202_v57 = vadd.f32 %v5570_v59, %v3163_v52  ;;  %v2858_v19 = vadd.f32 %v2769_v34, %v2552_v16  ;;  %v3273_v32 = vadd.f32 %v3272_v46, %v3201_v28  ;;  %v5798_v34 = vld [vmem:[#allocation26_spill] sm:$0xff] }
 0x1ec   : > { %3236 = vst [vmem:[%s5582_s11 + $0x70] sm:$0xff] %v3204_v35  ;;  %v3166_v18 = vadd.f32 %v4297_v48, %v2860_v36  ;;  %v4252_v63 = vpop.f32.mrf.mxu1  ;;  %v4300_v29 = vpop.f32.mrf.mxu0  ;;  %v3305_v14 = vmul.f32 %v3204_v35, %v3204_v35  ;;  %v2556_v55 = vadd.f32 %v5792_v27, %v2249_v39  ;;  %v2252_v28 = vadd.f32 %v5794_v25, %v5793_v22  ;;  %v5797_v36 = vld [vmem:[#allocation7_spill] sm:$0xff]  ;;  %v5802_v39 = vld [vmem:[#allocation30_spill] sm:$0xff] }
 0x1ed   : > { %3234 = vst [vmem:[%s5582_s11 + $0x60] sm:$0xff] %v3202_v57  ;;  %v3259_v33 = vadd.f32 %v3258_v24, %v3202_v57  ;;  %v3303_v20 = vmul.f32 %v3202_v57, %v3202_v57  ;;  %v3164_v58 = vadd.f32 %v3075_v12, %v2858_v19  ;;  %v3342_v31 = vadd.f32 %v3341_v9, %v3302_v38  ;;  %v5796_v38 = vld [vmem:[#allocation25_spill] sm:$0xff]  ;;  %v5799_v9 = vld [vmem:[#allocation8_spill] sm:$0xff]  ;;  %v5807_v25 = vld [vmem:[#allocation31_spill] sm:$0xff] }
 0x1ee   : > { %v3205_v2 = vadd.f32 %v5570_v59, %v3166_v18  ;;  %v2863_v13 = vadd.f32 %v4252_v63, %v2557_v17  ;;  %v2782_v6 = vpop.f32.mrf.mxu1  ;;  %v3088_v45 = vpop.f32.mrf.mxu0  ;;  %v2561_v16 = vadd.f32 %v5795_v61, %v2254_v11  ;;  %v2255_v12 = vadd.f32 %v5798_v34, %v5797_v36  ;;  %v5800_v57 = vld [vmem:[#allocation28_spill] sm:$0xff] }
 0x1ef   : > { %v3328_v3 = vadd.f32 %v3327_v1, %v3303_v20  ;;  %v3203_v60 = vadd.f32 %v5570_v59, %v3164_v58  ;;  %v2861_v49 = vadd.f32 %v2782_v6, %v2555_v51  ;;  %v3260_v40 = vadd.f32 %v3259_v33, %v3204_v35 }
 0x1f0   : > { %3237 = vst [vmem:[%s5582_s11 + $0x78] sm:$0xff] %v3205_v2  ;;  %v3169_v37 = vadd.f32 %v4300_v29, %v2863_v13  ;;  %v4253_v10 = vpop.f32.mrf.mxu1  ;;  %v4301_v5 = vpop.f32.mrf.mxu0  ;;  %v3306_v56 = vmul.f32 %v3205_v2, %v3205_v2  ;;  %v2559_v35 = vadd.f32 %v5796_v38, %v2252_v28  ;;  %v2253_v19 = vadd.f32 %v5800_v57, %v5799_v9  ;;  %v5804_v13 = vld [vmem:[#allocation29_spill] sm:$0xff] }
 0x1f1   : > { %3235 = vst [vmem:[%s5582_s11 + $0x68] sm:$0xff] %v3203_v60  ;;  %v3274_v47 = vadd.f32 %v3273_v32, %v3203_v60  ;;  %v3304_v41 = vmul.f32 %v3203_v60, %v3203_v60  ;;  %v3167_v0 = vadd.f32 %v3088_v45, %v2861_v49  ;;  %v3329_v24 = vadd.f32 %v3328_v3, %v3305_v14  ;;  %v5803_v14 = vld [vmem:[#allocation27_spill] sm:$0xff]  ;;  %v5805_v45 = vld [vmem:[#allocation10_spill] sm:$0xff]  ;;  %v5806_v3 = vld [vmem:[#allocation32_spill] sm:$0xff] }
 0x1f2   : > { %v3208_v7 = vadd.f32 %v5570_v59, %v3169_v37  ;;  %v2864_v23 = vadd.f32 %v4253_v10, %v2558_v4  ;;  %v2785_v48 = vpop.f32.mrf.mxu1  ;;  %v3091_v46 = vpop.f32.mrf.mxu0  ;;  %v2258_v18 = vadd.f32 %v5802_v39, %v5801_v54  ;;  %v2560_v6 = vadd.f32 %v5804_v13, %v2253_v19  ;;  %v5813_v57 = vld [vmem:[#allocation13_spill] sm:$0xff] }
 0x1f3   : > { %v3343_v26 = vadd.f32 %v3342_v31, %v3304_v41  ;;  %v3206_v52 = vadd.f32 %v5570_v59, %v3167_v0  ;;  %v2862_v1 = vadd.f32 %v2785_v48, %v2556_v55  ;;  %v3275_v17 = vadd.f32 %v3274_v47, %v3205_v2  ;;  %v5810_v48 = vld [vmem:[#allocation34_spill] sm:$0xff] }
 0x1f4   : > { %3240 = vst [vmem:[%s5582_s11 + $0x90] sm:$0xff] %v3208_v7  ;;  %v3170_v32 = vadd.f32 %v4301_v5, %v2864_v23  ;;  %v4256_v50 = vpop.f32.mrf.mxu1  ;;  %v4304_v51 = vpop.f32.mrf.mxu0  ;;  %v3309_v63 = vmul.f32 %v3208_v7, %v3208_v7  ;;  %v2562_v2 = vadd.f32 %v5803_v14, %v2255_v12  ;;  %v2256_v60 = vadd.f32 %v5806_v3, %v5805_v45  ;;  %v5809_v23 = vld [vmem:[#allocation11_spill] sm:$0xff] }
 0x1f5   : > { %3238 = vst [vmem:[%s5582_s11 + $0x80] sm:$0xff] %v3206_v52  ;;  %v3261_v42 = vadd.f32 %v3260_v40, %v3206_v52  ;;  %v3307_v30 = vmul.f32 %v3206_v52, %v3206_v52  ;;  %v3168_v43 = vadd.f32 %v3091_v46, %v2862_v1  ;;  %v3344_v62 = vadd.f32 %v3343_v26, %v3306_v56  ;;  %v5808_v56 = vld [vmem:[#allocation33_spill] sm:$0xff]  ;;  %v5811_v26 = vld [vmem:[#allocation12_spill] sm:$0xff] }
 0x1f6   : > { %v3209_v29 = vadd.f32 %v5570_v59, %v3170_v32  ;;  %v2867_v33 = vadd.f32 %v4256_v50, %v2561_v16  ;;  %v2798_v20 = vpop.f32.mrf.mxu1  ;;  %v3104_v58 = vpop.f32.mrf.mxu0  ;;  %v2565_v28 = vadd.f32 %v5807_v25, %v2258_v18  ;;  %v2259_v46 = vadd.f32 %v5810_v48, %v5809_v23  ;;  %v5812_v52 = vld [vmem:[#allocation36_spill] sm:$0xff]  ;;  %v5814_v18 = vld [vmem:[#allocation35_spill] sm:$0xff] }
 0x1f7   : > { %v3330_v31 = vadd.f32 %v3329_v24, %v3307_v30  ;;  %v3207_v8 = vadd.f32 %v5570_v59, %v3168_v43  ;;  %v2865_v53 = vadd.f32 %v2798_v20, %v2559_v35  ;;  %v3262_v11 = vadd.f32 %v3261_v42, %v3208_v7  ;;  %v5816_v20 = vld [vmem:[#allocation14_spill] sm:$0xff]  ;;  %v5819_v25 = vld [vmem:[#allocation40_spill] sm:$0xff] }
 0x1f8   : > { %3241 = vst [vmem:[%s5582_s11 + $0x98] sm:$0xff] %v3209_v29  ;;  %v3173_v49 = vadd.f32 %v4304_v51, %v2867_v33  ;;  %v4257_v40 = vpop.f32.mrf.mxu1  ;;  %v4305_v15 = vpop.f32.mrf.mxu0  ;;  %v3310_v37 = vmul.f32 %v3209_v29, %v3209_v29  ;;  %v2563_v7 = vadd.f32 %v5808_v56, %v2256_v60  ;;  %v2257_v1 = vadd.f32 %v5812_v52, %v5811_v26 }
 0x1f9   : > { %3239 = vst [vmem:[%s5582_s11 + $0x88] sm:$0xff] %v3207_v8  ;;  %v3276_v4 = vadd.f32 %v3275_v17, %v3207_v8  ;;  %v3308_v27 = vmul.f32 %v3207_v8, %v3207_v8  ;;  %v3171_v55 = vadd.f32 %v3104_v58, %v2865_v53  ;;  %v3331_v22 = vadd.f32 %v3330_v31, %v3309_v63  ;;  %v5817_v58 = vld [vmem:[#allocation39_spill] sm:$0xff] }
 0x1fa   : > { %v3212_v10 = vadd.f32 %v5570_v59, %v3173_v49  ;;  %v2868_v5 = vadd.f32 %v4257_v40, %v2562_v2  ;;  %v2801_v47 = vpop.f32.mrf.mxu1  ;;  %v3107_v41 = vpop.f32.mrf.mxu0  ;;  %v2262_v19 = vadd.f32 %v5543_v21, %v5813_v57  ;;  %v2566_v63 = vadd.f32 %v5814_v18, %v2259_v46 }
 0x1fb   : > { %v3345_v0 = vadd.f32 %v3344_v62, %v3308_v27  ;;  %v3210_v24 = vadd.f32 %v5570_v59, %v3171_v55  ;;  %v2866_v61 = vadd.f32 %v2801_v47, %v2560_v6  ;;  %v3277_v16 = vadd.f32 %v3276_v4, %v3209_v29  ;;  %v5815_v29 = vld [vmem:[#allocation37_spill] sm:$0xff]  ;;  %v5818_v6 = vld [vmem:[#allocation38_spill] sm:$0xff] }
 0x1fc   : > { %3244 = vst [vmem:[%s5582_s11 + $0xb0] sm:$0xff] %v3212_v10  ;;  %v3174_v17 = vadd.f32 %v4305_v15, %v2868_v5  ;;  %v4260_v38 = vpop.f32.mrf.mxu1  ;;  %v4308_v35 = vpop.f32.mrf.mxu0  ;;  %v3313_v32 = vmul.f32 %v3212_v10, %v3212_v10  ;;  %v2564_v33 = vadd.f32 %v5815_v29, %v2257_v1  ;;  %v2260_v31 = vadd.f32 %v5817_v58, %v5816_v20  ;;  %v5821_v5 = vld [vmem:[#allocation16_spill] sm:$0xff]  ;;  %v5822_v47 = vld [vmem:[#allocation42_spill] sm:$0xff] }
 0x1fd   : > { %3242 = vst [vmem:[%s5582_s11 + $0xa0] sm:$0xff] %v3210_v24  ;;  %v3263_v36 = vadd.f32 %v3262_v11, %v3210_v24  ;;  %v3311_v34 = vmul.f32 %v3210_v24, %v3210_v24  ;;  %v3172_v12 = vadd.f32 %v3107_v41, %v2866_v61  ;;  %v3346_v9 = vadd.f32 %v3345_v0, %v3310_v37  ;;  %v5820_v37 = vld [vmem:[#allocation15_spill] sm:$0xff] }
 0x1fe   : > { %v3213_v50 = vadd.f32 %v5570_v59, %v3174_v17  ;;  %v2871_v51 = vadd.f32 %v4260_v38, %v2565_v28  ;;  %v2814_v42 = vpop.f32.mrf.mxu1  ;;  %v3120_v30 = vpop.f32.mrf.mxu0  ;;  %v2569_v45 = vadd.f32 %v5818_v6, %v2262_v19  ;;  %v2567_v28 = vadd.f32 %v5819_v25, %v2260_v31 }
 0x1ff   : > { %v3332_v43 = vadd.f32 %v3331_v22, %v3311_v34  ;;  %v3211_v62 = vadd.f32 %v5570_v59, %v3172_v12  ;;  %v2869_v54 = vadd.f32 %v2814_v42, %v2563_v7  ;;  %v3264_v39 = vadd.f32 %v3263_v36, %v3212_v10  ;;  %v5823_v36 = vld [vmem:[#allocation41_spill] sm:$0xff]  ;;  %v5824_v12 = vld [vmem:[#allocation43_spill] sm:$0xff] }
 0x200   : > { %3245 = vst [vmem:[%s5582_s11 + $0xb8] sm:$0xff] %v3213_v50  ;;  %v3177_v21 = vadd.f32 %v4308_v35, %v2871_v51  ;;  %v4261_v8 = vpop.f32.mrf.mxu1  ;;  %v4309_v53 = vpop.f32.mrf.mxu0  ;;  %v3314_v3 = vmul.f32 %v3213_v50, %v3213_v50  ;;  %v2263_v10 = vadd.f32 %v5552_v44, %v5820_v37  ;;  %v2261_v41 = vadd.f32 %v5822_v47, %v5821_v5 }
 0x201   : > { %3243 = vst [vmem:[%s5582_s11 + $0xa8] sm:$0xff] %v3211_v62  ;;  %v3278_v11 = vadd.f32 %v3277_v16, %v3211_v62  ;;  %v3312_v14 = vmul.f32 %v3211_v62, %v3211_v62  ;;  %v3175_v2 = vadd.f32 %v3120_v30, %v2869_v54  ;;  %v3333_v13 = vadd.f32 %v3332_v43, %v3313_v32 }
 0x202   : > { %v3216_v60 = vadd.f32 %v5570_v59, %v3177_v21  ;;  %v2872_v49 = vadd.f32 %v4261_v8, %v2566_v63  ;;  %v2817_v40 = vpop.f32.mrf.mxu1  ;;  %v3123_v15 = vpop.f32.mrf.mxu0  ;;  %v2570_v34 = vadd.f32 %v5823_v36, %v2263_v10 }
 0x203   : > { %v3347_v4 = vadd.f32 %v3346_v9, %v3312_v14  ;;  %v3214_v27 = vadd.f32 %v5570_v59, %v3175_v2  ;;  %v2870_v55 = vadd.f32 %v2817_v40, %v2564_v33  ;;  %v3279_v22 = vadd.f32 %v3278_v11, %v3213_v50 }
 0x204   : > { %3248 = vst [vmem:[%s5582_s11 + $0xd0] sm:$0xff] %v3216_v60  ;;  %v3178_v0 = vadd.f32 %v4309_v53, %v2872_v49  ;;  %v4264_v24 = vpop.f32.mrf.mxu1  ;;  %v4312_v61 = vpop.f32.mrf.mxu0  ;;  %v3317_v48 = vmul.f32 %v3216_v60, %v3216_v60  ;;  %v2568_v9 = vadd.f32 %v5824_v12, %v2261_v41 }
 0x205   : > { %3246 = vst [vmem:[%s5582_s11 + $0xc0] sm:$0xff] %v3214_v27  ;;  %v3265_v16 = vadd.f32 %v3264_v39, %v3214_v27  ;;  %v3315_v56 = vmul.f32 %v3214_v27, %v3214_v27  ;;  %v3176_v7 = vadd.f32 %v3123_v15, %v2870_v55  ;;  %v3348_v23 = vadd.f32 %v3347_v4, %v3314_v3 }
 0x206   : > { %v3217_v46 = vadd.f32 %v5570_v59, %v3178_v0  ;;  %v2875_v26 = vadd.f32 %v4264_v24, %v2569_v45  ;;  %v2830_v52 = vpop.f32.mrf.mxu1  ;;  %v3136_v44 = vpop.f32.mrf.mxu0 }
 0x207   : > { %v3334_v1 = vadd.f32 %v3333_v13, %v3315_v56  ;;  %v3215_v17 = vadd.f32 %v5570_v59, %v3176_v7  ;;  %v2873_v38 = vadd.f32 %v2830_v52, %v2567_v28  ;;  %v3266_v35 = vadd.f32 %v3265_v16, %v3216_v60 }
 0x208   : > { %3249 = vst [vmem:[%s5582_s11 + $0xd8] sm:$0xff] %v3217_v46  ;;  %v3181_v57 = vadd.f32 %v4312_v61, %v2875_v26  ;;  %v4265_v19 = vpop.f32.mrf.mxu1  ;;  %v4313_v32 = vpop.f32.mrf.mxu0  ;;  %v3318_v43 = vmul.f32 %v3217_v46, %v3217_v46 }
 0x209   : > { %3247 = vst [vmem:[%s5582_s11 + $0xc8] sm:$0xff] %v3215_v17  ;;  %v3280_v50 = vadd.f32 %v3279_v22, %v3215_v17  ;;  %v3316_v51 = vmul.f32 %v3215_v17, %v3215_v17  ;;  %v3179_v42 = vadd.f32 %v3136_v44, %v2873_v38  ;;  %v3335_v30 = vadd.f32 %v3334_v1, %v3317_v48 }
 0x20a   : > { %v3220_v62 = vadd.f32 %v5570_v59, %v3181_v57  ;;  %v2876_v54 = vadd.f32 %v4265_v19, %v2570_v34  ;;  %v2833_v39 = vpop.f32.mrf.mxu1  ;;  %v3139_v58 = vpop.f32.mrf.mxu0 }
 0x20b   : > { %v3349_v18 = vadd.f32 %v3348_v23, %v3316_v51  ;;  %v3218_v63 = vadd.f32 %v5570_v59, %v3179_v42  ;;  %v2874_v29 = vadd.f32 %v2833_v39, %v2568_v9  ;;  %v3281_v33 = vadd.f32 %v3280_v50, %v3217_v46 }
 0x20c   : > { %3252 = vst [vmem:[%s5582_s11 + $0xf0] sm:$0xff] %v3220_v62  ;;  %v3182_v20 = vadd.f32 %v4313_v32, %v2876_v54  ;;  %v3321_v14 = vmul.f32 %v3220_v62, %v3220_v62 }
 0x20d   : > { %3250 = vst [vmem:[%s5582_s11 + $0xe0] sm:$0xff] %v3218_v63  ;;  %v3267_v31 = vadd.f32 %v3266_v35, %v3218_v63  ;;  %v3319_v21 = vmul.f32 %v3218_v63, %v3218_v63  ;;  %v3180_v8 = vadd.f32 %v3139_v58, %v2874_v29  ;;  %v3350_v53 = vadd.f32 %v3349_v18, %v3318_v43 }
 0x20e   : > { %v3221_v11 = vadd.f32 %v5570_v59, %v3182_v20 }
 0x20f   : > { %v3268_v2 = vadd.f32 %v3267_v31, %v3220_v62  ;;  %v3336_v13 = vadd.f32 %v3335_v30, %v3319_v21  ;;  %v3219_v6 = vadd.f32 %v5570_v59, %v3180_v8 }
 0x210   : > { %3253 = vst [vmem:[%s5582_s11 + $0xf8] sm:$0xff] %v3221_v11  ;;  %v3322_v49 = vmul.f32 %v3221_v11, %v3221_v11 }
 0x211   : > { %v3337_v45 = vadd.f32 %v3336_v13, %v3321_v14  ;;  %3251 = vst [vmem:[%s5582_s11 + $0xe8] sm:$0xff] %v3219_v6  ;;  %v3282_v3 = vadd.f32 %v3281_v33, %v3219_v6  ;;  %v3320_v60 = vmul.f32 %v3219_v6, %v3219_v6 }
 0x213   : > { %v3283_v40 = vadd.f32 %v3282_v3, %v3221_v11  ;;  %v3351_v15 = vadd.f32 %v3350_v53, %v3320_v60 }
 0x215   : > { %v3284_v4 = vadd.f32 %v3283_v40, %v3268_v2  ;;  %v3352_v27 = vadd.f32 %v3351_v15, %v3322_v49 }
 0x217   : > { %v3285_v55 = vrot.slane %v3284_v4, 4  ;;  %v3353_v22 = vadd.f32 %v3352_v27, %v3337_v45 }
 0x219   : > { %v3286_v25 = vadd.f32 %v3285_v55, %v3284_v4  ;;  %v3354_v28 = vrot.slane %v3353_v22, 4 }
 0x21b   : > { %v3287_v37 = vrot.slane %v3286_v25, 2  ;;  %v3355_v10 = vadd.f32 %v3354_v28, %v3353_v22 }
 0x21d   : > { %v3288_v5 = vadd.f32 %v3287_v37, %v3286_v25  ;;  %v3356_v47 = vrot.slane %v3355_v10, 2 }
 0x21f   : > { %v3289_v59 = vrot.slane %v3288_v5, 1  ;;  %v3357_v41 = vadd.f32 %v3356_v47, %v3355_v10 }
 0x221   : > { %v3358_v0 = vrot.slane %v3357_v41, 1  ;;  %v3290_v24 = vadd.f32 %v3289_v59, %v3288_v5 }
 0x223   : > { %v3359_v61 = vadd.f32 %v3358_v0, %v3357_v41 }
 0x225   : > { %v3361_v16 = vsel %vm3360_vm0, %v3290_v24, %v3359_v61 }
 0x226   : > { %3362 = vst [vmem:[%s262_s14] sm:$0x3] %v3361_v16 }
 0x227 PF: > { %s17_s21 = sadd.s32 1, %s4418_s21  }
 0x228   : > { %p14_p4 = scmp.ge.s32.totalorder %s17_s21, 4  }
 0x22a   :  { %16 = sbr.rel (!%p14_p4) target bundleno = 1 (0x1), region = 92 }

</bundles_post_ra>
